<compile_context>
chip_gen: v7x
topology: tpu7x:2x2x1
jax: 0.10.0
libtpu: 0.0.40
codegen_flags: <defaults>
</compile_context>

<pallas_src>
import functools
import math

import jax
import jax.numpy as jnp
from jax.experimental import pallas as pl
from jax.experimental.pallas import tpu as pltpu

LN_EPS = 1e-5      # layer_norm_eps default of the module
NEG_INF = -1e30    # finite large-negative mask value (robust vs -inf)


# ------------------------------- fused kernel --------------------------------


def _temporal_transformer_kernel(q_ref, k_ref, x_ref, mask_ref,
                                 hsel_ref, hexp_ref,
                                 wq_ref, wk_ref, wv_ref, bq_ref, bk_ref, bv_ref,
                                 bias_k_ref, bias_v_ref, wo_ref, bo_ref,
                                 w1_ref, b1_ref, w2_ref, b2_ref,
                                 g1_ref, be1_ref, g2_ref, be2_ref,
                                 o_ref, *, head_dim, num_layers):
    """All num_layers shared-weight layers for one batch element (query length == 1)."""
    f32 = jnp.float32
    bf16 = jnp.bfloat16
    scale = 1.0 / math.sqrt(head_dim)

    q = q_ref[0]              # [1, E]  f32
    k = k_ref[0]              # [S, E]  f32
    x = x_ref[0]              # [S, E]  f32 (ref_embedding / running layer output)
    add_mask = mask_ref[0]    # [S, 1]  f32 additive mask: 0 (keep) or NEG_INF (padded key)

    hsel = hsel_ref[...]      # [E, H]  one-hot head selector (lane e -> head e // Dh)
    hexp = hexp_ref[...]      # [H, E]  transpose: expand a per-head scalar to its lanes

    # ---- attention probabilities: q, k, mask and the (shared) MHA weights are identical
    #      for every layer, so the masked softmax is computed exactly once.
    qp = jnp.dot(q.astype(bf16), wq_ref[...], preferred_element_type=f32) + bq_ref[...]   # [1, E]
    kp = jnp.dot(k.astype(bf16), wk_ref[...], preferred_element_type=f32) + bk_ref[...]   # [S, E]

    # per-head scores via broadcast multiply + head-selection matmul (no transposes)
    scores = jnp.dot(qp * kp, hsel, preferred_element_type=f32) * scale + add_mask        # [S, H]
    # score of the add_bias_kv row (appended to the *projected* keys, never masked)
    s_bias = jnp.dot(qp * bias_k_ref[...], hsel, preferred_element_type=f32) * scale      # [1, H]

    m = jnp.maximum(jnp.max(scores, axis=0, keepdims=True), s_bias)                       # [1, H]
    p = jnp.exp(scores - m)                                                               # [S, H]
    p_bias = jnp.exp(s_bias - m)                                                          # [1, H]
    inv_d = pl.reciprocal(jnp.sum(p, axis=0, keepdims=True) + p_bias, approx=True)        # [1, H]

    # normalized attention weights, expanded per-head -> per-lane (layer invariant)
    w_attn = jnp.dot(p * inv_d, hexp, preferred_element_type=f32)                         # [S, E]
    c_attn = jnp.dot(p_bias * inv_d, hexp, preferred_element_type=f32) * bias_v_ref[...]  # [1, E]

    # hoist parameter loads out of the (unrolled, 3-iteration) layer loop
    bv = bv_ref[...]; bo = bo_ref[...]
    b1 = b1_ref[...]; b2 = b2_ref[...]
    g1 = g1_ref[...]; be1 = be1_ref[...]
    g2 = g2_ref[...]; be2 = be2_ref[...]
    wv = wv_ref[...]; wo = wo_ref[...]
    w1 = w1_ref[...]; w2 = w2_ref[...]

    for _ in range(num_layers):   # copy.deepcopy layers -> identical weights every layer
        # value projection for the current x, then the (precomputed) softmax weighting
        vp = jnp.dot(x.astype(bf16), wv, preferred_element_type=f32) + bv                 # [S, E]
        heads = jnp.sum(w_attn * vp, axis=0, keepdims=True) + c_attn                      # [1, E]
        attn = jnp.dot(heads.astype(bf16), wo, preferred_element_type=f32) + bo           # [1, E]

        # add & norm 1  (attn broadcasts over the S rows; Lq == 1)
        h = x + attn
        mu = jnp.mean(h, axis=-1, keepdims=True)
        var = jnp.mean(jnp.square(h - mu), axis=-1, keepdims=True)
        ctx = (h - mu) * jax.lax.rsqrt(var + LN_EPS) * g1 + be1

        # feed-forward (Linear -> ReLU -> Linear), bf16 matmuls with f32 accumulation
        ff = jnp.dot(ctx.astype(bf16), w1, preferred_element_type=f32) + b1               # [S, F]
        ff = jnp.maximum(ff, 0.0)
        ff = jnp.dot(ff.astype(bf16), w2, preferred_element_type=f32) + b2                # [S, E]

        # add & norm 2
        y = ctx + ff
        mu2 = jnp.mean(y, axis=-1, keepdims=True)
        var2 = jnp.mean(jnp.square(y - mu2), axis=-1, keepdims=True)
        x = (y - mu2) * jax.lax.rsqrt(var2 + LN_EPS) * g2 + be2

    o_ref[0] = x


# --------------------------------- wrapper ------------------------------------


def temporal_transformer_forward(query_embedding, key_embedding, ref_embedding,
                                 key_padding_mask, params, num_layers=3):
    """Matches TemporalTransformer.forward (eval mode: dropouts are identity)."""
    B, S, E = ref_embedding.shape
    Lq = query_embedding.shape[1]
    assert Lq == 1, "kernel softmax/broadcast semantics require a single query position"
    nhead = params["nhead"]
    assert E % nhead == 0
    head_dim = E // nhead
    F = params["w1_t"].shape[1]

    # key_padding_mask: True => key position is padding / ignored.
    # Pre-convert to an additive mask [B, S, 1] (0 keep / NEG_INF drop).
    add_mask = key_padding_mask.astype(jnp.float32).reshape(B, S, 1) * NEG_INF

    # head selection / expansion matrices (tiny constants, passed as inputs)
    e_head = jnp.arange(E, dtype=jnp.int32) // head_dim
    hsel = (e_head[:, None] == jnp.arange(nhead, dtype=jnp.int32)[None, :]).astype(jnp.float32)
    hexp = hsel.T

    kern = functools.partial(_temporal_transformer_kernel,
                             head_dim=head_dim, num_layers=num_layers)

    def inv(shape):  # grid-invariant (weights): fetched once, block == full array
        return pl.BlockSpec(shape, lambda b: (0,) * len(shape))

    return pl.pallas_call(
        kern,
        out_shape=jax.ShapeDtypeStruct((B, S, E), jnp.float32),
        grid=(B,),
        in_specs=[
            pl.BlockSpec((1, Lq, E), lambda b: (b, 0, 0)),   # query_embedding
            pl.BlockSpec((1, S, E), lambda b: (b, 0, 0)),    # key_embedding
            pl.BlockSpec((1, S, E), lambda b: (b, 0, 0)),    # ref_embedding
            pl.BlockSpec((1, S, 1), lambda b: (b, 0, 0)),    # additive key_padding_mask
            inv((E, nhead)), inv((nhead, E)),                # hsel, hexp
            inv((E, E)), inv((E, E)), inv((E, E)),           # WqT, WkT, WvT (bf16)
            inv((1, E)), inv((1, E)), inv((1, E)),           # bq, bk, bv
            inv((1, E)), inv((1, E)),                        # bias_k, bias_v (add_bias_kv)
            inv((E, E)), inv((1, E)),                        # WoT (bf16), bo
            inv((E, F)), inv((1, F)),                        # W1T (bf16), b1
            inv((F, E)), inv((1, E)),                        # W2T (bf16), b2
            inv((1, E)), inv((1, E)),                        # norm1 gamma/beta
            inv((1, E)), inv((1, E)),                        # norm2 gamma/beta
        ],
        out_specs=pl.BlockSpec((1, S, E), lambda b: (b, 0, 0)),
        compiler_params=pltpu.CompilerParams(dimension_semantics=("parallel",)),
    )(query_embedding, key_embedding, ref_embedding, add_mask,
      hsel, hexp,
      params["wq_t"], params["wk_t"], params["wv_t"],
      params["bq"], params["bk"], params["bv"],
      params["bias_k"], params["bias_v"],
      params["wo_t"], params["bo"],
      params["w1_t"], params["b1"], params["w2_t"], params["b2"],
      params["g1"], params["be1"], params["g2"], params["be2"])


# ----------------------- pure-JAX reference (correctness) ----------------------


def temporal_transformer_reference(query_embedding, key_embedding, ref_embedding,
                                   key_padding_mask, params, num_layers=3):
    """Direct f32 translation of the PyTorch module (eval mode) for self-checking."""
    f32 = jnp.float32
    B, S, E = ref_embedding.shape
    H = params["nhead"]
    Dh = E // H
    wq = params["wq_t"].astype(f32); wk = params["wk_t"].astype(f32)
    wv = params["wv_t"].astype(f32); wo = params["wo_t"].astype(f32)
    w1 = params["w1_t"].astype(f32); w2 = params["w2_t"].astype(f32)

    def ln(z, g, b):
        mu = jnp.mean(z, axis=-1, keepdims=True)
        var = jnp.mean(jnp.square(z - mu), axis=-1, keepdims=True)
        return (z - mu) / jnp.sqrt(var + LN_EPS) * g + b

    qp = query_embedding @ wq + params["bq"]                                   # [B,1,E]
    kp = key_embedding @ wk + params["bk"]                                     # [B,S,E]
    kp = jnp.concatenate([kp, jnp.broadcast_to(params["bias_k"][None], (B, 1, E))], axis=1)
    maskx = jnp.concatenate([key_padding_mask, jnp.zeros((B, 1), jnp.bool_)], axis=1)

    qh = qp.reshape(B, 1, H, Dh)
    kh = kp.reshape(B, S + 1, H, Dh)
    scores = jnp.einsum('bqhd,bkhd->bhqk', qh, kh) / math.sqrt(Dh)             # [B,H,1,S+1]
    scores = jnp.where(maskx[:, None, None, :], -jnp.inf, scores)
    a = jax.nn.softmax(scores, axis=-1)                                        # fixed across layers

    out = ref_embedding
    for _ in range(num_layers):
        vp = out @ wv + params["bv"]
        vp = jnp.concatenate([vp, jnp.broadcast_to(params["bias_v"][None], (B, 1, E))], axis=1)
        vh = vp.reshape(B, S + 1, H, Dh)
        heads = jnp.einsum('bhqk,bkhd->bqhd', a, vh).reshape(B, 1, E)
        attn = heads @ wo + params["bo"]
        ctx = ln(out + attn, params["g1"], params["be1"])
        ff = jnp.maximum(ctx @ w1 + params["b1"], 0.0) @ w2 + params["b2"]
        out = ln(ctx + ff, params["g2"], params["be2"])
    return out


# --------------------------- deterministic params ---------------------------


def init_params(key, E, nhead, dim_feedforward=2048):
    ks = jax.random.split(key, 12)
    bf16 = jnp.bfloat16

    def w(k, shape, scale=0.05):
        return scale * jax.random.normal(k, shape, jnp.float32)

    # PyTorch-convention shapes, then transpose to [in, out]; matmul weights in bf16.
    in_proj_w = w(ks[0], (3 * E, E))      # nn.MultiheadAttention.in_proj_weight
    in_proj_b = w(ks[1], (3 * E,))
    wq, wk, wv = in_proj_w[:E], in_proj_w[E:2 * E], in_proj_w[2 * E:]
    bq, bk, bv = in_proj_b[:E], in_proj_b[E:2 * E], in_proj_b[2 * E:]

    return dict(
        nhead=nhead,
        wq_t=wq.T.astype(bf16), wk_t=wk.T.astype(bf16), wv_t=wv.T.astype(bf16),
        bq=bq.reshape(1, E), bk=bk.reshape(1, E), bv=bv.reshape(1, E),
        bias_k=w(ks[2], (1, E)), bias_v=w(ks[3], (1, E)),      # add_bias_kv=True params
        wo_t=w(ks[4], (E, E)).T.astype(bf16), bo=w(ks[5], (1, E)),
        w1_t=w(ks[6], (dim_feedforward, E)).T.astype(bf16), b1=w(ks[7], (1, dim_feedforward)),
        w2_t=w(ks[8], (E, dim_feedforward)).T.astype(bf16), b2=w(ks[9], (1, E)),
        g1=1.0 + 0.1 * jax.random.normal(ks[10], (1, E), jnp.float32),
        be1=0.1 * jax.random.normal(ks[11], (1, E), jnp.float32),
        g2=jnp.ones((1, E), jnp.float32),
        be2=jnp.zeros((1, E), jnp.float32),
    )


# ----------------------------------- main -------------------------------------


if __name__ == "__main__":
    B, S, Lq, E, H = 2, 64, 1, 32, 4   # batch, kv seq, query seq, embedding, heads
    NUM_LAYERS = 3

    key = jax.random.PRNGKey(0)
    kq, kk, kr = jax.random.split(key, 3)
    query_embedding = jax.random.normal(kq, (B, Lq, E), jnp.float32)
    key_embedding = jax.random.normal(kk, (B, S, E), jnp.float32)
    ref_embedding = jax.random.normal(kr, (B, S, E), jnp.float32)
    # key_padding_mask: True => that key position is padding / ignored
    key_padding_mask = jnp.zeros((B, S), jnp.bool_).at[:, S - 8:].set(True)

    params = init_params(jax.random.PRNGKey(42), E, H)

    out = temporal_transformer_forward(query_embedding, key_embedding, ref_embedding,
                                       key_padding_mask, params, num_layers=NUM_LAYERS)
    out = jax.block_until_ready(out)

    assert out.shape == (B, S, E), out.shape
    assert bool(jnp.all(jnp.isfinite(out)))

    # correctness self-check against a plain-JAX reference (bf16 matmuls inside the
    # kernel vs f32 reference -> loose tolerance)
    ref = temporal_transformer_reference(query_embedding, key_embedding, ref_embedding,
                                         key_padding_mask, params, num_layers=NUM_LAYERS)
    max_err = float(jnp.max(jnp.abs(out - ref)))
    assert max_err < 5e-2, f"max |kernel - reference| = {max_err}"

    print("KERNEL_OK")
</pallas_src>

<mosaic_0001>
module attributes {stable_mosaic.version = 11 : i64} {
  func.func @_temporal_transformer_kernel(%arg0: i32, %arg1: memref<1x1x32xf32, #tpu.memory_space<vmem>>, %arg2: memref<1x64x32xf32, #tpu.memory_space<vmem>>, %arg3: memref<1x64x32xf32, #tpu.memory_space<vmem>>, %arg4: memref<1x64x1xf32, #tpu.memory_space<vmem>>, %arg5: memref<32x4xf32, #tpu.memory_space<vmem>>, %arg6: memref<4x32xf32, #tpu.memory_space<vmem>>, %arg7: memref<32x32xbf16, #tpu.memory_space<vmem>>, %arg8: memref<32x32xbf16, #tpu.memory_space<vmem>>, %arg9: memref<32x32xbf16, #tpu.memory_space<vmem>>, %arg10: memref<1x32xf32, #tpu.memory_space<vmem>>, %arg11: memref<1x32xf32, #tpu.memory_space<vmem>>, %arg12: memref<1x32xf32, #tpu.memory_space<vmem>>, %arg13: memref<1x32xf32, #tpu.memory_space<vmem>>, %arg14: memref<1x32xf32, #tpu.memory_space<vmem>>, %arg15: memref<32x32xbf16, #tpu.memory_space<vmem>>, %arg16: memref<1x32xf32, #tpu.memory_space<vmem>>, %arg17: memref<32x2048xbf16, #tpu.memory_space<vmem>>, %arg18: memref<1x2048xf32, #tpu.memory_space<vmem>>, %arg19: memref<2048x32xbf16, #tpu.memory_space<vmem>>, %arg20: memref<1x32xf32, #tpu.memory_space<vmem>>, %arg21: memref<1x32xf32, #tpu.memory_space<vmem>>, %arg22: memref<1x32xf32, #tpu.memory_space<vmem>>, %arg23: memref<1x32xf32, #tpu.memory_space<vmem>>, %arg24: memref<1x32xf32, #tpu.memory_space<vmem>>, %arg25: memref<1x64x32xf32, #tpu.memory_space<vmem>>) attributes {dimension_semantics = [#tpu.dimension_semantics<parallel>], iteration_bounds = array<i64: 2>, scalar_prefetch = 0 : i64, scratch_operands = 0 : i64, tpu.core_type = #tpu.core_type<tc>, window_params = [{transform_indices = @transform_0, window_bounds = array<i64: 1, 1, 32>}, {transform_indices = @transform_1, window_bounds = array<i64: 1, 64, 32>}, {transform_indices = @transform_2, window_bounds = array<i64: 1, 64, 32>}, {transform_indices = @transform_3, window_bounds = array<i64: 1, 64, 1>}, {pipeline_mode = #tpu.pipeline_mode<synchronous>, transform_indices = @transform_4, window_bounds = array<i64: 32, 4>}, {pipeline_mode = #tpu.pipeline_mode<synchronous>, transform_indices = @transform_5, window_bounds = array<i64: 4, 32>}, {pipeline_mode = #tpu.pipeline_mode<synchronous>, transform_indices = @transform_6, window_bounds = array<i64: 32, 32>}, {pipeline_mode = #tpu.pipeline_mode<synchronous>, transform_indices = @transform_7, window_bounds = array<i64: 32, 32>}, {pipeline_mode = #tpu.pipeline_mode<synchronous>, transform_indices = @transform_8, window_bounds = array<i64: 32, 32>}, {pipeline_mode = #tpu.pipeline_mode<synchronous>, transform_indices = @transform_9, window_bounds = array<i64: 1, 32>}, {pipeline_mode = #tpu.pipeline_mode<synchronous>, transform_indices = @transform_10, window_bounds = array<i64: 1, 32>}, {pipeline_mode = #tpu.pipeline_mode<synchronous>, transform_indices = @transform_11, window_bounds = array<i64: 1, 32>}, {pipeline_mode = #tpu.pipeline_mode<synchronous>, transform_indices = @transform_12, window_bounds = array<i64: 1, 32>}, {pipeline_mode = #tpu.pipeline_mode<synchronous>, transform_indices = @transform_13, window_bounds = array<i64: 1, 32>}, {pipeline_mode = #tpu.pipeline_mode<synchronous>, transform_indices = @transform_14, window_bounds = array<i64: 32, 32>}, {pipeline_mode = #tpu.pipeline_mode<synchronous>, transform_indices = @transform_15, window_bounds = array<i64: 1, 32>}, {pipeline_mode = #tpu.pipeline_mode<synchronous>, transform_indices = @transform_16, window_bounds = array<i64: 32, 2048>}, {pipeline_mode = #tpu.pipeline_mode<synchronous>, transform_indices = @transform_17, window_bounds = array<i64: 1, 2048>}, {pipeline_mode = #tpu.pipeline_mode<synchronous>, transform_indices = @transform_18, window_bounds = array<i64: 2048, 32>}, {pipeline_mode = #tpu.pipeline_mode<synchronous>, transform_indices = @transform_19, window_bounds = array<i64: 1, 32>}, {pipeline_mode = #tpu.pipeline_mode<synchronous>, transform_indices = @transform_20, window_bounds = array<i64: 1, 32>}, {pipeline_mode = #tpu.pipeline_mode<synchronous>, transform_indices = @transform_21, window_bounds = array<i64: 1, 32>}, {pipeline_mode = #tpu.pipeline_mode<synchronous>, transform_indices = @transform_22, window_bounds = array<i64: 1, 32>}, {pipeline_mode = #tpu.pipeline_mode<synchronous>, transform_indices = @transform_23, window_bounds = array<i64: 1, 32>}, {transform_indices = @transform_24, window_bounds = array<i64: 1, 64, 32>}]} {
    %c0 = arith.constant 0 : index
    %c0_0 = arith.constant 0 : index
    %c0_1 = arith.constant 0 : index
    %0 = vector.load %arg1[%c0, %c0_0, %c0_1] : memref<1x1x32xf32, #tpu.memory_space<vmem>>, vector<1x1x32xf32>
    %1 = vector.shape_cast %0 : vector<1x1x32xf32> to vector<1x32xf32>
    %c0_2 = arith.constant 0 : index
    %c0_3 = arith.constant 0 : index
    %c0_4 = arith.constant 0 : index
    %2 = vector.load %arg2[%c0_2, %c0_3, %c0_4] : memref<1x64x32xf32, #tpu.memory_space<vmem>>, vector<1x64x32xf32>
    %3 = vector.shape_cast %2 : vector<1x64x32xf32> to vector<64x32xf32>
    %c0_5 = arith.constant 0 : index
    %c0_6 = arith.constant 0 : index
    %c0_7 = arith.constant 0 : index
    %4 = vector.load %arg3[%c0_5, %c0_6, %c0_7] : memref<1x64x32xf32, #tpu.memory_space<vmem>>, vector<1x64x32xf32>
    %5 = vector.shape_cast %4 : vector<1x64x32xf32> to vector<64x32xf32>
    %c0_8 = arith.constant 0 : index
    %c0_9 = arith.constant 0 : index
    %c0_10 = arith.constant 0 : index
    %6 = vector.load %arg4[%c0_8, %c0_9, %c0_10] : memref<1x64x1xf32, #tpu.memory_space<vmem>>, vector<1x64x1xf32>
    %7 = vector.shape_cast %6 : vector<1x64x1xf32> to vector<64x1xf32>
    %c0_11 = arith.constant 0 : index
    %c0_12 = arith.constant 0 : index
    %8 = vector.load %arg5[%c0_11, %c0_12] : memref<32x4xf32, #tpu.memory_space<vmem>>, vector<32x4xf32>
    %c0_13 = arith.constant 0 : index
    %c0_14 = arith.constant 0 : index
    %9 = vector.load %arg6[%c0_13, %c0_14] : memref<4x32xf32, #tpu.memory_space<vmem>>, vector<4x32xf32>
    %10 = arith.truncf %1 : vector<1x32xf32> to vector<1x32xbf16>
    %c0_15 = arith.constant 0 : index
    %c0_16 = arith.constant 0 : index
    %11 = vector.load %arg7[%c0_15, %c0_16] : memref<32x32xbf16, #tpu.memory_space<vmem>>, vector<32x32xbf16>
    %cst = arith.constant dense<0.000000e+00> : vector<1x32xf32>
    %12 = tpu.matmul %10, %11, %cst {dimension_numbers = #tpu.dot_dimension_numbers<[1], [0], [0], [1], [0, 0, 1, 1], [], []>} : vector<1x32xbf16>, vector<32x32xbf16>, vector<1x32xf32> -> vector<1x32xf32>
    %c0_17 = arith.constant 0 : index
    %c0_18 = arith.constant 0 : index
    %13 = vector.load %arg10[%c0_17, %c0_18] : memref<1x32xf32, #tpu.memory_space<vmem>>, vector<1x32xf32>
    %14 = arith.addf %12, %13 : vector<1x32xf32>
    %15 = arith.truncf %3 : vector<64x32xf32> to vector<64x32xbf16>
    %c0_19 = arith.constant 0 : index
    %c0_20 = arith.constant 0 : index
    %16 = vector.load %arg8[%c0_19, %c0_20] : memref<32x32xbf16, #tpu.memory_space<vmem>>, vector<32x32xbf16>
    %cst_21 = arith.constant dense<0.000000e+00> : vector<64x32xf32>
    %17 = tpu.matmul %15, %16, %cst_21 {dimension_numbers = #tpu.dot_dimension_numbers<[1], [0], [0], [1], [0, 0, 1, 1], [], []>} : vector<64x32xbf16>, vector<32x32xbf16>, vector<64x32xf32> -> vector<64x32xf32>
    %c0_22 = arith.constant 0 : index
    %c0_23 = arith.constant 0 : index
    %18 = vector.load %arg11[%c0_22, %c0_23] : memref<1x32xf32, #tpu.memory_space<vmem>>, vector<1x32xf32>
    %19 = vector.broadcast %18 : vector<1x32xf32> to vector<64x32xf32>
    %20 = arith.addf %17, %19 : vector<64x32xf32>
    %21 = vector.broadcast %14 : vector<1x32xf32> to vector<64x32xf32>
    %22 = arith.mulf %21, %20 : vector<64x32xf32>
    %cst_24 = arith.constant dense<0.000000e+00> : vector<64x4xf32>
    %23 = tpu.matmul %22, %8, %cst_24 {dimension_numbers = #tpu.dot_dimension_numbers<[1], [0], [0], [1], [0, 0, 1, 1], [], []>} : vector<64x32xf32>, vector<32x4xf32>, vector<64x4xf32> -> vector<64x4xf32>
    %cst_25 = arith.constant 0.353553385 : f32
    %24 = vector.broadcast %cst_25 : f32 to vector<64x4xf32>
    %25 = arith.mulf %23, %24 : vector<64x4xf32>
    %26 = vector.broadcast %7 : vector<64x1xf32> to vector<64x4xf32>
    %27 = arith.addf %25, %26 : vector<64x4xf32>
    %c0_26 = arith.constant 0 : index
    %c0_27 = arith.constant 0 : index
    %28 = vector.load %arg13[%c0_26, %c0_27] : memref<1x32xf32, #tpu.memory_space<vmem>>, vector<1x32xf32>
    %29 = arith.mulf %14, %28 : vector<1x32xf32>
    %cst_28 = arith.constant dense<0.000000e+00> : vector<1x4xf32>
    %30 = tpu.matmul %29, %8, %cst_28 {dimension_numbers = #tpu.dot_dimension_numbers<[1], [0], [0], [1], [0, 0, 1, 1], [], []>} : vector<1x32xf32>, vector<32x4xf32>, vector<1x4xf32> -> vector<1x4xf32>
    %cst_29 = arith.constant 0.353553385 : f32
    %31 = vector.broadcast %cst_29 : f32 to vector<1x4xf32>
    %32 = arith.mulf %30, %31 : vector<1x4xf32>
    %cst_30 = arith.constant dense<0xFF800000> : vector<4xf32>
    %33 = vector.multi_reduction <maximumf>, %27, %cst_30 [0] : vector<64x4xf32> to vector<4xf32>
    %34 = vector.shape_cast %33 : vector<4xf32> to vector<1x4xf32>
    %35 = arith.maximumf %34, %32 : vector<1x4xf32>
    %36 = vector.broadcast %35 : vector<1x4xf32> to vector<64x4xf32>
    %37 = arith.subf %27, %36 : vector<64x4xf32>
    %38 = math.exp %37 : vector<64x4xf32>
    %39 = arith.subf %32, %35 : vector<1x4xf32>
    %40 = math.exp %39 : vector<1x4xf32>
    %cst_31 = arith.constant dense<0.000000e+00> : vector<4xf32>
    %41 = vector.multi_reduction <add>, %38, %cst_31 [0] : vector<64x4xf32> to vector<4xf32>
    %42 = vector.shape_cast %41 : vector<4xf32> to vector<1x4xf32>
    %43 = arith.addf %42, %40 : vector<1x4xf32>
    %44 = tpu.reciprocal %43 {approx = true} : vector<1x4xf32> -> vector<1x4xf32>
    %45 = vector.broadcast %44 : vector<1x4xf32> to vector<64x4xf32>
    %46 = arith.mulf %38, %45 : vector<64x4xf32>
    %cst_32 = arith.constant dense<0.000000e+00> : vector<64x32xf32>
    %47 = tpu.matmul %46, %9, %cst_32 {dimension_numbers = #tpu.dot_dimension_numbers<[1], [0], [0], [1], [0, 0, 1, 1], [], []>} : vector<64x4xf32>, vector<4x32xf32>, vector<64x32xf32> -> vector<64x32xf32>
    %48 = arith.mulf %40, %44 : vector<1x4xf32>
    %cst_33 = arith.constant dense<0.000000e+00> : vector<1x32xf32>
    %49 = tpu.matmul %48, %9, %cst_33 {dimension_numbers = #tpu.dot_dimension_numbers<[1], [0], [0], [1], [0, 0, 1, 1], [], []>} : vector<1x4xf32>, vector<4x32xf32>, vector<1x32xf32> -> vector<1x32xf32>
    %c0_34 = arith.constant 0 : index
    %c0_35 = arith.constant 0 : index
    %50 = vector.load %arg14[%c0_34, %c0_35] : memref<1x32xf32, #tpu.memory_space<vmem>>, vector<1x32xf32>
    %51 = arith.mulf %49, %50 : vector<1x32xf32>
    %c0_36 = arith.constant 0 : index
    %c0_37 = arith.constant 0 : index
    %52 = vector.load %arg12[%c0_36, %c0_37] : memref<1x32xf32, #tpu.memory_space<vmem>>, vector<1x32xf32>
    %c0_38 = arith.constant 0 : index
    %c0_39 = arith.constant 0 : index
    %53 = vector.load %arg16[%c0_38, %c0_39] : memref<1x32xf32, #tpu.memory_space<vmem>>, vector<1x32xf32>
    %c0_40 = arith.constant 0 : index
    %c0_41 = arith.constant 0 : index
    %54 = vector.load %arg18[%c0_40, %c0_41] : memref<1x2048xf32, #tpu.memory_space<vmem>>, vector<1x2048xf32>
    %c0_42 = arith.constant 0 : index
    %c0_43 = arith.constant 0 : index
    %55 = vector.load %arg20[%c0_42, %c0_43] : memref<1x32xf32, #tpu.memory_space<vmem>>, vector<1x32xf32>
    %c0_44 = arith.constant 0 : index
    %c0_45 = arith.constant 0 : index
    %56 = vector.load %arg21[%c0_44, %c0_45] : memref<1x32xf32, #tpu.memory_space<vmem>>, vector<1x32xf32>
    %c0_46 = arith.constant 0 : index
    %c0_47 = arith.constant 0 : index
    %57 = vector.load %arg22[%c0_46, %c0_47] : memref<1x32xf32, #tpu.memory_space<vmem>>, vector<1x32xf32>
    %c0_48 = arith.constant 0 : index
    %c0_49 = arith.constant 0 : index
    %58 = vector.load %arg23[%c0_48, %c0_49] : memref<1x32xf32, #tpu.memory_space<vmem>>, vector<1x32xf32>
    %c0_50 = arith.constant 0 : index
    %c0_51 = arith.constant 0 : index
    %59 = vector.load %arg24[%c0_50, %c0_51] : memref<1x32xf32, #tpu.memory_space<vmem>>, vector<1x32xf32>
    %c0_52 = arith.constant 0 : index
    %c0_53 = arith.constant 0 : index
    %60 = vector.load %arg9[%c0_52, %c0_53] : memref<32x32xbf16, #tpu.memory_space<vmem>>, vector<32x32xbf16>
    %c0_54 = arith.constant 0 : index
    %c0_55 = arith.constant 0 : index
    %61 = vector.load %arg15[%c0_54, %c0_55] : memref<32x32xbf16, #tpu.memory_space<vmem>>, vector<32x32xbf16>
    %c0_56 = arith.constant 0 : index
    %c0_57 = arith.constant 0 : index
    %62 = vector.load %arg17[%c0_56, %c0_57] : memref<32x2048xbf16, #tpu.memory_space<vmem>>, vector<32x2048xbf16>
    %c0_58 = arith.constant 0 : index
    %c0_59 = arith.constant 0 : index
    %63 = vector.load %arg19[%c0_58, %c0_59] : memref<2048x32xbf16, #tpu.memory_space<vmem>>, vector<2048x32xbf16>
    %64 = arith.truncf %5 : vector<64x32xf32> to vector<64x32xbf16>
    %cst_60 = arith.constant dense<0.000000e+00> : vector<64x32xf32>
    %65 = tpu.matmul %64, %60, %cst_60 {dimension_numbers = #tpu.dot_dimension_numbers<[1], [0], [0], [1], [0, 0, 1, 1], [], []>} : vector<64x32xbf16>, vector<32x32xbf16>, vector<64x32xf32> -> vector<64x32xf32>
    %66 = vector.broadcast %52 : vector<1x32xf32> to vector<64x32xf32>
    %67 = arith.addf %65, %66 : vector<64x32xf32>
    %68 = arith.mulf %47, %67 : vector<64x32xf32>
    %cst_61 = arith.constant dense<0.000000e+00> : vector<32xf32>
    %69 = vector.multi_reduction <add>, %68, %cst_61 [0] : vector<64x32xf32> to vector<32xf32>
    %70 = vector.shape_cast %69 : vector<32xf32> to vector<1x32xf32>
    %71 = arith.addf %70, %51 : vector<1x32xf32>
    %72 = arith.truncf %71 : vector<1x32xf32> to vector<1x32xbf16>
    %cst_62 = arith.constant dense<0.000000e+00> : vector<1x32xf32>
    %73 = tpu.matmul %72, %61, %cst_62 {dimension_numbers = #tpu.dot_dimension_numbers<[1], [0], [0], [1], [0, 0, 1, 1], [], []>} : vector<1x32xbf16>, vector<32x32xbf16>, vector<1x32xf32> -> vector<1x32xf32>
    %74 = arith.addf %73, %53 : vector<1x32xf32>
    %75 = vector.broadcast %74 : vector<1x32xf32> to vector<64x32xf32>
    %76 = arith.addf %5, %75 : vector<64x32xf32>
    %cst_63 = arith.constant dense<0.000000e+00> : vector<64xf32>
    %77 = vector.multi_reduction <add>, %76, %cst_63 [1] : vector<64x32xf32> to vector<64xf32>
    %78 = vector.shape_cast %77 : vector<64xf32> to vector<64x1xf32>
    %cst_64 = arith.constant 3.200000e+01 : f32
    %79 = vector.broadcast %cst_64 : f32 to vector<64x1xf32>
    %80 = arith.divf %78, %79 : vector<64x1xf32>
    %81 = vector.broadcast %80 : vector<64x1xf32> to vector<64x32xf32>
    %82 = arith.subf %76, %81 : vector<64x32xf32>
    %83 = arith.mulf %82, %82 : vector<64x32xf32>
    %cst_65 = arith.constant dense<0.000000e+00> : vector<64xf32>
    %84 = vector.multi_reduction <add>, %83, %cst_65 [1] : vector<64x32xf32> to vector<64xf32>
    %85 = vector.shape_cast %84 : vector<64xf32> to vector<64x1xf32>
    %cst_66 = arith.constant 3.200000e+01 : f32
    %86 = vector.broadcast %cst_66 : f32 to vector<64x1xf32>
    %87 = arith.divf %85, %86 : vector<64x1xf32>
    %88 = vector.broadcast %80 : vector<64x1xf32> to vector<64x32xf32>
    %89 = arith.subf %76, %88 : vector<64x32xf32>
    %cst_67 = arith.constant 9.99999974E-6 : f32
    %90 = vector.broadcast %cst_67 : f32 to vector<64x1xf32>
    %91 = arith.addf %87, %90 : vector<64x1xf32>
    %92 = math.rsqrt %91 : vector<64x1xf32>
    %93 = vector.broadcast %92 : vector<64x1xf32> to vector<64x32xf32>
    %94 = arith.mulf %89, %93 : vector<64x32xf32>
    %95 = vector.broadcast %56 : vector<1x32xf32> to vector<64x32xf32>
    %96 = arith.mulf %94, %95 : vector<64x32xf32>
    %97 = vector.broadcast %57 : vector<1x32xf32> to vector<64x32xf32>
    %98 = arith.addf %96, %97 : vector<64x32xf32>
    %99 = arith.truncf %98 : vector<64x32xf32> to vector<64x32xbf16>
    %cst_68 = arith.constant dense<0.000000e+00> : vector<64x2048xf32>
    %100 = tpu.matmul %99, %62, %cst_68 {dimension_numbers = #tpu.dot_dimension_numbers<[1], [0], [0], [1], [0, 0, 1, 1], [], []>} : vector<64x32xbf16>, vector<32x2048xbf16>, vector<64x2048xf32> -> vector<64x2048xf32>
    %101 = vector.broadcast %54 : vector<1x2048xf32> to vector<64x2048xf32>
    %102 = arith.addf %100, %101 : vector<64x2048xf32>
    %cst_69 = arith.constant 0.000000e+00 : f32
    %103 = vector.broadcast %cst_69 : f32 to vector<64x2048xf32>
    %104 = arith.maximumf %102, %103 : vector<64x2048xf32>
    %105 = arith.truncf %104 : vector<64x2048xf32> to vector<64x2048xbf16>
    %cst_70 = arith.constant dense<0.000000e+00> : vector<64x32xf32>
    %106 = tpu.matmul %105, %63, %cst_70 {dimension_numbers = #tpu.dot_dimension_numbers<[1], [0], [0], [1], [0, 0, 1, 1], [], []>} : vector<64x2048xbf16>, vector<2048x32xbf16>, vector<64x32xf32> -> vector<64x32xf32>
    %107 = vector.broadcast %55 : vector<1x32xf32> to vector<64x32xf32>
    %108 = arith.addf %106, %107 : vector<64x32xf32>
    %109 = arith.addf %98, %108 : vector<64x32xf32>
    %cst_71 = arith.constant dense<0.000000e+00> : vector<64xf32>
    %110 = vector.multi_reduction <add>, %109, %cst_71 [1] : vector<64x32xf32> to vector<64xf32>
    %111 = vector.shape_cast %110 : vector<64xf32> to vector<64x1xf32>
    %cst_72 = arith.constant 3.200000e+01 : f32
    %112 = vector.broadcast %cst_72 : f32 to vector<64x1xf32>
    %113 = arith.divf %111, %112 : vector<64x1xf32>
    %114 = vector.broadcast %113 : vector<64x1xf32> to vector<64x32xf32>
    %115 = arith.subf %109, %114 : vector<64x32xf32>
    %116 = arith.mulf %115, %115 : vector<64x32xf32>
    %cst_73 = arith.constant dense<0.000000e+00> : vector<64xf32>
    %117 = vector.multi_reduction <add>, %116, %cst_73 [1] : vector<64x32xf32> to vector<64xf32>
    %118 = vector.shape_cast %117 : vector<64xf32> to vector<64x1xf32>
    %cst_74 = arith.constant 3.200000e+01 : f32
    %119 = vector.broadcast %cst_74 : f32 to vector<64x1xf32>
    %120 = arith.divf %118, %119 : vector<64x1xf32>
    %121 = vector.broadcast %113 : vector<64x1xf32> to vector<64x32xf32>
    %122 = arith.subf %109, %121 : vector<64x32xf32>
    %cst_75 = arith.constant 9.99999974E-6 : f32
    %123 = vector.broadcast %cst_75 : f32 to vector<64x1xf32>
    %124 = arith.addf %120, %123 : vector<64x1xf32>
    %125 = math.rsqrt %124 : vector<64x1xf32>
    %126 = vector.broadcast %125 : vector<64x1xf32> to vector<64x32xf32>
    %127 = arith.mulf %122, %126 : vector<64x32xf32>
    %128 = vector.broadcast %58 : vector<1x32xf32> to vector<64x32xf32>
    %129 = arith.mulf %127, %128 : vector<64x32xf32>
    %130 = vector.broadcast %59 : vector<1x32xf32> to vector<64x32xf32>
    %131 = arith.addf %129, %130 : vector<64x32xf32>
    %132 = arith.truncf %131 : vector<64x32xf32> to vector<64x32xbf16>
    %cst_76 = arith.constant dense<0.000000e+00> : vector<64x32xf32>
    %133 = tpu.matmul %132, %60, %cst_76 {dimension_numbers = #tpu.dot_dimension_numbers<[1], [0], [0], [1], [0, 0, 1, 1], [], []>} : vector<64x32xbf16>, vector<32x32xbf16>, vector<64x32xf32> -> vector<64x32xf32>
    %134 = vector.broadcast %52 : vector<1x32xf32> to vector<64x32xf32>
    %135 = arith.addf %133, %134 : vector<64x32xf32>
    %136 = arith.mulf %47, %135 : vector<64x32xf32>
    %cst_77 = arith.constant dense<0.000000e+00> : vector<32xf32>
    %137 = vector.multi_reduction <add>, %136, %cst_77 [0] : vector<64x32xf32> to vector<32xf32>
    %138 = vector.shape_cast %137 : vector<32xf32> to vector<1x32xf32>
    %139 = arith.addf %138, %51 : vector<1x32xf32>
    %140 = arith.truncf %139 : vector<1x32xf32> to vector<1x32xbf16>
    %cst_78 = arith.constant dense<0.000000e+00> : vector<1x32xf32>
    %141 = tpu.matmul %140, %61, %cst_78 {dimension_numbers = #tpu.dot_dimension_numbers<[1], [0], [0], [1], [0, 0, 1, 1], [], []>} : vector<1x32xbf16>, vector<32x32xbf16>, vector<1x32xf32> -> vector<1x32xf32>
    %142 = arith.addf %141, %53 : vector<1x32xf32>
    %143 = vector.broadcast %142 : vector<1x32xf32> to vector<64x32xf32>
    %144 = arith.addf %131, %143 : vector<64x32xf32>
    %cst_79 = arith.constant dense<0.000000e+00> : vector<64xf32>
    %145 = vector.multi_reduction <add>, %144, %cst_79 [1] : vector<64x32xf32> to vector<64xf32>
    %146 = vector.shape_cast %145 : vector<64xf32> to vector<64x1xf32>
    %cst_80 = arith.constant 3.200000e+01 : f32
    %147 = vector.broadcast %cst_80 : f32 to vector<64x1xf32>
    %148 = arith.divf %146, %147 : vector<64x1xf32>
    %149 = vector.broadcast %148 : vector<64x1xf32> to vector<64x32xf32>
    %150 = arith.subf %144, %149 : vector<64x32xf32>
    %151 = arith.mulf %150, %150 : vector<64x32xf32>
    %cst_81 = arith.constant dense<0.000000e+00> : vector<64xf32>
    %152 = vector.multi_reduction <add>, %151, %cst_81 [1] : vector<64x32xf32> to vector<64xf32>
    %153 = vector.shape_cast %152 : vector<64xf32> to vector<64x1xf32>
    %cst_82 = arith.constant 3.200000e+01 : f32
    %154 = vector.broadcast %cst_82 : f32 to vector<64x1xf32>
    %155 = arith.divf %153, %154 : vector<64x1xf32>
    %156 = vector.broadcast %148 : vector<64x1xf32> to vector<64x32xf32>
    %157 = arith.subf %144, %156 : vector<64x32xf32>
    %cst_83 = arith.constant 9.99999974E-6 : f32
    %158 = vector.broadcast %cst_83 : f32 to vector<64x1xf32>
    %159 = arith.addf %155, %158 : vector<64x1xf32>
    %160 = math.rsqrt %159 : vector<64x1xf32>
    %161 = vector.broadcast %160 : vector<64x1xf32> to vector<64x32xf32>
    %162 = arith.mulf %157, %161 : vector<64x32xf32>
    %163 = vector.broadcast %56 : vector<1x32xf32> to vector<64x32xf32>
    %164 = arith.mulf %162, %163 : vector<64x32xf32>
    %165 = vector.broadcast %57 : vector<1x32xf32> to vector<64x32xf32>
    %166 = arith.addf %164, %165 : vector<64x32xf32>
    %167 = arith.truncf %166 : vector<64x32xf32> to vector<64x32xbf16>
    %cst_84 = arith.constant dense<0.000000e+00> : vector<64x2048xf32>
    %168 = tpu.matmul %167, %62, %cst_84 {dimension_numbers = #tpu.dot_dimension_numbers<[1], [0], [0], [1], [0, 0, 1, 1], [], []>} : vector<64x32xbf16>, vector<32x2048xbf16>, vector<64x2048xf32> -> vector<64x2048xf32>
    %169 = vector.broadcast %54 : vector<1x2048xf32> to vector<64x2048xf32>
    %170 = arith.addf %168, %169 : vector<64x2048xf32>
    %cst_85 = arith.constant 0.000000e+00 : f32
    %171 = vector.broadcast %cst_85 : f32 to vector<64x2048xf32>
    %172 = arith.maximumf %170, %171 : vector<64x2048xf32>
    %173 = arith.truncf %172 : vector<64x2048xf32> to vector<64x2048xbf16>
    %cst_86 = arith.constant dense<0.000000e+00> : vector<64x32xf32>
    %174 = tpu.matmul %173, %63, %cst_86 {dimension_numbers = #tpu.dot_dimension_numbers<[1], [0], [0], [1], [0, 0, 1, 1], [], []>} : vector<64x2048xbf16>, vector<2048x32xbf16>, vector<64x32xf32> -> vector<64x32xf32>
    %175 = vector.broadcast %55 : vector<1x32xf32> to vector<64x32xf32>
    %176 = arith.addf %174, %175 : vector<64x32xf32>
    %177 = arith.addf %166, %176 : vector<64x32xf32>
    %cst_87 = arith.constant dense<0.000000e+00> : vector<64xf32>
    %178 = vector.multi_reduction <add>, %177, %cst_87 [1] : vector<64x32xf32> to vector<64xf32>
    %179 = vector.shape_cast %178 : vector<64xf32> to vector<64x1xf32>
    %cst_88 = arith.constant 3.200000e+01 : f32
    %180 = vector.broadcast %cst_88 : f32 to vector<64x1xf32>
    %181 = arith.divf %179, %180 : vector<64x1xf32>
    %182 = vector.broadcast %181 : vector<64x1xf32> to vector<64x32xf32>
    %183 = arith.subf %177, %182 : vector<64x32xf32>
    %184 = arith.mulf %183, %183 : vector<64x32xf32>
    %cst_89 = arith.constant dense<0.000000e+00> : vector<64xf32>
    %185 = vector.multi_reduction <add>, %184, %cst_89 [1] : vector<64x32xf32> to vector<64xf32>
    %186 = vector.shape_cast %185 : vector<64xf32> to vector<64x1xf32>
    %cst_90 = arith.constant 3.200000e+01 : f32
    %187 = vector.broadcast %cst_90 : f32 to vector<64x1xf32>
    %188 = arith.divf %186, %187 : vector<64x1xf32>
    %189 = vector.broadcast %181 : vector<64x1xf32> to vector<64x32xf32>
    %190 = arith.subf %177, %189 : vector<64x32xf32>
    %cst_91 = arith.constant 9.99999974E-6 : f32
    %191 = vector.broadcast %cst_91 : f32 to vector<64x1xf32>
    %192 = arith.addf %188, %191 : vector<64x1xf32>
    %193 = math.rsqrt %192 : vector<64x1xf32>
    %194 = vector.broadcast %193 : vector<64x1xf32> to vector<64x32xf32>
    %195 = arith.mulf %190, %194 : vector<64x32xf32>
    %196 = vector.broadcast %58 : vector<1x32xf32> to vector<64x32xf32>
    %197 = arith.mulf %195, %196 : vector<64x32xf32>
    %198 = vector.broadcast %59 : vector<1x32xf32> to vector<64x32xf32>
    %199 = arith.addf %197, %198 : vector<64x32xf32>
    %200 = arith.truncf %199 : vector<64x32xf32> to vector<64x32xbf16>
    %cst_92 = arith.constant dense<0.000000e+00> : vector<64x32xf32>
    %201 = tpu.matmul %200, %60, %cst_92 {dimension_numbers = #tpu.dot_dimension_numbers<[1], [0], [0], [1], [0, 0, 1, 1], [], []>} : vector<64x32xbf16>, vector<32x32xbf16>, vector<64x32xf32> -> vector<64x32xf32>
    %202 = vector.broadcast %52 : vector<1x32xf32> to vector<64x32xf32>
    %203 = arith.addf %201, %202 : vector<64x32xf32>
    %204 = arith.mulf %47, %203 : vector<64x32xf32>
    %cst_93 = arith.constant dense<0.000000e+00> : vector<32xf32>
    %205 = vector.multi_reduction <add>, %204, %cst_93 [0] : vector<64x32xf32> to vector<32xf32>
    %206 = vector.shape_cast %205 : vector<32xf32> to vector<1x32xf32>
    %207 = arith.addf %206, %51 : vector<1x32xf32>
    %208 = arith.truncf %207 : vector<1x32xf32> to vector<1x32xbf16>
    %cst_94 = arith.constant dense<0.000000e+00> : vector<1x32xf32>
    %209 = tpu.matmul %208, %61, %cst_94 {dimension_numbers = #tpu.dot_dimension_numbers<[1], [0], [0], [1], [0, 0, 1, 1], [], []>} : vector<1x32xbf16>, vector<32x32xbf16>, vector<1x32xf32> -> vector<1x32xf32>
    %210 = arith.addf %209, %53 : vector<1x32xf32>
    %211 = vector.broadcast %210 : vector<1x32xf32> to vector<64x32xf32>
    %212 = arith.addf %199, %211 : vector<64x32xf32>
    %cst_95 = arith.constant dense<0.000000e+00> : vector<64xf32>
    %213 = vector.multi_reduction <add>, %212, %cst_95 [1] : vector<64x32xf32> to vector<64xf32>
    %214 = vector.shape_cast %213 : vector<64xf32> to vector<64x1xf32>
    %cst_96 = arith.constant 3.200000e+01 : f32
    %215 = vector.broadcast %cst_96 : f32 to vector<64x1xf32>
    %216 = arith.divf %214, %215 : vector<64x1xf32>
    %217 = vector.broadcast %216 : vector<64x1xf32> to vector<64x32xf32>
    %218 = arith.subf %212, %217 : vector<64x32xf32>
    %219 = arith.mulf %218, %218 : vector<64x32xf32>
    %cst_97 = arith.constant dense<0.000000e+00> : vector<64xf32>
    %220 = vector.multi_reduction <add>, %219, %cst_97 [1] : vector<64x32xf32> to vector<64xf32>
    %221 = vector.shape_cast %220 : vector<64xf32> to vector<64x1xf32>
    %cst_98 = arith.constant 3.200000e+01 : f32
    %222 = vector.broadcast %cst_98 : f32 to vector<64x1xf32>
    %223 = arith.divf %221, %222 : vector<64x1xf32>
    %224 = vector.broadcast %216 : vector<64x1xf32> to vector<64x32xf32>
    %225 = arith.subf %212, %224 : vector<64x32xf32>
    %cst_99 = arith.constant 9.99999974E-6 : f32
    %226 = vector.broadcast %cst_99 : f32 to vector<64x1xf32>
    %227 = arith.addf %223, %226 : vector<64x1xf32>
    %228 = math.rsqrt %227 : vector<64x1xf32>
    %229 = vector.broadcast %228 : vector<64x1xf32> to vector<64x32xf32>
    %230 = arith.mulf %225, %229 : vector<64x32xf32>
    %231 = vector.broadcast %56 : vector<1x32xf32> to vector<64x32xf32>
    %232 = arith.mulf %230, %231 : vector<64x32xf32>
    %233 = vector.broadcast %57 : vector<1x32xf32> to vector<64x32xf32>
    %234 = arith.addf %232, %233 : vector<64x32xf32>
    %235 = arith.truncf %234 : vector<64x32xf32> to vector<64x32xbf16>
    %cst_100 = arith.constant dense<0.000000e+00> : vector<64x2048xf32>
    %236 = tpu.matmul %235, %62, %cst_100 {dimension_numbers = #tpu.dot_dimension_numbers<[1], [0], [0], [1], [0, 0, 1, 1], [], []>} : vector<64x32xbf16>, vector<32x2048xbf16>, vector<64x2048xf32> -> vector<64x2048xf32>
    %237 = vector.broadcast %54 : vector<1x2048xf32> to vector<64x2048xf32>
    %238 = arith.addf %236, %237 : vector<64x2048xf32>
    %cst_101 = arith.constant 0.000000e+00 : f32
    %239 = vector.broadcast %cst_101 : f32 to vector<64x2048xf32>
    %240 = arith.maximumf %238, %239 : vector<64x2048xf32>
    %241 = arith.truncf %240 : vector<64x2048xf32> to vector<64x2048xbf16>
    %cst_102 = arith.constant dense<0.000000e+00> : vector<64x32xf32>
    %242 = tpu.matmul %241, %63, %cst_102 {dimension_numbers = #tpu.dot_dimension_numbers<[1], [0], [0], [1], [0, 0, 1, 1], [], []>} : vector<64x2048xbf16>, vector<2048x32xbf16>, vector<64x32xf32> -> vector<64x32xf32>
    %243 = vector.broadcast %55 : vector<1x32xf32> to vector<64x32xf32>
    %244 = arith.addf %242, %243 : vector<64x32xf32>
    %245 = arith.addf %234, %244 : vector<64x32xf32>
    %cst_103 = arith.constant dense<0.000000e+00> : vector<64xf32>
    %246 = vector.multi_reduction <add>, %245, %cst_103 [1] : vector<64x32xf32> to vector<64xf32>
    %247 = vector.shape_cast %246 : vector<64xf32> to vector<64x1xf32>
    %cst_104 = arith.constant 3.200000e+01 : f32
    %248 = vector.broadcast %cst_104 : f32 to vector<64x1xf32>
    %249 = arith.divf %247, %248 : vector<64x1xf32>
    %250 = vector.broadcast %249 : vector<64x1xf32> to vector<64x32xf32>
    %251 = arith.subf %245, %250 : vector<64x32xf32>
    %252 = arith.mulf %251, %251 : vector<64x32xf32>
    %cst_105 = arith.constant dense<0.000000e+00> : vector<64xf32>
    %253 = vector.multi_reduction <add>, %252, %cst_105 [1] : vector<64x32xf32> to vector<64xf32>
    %254 = vector.shape_cast %253 : vector<64xf32> to vector<64x1xf32>
    %cst_106 = arith.constant 3.200000e+01 : f32
    %255 = vector.broadcast %cst_106 : f32 to vector<64x1xf32>
    %256 = arith.divf %254, %255 : vector<64x1xf32>
    %257 = vector.broadcast %249 : vector<64x1xf32> to vector<64x32xf32>
    %258 = arith.subf %245, %257 : vector<64x32xf32>
    %cst_107 = arith.constant 9.99999974E-6 : f32
    %259 = vector.broadcast %cst_107 : f32 to vector<64x1xf32>
    %260 = arith.addf %256, %259 : vector<64x1xf32>
    %261 = math.rsqrt %260 : vector<64x1xf32>
    %262 = vector.broadcast %261 : vector<64x1xf32> to vector<64x32xf32>
    %263 = arith.mulf %258, %262 : vector<64x32xf32>
    %264 = vector.broadcast %58 : vector<1x32xf32> to vector<64x32xf32>
    %265 = arith.mulf %263, %264 : vector<64x32xf32>
    %266 = vector.broadcast %59 : vector<1x32xf32> to vector<64x32xf32>
    %267 = arith.addf %265, %266 : vector<64x32xf32>
    %c0_108 = arith.constant 0 : index
    %c0_109 = arith.constant 0 : index
    %c0_110 = arith.constant 0 : index
    %268 = vector.load %arg25[%c0_108, %c0_109, %c0_110] : memref<1x64x32xf32, #tpu.memory_space<vmem>>, vector<1x64x32xf32>
    %269 = vector.shape_cast %268 : vector<1x64x32xf32> to vector<64x32xf32>
    %270 = vector.shape_cast %267 : vector<64x32xf32> to vector<1x64x32xf32>
    tpu.vector_store %arg25[%c0_108, %c0_109, %c0_110], %270 {strides = array<i32>} : memref<1x64x32xf32, #tpu.memory_space<vmem>>, vector<1x64x32xf32>,
    return
  }
  func.func @transform_0(%arg0: i32) -> (i32, i32, i32) {
    %c0_i32 = arith.constant 0 : i32
    %c0_i32_0 = arith.constant 0 : i32
    %c0_i32_1 = arith.constant 0 : i32
    return %arg0, %c0_i32, %c0_i32_0 : i32, i32, i32
  }
  func.func @transform_1(%arg0: i32) -> (i32, i32, i32) {
    %c0_i32 = arith.constant 0 : i32
    %c0_i32_0 = arith.constant 0 : i32
    %c0_i32_1 = arith.constant 0 : i32
    return %arg0, %c0_i32, %c0_i32_0 : i32, i32, i32
  }
  func.func @transform_2(%arg0: i32) -> (i32, i32, i32) {
    %c0_i32 = arith.constant 0 : i32
    %c0_i32_0 = arith.constant 0 : i32
    %c0_i32_1 = arith.constant 0 : i32
    return %arg0, %c0_i32, %c0_i32_0 : i32, i32, i32
  }
  func.func @transform_3(%arg0: i32) -> (i32, i32, i32) {
    %c0_i32 = arith.constant 0 : i32
    %c0_i32_0 = arith.constant 0 : i32
    %c0_i32_1 = arith.constant 0 : i32
    return %arg0, %c0_i32, %c0_i32_0 : i32, i32, i32
  }
  func.func @transform_4(%arg0: i32) -> (i32, i32) {
    %c0_i32 = arith.constant 0 : i32
    %c0_i32_0 = arith.constant 0 : i32
    %c0_i32_1 = arith.constant 0 : i32
    return %c0_i32, %c0_i32_0 : i32, i32
  }
  func.func @transform_5(%arg0: i32) -> (i32, i32) {
    %c0_i32 = arith.constant 0 : i32
    %c0_i32_0 = arith.constant 0 : i32
    %c0_i32_1 = arith.constant 0 : i32
    return %c0_i32, %c0_i32_0 : i32, i32
  }
  func.func @transform_6(%arg0: i32) -> (i32, i32) {
    %c0_i32 = arith.constant 0 : i32
    %c0_i32_0 = arith.constant 0 : i32
    %c0_i32_1 = arith.constant 0 : i32
    return %c0_i32, %c0_i32_0 : i32, i32
  }
  func.func @transform_7(%arg0: i32) -> (i32, i32) {
    %c0_i32 = arith.constant 0 : i32
    %c0_i32_0 = arith.constant 0 : i32
    %c0_i32_1 = arith.constant 0 : i32
    return %c0_i32, %c0_i32_0 : i32, i32
  }
  func.func @transform_8(%arg0: i32) -> (i32, i32) {
    %c0_i32 = arith.constant 0 : i32
    %c0_i32_0 = arith.constant 0 : i32
    %c0_i32_1 = arith.constant 0 : i32
    return %c0_i32, %c0_i32_0 : i32, i32
  }
  func.func @transform_9(%arg0: i32) -> (i32, i32) {
    %c0_i32 = arith.constant 0 : i32
    %c0_i32_0 = arith.constant 0 : i32
    %c0_i32_1 = arith.constant 0 : i32
    return %c0_i32, %c0_i32_0 : i32, i32
  }
  func.func @transform_10(%arg0: i32) -> (i32, i32) {
    %c0_i32 = arith.constant 0 : i32
    %c0_i32_0 = arith.constant 0 : i32
    %c0_i32_1 = arith.constant 0 : i32
    return %c0_i32, %c0_i32_0 : i32, i32
  }
  func.func @transform_11(%arg0: i32) -> (i32, i32) {
    %c0_i32 = arith.constant 0 : i32
    %c0_i32_0 = arith.constant 0 : i32
    %c0_i32_1 = arith.constant 0 : i32
    return %c0_i32, %c0_i32_0 : i32, i32
  }
  func.func @transform_12(%arg0: i32) -> (i32, i32) {
    %c0_i32 = arith.constant 0 : i32
    %c0_i32_0 = arith.constant 0 : i32
    %c0_i32_1 = arith.constant 0 : i32
    return %c0_i32, %c0_i32_0 : i32, i32
  }
  func.func @transform_13(%arg0: i32) -> (i32, i32) {
    %c0_i32 = arith.constant 0 : i32
    %c0_i32_0 = arith.constant 0 : i32
    %c0_i32_1 = arith.constant 0 : i32
    return %c0_i32, %c0_i32_0 : i32, i32
  }
  func.func @transform_14(%arg0: i32) -> (i32, i32) {
    %c0_i32 = arith.constant 0 : i32
    %c0_i32_0 = arith.constant 0 : i32
    %c0_i32_1 = arith.constant 0 : i32
    return %c0_i32, %c0_i32_0 : i32, i32
  }
  func.func @transform_15(%arg0: i32) -> (i32, i32) {
    %c0_i32 = arith.constant 0 : i32
    %c0_i32_0 = arith.constant 0 : i32
    %c0_i32_1 = arith.constant 0 : i32
    return %c0_i32, %c0_i32_0 : i32, i32
  }
  func.func @transform_16(%arg0: i32) -> (i32, i32) {
    %c0_i32 = arith.constant 0 : i32
    %c0_i32_0 = arith.constant 0 : i32
    %c0_i32_1 = arith.constant 0 : i32
    return %c0_i32, %c0_i32_0 : i32, i32
  }
  func.func @transform_17(%arg0: i32) -> (i32, i32) {
    %c0_i32 = arith.constant 0 : i32
    %c0_i32_0 = arith.constant 0 : i32
    %c0_i32_1 = arith.constant 0 : i32
    return %c0_i32, %c0_i32_0 : i32, i32
  }
  func.func @transform_18(%arg0: i32) -> (i32, i32) {
    %c0_i32 = arith.constant 0 : i32
    %c0_i32_0 = arith.constant 0 : i32
    %c0_i32_1 = arith.constant 0 : i32
    return %c0_i32, %c0_i32_0 : i32, i32
  }
  func.func @transform_19(%arg0: i32) -> (i32, i32) {
    %c0_i32 = arith.constant 0 : i32
    %c0_i32_0 = arith.constant 0 : i32
    %c0_i32_1 = arith.constant 0 : i32
    return %c0_i32, %c0_i32_0 : i32, i32
  }
  func.func @transform_20(%arg0: i32) -> (i32, i32) {
    %c0_i32 = arith.constant 0 : i32
    %c0_i32_0 = arith.constant 0 : i32
    %c0_i32_1 = arith.constant 0 : i32
    return %c0_i32, %c0_i32_0 : i32, i32
  }
  func.func @transform_21(%arg0: i32) -> (i32, i32) {
    %c0_i32 = arith.constant 0 : i32
    %c0_i32_0 = arith.constant 0 : i32
    %c0_i32_1 = arith.constant 0 : i32
    return %c0_i32, %c0_i32_0 : i32, i32
  }
  func.func @transform_22(%arg0: i32) -> (i32, i32) {
    %c0_i32 = arith.constant 0 : i32
    %c0_i32_0 = arith.constant 0 : i32
    %c0_i32_1 = arith.constant 0 : i32
    return %c0_i32, %c0_i32_0 : i32, i32
  }
  func.func @transform_23(%arg0: i32) -> (i32, i32) {
    %c0_i32 = arith.constant 0 : i32
    %c0_i32_0 = arith.constant 0 : i32
    %c0_i32_1 = arith.constant 0 : i32
    return %c0_i32, %c0_i32_0 : i32, i32
  }
  func.func @transform_24(%arg0: i32) -> (i32, i32, i32) {
    %c0_i32 = arith.constant 0 : i32
    %c0_i32_0 = arith.constant 0 : i32
    %c0_i32_1 = arith.constant 0 : i32
    return %arg0, %c0_i32, %c0_i32_0 : i32, i32, i32
  }
}

</mosaic_0001>

<bundles_post_ra>
// kernel: tpu_custom_call.1
= control target key start
LH: loop header
LB: loop body
LE: loop exit
PB: predicated region body
PF: predicated region fallthrough
CT: control target
= control target key end

     0   :  { %s13660_s0 = inlined_call_operand.vmem [shape: f32[2,1,32], index: 0, kind: input, shape index: {}]   ;;  %s13661_s1 = inlined_call_operand.vmem [shape: f32[2,64,32], index: 1, kind: input, shape index: {}]   ;;  %s13662_s2 = inlined_call_operand.vmem [shape: f32[2,64,32], index: 2, kind: input, shape index: {}]   ;;  %s13663_s3 = inlined_call_operand.vmem [shape: f32[2,64,1], index: 3, kind: input, shape index: {}]   ;;  %s13664_s4 = inlined_call_operand.vmem [shape: f32[32,4], index: 4, kind: input, shape index: {}]   ;;  %s13665_s5 = inlined_call_operand.vmem [shape: f32[4,32], index: 5, kind: input, shape index: {}]   ;;  %s13666_s6 = inlined_call_operand.vmem [shape: bf16[32,32], index: 6, kind: input, shape index: {}]   ;;  %s13667_s7 = inlined_call_operand.vmem [shape: bf16[32,32], index: 7, kind: input, shape index: {}]   ;;  %s13668_s8 = inlined_call_operand.vmem [shape: bf16[32,32], index: 8, kind: input, shape index: {}]   ;;  %s13669_s9 = inlined_call_operand.vmem [shape: f32[1,32], index: 9, kind: input, shape index: {}]   ;;  %s13670_s10 = inlined_call_operand.vmem [shape: f32[1,32], index: 10, kind: input, shape index: {}]   ;;  %s13671_s11 = inlined_call_operand.vmem [shape: f32[1,32], index: 11, kind: input, shape index: {}]   ;;  %s13672_s12 = inlined_call_operand.vmem [shape: f32[1,32], index: 12, kind: input, shape index: {}]   ;;  %s13673_s13 = inlined_call_operand.vmem [shape: f32[1,32], index: 13, kind: input, shape index: {}]   ;;  %s13674_s14 = inlined_call_operand.vmem [shape: bf16[32,32], index: 14, kind: input, shape index: {}]   ;;  %s13675_s15 = inlined_call_operand.vmem [shape: f32[1,32], index: 15, kind: input, shape index: {}]   ;;  %s13676_s16 = inlined_call_operand.vmem [shape: bf16[32,2048], index: 16, kind: input, shape index: {}]   ;;  %s13677_s17 = inlined_call_operand.vmem [shape: f32[1,2048], index: 17, kind: input, shape index: {}]   ;;  %s13678_s18 = inlined_call_operand.vmem [shape: bf16[2048,32], index: 18, kind: input, shape index: {}]   ;;  %s13679_s19 = inlined_call_operand.vmem [shape: f32[1,32], index: 19, kind: input, shape index: {}]   ;;  %s13680_s20 = inlined_call_operand.vmem [shape: f32[1,32], index: 20, kind: input, shape index: {}]   ;;  %s13681_s21 = inlined_call_operand.vmem [shape: f32[1,32], index: 21, kind: input, shape index: {}]   ;;  %s13682_s22 = inlined_call_operand.vmem [shape: f32[1,32], index: 22, kind: input, shape index: {}]   ;;  %s13683_s23 = inlined_call_operand.vmem [shape: f32[1,32], index: 23, kind: input, shape index: {}]   ;;  %s13684_s24 = inlined_call_operand.vmem [shape: f32[2,64,32], index: 24, kind: output, shape index: {}]  }
   0x1   :  { %13786 = sst [smem:[#allocation38_spill]] %s13660_s0 }
   0x2   :  { %13787 = sst [smem:[#allocation39_spill]] %s13661_s1 }
   0x3   :  { %13788 = sst [smem:[#allocation40_spill]] %s13662_s2 }
   0x4   :  { %13789 = sst [smem:[#allocation41_spill]] %s13663_s3 }
   0x5   :  { %13790 = sst [smem:[#allocation42_spill]] %s13664_s4 }
   0x6   :  { %13791 = sst [smem:[#allocation43_spill]] %s13665_s5  ;;  %s10392_s5 = smov 0  }
   0x7   :  { %13792 = sst [smem:[#allocation44_spill]] %s13666_s6 }
   0x8   :  { %13793 = sst [smem:[#allocation45_spill]] %s13667_s7 }
   0x9   :  { %13794 = sst [smem:[#allocation46_spill]] %s13668_s8 }
   0xa LB: > { %13795 = sst [smem:[#allocation2_spill]] %s10261_s5  ;;  %s8213_s26 = sadd.s32 4294967295, %s10261_s5   ;;  %s10261_s5 = sphi %s10392_s5, %s34_s5  }
   0xb   : > { %p8217_p0 = scmp.ge.s32.totalorder %s10261_s5, 1  ;;  %p690_p1 = scmp.lt.s32.totalorder %s10261_s5, 3 }
   0xd   : > { %p691_p2 = pnand %p8217_p0, %p690_p1 }
   0xf   : > { %694 = sbr.rel (%p691_p2) target bundleno = 5552 (0x15b0), region = 116 }
  0x16   : > { %s13796_s6 = sld [smem:[#allocation44_spill]]  ;;  %v13694_v1 = vmov 0.0   ;;  %s13797_s0 = sld [smem:[#allocation45_spill]]  ;;  %vm10264_vm0 = vmmov 0   ;;  %vm841_vm1 = vcmask 261120   ;;  %v10265_v17 = vmov 0.0|0.0  }
  0x17   : > { %9567 = vmatprep.subr.bf16.mxu0 %v13694_v1  ;;  %9571 = vmatprep.mubr.msk.bf16.mxu0 %vm10264_vm0, %v13694_v1  ;;  %p769_p3 = scmp.lt.s32.totalorder %s8213_s26, 1  ;;  %s13798_s1 = sld [smem:[#allocation42_spill]]  ;;  %v13692_v28 = vmov 0   ;;  %v989_v35 = vlaneseq  ;;  %v828_v37 = vld [vmem:[%s13669_s9] sm:$0x1]  ;;  %vm1375_vm2 = vcmask 1043456  }
  0x18   : > { %s13799_s7 = sld [smem:[#allocation38_spill]]  ;;  %s13801_s27 = sld [smem:[#allocation41_spill]]  ;;  %9724 = vset.pattern.permute.xlu1 %v13692_v28  ;;  %9723 = vset.pattern.permute.xlu0 %v13692_v28  ;;  %v1186_v40 = vld [vmem:[%s13672_s12] sm:$0x1]  ;;  %vm1262_vm3 = vcmask 31744  }
  0x19   : > { %s13922_s26 = smov (!%p769_p3, %s8213_s26), 1  ;;  %v10451_v36 = vshrl.u32 %v989_v35, 7  ;;  %v8229_v41 = vld [vmem:[%s13670_s10] ss:$0 sm:$0xff]  ;;  %s13804_s29 = sld [smem:[#allocation40_spill]] }
  0x1a   : > { %s10425_s3 = sshll.u32 %s13922_s26, 6 }
  0x1b   : > { %v10457_v38 = vsub.s32 0, %v10451_v36 }
  0x1c   : > { %v9725_v0 = vld [vmem:[%s13796_s6] sm:$0xff]   ;;  %v9727_v3 = vld [vmem:[%s13796_s6 + $0x8] sm:$0xff]   ;;  %s13800_s6 = sld [smem:[#allocation39_spill]] }
  0x1d   : > { %v9726_v2 = vld [vmem:[%s13797_s0] sm:$0xff]   ;;  %9568 = vmatpush3.bf16.msra.mxu0 %v9725_v0  ;;  %v9728_v4 = vld [vmem:[%s13797_s0 + $0x8] sm:$0xff]   ;;  %v820_v23 = vld [vmem:[%s13798_s1 + $0x10] sm:$0xff] }
  0x1e   : > { %9575 = vmatprep.subr.bf16.mxu1 %v9726_v2  ;;  %9569 = vmatprep.subr.bf16.mxu0 %v13694_v1  ;;  %v818_v5 = vld [vmem:[%s13798_s1] sm:$0xff]  ;;  %v819_v6 = vld [vmem:[%s13798_s1 + $0x8] sm:$0xff]  ;;  %s771_s30 = scalar_lea.vmem %s13799_s7, %s13922_s26  ;;  %v821_v24 = vld [vmem:[%s13798_s1 + $0x18] sm:$0xff]  ;;  %s786_s28 = scalar_lea.vmem %s13801_s27, %s10425_s3 }
  0x1f   : > { %9576 = vmatpush3.bf16.msra.mxu1 %v9726_v2  ;;  %v9697_v7 = vpack.c.bf16 %v819_v6, %v818_v5  ;;  %v793_v8 = vld [vmem:[%s771_s30] sm:$0x1]  ;;  %v9701_v25 = vpack.c.bf16 %v821_v24, %v820_v23  ;;  %v812_v26 = vld [vmem:[%s786_s28 + $0x10] sm:$0xff]  ;;  %v813_v29 = vld [vmem:[%s786_s28 + $0x18] sm:$0xff]  ;;  %s13803_s27 = sld [smem:[#allocation46_spill]]  ;;  %s10508_s7 = scalar_lea.vmem %s13804_s29, %s10425_s3 }
  0x20   : > { %9577 = vmatprep.subr.bf16.mxu1 %v9728_v4  ;;  %v823_v9 = vpack.c.bf16 %v793_v8, %v793_v8  ;;  %v810_v27 = vld [vmem:[%s786_s28] sm:$0xff]  ;;  %1150 = vperm.xlu1 %9724, %v812_v26   ;;  %v811_v30 = vld [vmem:[%s786_s28 + $0x8] sm:$0xff]  ;;  %v817_v33 = vld [vmem:[%s786_s28 + $0x38] sm:$0xff]  ;;  %s13630_s26 = scalar_lea.vmem %s13684_s24, %s10425_s3 }
  0x21   : > { %9570 = vmatpush3.bf16.msra.mxu0 %v9727_v3  ;;  %1140 = vperm.xlu0 %9723, %v810_v27   ;;  %v815_v31 = vld [vmem:[%s786_s28 + $0x28] sm:$0xff]  ;;  %v814_v32 = vld [vmem:[%s786_s28 + $0x20] sm:$0xff]  ;;  %v816_v34 = vld [vmem:[%s786_s28 + $0x30] sm:$0xff] }
  0x22   : > { %s776_s5 = scalar_lea.vmem %s13800_s6, %s10425_s3  ;;  %9698 = vmatprep.subr.bf16.mxu0 %v9697_v7 }
  0x23   : > { %9578 = vmatpush3.bf16.msra.mxu1 %v9728_v4  ;;  %v794_v10 = vld [vmem:[%s776_s5] sm:$0xff]  ;;  %v795_v11 = vld [vmem:[%s776_s5 + $0x8] sm:$0xff]  ;;  %v796_v12 = vld [vmem:[%s776_s5 + $0x10] sm:$0xff] }
  0x24   : > { %v885_v13 = vpack.c.bf16 %v795_v11, %v794_v10  ;;  %v797_v14 = vld [vmem:[%s776_s5 + $0x18] sm:$0xff]  ;;  %v798_v15 = vld [vmem:[%s776_s5 + $0x20] sm:$0xff]  ;;  %v799_v16 = vld [vmem:[%s776_s5 + $0x28] sm:$0xff]  ;;  %9705 = vmatprep.subr.bf16.mxu1 %v10265_v17  ;;  %9572 = vmatmul.mubr.msk.bf16.vlgmr.msra.gmra.mrb[0].mxu0 %vm841_vm1, %v823_v9 }
  0x25   : > { %v886_v18 = vpack.c.bf16 %v797_v14, %v796_v12  ;;  %v887_v19 = vpack.c.bf16 %v799_v16, %v798_v15  ;;  %v800_v20 = vld [vmem:[%s776_s5 + $0x30] sm:$0xff]  ;;  %v801_v21 = vld [vmem:[%s776_s5 + $0x38] sm:$0xff]  ;;  %9700 = vmatpush3.bf16.msra.mxu0 %v9697_v7  ;;  %1155 = vperm.xlu1 %9724, %v813_v29   ;;  %s13802_s5 = sld [smem:[#allocation43_spill]]  ;;  %v10483_v10 = vld [vmem:[%s13803_s27] sm:$0xff]  }
  0x26   : > { %9579 = vmatprep.mubr.msk.bf16.mxu1 %vm841_vm1, %v885_v13  ;;  %v888_v22 = vpack.c.bf16 %v801_v21, %v800_v20  ;;  %9702 = vmatprep.subr.bf16.mxu0 %v9701_v25 }
  0x27   : > { %9580 = vmatmul.mubr.msk.bf16.vlgmr.msra.gmra.mrb[0].mxu1 %vm841_vm1, %v886_v18  ;;  %1145 = vperm.xlu0 %9723, %v811_v30  }
  0x28   : > { %9583 = vmatprep.mubr.msk.bf16.mxu1 %vm841_vm1, %v887_v19  ;;  %9707 = vmatpush3.bf16.msra.mxu1 %v9697_v7 }
  0x29   : > { %9708 = vmatprep.subr.bf16.mxu1 %v10265_v17  ;;  %9704 = vmatpush3.bf16.msra.mxu0 %v9701_v25 }
  0x2a   : > { %9632 = vmatprep.subr.mxu0 %v13694_v1  ;;  %1165 = vperm.xlu1 %9724, %v815_v31  }
  0x2b   : > { %1160 = vperm.xlu0 %9723, %v814_v32   ;;  %v822_v9 = vld [vmem:[%s13802_s5] sm:$0xf] }
  0x2c   : > { %9710 = vmatpush3.bf16.msra.mxu1 %v9701_v25 }
  0x2d   : > { %9618 = vmatprep.subr.msk.mxu1 %vm1375_vm2, %v822_v9 }
  0x2e   : > { %1175 = vperm.xlu1 %9724, %v817_v33  }
  0x2f   : > { %9584 = vmatmul.mubr.msk.bf16.gmra.mrb[4].mxu1 %vm841_vm1, %v888_v22  ;;  %1170 = vperm.xlu0 %9723, %v816_v34  }
  0x30   : > { %9615 = vmatprep.mubr.msk.f32.mxu1 %vm10264_vm0, %v13694_v1 }
  0x9f   : > { %v1151_v12 = vpop.permute.xlu1 %1150 }
  0xa0   : > { %v1141_v14 = vpop.permute.xlu0 %1140 }
  0xa4   : > { %v1156_v17 = vpop.permute.xlu1 %1155 }
  0xa6   : > { %v1146_v18 = vpop.permute.xlu0 %1145 }
  0xa9   : > { %v1166_v23 = vpop.permute.xlu1 %1165 }
  0xaa   : > { %v1161_v26 = vpop.permute.xlu0 %1160 }
  0xf7   : > { %v879_v39 = vpop.f32.mrb[0].mxu0 }
  0xf8   : > { %v880_v42 = vadd.f32 %v879_v39, %v828_v37  ;;  %v9573_v43 = vpop.f32.mrb[1].mxu0 }
  0xf9   : > { %v882_v45 = vpop.f32.mrb[2].mxu0 }
  0xfa   : > { %v9581_v44 = vpop.f32.mrb[0].mxu1  ;;  %v992_v46 = vrot.slane %v880_v42, %v10457_v38  ;;  %v1187_v47 = vmul.f32 %v1186_v40, %v880_v42  ;;  %v9574_v50 = vpop.f32.mrb[3].mxu0 }
  0xfb   : > { %v967_v48 = vadd.f32 %v9581_v44, %v8229_v41  ;;  %v958_v49 = vpop.f32.mrb[1].mxu1  ;;  %v1176_v45 = vpop.permute.xlu1 %1175 }
  0xfc   : > { %v959_v51 = vadd.f32 %v8229_v41, %v958_v49  ;;  %v9582_v52 = vpop.f32.mrb[2].mxu1  ;;  %9616 = vmatmul.mubr.msk.f32.vlgmr.msra.gmra.mrb[8].mxu1 %vm841_vm1, %v1187_v47  ;;  %v1171_v50 = vpop.permute.xlu0 %1170 }
  0xfd   : > { %v995_v53 = vmul.f32 %v992_v46, %v967_v48  ;;  %v970_v54 = vadd.f32 %v9582_v52, %v8229_v41  ;;  %v961_v55 = vpop.f32.mrb[3].mxu1  ;;  %9619 = vmatpush3.msk.msra.mxu1 %vm1375_vm2, %v822_v9 }
  0xfe   : > { %v993_v56 = vmul.f32 %v992_v46, %v959_v51  ;;  %v962_v57 = vadd.f32 %v8229_v41, %v961_v55  ;;  %9649 = vmatprep.subr.bf16.mxu1 %v13694_v1 }
  0xff   : > { %v996_v58 = vmul.f32 %v992_v46, %v970_v54 }
 0x100   : > { %v994_v59 = vmul.f32 %v992_v46, %v962_v57  ;;  %9595 = vmatprep.mubr.msk.f32.mxu0 %vm841_vm1, %v993_v56 }
 0x102   : > { %v9585_v60 = vpop.f32.mrb[4].mxu1  ;;  %9596 = vmatmul.mubr.msk.f32.vlgmr.msra.gmra.mrb[4].mxu0 %vm841_vm1, %v994_v59 }
 0x103   : > { %v983_v61 = vadd.f32 %v9585_v60, %v8229_v41  ;;  %v974_v62 = vpop.f32.mrb[5].mxu1  ;;  %9598 = vmatprep.mubr.msk.f32.mxu0 %vm841_vm1, %v995_v53  ;;  %9633 = vmatpush3.msk.msra.mxu0 %vm1375_vm2, %v822_v9 }
 0x104   : > { %v975_v63 = vadd.f32 %v8229_v41, %v974_v62  ;;  %v9586_v0 = vpop.f32.mrb[6].mxu1  ;;  %9637 = vmatprep.subr.bf16.mxu0 %v10483_v10 }
 0x105   : > { %v999_v2 = vmul.f32 %v992_v46, %v983_v61  ;;  %v986_v3 = vadd.f32 %v9586_v0, %v8229_v41  ;;  %v977_v4 = vpop.f32.mrb[7].mxu1 }
 0x106   : > { %v997_v5 = vmul.f32 %v992_v46, %v975_v63  ;;  %v978_v6 = vadd.f32 %v8229_v41, %v977_v4  ;;  %9599 = vmatmul.mubr.msk.f32.gmra.mrb[6].mxu0 %vm841_vm1, %v996_v58 }
 0x107   : > { %v1000_v7 = vmul.f32 %v992_v46, %v986_v3 }
 0x108   : > { %v998_v8 = vmul.f32 %v992_v46, %v978_v6  ;;  %9601 = vmatprep.mubr.msk.f32.mxu0 %vm841_vm1, %v997_v5 }
 0x10a   : > { %9602 = vmatmul.mubr.msk.f32.gmra.mrb[8].mxu0 %vm841_vm1, %v998_v8 }
 0x10b   : > { %9604 = vmatprep.mubr.msk.f32.mxu0 %vm841_vm1, %v999_v2 }
 0x10e   : > { %9605 = vmatmul.mubr.msk.f32.gmra.mrb[10].mxu0 %vm841_vm1, %v1000_v7 }
 0x10f   : > { %9634 = vmatprep.mubr.msk.f32.mxu0 %vm10264_vm0, %v13694_v1 }
 0x1cf   : > { %v1257_v11 = vpop.f32.mrb[8].mxu1 }
 0x1d0   : > { %v9617_v13 = vpop.f32.mrb[9].mxu1  ;;  %v1261_v5 = vmul.f32 0.35355338, %v1257_v11 }
 0x1d5   : > { %v9597_v15 = vpop.f32.mrb[4].mxu0 }
 0x1d6   : > { %v1091_v16 = vpop.f32.mrb[5].mxu0  ;;  %v1131_v19 = vmul.f32 0.35355338, %v9597_v15 }
 0x1d7   : > { %v1130_v21 = vmul.f32 0.35355338, %v1091_v16 }
 0x1d8   : > { %v1179_v24 = vadd.f32 %v1146_v18, %v1131_v19 }
 0x1d9   : > { %v9600_v20 = vpop.f32.mrb[6].mxu0  ;;  %v1178_v27 = vadd.f32 %v1141_v14, %v1130_v21 }
 0x1da   : > { %v1101_v22 = vpop.f32.mrb[7].mxu0  ;;  %v1133_v29 = vmul.f32 0.35355338, %v9600_v20  ;;  %v1264_v35 = vsel %vm1262_vm3, %v1179_v24, -inf }
 0x1db   : > { %v1132_v32 = vmul.f32 0.35355338, %v1101_v22  ;;  %v1263_v40 = vsel %vm1262_vm3, %v1178_v27, -inf }
 0x1dc   : > { %v1181_v41 = vadd.f32 %v1156_v17, %v1133_v29 }
 0x1dd   : > { %v9603_v25 = vpop.f32.mrb[8].mxu0  ;;  %v1180_v46 = vadd.f32 %v1151_v12, %v1132_v32 }
 0x1de   : > { %v1135_v30 = vmul.f32 0.35355338, %v9603_v25  ;;  %v1111_v31 = vpop.f32.mrb[9].mxu0  ;;  %v1266_v54 = vsel %vm1262_vm3, %v1181_v41, -inf }
 0x1df   : > { %v1134_v33 = vmul.f32 0.35355338, %v1111_v31  ;;  %v1265_v57 = vsel %vm1262_vm3, %v1180_v46, -inf }
 0x1e0   : > { %v1183_v34 = vadd.f32 %v1166_v23, %v1135_v30 }
 0x1e1   : > { %v1182_v37 = vadd.f32 %v1161_v26, %v1134_v33  ;;  %v9606_v39 = vpop.f32.mrb[10].mxu0 }
 0x1e2   : > { %v1269_v42 = vsel %vm1262_vm3, %v1183_v34, -inf  ;;  %v1137_v43 = vmul.f32 0.35355338, %v9606_v39  ;;  %v1121_v44 = vpop.f32.mrb[11].mxu0 }
 0x1e3   : > { %v1270_v47 = vmax.f32 %v1264_v35, %v1269_v42  ;;  %v1267_v48 = vsel %vm1262_vm3, %v1182_v37, -inf  ;;  %v1136_v49 = vmul.f32 0.35355338, %v1121_v44 }
 0x1e4   : > { %v1268_v51 = vmax.f32 %v1263_v40, %v1267_v48  ;;  %v1185_v52 = vadd.f32 %v1176_v45, %v1137_v43 }
 0x1e5   : > { %v1184_v53 = vadd.f32 %v1171_v50, %v1136_v49 }
 0x1e6   : > { %v1275_v55 = vmax.f32 %v1268_v51, %v1270_v47  ;;  %v1273_v56 = vsel %vm1262_vm3, %v1185_v52, -inf }
 0x1e7   : > { %v1274_v58 = vmax.f32 %v1266_v54, %v1273_v56  ;;  %v1271_v59 = vsel %vm1262_vm3, %v1184_v53, -inf }
 0x1e8   : > { %v1272_v60 = vmax.f32 %v1265_v57, %v1271_v59 }
 0x1ea   : > { %v1276_v61 = vmax.f32 %v1272_v60, %v1274_v58 }
 0x1ec   : > { %v1277_v62 = vmax.f32 %v1275_v55, %v1276_v61 }
 0x1ee   : > { %v1278_v63 = vrot.slane %v1277_v62, 4 }
 0x1f0   : > { %v1279_v0 = vmax.f32 %v1277_v62, %v1278_v63  ;;  %v10511_v62 = vld [vmem:[%s10508_s7] sm:$0xff]  ;;  %v10514_v63 = vld [vmem:[%s10508_s7 + $0x8] sm:$0xff] }
 0x1f2   : > { %v1280_v2 = vrot.slane %v1279_v0, 2 }
 0x1f4   : > { %v1281_v3 = vmax.f32 %v1279_v0, %v1280_v2  ;;  %v1865_v2 = vpack.c.bf16 %v10514_v63, %v10511_v62 }
 0x1f6   : > { %v1282_v4 = vrot.slane %v1281_v3, 1 }
 0x1f8   : > { %v1283_v6 = vmax.f32 %v1281_v3, %v1282_v4 }
 0x1fa   : > { %v1284_v7 = vmax.f32 %v1283_v6, %v1261_v5 }
 0x1fc   : > { %v1288_v8 = vrot.slane %v1284_v7, %v10457_v38  ;;  %v1313_v9 = vsub.f32 %v1261_v5, %v1284_v7  ;;  %v9730_v5 = vld [vmem:[%s13803_s27 + $0x8] sm:$0xff]  }
 0x1fe   : > { %v1289_v12 = vsub.f32 %v1178_v27, %v1288_v8  ;;  %v1290_v13 = vsub.f32 %v1179_v24, %v1288_v8  ;;  %v1291_v14 = vsub.f32 %v1180_v46, %v1288_v8  ;;  %v1292_v15 = vsub.f32 %v1181_v41, %v1288_v8 }
 0x1ff   : > { %v1293_v16 = vsub.f32 %v1182_v37, %v1288_v8  ;;  %v1294_v17 = vsub.f32 %v1183_v34, %v1288_v8  ;;  %v1295_v18 = vsub.f32 %v1184_v53, %v1288_v8  ;;  %v1296_v19 = vsub.f32 %v1185_v52, %v1288_v8 }
 0x200   : > { %v1297_v20 = vmul.f32 1.442695, %v1289_v12  ;;  %v1299_v21 = vmul.f32 1.442695, %v1290_v13  ;;  %v1301_v22 = vmul.f32 1.442695, %v1291_v14 }
 0x201   : > { %v1303_v23 = vmul.f32 1.442695, %v1292_v15  ;;  %v1305_v11 = vmul.f32 1.442695, %v1293_v16  ;;  %v1307_v25 = vmul.f32 1.442695, %v1294_v17 }
 0x202   : > { %9861 = vpow2.f32 %v1297_v20  ;;  %v1309_v26 = vmul.f32 1.442695, %v1295_v18  ;;  %v1311_v24 = vmul.f32 1.442695, %v1296_v19  ;;  %v1314_v51 = vmul.f32 1.442695, %v1313_v9 }
 0x203   : > { %9863 = vpow2.f32 %v1299_v21  ;;  %v10526_v12 = vld [vmem:[%s10508_s7 + $0x10] sm:$0xff]  ;;  %v10529_v13 = vld [vmem:[%s10508_s7 + $0x18] sm:$0xff]  ;;  %v10533_v17 = vld [vmem:[%s10508_s7 + $0x20] sm:$0xff] }
 0x204   : > { %9865 = vpow2.f32 %v1301_v22  ;;  %v10536_v18 = vld [vmem:[%s10508_s7 + $0x28] sm:$0xff]  ;;  %v10549_v21 = vld [vmem:[%s10508_s7 + $0x30] sm:$0xff]  ;;  %v10552_v22 = vld [vmem:[%s10508_s7 + $0x38] sm:$0xff] }
 0x205   : > { %9867 = vpow2.f32 %v1303_v23  ;;  %v1867_v20 = vpack.c.bf16 %v10536_v18, %v10533_v17  ;;  %v1868_v23 = vpack.c.bf16 %v10552_v22, %v10549_v21 }
 0x206   : > { %9869 = vpow2.f32 %v1305_v11  ;;  %v9731_v11 = vld [vmem:[%s13674_s14] sm:$0xff]  }
 0x207   : > { %9871 = vpow2.f32 %v1307_v25  ;;  %v9732_v25 = vld [vmem:[%s13674_s14 + $0x8] sm:$0xff]  }
 0x208   : > { %9873 = vpow2.f32 %v1309_v26 }
 0x209   : > { %9875 = vpow2.f32 %v1311_v24 }
 0x20a   : > { %9877 = vpow2.f32 %v1314_v51 }
 0x20c   : > { %v9862_v27 = vpop.eup %9861 }
 0x20d   : > { %v9864_v29 = vpop.eup %9863  ;;  %v1316_v30 = vsel %vm1262_vm3, %v9862_v27, 0.0 }
 0x20e   : > { %v9866_v31 = vpop.eup %9865  ;;  %v1317_v32 = vsel %vm1262_vm3, %v9864_v29, 0.0 }
 0x20f   : > { %v9868_v33 = vpop.eup %9867  ;;  %v1318_v34 = vadd.f32 %v1317_v32, %v1316_v30  ;;  %v1319_v35 = vsel %vm1262_vm3, %v9866_v31, 0.0  ;;  %v8256_v30 = vld [vmem:[%s13671_s11] ss:$0 sm:$0xff] }
 0x210   : > { %v9870_v37 = vpop.eup %9869  ;;  %v1321_v40 = vsel %vm1262_vm3, %v9868_v33, 0.0 }
 0x211   : > { %v1320_v39 = vadd.f32 %v1319_v35, %v1318_v34  ;;  %v9872_v41 = vpop.eup %9871  ;;  %v1323_v43 = vsel %vm1262_vm3, %v9870_v37, 0.0 }
 0x212   : > { %v9874_v44 = vpop.eup %9873  ;;  %v1325_v46 = vsel %vm1262_vm3, %v9872_v41, 0.0 }
 0x213   : > { %v1322_v42 = vadd.f32 %v1321_v40, %v1320_v39  ;;  %v9876_v47 = vpop.eup %9875  ;;  %v1327_v49 = vsel %vm1262_vm3, %v9874_v44, 0.0 }
 0x214   : > { %v1329_v52 = vsel %vm1262_vm3, %v9876_v47, 0.0  ;;  %v9878_v60 = vpop.eup %9877 }
 0x215   : > { %v1324_v45 = vadd.f32 %v1323_v43, %v1322_v42 }
 0x217   : > { %v1326_v48 = vadd.f32 %v1325_v46, %v1324_v45 }
 0x219   : > { %v1328_v50 = vadd.f32 %v1327_v49, %v1326_v48 }
 0x21b   : > { %v1330_v53 = vadd.f32 %v1329_v52, %v1328_v50 }
 0x21d   : > { %v1331_v54 = vrot.slane %v1330_v53, 4 }
 0x21f   : > { %v1332_v55 = vadd.f32 %v1331_v54, %v1330_v53 }
 0x221   : > { %v1333_v56 = vrot.slane %v1332_v55, 2 }
 0x223   : > { %v1334_v57 = vadd.f32 %v1333_v56, %v1332_v55 }
 0x225   : > { %v1335_v58 = vrot.slane %v1334_v57, 1 }
 0x227   : > { %v1336_v59 = vadd.f32 %v1335_v58, %v1334_v57 }
 0x229   : > { %v1337_v61 = vadd.f32 %v9878_v60, %v1336_v59 }
 0x22b   : > { %9879 = vrcp.f32 %v1337_v61 }
 0x235   : > { %v9880_v0 = vpop.eup %9879 }
 0x236   : > { %v1484_v3 = vmul.f32 %v9880_v0, %v9878_v60  ;;  %v1342_v4 = vrot.slane %v9880_v0, %v10457_v38 }
 0x238   : > { %9635 = vmatmul.mubr.msk.f32.vlgmr.msra.gmra.mrb[12].mxu0 %vm1262_vm3, %v1484_v3  ;;  %v1343_v6 = vmul.f32 %v9862_v27, %v1342_v4  ;;  %v1344_v7 = vmul.f32 %v9864_v29, %v1342_v4  ;;  %v1345_v8 = vmul.f32 %v9866_v31, %v1342_v4  ;;  %v1346_v9 = vmul.f32 %v9868_v33, %v1342_v4 }
 0x239   : > { %9638 = vmatpush3.bf16.msra.mxu0 %v10483_v10  ;;  %9641 = vmatprep.mubr.msk.bf16.mxu0 %vm841_vm1, %v1865_v2  ;;  %v1347_v14 = vmul.f32 %v9870_v37, %v1342_v4  ;;  %v1348_v15 = vmul.f32 %v9872_v41, %v1342_v4  ;;  %v1349_v16 = vmul.f32 %v9874_v44, %v1342_v4 }
 0x23a   : > { %9620 = vmatprep.mubr.msk.f32.mxu1 %vm1262_vm3, %v1343_v6  ;;  %9639 = vmatprep.subr.bf16.mxu0 %v9730_v5  ;;  %v1350_v19 = vmul.f32 %v9876_v47, %v1342_v4  ;;  %v1866_v10 = vpack.c.bf16 %v10529_v13, %v10526_v12 }
 0x23b   : > { %9621 = vmatmul.mubr.msk.f32.vlgmr.msra.gmra.mrb[10].mxu1 %vm1262_vm3, %v1344_v7 }
 0x23c   : > { %9623 = vmatprep.mubr.msk.f32.mxu1 %vm1262_vm3, %v1345_v8  ;;  %9650 = vmatpush3.bf16.msra.mxu1 %v9731_v11 }
 0x23d   : > { %9640 = vmatpush3.bf16.msra.mxu0 %v9730_v5  ;;  %9651 = vmatprep.subr.bf16.mxu1 %v13694_v1 }
 0x23f   : > { %9624 = vmatmul.mubr.msk.f32.gmra.mrb[12].mxu1 %vm1262_vm3, %v1346_v9 }
 0x240   : > { %9642 = vmatmul.mubr.msk.bf16.vlgmr.msra.gmra.mrb[16].mxu0 %vm841_vm1, %v1866_v10  ;;  %9626 = vmatprep.mubr.msk.f32.mxu1 %vm1262_vm3, %v1347_v14 }
 0x241   : > { %9645 = vmatprep.mubr.msk.bf16.mxu0 %vm841_vm1, %v1867_v20  ;;  %9652 = vmatpush3.bf16.msra.mxu1 %v9732_v25 }
 0x243   : > { %9627 = vmatmul.mubr.msk.f32.gmra.mrb[14].mxu1 %vm1262_vm3, %v1348_v15 }
 0x244   : > { %9629 = vmatprep.mubr.msk.f32.mxu1 %vm1262_vm3, %v1349_v16 }
 0x247   : > { %9630 = vmatmul.mubr.msk.f32.gmra.mrb[16].mxu1 %vm1262_vm3, %v1350_v19 }
 0x248   : > { %9646 = vmatmul.mubr.msk.bf16.gmra.mrb[20].mxu0 %vm841_vm1, %v1868_v23  ;;  %9653 = vmatprep.mubr.msk.bf16.mxu1 %vm10264_vm0, %v13694_v1 }
 0x249   : > { %2558 = vmatprep.mubr.bf16.mxu0 %v13692_v28 }
 0x30b   : > { %v1554_v26 = vpop.f32.mrb[12].mxu0 }
 0x30c   : > { %v9636_v24 = vpop.f32.mrb[13].mxu0 }
 0x30e   : > { %v10570_v27 = vpop.f32.mrb[10].mxu1 }
 0x30f   : > { %v10572_v29 = vpop.f32.mrb[11].mxu1 }
 0x312   : > { %v10577_v31 = vpop.f32.mrb[12].mxu1 }
 0x313   : > { %v9643_v32 = vpop.f32.mrb[16].mxu0  ;;  %v10579_v33 = vpop.f32.mrb[13].mxu1 }
 0x314   : > { %v1942_v34 = vadd.f32 %v9643_v32, %v8256_v30  ;;  %v1933_v35 = vpop.f32.mrb[17].mxu0  ;;  %v1558_v32 = vld [vmem:[%s13673_s13] sm:$0x1] }
 0x315   : > { %v1934_v37 = vadd.f32 %v8256_v30, %v1933_v35  ;;  %v9644_v39 = vpop.f32.mrb[18].mxu0  ;;  %v10608_v35 = vmul.f32 %v1558_v32, %v1554_v26 }
 0x316   : > { %v1966_v40 = vmul.f32 %v1942_v34, %v10579_v33  ;;  %v1945_v41 = vadd.f32 %v9644_v39, %v8256_v30  ;;  %v1936_v42 = vpop.f32.mrb[19].mxu0  ;;  %v10582_v43 = vpop.f32.mrb[14].mxu1 }
 0x317   : > { %v1964_v44 = vmul.f32 %v1934_v37, %v10572_v29  ;;  %v1937_v45 = vadd.f32 %v8256_v30, %v1936_v42  ;;  %v10585_v46 = vpop.f32.mrb[15].mxu1 }
 0x318   : > { %v1967_v47 = vmul.f32 %v10577_v31, %v1945_v41  ;;  %v1975_v57 = vsel %vm841_vm1, %v1966_v40, 0.0  ;;  %v1561_v41 = vld [vmem:[%s13675_s15] sm:$0x1] }
 0x319   : > { %v1965_v48 = vmul.f32 %v10570_v27, %v1937_v45  ;;  %v1972_v50 = vsel %vm841_vm1, %v1964_v44, 0.0 }
 0x31a   : > { %v10589_v49 = vpop.f32.mrb[16].mxu1  ;;  %v1977_v3 = vsel %vm841_vm1, %v1967_v47, 0.0 }
 0x31b   : > { %v1973_v51 = vsel %vm841_vm1, %v1965_v48, 0.0  ;;  %v9647_v52 = vpop.f32.mrb[20].mxu0  ;;  %v10593_v53 = vpop.f32.mrb[17].mxu1 }
 0x31c   : > { %v1974_v54 = vadd.f32 %v1973_v51, %v1972_v50  ;;  %v1958_v55 = vadd.f32 %v9647_v52, %v8256_v30  ;;  %v1949_v56 = vpop.f32.mrb[21].mxu0 }
 0x31d   : > { %v1950_v58 = vadd.f32 %v8256_v30, %v1949_v56  ;;  %v9648_v59 = vpop.f32.mrb[22].mxu0 }
 0x31e   : > { %v1976_v60 = vadd.f32 %v1975_v57, %v1974_v54  ;;  %v1970_v61 = vmul.f32 %v1958_v55, %v10593_v53  ;;  %v1961_v0 = vadd.f32 %v9648_v59, %v8256_v30  ;;  %v1952_v2 = vpop.f32.mrb[23].mxu0 }
 0x31f   : > { %v1968_v4 = vmul.f32 %v1950_v58, %v10585_v46  ;;  %v1953_v5 = vadd.f32 %v8256_v30, %v1952_v2 }
 0x320   : > { %v1978_v6 = vadd.f32 %v1977_v3, %v1976_v60  ;;  %v1971_v7 = vmul.f32 %v10589_v49, %v1961_v0  ;;  %v1983_v19 = vsel %vm841_vm1, %v1970_v61, 0.0 }
 0x321   : > { %v1979_v8 = vsel %vm841_vm1, %v1968_v4, 0.0  ;;  %v1969_v9 = vmul.f32 %v10582_v43, %v1953_v5 }
 0x322   : > { %v1980_v14 = vadd.f32 %v1979_v8, %v1978_v6  ;;  %v1985_v20 = vsel %vm841_vm1, %v1971_v7, 0.0 }
 0x323   : > { %v1981_v15 = vsel %vm841_vm1, %v1969_v9, 0.0 }
 0x324   : > { %v1982_v16 = vadd.f32 %v1981_v15, %v1980_v14 }
 0x326   : > { %v1984_v10 = vadd.f32 %v1983_v19, %v1982_v16 }
 0x328   : > { %v1986_v23 = vadd.f32 %v1985_v20, %v1984_v10 }
 0x32a   : > { %v1987_v11 = vrot.slane %v1986_v23, 4 }
 0x32c   : > { %v1988_v25 = vadd.f32 %v1987_v11, %v1986_v23 }
 0x32e   : > { %v1989_v24 = vrot.slane %v1988_v25, 2 }
 0x330   : > { %v1990_v30 = vadd.f32 %v1989_v24, %v1988_v25 }
 0x332   : > { %v1991_v34 = vrot.slane %v1990_v30, 1 }
 0x334   : > { %v1992_v37 = vadd.f32 %v1991_v34, %v1990_v30 }
 0x336   : > { %v1993_v39 = vadd.f32 %v1992_v37, %v10608_v35 }
 0x338   : > { %v1994_v40 = vpack.c.bf16 %v1993_v39, %v1993_v39 }
 0x33a   : > { %9654 = vmatmul.mubr.msk.bf16.vlgmr.msra.gmra.mrb[20].mxu1 %vm841_vm1, %v1994_v40 }
 0x33b   : > { %2485 = vmatprep.mubr.bf16.mxu1 %v13692_v28 }
 0x40d   : > { %v2044_v42 = vpop.f32.mrb[20].mxu1 }
 0x40e   : > { %v2045_v44 = vadd.f32 %v2044_v42, %v1561_v41  ;;  %v9655_v45 = vpop.f32.mrb[21].mxu1 }
 0x40f   : > { %v2047_v47 = vpop.f32.mrb[22].mxu1 }
 0x410   : > { %v2053_v48 = vrot.slane %v2045_v44, %v10457_v38  ;;  %v9656_v26 = vpop.f32.mrb[23].mxu1 }
 0x412   : > { %v2055_v50 = vadd.f32 %v2053_v48, %v10514_v63  ;;  %v2054_v51 = vadd.f32 %v2053_v48, %v10511_v62  ;;  %v2058_v55 = vadd.f32 %v2053_v48, %v10533_v17  ;;  %v2056_v56 = vadd.f32 %v2053_v48, %v10526_v12 }
 0x413   : > { %v2060_v59 = vadd.f32 %v2053_v48, %v10549_v21  ;;  %v2057_v63 = vadd.f32 %v2053_v48, %v10529_v13  ;;  %v2059_v17 = vadd.f32 %v2053_v48, %v10536_v18  ;;  %v2061_v61 = vadd.f32 %v2053_v48, %v10552_v22 }
 0x414   : > { %v2065_v52 = vsel %vm841_vm1, %v2055_v50, 0.0  ;;  %v2062_v54 = vsel %vm841_vm1, %v2054_v51, 0.0  ;;  %v2074_v57 = vsel %vm841_vm1, %v2058_v55, 0.0  ;;  %v2068_v58 = vsel %vm841_vm1, %v2056_v56, 0.0 }
 0x415   : > { %2066 = vadd.xlane.f32.xlu1 %v2065_v52  ;;  %2063 = vadd.xlane.f32.xlu0 %v2062_v54  ;;  %v2080_v62 = vsel %vm841_vm1, %v2060_v59, 0.0  ;;  %v2071_v60 = vsel %vm841_vm1, %v2057_v63, 0.0  ;;  %v2077_v12 = vsel %vm841_vm1, %v2059_v17, 0.0  ;;  %v2083_v0 = vsel %vm841_vm1, %v2061_v61, 0.0 }
 0x419   : > { %2075 = vadd.xlane.f32.xlu1 %v2074_v57  ;;  %2069 = vadd.xlane.f32.xlu0 %v2068_v58  ;;  %v1586_v57 = vld [vmem:[%s13676_s16 + $0x48] sm:$0xff]  ;;  %v1577_v58 = vld [vmem:[%s13676_s16] sm:$0xff] }
 0x41d   : > { %2081 = vadd.xlane.f32.xlu1 %v2080_v62  ;;  %2072 = vadd.xlane.f32.xlu0 %v2071_v60 }
 0x421   : > { %2078 = vadd.xlane.f32.xlu0 %v2077_v12  ;;  %v1594_v12 = vld [vmem:[%s13676_s16 + $0x88] sm:$0xff] }
 0x425   : > { %2084 = vadd.xlane.f32.xlu0 %v2083_v0  ;;  %v1593_v0 = vld [vmem:[%s13676_s16 + $0x80] sm:$0xff] }
 0x4a2   : > { %v2067_v21 = vpop.xlane.xlu1 %2066  ;;  %v2064_v13 = vpop.xlane.xlu0 %2063 }
 0x4a3   : > { %v2088_v2 = vmul.f32 0.03125, %v2067_v21  ;;  %v2087_v3 = vmul.f32 0.03125, %v2064_v13  ;;  %v1601_v13 = vld [vmem:[%s13676_s16 + $0xc0] sm:$0xff] }
 0x4a5   : > { %v10633_v4 = vsub.f32 %v2055_v50, %v2088_v2  ;;  %v10635_v5 = vsub.f32 %v2054_v51, %v2087_v3  ;;  %v10713_v3 = vcombine.low %v1593_v0, %v1601_v13 }
 0x4a6   : > { %v2076_v6 = vpop.xlane.xlu1 %2075  ;;  %v2070_v18 = vpop.xlane.xlu0 %2069 }
 0x4a7   : > { %v2091_v7 = vmul.f32 0.03125, %v2076_v6  ;;  %v2089_v8 = vmul.f32 0.03125, %v2070_v18  ;;  %v2104_v9 = vmul.f32 %v10633_v4, %v10633_v4  ;;  %v2103_v22 = vmul.f32 %v10635_v5, %v10635_v5  ;;  %v1579_v18 = vld [vmem:[%s13676_s16 + $0x10] sm:$0xff] }
 0x4a8   : > { %v10715_v6 = vcombine.high %v1593_v0, %v1601_v13  ;;  %v10752_v0 = vld [vmem:[%s13681_s21] ss:$0 sm:$0xff] }
 0x4a9   : > { %v10641_v14 = vsub.f32 %v2058_v55, %v2091_v7  ;;  %v10643_v15 = vsub.f32 %v2056_v56, %v2089_v8  ;;  %v2114_v16 = vsel %vm841_vm1, %v2104_v9, 0.0  ;;  %v2111_v19 = vsel %vm841_vm1, %v2103_v22, 0.0  ;;  %v1578_v56 = vld [vmem:[%s13676_s16 + $0x8] sm:$0xff]  ;;  %v1587_v7 = vld [vmem:[%s13676_s16 + $0x50] sm:$0xff]  ;;  %v1580_v8 = vld [vmem:[%s13676_s16 + $0x18] sm:$0xff] }
 0x4aa   : > { %v2082_v10 = vpop.xlane.xlu1 %2081  ;;  %2115 = vadd.xlane.f32.xlu0 %v2114_v16  ;;  %2112 = vadd.xlane.f32.xlu1 %v2111_v19  ;;  %v2073_v20 = vpop.xlane.xlu0 %2072  ;;  %v10687_v62 = vcombine.low %v1578_v56, %v1586_v57  ;;  %v10730_v9 = vcombine.low %v1579_v18, %v1587_v7  ;;  %v10732_v22 = vcombine.high %v1579_v18, %v1587_v7  ;;  %v1588_v16 = vld [vmem:[%s13676_s16 + $0x58] sm:$0xff] }
 0x4ab   : > { %v2093_v23 = vmul.f32 0.03125, %v2082_v10  ;;  %v2090_v11 = vmul.f32 0.03125, %v2073_v20  ;;  %v2105_v25 = vmul.f32 %v10643_v15, %v10643_v15  ;;  %v2107_v34 = vmul.f32 %v10641_v14, %v10641_v14 }
 0x4ac   : > { %v10737_v19 = vcombine.low %v1580_v8, %v1588_v16  ;;  %v10739_v10 = vcombine.high %v1580_v8, %v1588_v16 }
 0x4ad   : > { %v10649_v24 = vsub.f32 %v2060_v59, %v2093_v23  ;;  %v10651_v30 = vsub.f32 %v2057_v63, %v2090_v11  ;;  %v2117_v32 = vsel %vm841_vm1, %v2105_v25, 0.0  ;;  %v2123_v42 = vsel %vm841_vm1, %v2107_v34, 0.0  ;;  %v1585_v63 = vld [vmem:[%s13676_s16 + $0x40] sm:$0xff] }
 0x4ae   : > { %2118 = vadd.xlane.f32.xlu1 %v2117_v32  ;;  %v2079_v37 = vpop.xlane.xlu0 %2078  ;;  %v10682_v59 = vcombine.high %v1578_v56, %v1586_v57  ;;  %v10689_v60 = vcombine.low %v1577_v58, %v1585_v63  ;;  %v10746_v56 = vld [vmem:[%s13680_s20] ss:$0 sm:$0xff] }
 0x4af   : > { %v2092_v39 = vmul.f32 0.03125, %v2079_v37  ;;  %v2106_v40 = vmul.f32 %v10651_v30, %v10651_v30  ;;  %v2109_v45 = vmul.f32 %v10649_v24, %v10649_v24 }
 0x4b0   : > { %13805 = vst [vmem:[#allocation3_spill] sm:$0xff] %v10682_v59  ;;  %2526 = vmatprep.subr.bf16.mxu0 %v10682_v59 }
 0x4b1   : > { %v10658_v41 = vsub.f32 %v2059_v17, %v2092_v39  ;;  %v2120_v44 = vsel %vm841_vm1, %v2106_v40, 0.0  ;;  %v2129_v51 = vsel %vm841_vm1, %v2109_v45, 0.0  ;;  %v10691_v17 = vcombine.high %v1577_v58, %v1585_v63  ;;  %2527 = vmatpush1.bf16.msra.mxu0 %v10687_v62 }
 0x4b2   : > { %2124 = vadd.xlane.f32.xlu1 %v2123_v42  ;;  %2121 = vadd.xlane.f32.xlu0 %v2120_v44  ;;  %v2085_v47 = vpop.xlane.xlu0 %2084 }
 0x4b3   : > { %v2094_v48 = vmul.f32 0.03125, %v2085_v47  ;;  %v2108_v26 = vmul.f32 %v10658_v41, %v10658_v41  ;;  %13806 = vst [vmem:[#allocation4_spill] sm:$0xff] %v10691_v17  ;;  %2453 = vmatprep.subr.bf16.mxu1 %v10691_v17 }
 0x4b4   : > { %2454 = vmatpush1.bf16.msra.mxu1 %v10689_v60 }
 0x4b5   : > { %v10666_v50 = vsub.f32 %v2061_v61, %v2094_v48  ;;  %v2126_v52 = vsel %vm841_vm1, %v2108_v26, 0.0  ;;  %v1602_v61 = vld [vmem:[%s13676_s16 + $0xc8] sm:$0xff]  ;;  %2455 = vmatprep.subr.bf16.mxu1 %v10715_v6 }
 0x4b6   : > { %2130 = vadd.xlane.f32.xlu1 %v2129_v51  ;;  %2127 = vadd.xlane.f32.xlu0 %v2126_v52  ;;  %v10706_v21 = vcombine.high %v1594_v12, %v1602_v61  ;;  %v10711_v2 = vcombine.low %v1594_v12, %v1602_v61 }
 0x4b7   : > { %v2110_v54 = vmul.f32 %v10666_v50, %v10666_v50 }
 0x4b8   : > { %2528 = vmatprep.subr.bf16.mxu0 %v10706_v21  ;;  %2456 = vmatpush1.bf16.msra.mxu1 %v10713_v3 }
 0x4b9   : > { %v2132_v55 = vsel %vm841_vm1, %v2110_v54, 0.0  ;;  %2529 = vmatpush1.bf16.msra.mxu0 %v10711_v2  ;;  %2599 = vmatprep.subr.bf16.mxu1 %v10732_v22 }
 0x4ba   : > { %2133 = vadd.xlane.f32.xlu0 %v2132_v55  ;;  %2672 = vmatprep.subr.bf16.mxu0 %v10739_v10 }
 0x537   : > { %v2113_v20 = vpop.xlane.xlu1 %2112  ;;  %v2116_v23 = vpop.xlane.xlu0 %2115 }
 0x538   : > { %v2135_v11 = vmul.f32 0.03125, %v2113_v20  ;;  %v2136_v25 = vmul.f32 0.03125, %v2116_v23 }
 0x53a   : > { %v2143_v32 = vadd.f32 1e-05, %v2135_v11  ;;  %v2144_v34 = vadd.f32 1e-05, %v2136_v25  ;;  %v1595_v11 = vld [vmem:[%s13676_s16 + $0x90] sm:$0xff] }
 0x53b   : > { %v2119_v37 = vpop.xlane.xlu1 %2118 }
 0x53c   : > { %9881 = vrsqrt.f32 %v2143_v32  ;;  %v2137_v39 = vmul.f32 0.03125, %v2119_v37  ;;  %v1603_v32 = vld [vmem:[%s13676_s16 + $0xd0] sm:$0xff]  ;;  %v1604_v37 = vld [vmem:[%s13676_s16 + $0xd8] sm:$0xff] }
 0x53d   : > { %9883 = vrsqrt.f32 %v2144_v34  ;;  %v1596_v34 = vld [vmem:[%s13676_s16 + $0x98] sm:$0xff] }
 0x53e   : > { %v2145_v40 = vadd.f32 1e-05, %v2137_v39 }
 0x53f   : > { %v2125_v42 = vpop.xlane.xlu1 %2124  ;;  %v2122_v44 = vpop.xlane.xlu0 %2121 }
 0x540   : > { %9885 = vrsqrt.f32 %v2145_v40  ;;  %v2139_v45 = vmul.f32 0.03125, %v2125_v42  ;;  %v2138_v47 = vmul.f32 0.03125, %v2122_v44  ;;  %v10785_v42 = vcombine.high %v1595_v11, %v1603_v32 }
 0x541   : > { %v10787_v44 = vcombine.high %v1596_v34, %v1604_v37 }
 0x542   : > { %v2146_v48 = vadd.f32 1e-05, %v2138_v47  ;;  %v2147_v26 = vadd.f32 1e-05, %v2139_v45  ;;  %v1589_v45 = vld [vmem:[%s13676_s16 + $0x60] sm:$0xff]  ;;  %v1582_v47 = vld [vmem:[%s13676_s16 + $0x28] sm:$0xff] }
 0x543   : > { %v2128_v51 = vpop.xlane.xlu0 %2127  ;;  %v2131_v52 = vpop.xlane.xlu1 %2130 }
 0x544   : > { %v2140_v54 = vmul.f32 0.03125, %v2128_v51  ;;  %9887 = vrsqrt.f32 %v2146_v48  ;;  %v2141_v12 = vmul.f32 0.03125, %v2131_v52  ;;  %v1590_v48 = vld [vmem:[%s13676_s16 + $0x68] sm:$0xff] }
 0x545   : > { %9889 = vrsqrt.f32 %v2147_v26 }
 0x546   : > { %v9882_v55 = vpop.eup %9881  ;;  %v2148_v57 = vadd.f32 1e-05, %v2140_v54  ;;  %v2149_v23 = vadd.f32 1e-05, %v2141_v12  ;;  %v10806_v54 = vcombine.low %v1595_v11, %v1603_v32 }
 0x547   : > { %v9884_v58 = vpop.eup %9883  ;;  %v2159_v63 = vmul.f32 %v9882_v55, %v10635_v5  ;;  %v2134_v61 = vpop.xlane.xlu0 %2133  ;;  %v10808_v55 = vcombine.low %v1596_v34, %v1604_v37 }
 0x548   : > { %v2160_v13 = vmul.f32 %v9884_v58, %v10633_v4  ;;  %v2142_v18 = vmul.f32 0.03125, %v2134_v61  ;;  %9891 = vrsqrt.f32 %v2148_v57  ;;  %v10816_v58 = vcombine.high %v1582_v47, %v1590_v48 }
 0x549   : > { %v2173_v7 = vmul.f32 %v10746_v56, %v2159_v63  ;;  %13807 = vst [vmem:[#allocation5_spill] sm:$0xff] %v10808_v55 }
 0x54a   : > { %v9886_v8 = vpop.eup %9885  ;;  %v2174_v16 = vmul.f32 %v10746_v56, %v2160_v13  ;;  %v2150_v20 = vadd.f32 1e-05, %v2142_v18  ;;  %13809 = vst [vmem:[#allocation7_spill] sm:$0xff] %v10816_v58 }
 0x54b   : > { %v10758_v5 = vadd.f32 %v10752_v0, %v2173_v7  ;;  %v2161_v4 = vmul.f32 %v9886_v8, %v10643_v15  ;;  %v10783_v15 = vld [vmem:[%s13676_s16 + $0x20] sm:$0xff] }
 0x54c   : > { %v10764_v25 = vadd.f32 %v10752_v0, %v2174_v16  ;;  %9893 = vrsqrt.f32 %v2150_v20 }
 0x54d   : > { %9895 = vrsqrt.f32 %v2149_v23  ;;  %v2175_v26 = vmul.f32 %v10746_v56, %v2161_v4 }
 0x54e   : > { %v10778_v39 = vpack.c.bf16 %v10764_v25, %v10758_v5  ;;  %v9888_v40 = vpop.eup %9887 }
 0x54f   : > { %v2162_v51 = vmul.f32 %v9888_v40, %v10651_v30  ;;  %v9890_v52 = vpop.eup %9889  ;;  %v10814_v30 = vcombine.high %v10783_v15, %v1589_v45  ;;  %v10821_v12 = vadd.f32 %v10752_v0, %v2175_v26  ;;  %v1598_v26 = vld [vmem:[%s13676_s16 + $0xa8] sm:$0xff] }
 0x550   : > { %8300 = vmatmul.mubr.msk.bf16.vlgmr.msra.gmra.mrb[24].mxu1 %vm841_vm1, %v10778_v39  ;;  %8304 = vmatmul.mubr.msk.bf16.vlgmr.msra.gmra.mrb[24].mxu0 %vm841_vm1, %v10778_v39  ;;  %v2163_v61 = vmul.f32 %v9890_v52, %v10641_v14  ;;  %v10893_v52 = vcombine.low %v10783_v15, %v1589_v45  ;;  %v1592_v15 = vld [vmem:[%s13676_s16 + $0x78] sm:$0xff] }
 0x551   : > { %2600 = vmatpush1.bf16.msra.mxu1 %v10730_v9  ;;  %2673 = vmatpush1.bf16.msra.mxu0 %v10737_v19  ;;  %v2176_v57 = vmul.f32 %v10746_v56, %v2162_v51  ;;  %13808 = vst [vmem:[#allocation6_spill] sm:$0xff] %v10814_v30  ;;  %v1606_v51 = vld [vmem:[%s13676_s16 + $0xe8] sm:$0xff] }
 0x552   : > { %2495 = vmatprep.mubr.bf16.mxu1 %v13692_v28  ;;  %2568 = vmatprep.mubr.bf16.mxu0 %v13692_v28  ;;  %v9892_v63 = vpop.eup %9891  ;;  %v2177_v16 = vmul.f32 %v10746_v56, %v2163_v61  ;;  %13810 = vst [vmem:[#allocation8_spill] sm:$0xff] %v10893_v52 }
 0x553   : > { %2601 = vmatprep.subr.bf16.mxu1 %v10785_v42  ;;  %2674 = vmatprep.subr.bf16.mxu0 %v10787_v44  ;;  %v10825_v13 = vadd.f32 %v10752_v0, %v2176_v57  ;;  %v2164_v18 = vmul.f32 %v9892_v63, %v10658_v41  ;;  %v10895_v57 = vcombine.low %v1582_v47, %v1590_v48  ;;  %v1583_v63 = vld [vmem:[%s13676_s16 + $0x30] sm:$0xff] }
 0x554   : > { %v10849_v11 = vadd.f32 %v10752_v0, %v2177_v16  ;;  %v10921_v47 = vcombine.low %v1598_v26, %v1606_v51 }
 0x555   : > { %2602 = vmatpush1.bf16.msra.mxu1 %v10806_v54  ;;  %2675 = vmatpush1.bf16.msra.mxu0 %v10808_v55  ;;  %v10832_v7 = vpack.c.bf16 %v10825_v13, %v10821_v12  ;;  %v2178_v8 = vmul.f32 %v10746_v56, %v2164_v18  ;;  %13811 = vst [vmem:[#allocation9_spill] sm:$0xff] %v10895_v57  ;;  %v9782_v55 = vld [vmem:[%s13678_s18 + $0x120] sm:$0xff]  }
 0x556   : > { %2745 = vmatprep.subr.bf16.mxu1 %v10814_v30  ;;  %2818 = vmatprep.subr.bf16.mxu0 %v10816_v58  ;;  %v9894_v14 = vpop.eup %9893  ;;  %v10902_v18 = vcombine.high %v1598_v26, %v1606_v51  ;;  %13815 = vst [vmem:[#allocation13_spill] sm:$0xff] %v10921_v47 }
 0x557   : > { %v9896_v41 = vpop.eup %9895  ;;  %v10845_v20 = vadd.f32 %v10752_v0, %v2178_v8  ;;  %v2166_v23 = vmul.f32 %v9894_v14, %v10666_v50  ;;  %v1591_v8 = vld [vmem:[%s13676_s16 + $0x70] sm:$0xff]  ;;  %v1584_v14 = vld [vmem:[%s13676_s16 + $0x38] sm:$0xff] }
 0x558   : > { %8301 = vmatmul.mubr.msk.bf16.gmra.mrb[28].mxu1 %vm841_vm1, %v10832_v7  ;;  %8305 = vmatmul.mubr.msk.bf16.gmra.mrb[28].mxu0 %vm841_vm1, %v10832_v7  ;;  %v2165_v4 = vmul.f32 %v9896_v41, %v10649_v24  ;;  %13813 = vst [vmem:[#allocation11_spill] sm:$0xff] %v10902_v18  ;;  %v10925_v48 = vcombine.high %v1583_v63, %v1591_v8  ;;  %v1599_v41 = vld [vmem:[%s13676_s16 + $0xb0] sm:$0xff] }
 0x559   : > { %2505 = vmatprep.mubr.bf16.mxu1 %v13692_v28  ;;  %2578 = vmatprep.mubr.bf16.mxu0 %v13692_v28  ;;  %v10854_v32 = vpack.c.bf16 %v10845_v20, %v10849_v11  ;;  %v2180_v34 = vmul.f32 %v10746_v56, %v2166_v23  ;;  %v10927_v16 = vcombine.high %v1584_v14, %v1592_v15  ;;  %v1607_v23 = vld [vmem:[%s13676_s16 + $0xf0] sm:$0xff] }
 0x55a   : > { %v2179_v37 = vmul.f32 %v10746_v56, %v2165_v4  ;;  %v1597_v56 = vld [vmem:[%s13676_s16 + $0xa0] sm:$0xff]  ;;  %13816 = vst [vmem:[#allocation14_spill] sm:$0xff] %v10925_v48  ;;  %v1600_v4 = vld [vmem:[%s13676_s16 + $0xb8] sm:$0xff]  ;;  %v10979_v51 = vcombine.low %v1599_v41, %v1607_v23 }
 0x55b   : > { %v10865_v24 = vadd.f32 %v10752_v0, %v2180_v34  ;;  %13817 = vst [vmem:[#allocation15_spill] sm:$0xff] %v10927_v16  ;;  %v1608_v34 = vld [vmem:[%s13676_s16 + $0xf8] sm:$0xff] }
 0x55c   : > { %v10868_v50 = vadd.f32 %v10752_v0, %v2179_v37  ;;  %v1605_v0 = vld [vmem:[%s13676_s16 + $0xe0] sm:$0xff]  ;;  %v10965_v37 = vcombine.low %v1583_v63, %v1591_v8  ;;  %v10971_v26 = vcombine.high %v1600_v4, %v1608_v34  ;;  %13822 = vst [vmem:[#allocation20_spill] sm:$0xff] %v10979_v51  ;;  %v10981_v63 = vcombine.low %v1600_v4, %v1608_v34  ;;  %v9739_v4 = vld [vmem:[%s13678_s18 + $0xc8] sm:$0xff]  }
 0x55d   : > { %v10900_v61 = vcombine.high %v1597_v56, %v1605_v0  ;;  %v10919_v45 = vcombine.low %v1597_v56, %v1605_v0  ;;  %v10967_v56 = vcombine.low %v1584_v14, %v1592_v15  ;;  %v10969_v0 = vcombine.high %v1599_v41, %v1607_v23  ;;  %v9733_v8 = vld [vmem:[%s13678_s18 + $0x40] sm:$0xff]   ;;  %v9737_v23 = vld [vmem:[%s13678_s18 + $0x48] sm:$0xff]  }
 0x55e   : > { %v10872_v40 = vpack.c.bf16 %v10865_v24, %v10868_v50  ;;  %13818 = vst [vmem:[#allocation16_spill] sm:$0xff] %v10965_v37  ;;  %13821 = vst [vmem:[#allocation19_spill] sm:$0xff] %v10971_v26  ;;  %v9735_v14 = vld [vmem:[%s13678_s18 + $0xc0] sm:$0xff]   ;;  %v9738_v34 = vld [vmem:[%s13678_s18 + $0x8] sm:$0xff]  }
 0x55f   : > { %13812 = vst [vmem:[#allocation10_spill] sm:$0xff] %v10900_v61  ;;  %13814 = vst [vmem:[#allocation12_spill] sm:$0xff] %v10919_v45  ;;  %v9734_v15 = vld [vmem:[%s13678_s18] sm:$0xff]  }
 0x560   : > { %8302 = vmatmul.mubr.msk.bf16.gmra.mrb[32].mxu1 %vm841_vm1, %v10854_v32  ;;  %8306 = vmatmul.mubr.msk.bf16.gmra.mrb[32].mxu0 %vm841_vm1, %v10854_v32  ;;  %13819 = vst [vmem:[#allocation17_spill] sm:$0xff] %v10967_v56  ;;  %13820 = vst [vmem:[#allocation18_spill] sm:$0xff] %v10969_v0  ;;  %v9736_v41 = vld [vmem:[%s13678_s18 + $0x80] sm:$0xff]  }
 0x561   : > { %2515 = vmatprep.mubr.bf16.mxu1 %v13692_v28  ;;  %2588 = vmatprep.mubr.bf16.mxu0 %v13692_v28  ;;  %13823 = vst [vmem:[#allocation21_spill] sm:$0xff] %v10981_v63 }
 0x568   : > { %8303 = vmatmul.mubr.msk.bf16.gmra.mrb[36].mxu1 %vm841_vm1, %v10872_v40  ;;  %8307 = vmatmul.mubr.msk.bf16.gmra.mrb[36].mxu0 %vm841_vm1, %v10872_v40 }
 0x569   : > { %2631 = vmatprep.mubr.bf16.mxu1 %v13692_v28  ;;  %2704 = vmatprep.mubr.bf16.mxu0 %v13692_v28 }
 0x570   : > { %8308 = vmatmul.mubr.msk.bf16.vlgmr.msra.gmra.mrb[40].mxu1 %vm841_vm1, %v10778_v39  ;;  %8312 = vmatmul.mubr.msk.bf16.vlgmr.msra.gmra.mrb[40].mxu0 %vm841_vm1, %v10778_v39 }
 0x571   : > { %2746 = vmatpush1.bf16.msra.mxu1 %v10893_v52  ;;  %2819 = vmatpush1.bf16.msra.mxu0 %v10895_v57 }
 0x572   : > { %2641 = vmatprep.mubr.bf16.mxu1 %v13692_v28  ;;  %2714 = vmatprep.mubr.bf16.mxu0 %v13692_v28 }
 0x573   : > { %2747 = vmatprep.subr.bf16.mxu1 %v10900_v61  ;;  %2820 = vmatprep.subr.bf16.mxu0 %v10902_v18 }
 0x575   : > { %2748 = vmatpush1.bf16.msra.mxu1 %v10919_v45  ;;  %2821 = vmatpush1.bf16.msra.mxu0 %v10921_v47 }
 0x576   : > { %2891 = vmatprep.subr.bf16.mxu1 %v10925_v48  ;;  %2964 = vmatprep.subr.bf16.mxu0 %v10927_v16 }
 0x578   : > { %8309 = vmatmul.mubr.msk.bf16.gmra.mrb[44].mxu1 %vm841_vm1, %v10832_v7  ;;  %8313 = vmatmul.mubr.msk.bf16.gmra.mrb[44].mxu0 %vm841_vm1, %v10832_v7 }
 0x579   : > { %2651 = vmatprep.mubr.bf16.mxu1 %v13692_v28  ;;  %2724 = vmatprep.mubr.bf16.mxu0 %v13692_v28 }
 0x580   : > { %8310 = vmatmul.mubr.msk.bf16.gmra.mrb[48].mxu1 %vm841_vm1, %v10854_v32  ;;  %8314 = vmatmul.mubr.msk.bf16.gmra.mrb[48].mxu0 %vm841_vm1, %v10854_v32 }
 0x581   : > { %2661 = vmatprep.mubr.bf16.mxu1 %v13692_v28  ;;  %2734 = vmatprep.mubr.bf16.mxu0 %v13692_v28 }
 0x588   : > { %8311 = vmatmul.mubr.msk.bf16.gmra.mrb[52].mxu1 %vm841_vm1, %v10872_v40  ;;  %8315 = vmatmul.mubr.msk.bf16.gmra.mrb[52].mxu0 %vm841_vm1, %v10872_v40 }
 0x589   : > { %2777 = vmatprep.mubr.bf16.mxu1 %v13692_v28  ;;  %2850 = vmatprep.mubr.bf16.mxu0 %v13692_v28 }
 0x590   : > { %8316 = vmatmul.mubr.msk.bf16.vlgmr.msra.gmra.mrb[56].mxu1 %vm841_vm1, %v10778_v39  ;;  %8320 = vmatmul.mubr.msk.bf16.vlgmr.msra.gmra.mrb[56].mxu0 %vm841_vm1, %v10778_v39 }
 0x591   : > { %2892 = vmatpush1.bf16.msra.mxu1 %v10965_v37  ;;  %2965 = vmatpush1.bf16.msra.mxu0 %v10967_v56 }
 0x592   : > { %2787 = vmatprep.mubr.bf16.mxu1 %v13692_v28  ;;  %2860 = vmatprep.mubr.bf16.mxu0 %v13692_v28 }
 0x593   : > { %2893 = vmatprep.subr.bf16.mxu1 %v10969_v0  ;;  %2966 = vmatprep.subr.bf16.mxu0 %v10971_v26 }
 0x595   : > { %2894 = vmatpush1.bf16.msra.mxu1 %v10979_v51  ;;  %2967 = vmatpush1.bf16.msra.mxu0 %v10981_v63 }
 0x596   : > { %8589 = vmatprep.subr.bf16.mxu1 %v9733_v8  ;;  %8629 = vmatprep.subr.bf16.mxu0 %v9735_v14  ;;  %v9740_v8 = vld [vmem:[%s13678_s18 + $0x88] sm:$0xff]   ;;  %v9743_v14 = vld [vmem:[%s13678_s18 + $0xd0] sm:$0xff]  }
 0x598   : > { %8317 = vmatmul.mubr.msk.bf16.gmra.mrb[60].mxu1 %vm841_vm1, %v10832_v7  ;;  %8321 = vmatmul.mubr.msk.bf16.gmra.mrb[60].mxu0 %vm841_vm1, %v10832_v7 }
 0x599   : > { %2797 = vmatprep.mubr.bf16.mxu1 %v13692_v28  ;;  %2870 = vmatprep.mubr.bf16.mxu0 %v13692_v28 }
 0x5a0   : > { %8318 = vmatmul.mubr.msk.bf16.gmra.mrb[64].mxu1 %vm841_vm1, %v10854_v32  ;;  %8322 = vmatmul.mubr.msk.bf16.gmra.mrb[64].mxu0 %vm841_vm1, %v10854_v32 }
 0x5a1   : > { %2807 = vmatprep.mubr.bf16.mxu1 %v13692_v28  ;;  %2880 = vmatprep.mubr.bf16.mxu0 %v13692_v28 }
 0x5a8   : > { %8319 = vmatmul.mubr.msk.bf16.gmra.mrb[68].mxu1 %vm841_vm1, %v10872_v40  ;;  %8323 = vmatmul.mubr.msk.bf16.gmra.mrb[68].mxu0 %vm841_vm1, %v10872_v40 }
 0x5a9   : > { %2923 = vmatprep.mubr.bf16.mxu1 %v13692_v28  ;;  %2996 = vmatprep.mubr.bf16.mxu0 %v13692_v28 }
 0x5b0   : > { %8324 = vmatmul.mubr.msk.bf16.vlgmr.msra.gmra.mrb[72].mxu1 %vm841_vm1, %v10778_v39  ;;  %8328 = vmatmul.mubr.msk.bf16.vlgmr.msra.gmra.mrb[72].mxu0 %vm841_vm1, %v10778_v39  ;;  %v9741_v39 = vld [vmem:[%s13678_s18 + $0x50] sm:$0xff]  }
 0x5b1   : > { %2933 = vmatprep.mubr.bf16.mxu1 %v13692_v28  ;;  %3006 = vmatprep.mubr.bf16.mxu0 %v13692_v28 }
 0x5b2   : > { %8590 = vmatpush3.bf16.msra.mxu1 %v9734_v15  ;;  %8630 = vmatpush3.bf16.msra.mxu0 %v9736_v41  ;;  %v9742_v15 = vld [vmem:[%s13678_s18 + $0x10] sm:$0xff]  }
 0x5b3   : > { %8591 = vmatprep.subr.bf16.mxu1 %v9737_v23  ;;  %8631 = vmatprep.subr.bf16.mxu0 %v9739_v4  ;;  %v9744_v41 = vld [vmem:[%s13678_s18 + $0x90] sm:$0xff]   ;;  %v9745_v23 = vld [vmem:[%s13678_s18 + $0x58] sm:$0xff]  }
 0x5b4   : > { %v9747_v4 = vld [vmem:[%s13678_s18 + $0xd8] sm:$0xff]  }
 0x5b6   : > { %8592 = vmatpush3.bf16.msra.mxu1 %v9738_v34  ;;  %8632 = vmatpush3.bf16.msra.mxu0 %v9740_v8  ;;  %v9746_v34 = vld [vmem:[%s13678_s18 + $0x18] sm:$0xff]  }
 0x5b7   : > { %8593 = vmatprep.subr.bf16.mxu1 %v9741_v39  ;;  %8633 = vmatprep.subr.bf16.mxu0 %v9743_v14  ;;  %v9748_v8 = vld [vmem:[%s13678_s18 + $0x98] sm:$0xff]   ;;  %v9751_v39 = vld [vmem:[%s13678_s18 + $0xe0] sm:$0xff]  }
 0x5b8   : > { %8325 = vmatmul.mubr.msk.bf16.gmra.mrb[76].mxu1 %vm841_vm1, %v10832_v7  ;;  %8329 = vmatmul.mubr.msk.bf16.gmra.mrb[76].mxu0 %vm841_vm1, %v10832_v7  ;;  %v9749_v7 = vld [vmem:[%s13678_s18 + $0x60] sm:$0xff]  }
 0x5b9   : > { %2943 = vmatprep.mubr.bf16.mxu1 %v13692_v28  ;;  %3016 = vmatprep.mubr.bf16.mxu0 %v13692_v28  ;;  %v9750_v14 = vld [vmem:[%s13678_s18 + $0x20] sm:$0xff]  }
 0x5ba   : > { %8594 = vmatpush3.bf16.msra.mxu1 %v9742_v15  ;;  %8634 = vmatpush3.bf16.msra.mxu0 %v9744_v41  ;;  %v9752_v15 = vld [vmem:[%s13678_s18 + $0xa0] sm:$0xff]   ;;  %v9753_v41 = vld [vmem:[%s13678_s18 + $0x68] sm:$0xff]  }
 0x5bb   : > { %8595 = vmatprep.subr.bf16.mxu1 %v9745_v23  ;;  %8635 = vmatprep.subr.bf16.mxu0 %v9747_v4  ;;  %v9755_v23 = vld [vmem:[%s13678_s18 + $0xe8] sm:$0xff]  }
 0x5bc   : > { %v9754_v4 = vld [vmem:[%s13678_s18 + $0x28] sm:$0xff]  }
 0x5be   : > { %8596 = vmatpush3.bf16.msra.mxu1 %v9746_v34  ;;  %8636 = vmatpush3.bf16.msra.mxu0 %v9748_v8  ;;  %v9756_v34 = vld [vmem:[%s13678_s18 + $0xa8] sm:$0xff]   ;;  %v9759_v8 = vld [vmem:[%s13678_s18 + $0xf0] sm:$0xff]  }
 0x5bf   : > { %8597 = vmatprep.subr.bf16.mxu1 %v9749_v7  ;;  %8637 = vmatprep.subr.bf16.mxu0 %v9751_v39  ;;  %v9758_v7 = vld [vmem:[%s13678_s18 + $0x30] sm:$0xff]  }
 0x5c0   : > { %8326 = vmatmul.mubr.msk.bf16.gmra.mrb[80].mxu1 %vm841_vm1, %v10854_v32  ;;  %8330 = vmatmul.mubr.msk.bf16.gmra.mrb[80].mxu0 %vm841_vm1, %v10854_v32  ;;  %v9757_v32 = vld [vmem:[%s13678_s18 + $0x70] sm:$0xff]  }
 0x5c1   : > { %2953 = vmatprep.mubr.bf16.mxu1 %v13692_v28  ;;  %3026 = vmatprep.mubr.bf16.mxu0 %v13692_v28  ;;  %v9760_v39 = vld [vmem:[%s13678_s18 + $0xb0] sm:$0xff]  }
 0x5c2   : > { %8598 = vmatpush3.bf16.msra.mxu1 %v9750_v14  ;;  %8638 = vmatpush3.bf16.msra.mxu0 %v9752_v15  ;;  %v9761_v14 = vld [vmem:[%s13678_s18 + $0x78] sm:$0xff]  }
 0x5c3   : > { %8599 = vmatprep.subr.bf16.mxu1 %v9753_v41  ;;  %8639 = vmatprep.subr.bf16.mxu0 %v9755_v23  ;;  %v9763_v15 = vld [vmem:[%s13678_s18 + $0xf8] sm:$0xff]  }
 0x5c4   : > { %v9762_v41 = vld [vmem:[%s13678_s18 + $0x38] sm:$0xff]  }
 0x5c5   : > { %v9764_v23 = vld [vmem:[%s13678_s18 + $0xb8] sm:$0xff]  }
 0x5c6   : > { %8600 = vmatpush3.bf16.msra.mxu1 %v9754_v4  ;;  %8640 = vmatpush3.bf16.msra.mxu0 %v9756_v34  ;;  %v9765_v4 = vld [vmem:[%s13678_s18 + $0x140] sm:$0xff]   ;;  %v13698_v34 = vsub.s32 2, %v10451_v36 }
 0x5c7   : > { %8601 = vmatprep.subr.bf16.mxu1 %v9757_v32  ;;  %8641 = vmatprep.subr.bf16.mxu0 %v9759_v8  ;;  %v11135_v32 = vld [vmem:[%s13677_s17] sm:$0xff]  ;;  %v13703_v8 = vsub.s32 1, %v10451_v36 }
 0x5c8   : > { %8327 = vmatmul.mubr.msk.bf16.gmra.mrb[84].mxu1 %vm841_vm1, %v10872_v40  ;;  %8331 = vmatmul.mubr.msk.bf16.gmra.mrb[84].mxu0 %vm841_vm1, %v10872_v40  ;;  %v9767_v40 = vld [vmem:[%s13678_s18 + $0x1c0] sm:$0xff]  }
 0x5ca   : > { %8602 = vmatpush3.bf16.msra.mxu1 %v9758_v7  ;;  %8642 = vmatpush3.bf16.msra.mxu0 %v9760_v39  ;;  %v13708_v7 = vsub.s32 3, %v10451_v36  ;;  %v11141_v39 = vrot.slane %v11135_v32, %v10457_v38 }
 0x5cb   : > { %8603 = vmatprep.subr.bf16.mxu1 %v9761_v14  ;;  %8643 = vmatprep.subr.bf16.mxu0 %v9763_v15  ;;  %v11146_v14 = vrot.slane %v11135_v32, %v13698_v34  ;;  %v11151_v15 = vrot.slane %v11135_v32, %v13703_v8 }
 0x5cc   : > { %13824 = vst [vmem:[#allocation22_spill] sm:$0xff] %v11141_v39 }
 0x5cd   : > { %13825 = vst [vmem:[#allocation23_spill] sm:$0xff] %v11146_v14  ;;  %13826 = vst [vmem:[#allocation24_spill] sm:$0xff] %v11151_v15 }
 0x5ce   : > { %8604 = vmatpush3.bf16.msra.mxu1 %v9762_v41  ;;  %8644 = vmatpush3.bf16.msra.mxu0 %v9764_v23  ;;  %v11156_v41 = vrot.slane %v11135_v32, %v13708_v7 }
 0x5cf   : > { %8669 = vmatprep.subr.bf16.mxu1 %v9765_v4  ;;  %8709 = vmatprep.subr.bf16.mxu0 %v9767_v40 }
 0x5d0   : > { %13827 = vst [vmem:[#allocation25_spill] sm:$0xff] %v11156_v41 }
 0x623   : > { %v2487_v23 = vpop.f32.mrb[24].mxu1  ;;  %v2560_v4 = vpop.f32.mrb[24].mxu0 }
 0x624   : > { %v2488_v40 = vadd.f32 %v2487_v23, %v11141_v39  ;;  %v2561_v28 = vadd.f32 %v2560_v4, %v11146_v14  ;;  %v2489_v1 = vpop.f32.mrb[25].mxu1  ;;  %v2562_v63 = vpop.f32.mrb[25].mxu0 }
 0x625   : > { %v2490_v34 = vadd.f32 %v2489_v1, %v11151_v15  ;;  %v2563_v51 = vadd.f32 %v2562_v63, %v11156_v41  ;;  %v2491_v26 = vpop.f32.mrb[26].mxu1  ;;  %v2564_v8 = vpop.f32.mrb[26].mxu0 }
 0x626   : > { %v2492_v0 = vadd.f32 %v2491_v26, %v11141_v39  ;;  %v2565_v56 = vadd.f32 %v2564_v8, %v11146_v14  ;;  %v2493_v7 = vpop.f32.mrb[27].mxu1  ;;  %v2566_v37 = vpop.f32.mrb[27].mxu0  ;;  %v3037_v48 = vmax.f32 %v2488_v40, 0.0  ;;  %v3039_v4 = vmax.f32 %v2561_v28, 0.0  ;;  %v9768_v28 = vld [vmem:[%s13678_s18 + $0x180] sm:$0xff]  }
 0x627   : > { %v2494_v16 = vadd.f32 %v2493_v7, %v11151_v15  ;;  %v2567_v23 = vadd.f32 %v2566_v37, %v11156_v41  ;;  %v3038_v18 = vmax.f32 %v2490_v34, 0.0  ;;  %v3040_v1 = vmax.f32 %v2563_v51, 0.0  ;;  %v9766_v7 = vld [vmem:[%s13678_s18 + $0x100] sm:$0xff]  }
 0x628   : > { %v3053_v47 = vmax.f32 %v2492_v0, 0.0  ;;  %v3055_v45 = vmax.f32 %v2565_v56, 0.0 }
 0x629   : > { %v3054_v61 = vmax.f32 %v2494_v16, 0.0  ;;  %v3056_v63 = vmax.f32 %v2567_v23, 0.0 }
 0x62a   : > { %v3165_v57 = vpack.c.bf16 %v3053_v47, %v3037_v48  ;;  %v3167_v52 = vpack.c.bf16 %v3055_v45, %v3039_v4  ;;  %v9769_v45 = vld [vmem:[%s13678_s18 + $0x148] sm:$0xff]  }
 0x62b   : > { %v2497_v58 = vpop.f32.mrb[28].mxu1  ;;  %v2570_v26 = vpop.f32.mrb[28].mxu0  ;;  %v3166_v30 = vpack.c.bf16 %v3054_v61, %v3038_v18  ;;  %v3168_v8 = vpack.c.bf16 %v3056_v63, %v3040_v1  ;;  %v9771_v61 = vld [vmem:[%s13678_s18 + $0x1c8] sm:$0xff]  }
 0x62c   : > { %v2498_v37 = vadd.f32 %v2497_v58, %v11141_v39  ;;  %v2571_v56 = vadd.f32 %v2570_v26, %v11146_v14  ;;  %v2499_v16 = vpop.f32.mrb[29].mxu1  ;;  %v2572_v0 = vpop.f32.mrb[29].mxu0  ;;  %v9770_v63 = vld [vmem:[%s13678_s18 + $0x108] sm:$0xff]  }
 0x62d   : > { %v2500_v18 = vadd.f32 %v2499_v16, %v11151_v15  ;;  %v2573_v47 = vadd.f32 %v2572_v0, %v11156_v41  ;;  %v2501_v48 = vpop.f32.mrb[30].mxu1  ;;  %v2574_v51 = vpop.f32.mrb[30].mxu0  ;;  %4035 = vmatprep.mubr.bf16.mxu1 %v3166_v30  ;;  %4100 = vmatprep.mubr.bf16.mxu0 %v3168_v8  ;;  %v9772_v30 = vld [vmem:[%s13678_s18 + $0x188] sm:$0xff]  }
 0x62e   : > { %v2502_v58 = vadd.f32 %v2501_v48, %v11141_v39  ;;  %v2575_v34 = vadd.f32 %v2574_v51, %v11146_v14  ;;  %v2503_v40 = vpop.f32.mrb[31].mxu1  ;;  %v2576_v23 = vpop.f32.mrb[31].mxu0  ;;  %4036 = vmatmul.mubr.bf16.vlgmr.msra.gmra.mrb[88].mxu1 %v3165_v57  ;;  %4101 = vmatmul.mubr.bf16.vlgmr.msra.gmra.mrb[88].mxu0 %v3167_v52  ;;  %v3069_v26 = vmax.f32 %v2498_v37, 0.0  ;;  %v3071_v8 = vmax.f32 %v2571_v56, 0.0  ;;  %v9773_v52 = vld [vmem:[%s13678_s18 + $0x150] sm:$0xff]  }
 0x62f   : > { %v2504_v4 = vadd.f32 %v2503_v40, %v11151_v15  ;;  %v2577_v1 = vadd.f32 %v2576_v23, %v11156_v41  ;;  %8670 = vmatpush3.bf16.msra.mxu1 %v9766_v7  ;;  %8710 = vmatpush3.bf16.msra.mxu0 %v9768_v28  ;;  %v9775_v57 = vld [vmem:[%s13678_s18 + $0x1d0] sm:$0xff]   ;;  %v3070_v7 = vmax.f32 %v2500_v18, 0.0  ;;  %v3072_v28 = vmax.f32 %v2573_v47, 0.0 }
 0x630   : > { %v3085_v16 = vmax.f32 %v2502_v58, 0.0  ;;  %v3087_v0 = vmax.f32 %v2575_v34, 0.0  ;;  %8671 = vmatprep.subr.bf16.mxu1 %v9769_v45  ;;  %8711 = vmatprep.subr.bf16.mxu0 %v9771_v61  ;;  %v9774_v58 = vld [vmem:[%s13678_s18 + $0x110] sm:$0xff]  }
 0x631   : > { %v3086_v48 = vmax.f32 %v2504_v4, 0.0  ;;  %v3088_v51 = vmax.f32 %v2577_v1, 0.0  ;;  %v9776_v34 = vld [vmem:[%s13678_s18 + $0x190] sm:$0xff]  }
 0x632   : > { %v3181_v40 = vpack.c.bf16 %v3085_v16, %v3069_v26  ;;  %v3183_v23 = vpack.c.bf16 %v3087_v0, %v3071_v8 }
 0x633   : > { %8672 = vmatpush3.bf16.msra.mxu1 %v9770_v63  ;;  %v2507_v37 = vpop.f32.mrb[32].mxu1  ;;  %v2580_v56 = vpop.f32.mrb[32].mxu0  ;;  %8712 = vmatpush3.bf16.msra.mxu0 %v9772_v30  ;;  %v3182_v45 = vpack.c.bf16 %v3086_v48, %v3070_v7  ;;  %v3184_v61 = vpack.c.bf16 %v3088_v51, %v3072_v28  ;;  %v9777_v63 = vld [vmem:[%s13678_s18 + $0x158] sm:$0xff]   ;;  %v13733_v51 = vsub.s32 6, %v10451_v36 }
 0x634   : > { %v2508_v18 = vadd.f32 %v2507_v37, %v11141_v39  ;;  %v2581_v47 = vadd.f32 %v2580_v56, %v11146_v14  ;;  %v2509_v4 = vpop.f32.mrb[33].mxu1  ;;  %v2582_v1 = vpop.f32.mrb[33].mxu0  ;;  %8673 = vmatprep.subr.bf16.mxu1 %v9773_v52  ;;  %8713 = vmatprep.subr.bf16.mxu0 %v9775_v57  ;;  %v9779_v30 = vld [vmem:[%s13678_s18 + $0x1d8] sm:$0xff]  }
 0x635   : > { %v2510_v26 = vadd.f32 %v2509_v4, %v11151_v15  ;;  %v2583_v8 = vadd.f32 %v2582_v1, %v11156_v41  ;;  %v2511_v16 = vpop.f32.mrb[34].mxu1  ;;  %v2584_v0 = vpop.f32.mrb[34].mxu0  ;;  %4043 = vmatprep.mubr.bf16.mxu1 %v3182_v45  ;;  %4108 = vmatprep.mubr.bf16.mxu0 %v3184_v61  ;;  %v9778_v45 = vld [vmem:[%s13678_s18 + $0x118] sm:$0xff]  }
 0x636   : > { %v2512_v7 = vadd.f32 %v2511_v16, %v11141_v39  ;;  %v2585_v52 = vadd.f32 %v2584_v0, %v11146_v14  ;;  %v2513_v57 = vpop.f32.mrb[35].mxu1  ;;  %v2586_v28 = vpop.f32.mrb[35].mxu0  ;;  %4044 = vmatmul.mubr.bf16.gmra.mrb[92].mxu1 %v3181_v40  ;;  %4109 = vmatmul.mubr.bf16.gmra.mrb[92].mxu0 %v3183_v23  ;;  %v9780_v61 = vld [vmem:[%s13678_s18 + $0x198] sm:$0xff]   ;;  %v3101_v40 = vmax.f32 %v2508_v18, 0.0  ;;  %v3103_v23 = vmax.f32 %v2581_v47, 0.0  ;;  %v9781_v16 = vld [vmem:[%s13678_s18 + $0x160] sm:$0xff]  }
 0x637   : > { %v2514_v37 = vadd.f32 %v2513_v57, %v11151_v15  ;;  %v2587_v56 = vadd.f32 %v2586_v28, %v11156_v41  ;;  %8674 = vmatpush3.bf16.msra.mxu1 %v9774_v58  ;;  %8714 = vmatpush3.bf16.msra.mxu0 %v9776_v34  ;;  %v9783_v58 = vld [vmem:[%s13678_s18 + $0x1e0] sm:$0xff]   ;;  %v3102_v34 = vmax.f32 %v2510_v26, 0.0  ;;  %v3104_v0 = vmax.f32 %v2583_v8, 0.0 }
 0x638   : > { %v3117_v4 = vmax.f32 %v2512_v7, 0.0  ;;  %v3119_v1 = vmax.f32 %v2585_v52, 0.0  ;;  %8675 = vmatprep.subr.bf16.mxu1 %v9777_v63  ;;  %8715 = vmatprep.subr.bf16.mxu0 %v9779_v30  ;;  %v13734_v7 = vsub.s32 7, %v10451_v36  ;;  %v9784_v26 = vld [vmem:[%s13678_s18 + $0x1a0] sm:$0xff]   ;;  %v13828_v8 = vsub.s32 4, %v10451_v36 }
 0x639   : > { %v3118_v57 = vmax.f32 %v2514_v37, 0.0  ;;  %v3120_v28 = vmax.f32 %v2587_v56, 0.0 }
 0x63a   : > { %v3197_v18 = vpack.c.bf16 %v3117_v4, %v3101_v40  ;;  %v3199_v47 = vpack.c.bf16 %v3119_v1, %v3103_v23  ;;  %v11243_v37 = vrot.slane %v11135_v32, %v13828_v8  ;;  %v9785_v23 = vld [vmem:[%s13678_s18 + $0x168] sm:$0xff]   ;;  %v13830_v1 = vsub.s32 5, %v10451_v36 }
 0x63b   : > { %8676 = vmatpush3.bf16.msra.mxu1 %v9778_v45  ;;  %v2517_v63 = vpop.f32.mrb[36].mxu1  ;;  %v2590_v30 = vpop.f32.mrb[36].mxu0  ;;  %8716 = vmatpush3.bf16.msra.mxu0 %v9780_v61  ;;  %v3198_v52 = vpack.c.bf16 %v3118_v57, %v3102_v34  ;;  %v3200_v48 = vpack.c.bf16 %v3120_v28, %v3104_v0  ;;  %v9787_v4 = vld [vmem:[%s13678_s18 + $0x1e8] sm:$0xff]  }
 0x63c   : > { %13829 = vst [vmem:[#allocation26_spill] sm:$0xff] %v11243_v37  ;;  %v2518_v56 = vadd.f32 %v2517_v63, %v11141_v39  ;;  %v2591_v45 = vadd.f32 %v2590_v30, %v11146_v14  ;;  %v2519_v61 = vpop.f32.mrb[37].mxu1  ;;  %v2592_v40 = vpop.f32.mrb[37].mxu0  ;;  %8677 = vmatprep.subr.bf16.mxu1 %v9781_v16  ;;  %8717 = vmatprep.subr.bf16.mxu0 %v9783_v58 }
 0x63d   : > { %v11256_v34 = vrot.slane %v11135_v32, %v13830_v1  ;;  %v2520_v0 = vadd.f32 %v2519_v61, %v11151_v15  ;;  %v2593_v57 = vadd.f32 %v2592_v40, %v11156_v41  ;;  %v2521_v28 = vpop.f32.mrb[38].mxu1  ;;  %v2594_v16 = vpop.f32.mrb[38].mxu0  ;;  %4051 = vmatprep.mubr.bf16.mxu1 %v3198_v52  ;;  %4116 = vmatprep.mubr.bf16.mxu0 %v3200_v48  ;;  %v9786_v40 = vld [vmem:[%s13678_s18 + $0x128] sm:$0xff]  }
 0x63e   : > { %v11263_v58 = vrot.slane %v11135_v32, %v13733_v51  ;;  %v2522_v63 = vadd.f32 %v2521_v28, %v11141_v39  ;;  %v2595_v30 = vadd.f32 %v2594_v16, %v11146_v14  ;;  %v2523_v8 = vpop.f32.mrb[39].mxu1  ;;  %v2596_v1 = vpop.f32.mrb[39].mxu0  ;;  %4052 = vmatmul.mubr.bf16.gmra.mrb[96].mxu1 %v3197_v18  ;;  %4117 = vmatmul.mubr.bf16.gmra.mrb[96].mxu0 %v3199_v47  ;;  %v9788_v18 = vld [vmem:[%s13678_s18 + $0x1a8] sm:$0xff]   ;;  %v3133_v47 = vmax.f32 %v2518_v56, 0.0  ;;  %v9816_v14 = vld [vmem:[%s13678_s18 + $0x2a0] sm:$0xff]  }
 0x63f   : > { %13831 = vst [vmem:[#allocation27_spill] sm:$0xff] %v11256_v34  ;;  %v11270_v61 = vrot.slane %v11135_v32, %v13734_v7  ;;  %v2524_v48 = vadd.f32 %v2523_v8, %v11151_v15  ;;  %v2597_v52 = vadd.f32 %v2596_v1, %v11156_v41  ;;  %8678 = vmatpush3.bf16.msra.mxu1 %v9782_v55  ;;  %v3135_v28 = vmax.f32 %v2591_v45, 0.0  ;;  %v9789_v32 = vld [vmem:[%s13678_s18 + $0x170] sm:$0xff]  }
 0x640   : > { %13832 = vst [vmem:[#allocation28_spill] sm:$0xff] %v11263_v58  ;;  %8718 = vmatpush3.bf16.msra.mxu0 %v9784_v26  ;;  %v3149_v16 = vmax.f32 %v2522_v63, 0.0  ;;  %v3151_v51 = vmax.f32 %v2595_v30, 0.0  ;;  %8679 = vmatprep.subr.bf16.mxu1 %v9785_v23  ;;  %v9791_v55 = vld [vmem:[%s13678_s18 + $0x1f0] sm:$0xff]   ;;  %v3134_v26 = vmax.f32 %v2520_v0, 0.0  ;;  %v3136_v8 = vmax.f32 %v2593_v57, 0.0 }
 0x641   : > { %13833 = vst [vmem:[#allocation29_spill] sm:$0xff] %v11270_v61  ;;  %8719 = vmatprep.subr.bf16.mxu0 %v9787_v4  ;;  %v3150_v1 = vmax.f32 %v2524_v48, 0.0  ;;  %v3152_v7 = vmax.f32 %v2597_v52, 0.0  ;;  %v9790_v63 = vld [vmem:[%s13678_s18 + $0x130] sm:$0xff]   ;;  %v9795_v52 = vld [vmem:[%s13678_s18 + $0x1f8] sm:$0xff]  }
 0x642   : > { %v3213_v41 = vpack.c.bf16 %v3149_v16, %v3133_v47  ;;  %v3215_v15 = vpack.c.bf16 %v3151_v51, %v3135_v28  ;;  %v9792_v30 = vld [vmem:[%s13678_s18 + $0x1b0] sm:$0xff]  }
 0x643   : > { %8680 = vmatpush3.bf16.msra.mxu1 %v9786_v40  ;;  %v2633_v56 = vpop.f32.mrb[40].mxu1  ;;  %v2706_v45 = vpop.f32.mrb[40].mxu0  ;;  %v3214_v23 = vpack.c.bf16 %v3150_v1, %v3134_v26  ;;  %v3216_v4 = vpack.c.bf16 %v3152_v7, %v3136_v8  ;;  %v9793_v7 = vld [vmem:[%s13678_s18 + $0x178] sm:$0xff]  }
 0x644   : > { %8720 = vmatpush3.bf16.msra.mxu0 %v9788_v18  ;;  %v2634_v0 = vadd.f32 %v2633_v56, %v11243_v37  ;;  %v2707_v57 = vadd.f32 %v2706_v45, %v11263_v58  ;;  %v2635_v48 = vpop.f32.mrb[41].mxu1  ;;  %v2708_v51 = vpop.f32.mrb[41].mxu0  ;;  %8681 = vmatprep.subr.bf16.mxu1 %v9789_v32  ;;  %v9794_v56 = vld [vmem:[%s13678_s18 + $0x138] sm:$0xff]  }
 0x645   : > { %8721 = vmatprep.subr.bf16.mxu0 %v9791_v55  ;;  %v2636_v40 = vadd.f32 %v2635_v48, %v11256_v34  ;;  %v2709_v18 = vadd.f32 %v2708_v51, %v11270_v61  ;;  %v2637_v47 = vpop.f32.mrb[42].mxu1  ;;  %v2710_v28 = vpop.f32.mrb[42].mxu0  ;;  %4059 = vmatprep.mubr.bf16.mxu1 %v3214_v23  ;;  %v9796_v45 = vld [vmem:[%s13678_s18 + $0x1b8] sm:$0xff]  }
 0x646   : > { %4124 = vmatprep.mubr.bf16.mxu0 %v3216_v4  ;;  %v2638_v16 = vadd.f32 %v2637_v47, %v11243_v37  ;;  %v2711_v32 = vadd.f32 %v2710_v28, %v11263_v58  ;;  %v2639_v55 = vpop.f32.mrb[43].mxu1  ;;  %v2712_v26 = vpop.f32.mrb[43].mxu0  ;;  %4060 = vmatmul.mubr.bf16.gmra.mrb[100].mxu1 %v3213_v41  ;;  %v3041_v23 = vmax.f32 %v2634_v0, 0.0  ;;  %v3043_v4 = vmax.f32 %v2707_v57, 0.0  ;;  %v9799_v41 = vld [vmem:[%s13678_s18 + $0x2c0] sm:$0xff]  }
 0x647   : > { %4125 = vmatmul.mubr.bf16.gmra.mrb[100].mxu0 %v3215_v15  ;;  %v2640_v8 = vadd.f32 %v2639_v55, %v11256_v34  ;;  %v2713_v1 = vadd.f32 %v2712_v26, %v11270_v61  ;;  %8682 = vmatpush3.bf16.msra.mxu1 %v9790_v63  ;;  %v9797_v15 = vld [vmem:[%s13678_s18 + $0x240] sm:$0xff]   ;;  %v3042_v63 = vmax.f32 %v2636_v40, 0.0 }
 0x648   : > { %8722 = vmatpush3.bf16.msra.mxu0 %v9792_v30  ;;  %v3057_v48 = vmax.f32 %v2638_v16, 0.0  ;;  %v3059_v51 = vmax.f32 %v2711_v32, 0.0  ;;  %8683 = vmatprep.subr.bf16.mxu1 %v9793_v7  ;;  %v3044_v30 = vmax.f32 %v2709_v18, 0.0  ;;  %v9798_v16 = vld [vmem:[%s13678_s18 + $0x200] sm:$0xff]  }
 0x649   : > { %8723 = vmatprep.subr.bf16.mxu0 %v9795_v52  ;;  %v3058_v47 = vmax.f32 %v2640_v8, 0.0  ;;  %v3060_v28 = vmax.f32 %v2713_v1, 0.0  ;;  %v9800_v32 = vld [vmem:[%s13678_s18 + $0x280] sm:$0xff]  }
 0x64a   : > { %v3169_v55 = vpack.c.bf16 %v3057_v48, %v3041_v23  ;;  %v3171_v26 = vpack.c.bf16 %v3059_v51, %v3043_v4 }
 0x64b   : > { %8684 = vmatpush3.bf16.msra.mxu1 %v9794_v56  ;;  %v2643_v0 = vpop.f32.mrb[44].mxu1  ;;  %v2716_v57 = vpop.f32.mrb[44].mxu0  ;;  %v3170_v7 = vpack.c.bf16 %v3058_v47, %v3042_v63  ;;  %v3172_v52 = vpack.c.bf16 %v3060_v28, %v3044_v30  ;;  %v9801_v56 = vld [vmem:[%s13678_s18 + $0x248] sm:$0xff]  }
 0x64c   : > { %8724 = vmatpush3.bf16.msra.mxu0 %v9796_v45  ;;  %v2644_v40 = vadd.f32 %v2643_v0, %v11243_v37  ;;  %v2717_v18 = vadd.f32 %v2716_v57, %v11263_v58  ;;  %v2645_v8 = vpop.f32.mrb[45].mxu1  ;;  %v2718_v1 = vpop.f32.mrb[45].mxu0  ;;  %8749 = vmatprep.subr.bf16.mxu1 %v9797_v15  ;;  %v9803_v45 = vld [vmem:[%s13678_s18 + $0x2c8] sm:$0xff]  }
 0x64d   : > { %8789 = vmatprep.subr.bf16.mxu0 %v9799_v41  ;;  %v2646_v23 = vadd.f32 %v2645_v8, %v11256_v34  ;;  %v2719_v4 = vadd.f32 %v2718_v1, %v11270_v61  ;;  %v2647_v48 = vpop.f32.mrb[46].mxu1  ;;  %v2720_v51 = vpop.f32.mrb[46].mxu0  ;;  %4165 = vmatprep.mubr.bf16.mxu1 %v3170_v7  ;;  %v9802_v0 = vld [vmem:[%s13678_s18 + $0x208] sm:$0xff]  }
 0x64e   : > { %4230 = vmatprep.mubr.bf16.mxu0 %v3172_v52  ;;  %v2648_v63 = vadd.f32 %v2647_v48, %v11243_v37  ;;  %v2721_v15 = vadd.f32 %v2720_v51, %v11263_v58  ;;  %v2649_v41 = vpop.f32.mrb[47].mxu1  ;;  %v2722_v30 = vpop.f32.mrb[47].mxu0  ;;  %4166 = vmatmul.mubr.bf16.vlgmr.msra.gmra.mrb[104].mxu1 %v3169_v55  ;;  %v9804_v57 = vld [vmem:[%s13678_s18 + $0x288] sm:$0xff]   ;;  %v3073_v7 = vmax.f32 %v2644_v40, 0.0  ;;  %v3075_v52 = vmax.f32 %v2717_v18, 0.0  ;;  %v9805_v55 = vld [vmem:[%s13678_s18 + $0x250] sm:$0xff]  }
 0x64f   : > { %4231 = vmatmul.mubr.bf16.vlgmr.msra.gmra.mrb[104].mxu0 %v3171_v26  ;;  %v2650_v47 = vadd.f32 %v2649_v41, %v11256_v34  ;;  %v2723_v28 = vadd.f32 %v2722_v30, %v11270_v61  ;;  %8750 = vmatpush3.bf16.msra.mxu1 %v9798_v16  ;;  %v9807_v26 = vld [vmem:[%s13678_s18 + $0x2d0] sm:$0xff]   ;;  %v3074_v16 = vmax.f32 %v2646_v23, 0.0 }
 0x650   : > { %8790 = vmatpush3.bf16.msra.mxu0 %v9800_v32  ;;  %v3089_v8 = vmax.f32 %v2648_v63, 0.0  ;;  %v3091_v1 = vmax.f32 %v2721_v15, 0.0  ;;  %8751 = vmatprep.subr.bf16.mxu1 %v9801_v56  ;;  %v3076_v32 = vmax.f32 %v2719_v4, 0.0  ;;  %v9806_v63 = vld [vmem:[%s13678_s18 + $0x210] sm:$0xff]  }
 0x651   : > { %8791 = vmatprep.subr.bf16.mxu0 %v9803_v45  ;;  %v3090_v48 = vmax.f32 %v2650_v47, 0.0  ;;  %v3092_v51 = vmax.f32 %v2723_v28, 0.0  ;;  %v9808_v15 = vld [vmem:[%s13678_s18 + $0x290] sm:$0xff]  }
 0x652   : > { %v3185_v41 = vpack.c.bf16 %v3089_v8, %v3073_v7  ;;  %v3187_v30 = vpack.c.bf16 %v3091_v1, %v3075_v52 }
 0x653   : > { %8752 = vmatpush3.bf16.msra.mxu1 %v9802_v0  ;;  %v2653_v40 = vpop.f32.mrb[48].mxu1  ;;  %v2726_v18 = vpop.f32.mrb[48].mxu0  ;;  %v3186_v56 = vpack.c.bf16 %v3090_v48, %v3074_v16  ;;  %v3188_v45 = vpack.c.bf16 %v3092_v51, %v3076_v32  ;;  %v9809_v0 = vld [vmem:[%s13678_s18 + $0x258] sm:$0xff]  }
 0x654   : > { %8792 = vmatpush3.bf16.msra.mxu0 %v9804_v57  ;;  %v2654_v23 = vadd.f32 %v2653_v40, %v11243_v37  ;;  %v2727_v4 = vadd.f32 %v2726_v18, %v11263_v58  ;;  %v2655_v47 = vpop.f32.mrb[49].mxu1  ;;  %v2728_v28 = vpop.f32.mrb[49].mxu0  ;;  %8753 = vmatprep.subr.bf16.mxu1 %v9805_v55  ;;  %v9811_v57 = vld [vmem:[%s13678_s18 + $0x2d8] sm:$0xff]  }
 0x655   : > { %8793 = vmatprep.subr.bf16.mxu0 %v9807_v26  ;;  %v2656_v7 = vadd.f32 %v2655_v47, %v11256_v34  ;;  %v2729_v52 = vadd.f32 %v2728_v28, %v11270_v61  ;;  %v2657_v8 = vpop.f32.mrb[50].mxu1  ;;  %v2730_v1 = vpop.f32.mrb[50].mxu0  ;;  %4173 = vmatprep.mubr.bf16.mxu1 %v3186_v56  ;;  %v9810_v40 = vld [vmem:[%s13678_s18 + $0x218] sm:$0xff]  }
 0x656   : > { %4238 = vmatprep.mubr.bf16.mxu0 %v3188_v45  ;;  %v2658_v16 = vadd.f32 %v2657_v8, %v11243_v37  ;;  %v2731_v55 = vadd.f32 %v2730_v1, %v11263_v58  ;;  %v2659_v26 = vpop.f32.mrb[51].mxu1  ;;  %v2732_v32 = vpop.f32.mrb[51].mxu0  ;;  %4174 = vmatmul.mubr.bf16.gmra.mrb[108].mxu1 %v3185_v41  ;;  %v9812_v18 = vld [vmem:[%s13678_s18 + $0x298] sm:$0xff]   ;;  %v3105_v56 = vmax.f32 %v2654_v23, 0.0  ;;  %v3107_v45 = vmax.f32 %v2727_v4, 0.0  ;;  %v9813_v41 = vld [vmem:[%s13678_s18 + $0x260] sm:$0xff]  }
 0x657   : > { %4239 = vmatmul.mubr.bf16.gmra.mrb[108].mxu0 %v3187_v30  ;;  %v2660_v48 = vadd.f32 %v2659_v26, %v11256_v34  ;;  %v2733_v51 = vadd.f32 %v2732_v32, %v11270_v61  ;;  %8754 = vmatpush3.bf16.msra.mxu1 %v9806_v63  ;;  %v9815_v30 = vld [vmem:[%s13678_s18 + $0x2e0] sm:$0xff]   ;;  %v11385_v63 = vld [vmem:[%s13677_s17 + $0x8] sm:$0xff]  ;;  %v3108_v23 = vmax.f32 %v2729_v52, 0.0 }
 0x658   : > { %8794 = vmatpush3.bf16.msra.mxu0 %v9808_v15  ;;  %v3121_v47 = vmax.f32 %v2658_v16, 0.0  ;;  %v3123_v28 = vmax.f32 %v2731_v55, 0.0  ;;  %8755 = vmatprep.subr.bf16.mxu1 %v9809_v0  ;;  %v3106_v15 = vmax.f32 %v2656_v7, 0.0  ;;  %v9814_v32 = vld [vmem:[%s13678_s18 + $0x220] sm:$0xff]   ;;  %v11395_v7 = vrot.slane %v11385_v63, %v10457_v38 }
 0x659   : > { %8795 = vmatprep.subr.bf16.mxu0 %v9811_v57  ;;  %v3122_v4 = vmax.f32 %v2660_v48, 0.0  ;;  %v3124_v8 = vmax.f32 %v2733_v51, 0.0 }
 0x65a   : > { %v3201_v1 = vpack.c.bf16 %v3121_v47, %v3105_v56  ;;  %v3203_v0 = vpack.c.bf16 %v3123_v28, %v3107_v45  ;;  %13834 = vst [vmem:[#allocation30_spill] sm:$0xff] %v11395_v7  ;;  %v9819_v56 = vld [vmem:[%s13678_s18 + $0x2e8] sm:$0xff]   ;;  %v13835_v45 = vsub.s32 1, %v10451_v36 }
 0x65b   : > { %8756 = vmatpush3.bf16.msra.mxu1 %v9810_v40  ;;  %v2663_v57 = vpop.f32.mrb[52].mxu1  ;;  %v2736_v16 = vpop.f32.mrb[52].mxu0  ;;  %v3202_v55 = vpack.c.bf16 %v3122_v4, %v3106_v15  ;;  %v3204_v26 = vpack.c.bf16 %v3124_v8, %v3108_v23 }
 0x65c   : > { %8796 = vmatpush3.bf16.msra.mxu0 %v9812_v18  ;;  %v2664_v52 = vadd.f32 %v2663_v57, %v11243_v37  ;;  %v2737_v48 = vadd.f32 %v2736_v16, %v11263_v58  ;;  %v2665_v51 = vpop.f32.mrb[53].mxu1  ;;  %v2738_v40 = vpop.f32.mrb[53].mxu0  ;;  %8757 = vmatprep.subr.bf16.mxu1 %v9813_v41  ;;  %v9817_v18 = vld [vmem:[%s13678_s18 + $0x268] sm:$0xff]   ;;  %v11408_v47 = vrot.slane %v11385_v63, %v13835_v45 }
 0x65d   : > { %8797 = vmatprep.subr.bf16.mxu0 %v9815_v30  ;;  %v2666_v28 = vadd.f32 %v2665_v51, %v11256_v34  ;;  %v2739_v15 = vadd.f32 %v2738_v40, %v11270_v61  ;;  %v2667_v23 = vpop.f32.mrb[54].mxu1  ;;  %v2740_v41 = vpop.f32.mrb[54].mxu0  ;;  %4181 = vmatprep.mubr.bf16.mxu1 %v3202_v55  ;;  %v13837_v30 = vsub.s32 2, %v10451_v36  ;;  %v13839_v51 = vsub.s32 3, %v10451_v36 }
 0x65e   : > { %13836 = vst [vmem:[#allocation31_spill] sm:$0xff] %v11408_v47  ;;  %4246 = vmatprep.mubr.bf16.mxu0 %v3204_v26  ;;  %v2668_v8 = vadd.f32 %v2667_v23, %v11243_v37  ;;  %v2741_v57 = vadd.f32 %v2740_v41, %v11263_v58  ;;  %v2669_v16 = vpop.f32.mrb[55].mxu1  ;;  %v2742_v45 = vpop.f32.mrb[55].mxu0  ;;  %4182 = vmatmul.mubr.bf16.gmra.mrb[112].mxu1 %v3201_v1  ;;  %v9818_v23 = vld [vmem:[%s13678_s18 + $0x228] sm:$0xff]   ;;  %v3139_v41 = vmax.f32 %v2737_v48, 0.0 }
 0x65f   : > { %v11415_v4 = vrot.slane %v11385_v63, %v13837_v30  ;;  %4247 = vmatmul.mubr.bf16.gmra.mrb[112].mxu0 %v3203_v0  ;;  %v11422_v40 = vrot.slane %v11385_v63, %v13839_v51  ;;  %v2670_v55 = vadd.f32 %v2669_v16, %v11256_v34  ;;  %v2743_v26 = vadd.f32 %v2742_v45, %v11270_v61  ;;  %v9820_v1 = vld [vmem:[%s13678_s18 + $0x2a8] sm:$0xff]   ;;  %v9821_v16 = vld [vmem:[%s13678_s18 + $0x270] sm:$0xff]  }
 0x660   : > { %8758 = vmatpush3.bf16.msra.mxu1 %v9814_v32  ;;  %8798 = vmatpush3.bf16.msra.mxu0 %v9816_v14  ;;  %v3137_v0 = vmax.f32 %v2664_v52, 0.0  ;;  %v3153_v30 = vmax.f32 %v2668_v8, 0.0  ;;  %v3155_v58 = vmax.f32 %v2741_v57, 0.0  ;;  %v9823_v14 = vld [vmem:[%s13678_s18 + $0x2f0] sm:$0xff]   ;;  %v3138_v32 = vmax.f32 %v2666_v28, 0.0 }
 0x661   : > { %13838 = vst [vmem:[#allocation32_spill] sm:$0xff] %v11415_v4  ;;  %13840 = vst [vmem:[#allocation33_spill] sm:$0xff] %v11422_v40  ;;  %8759 = vmatprep.subr.bf16.mxu1 %v9817_v18  ;;  %8799 = vmatprep.subr.bf16.mxu0 %v9819_v56  ;;  %v3140_v45 = vmax.f32 %v2739_v15, 0.0  ;;  %v3154_v51 = vmax.f32 %v2670_v55, 0.0  ;;  %v3156_v61 = vmax.f32 %v2743_v26, 0.0  ;;  %v9822_v8 = vld [vmem:[%s13678_s18 + $0x230] sm:$0xff]  }
 0x662   : > { %v3217_v34 = vpack.c.bf16 %v3153_v30, %v3137_v0  ;;  %v3219_v37 = vpack.c.bf16 %v3155_v58, %v3139_v41  ;;  %v9824_v57 = vld [vmem:[%s13678_s18 + $0x2b0] sm:$0xff]   ;;  %v9827_v26 = vld [vmem:[%s13678_s18 + $0x2f8] sm:$0xff]  }
 0x663   : > { %v2779_v52 = vpop.f32.mrb[56].mxu1  ;;  %v2852_v48 = vpop.f32.mrb[56].mxu0  ;;  %v3218_v18 = vpack.c.bf16 %v3154_v51, %v3138_v32  ;;  %v3220_v56 = vpack.c.bf16 %v3156_v61, %v3140_v45  ;;  %v9825_v61 = vld [vmem:[%s13678_s18 + $0x278] sm:$0xff]  }
 0x664   : > { %8760 = vmatpush3.bf16.msra.mxu1 %v9818_v23  ;;  %8800 = vmatpush3.bf16.msra.mxu0 %v9820_v1  ;;  %v2780_v28 = vadd.f32 %v2779_v52, %v11395_v7  ;;  %v2853_v15 = vadd.f32 %v2852_v48, %v11415_v4  ;;  %v2781_v55 = vpop.f32.mrb[57].mxu1  ;;  %v2854_v58 = vpop.f32.mrb[57].mxu0  ;;  %v9826_v52 = vld [vmem:[%s13678_s18 + $0x238] sm:$0xff]  }
 0x665   : > { %8761 = vmatprep.subr.bf16.mxu1 %v9821_v16  ;;  %8801 = vmatprep.subr.bf16.mxu0 %v9823_v14  ;;  %v2782_v23 = vadd.f32 %v2781_v55, %v11408_v47  ;;  %v2855_v1 = vadd.f32 %v2854_v58, %v11422_v40  ;;  %v2783_v0 = vpop.f32.mrb[58].mxu1  ;;  %v2856_v41 = vpop.f32.mrb[58].mxu0  ;;  %v9828_v48 = vld [vmem:[%s13678_s18 + $0x2b8] sm:$0xff]  }
 0x666   : > { %4189 = vmatprep.mubr.bf16.mxu1 %v3218_v18  ;;  %4254 = vmatprep.mubr.bf16.mxu0 %v3220_v56  ;;  %v2784_v30 = vadd.f32 %v2783_v0, %v11395_v7  ;;  %v2857_v16 = vadd.f32 %v2856_v41, %v11415_v4  ;;  %v2785_v14 = vpop.f32.mrb[59].mxu1  ;;  %v2858_v32 = vpop.f32.mrb[59].mxu0  ;;  %v3045_v18 = vmax.f32 %v2780_v28, 0.0  ;;  %v3047_v56 = vmax.f32 %v2853_v15, 0.0 }
 0x667   : > { %4190 = vmatmul.mubr.bf16.gmra.mrb[116].mxu1 %v3217_v34  ;;  %4255 = vmatmul.mubr.bf16.gmra.mrb[116].mxu0 %v3219_v37  ;;  %v2786_v45 = vadd.f32 %v2785_v14, %v11408_v47  ;;  %v2859_v51 = vadd.f32 %v2858_v32, %v11422_v40  ;;  %v9829_v37 = vld [vmem:[%s13678_s18 + $0x340] sm:$0xff]  }
 0x668   : > { %8762 = vmatpush3.bf16.msra.mxu1 %v9822_v8  ;;  %8802 = vmatpush3.bf16.msra.mxu0 %v9824_v57  ;;  %v3061_v55 = vmax.f32 %v2784_v30, 0.0  ;;  %v3063_v58 = vmax.f32 %v2857_v16, 0.0  ;;  %v9831_v34 = vld [vmem:[%s13678_s18 + $0x3c0] sm:$0xff]   ;;  %v3046_v8 = vmax.f32 %v2782_v23, 0.0  ;;  %v3048_v57 = vmax.f32 %v2855_v1, 0.0 }
 0x669   : > { %8763 = vmatprep.subr.bf16.mxu1 %v9825_v61  ;;  %8803 = vmatprep.subr.bf16.mxu0 %v9827_v26  ;;  %v3062_v0 = vmax.f32 %v2786_v45, 0.0  ;;  %v3064_v41 = vmax.f32 %v2859_v51, 0.0  ;;  %v9830_v30 = vld [vmem:[%s13678_s18 + $0x300] sm:$0xff]  }
 0x66a   : > { %v3173_v14 = vpack.c.bf16 %v3061_v55, %v3045_v18  ;;  %v3175_v32 = vpack.c.bf16 %v3063_v58, %v3047_v56  ;;  %v9832_v16 = vld [vmem:[%s13678_s18 + $0x380] sm:$0xff]  }
 0x66b   : > { %v2789_v28 = vpop.f32.mrb[60].mxu1  ;;  %v2862_v15 = vpop.f32.mrb[60].mxu0  ;;  %v3174_v61 = vpack.c.bf16 %v3062_v0, %v3046_v8  ;;  %v3176_v26 = vpack.c.bf16 %v3064_v41, %v3048_v57 }
 0x66c   : > { %8764 = vmatpush3.bf16.msra.mxu1 %v9826_v52  ;;  %8804 = vmatpush3.bf16.msra.mxu0 %v9828_v48  ;;  %v2790_v23 = vadd.f32 %v2789_v28, %v11395_v7  ;;  %v2863_v1 = vadd.f32 %v2862_v15, %v11415_v4  ;;  %v2791_v45 = vpop.f32.mrb[61].mxu1  ;;  %v2864_v51 = vpop.f32.mrb[61].mxu0  ;;  %v9833_v52 = vld [vmem:[%s13678_s18 + $0x348] sm:$0xff]  }
 0x66d   : > { %8829 = vmatprep.subr.bf16.mxu1 %v9829_v37  ;;  %8869 = vmatprep.subr.bf16.mxu0 %v9831_v34  ;;  %v9835_v48 = vld [vmem:[%s13678_s18 + $0x3c8] sm:$0xff]   ;;  %v2792_v18 = vadd.f32 %v2791_v45, %v11408_v47  ;;  %v2865_v56 = vadd.f32 %v2864_v51, %v11422_v40  ;;  %v2793_v55 = vpop.f32.mrb[62].mxu1  ;;  %v2866_v58 = vpop.f32.mrb[62].mxu0 }
 0x66e   : > { %4295 = vmatprep.mubr.bf16.mxu1 %v3174_v61  ;;  %4360 = vmatprep.mubr.bf16.mxu0 %v3176_v26  ;;  %v2794_v8 = vadd.f32 %v2793_v55, %v11395_v7  ;;  %v2867_v37 = vadd.f32 %v2866_v58, %v11415_v4  ;;  %v2795_v34 = vpop.f32.mrb[63].mxu1  ;;  %v2868_v57 = vpop.f32.mrb[63].mxu0  ;;  %v9834_v28 = vld [vmem:[%s13678_s18 + $0x308] sm:$0xff]   ;;  %v3077_v61 = vmax.f32 %v2790_v23, 0.0  ;;  %v3079_v26 = vmax.f32 %v2863_v1, 0.0 }
 0x66f   : > { %4296 = vmatmul.mubr.bf16.vlgmr.msra.gmra.mrb[120].mxu1 %v3173_v14  ;;  %4361 = vmatmul.mubr.bf16.vlgmr.msra.gmra.mrb[120].mxu0 %v3175_v32  ;;  %v2796_v0 = vadd.f32 %v2795_v34, %v11408_v47  ;;  %v2869_v41 = vadd.f32 %v2868_v57, %v11422_v40  ;;  %v9836_v15 = vld [vmem:[%s13678_s18 + $0x388] sm:$0xff]   ;;  %v9837_v14 = vld [vmem:[%s13678_s18 + $0x350] sm:$0xff]  }
 0x670   : > { %8830 = vmatpush3.bf16.msra.mxu1 %v9830_v30  ;;  %8870 = vmatpush3.bf16.msra.mxu0 %v9832_v16  ;;  %v3093_v45 = vmax.f32 %v2794_v8, 0.0  ;;  %v3095_v51 = vmax.f32 %v2867_v37, 0.0  ;;  %v9839_v32 = vld [vmem:[%s13678_s18 + $0x3d0] sm:$0xff]   ;;  %v3078_v30 = vmax.f32 %v2792_v18, 0.0  ;;  %v3080_v16 = vmax.f32 %v2865_v56, 0.0 }
 0x671   : > { %8831 = vmatprep.subr.bf16.mxu1 %v9833_v52  ;;  %8871 = vmatprep.subr.bf16.mxu0 %v9835_v48  ;;  %v3094_v55 = vmax.f32 %v2796_v0, 0.0  ;;  %v3096_v58 = vmax.f32 %v2869_v41, 0.0  ;;  %v9838_v8 = vld [vmem:[%s13678_s18 + $0x310] sm:$0xff]  }
 0x672   : > { %v3189_v34 = vpack.c.bf16 %v3093_v45, %v3077_v61  ;;  %v3191_v57 = vpack.c.bf16 %v3095_v51, %v3079_v26  ;;  %v9840_v37 = vld [vmem:[%s13678_s18 + $0x390] sm:$0xff]  }
 0x673   : > { %v2799_v23 = vpop.f32.mrb[64].mxu1  ;;  %v2872_v1 = vpop.f32.mrb[64].mxu0  ;;  %v3190_v52 = vpack.c.bf16 %v3094_v55, %v3078_v30  ;;  %v3192_v48 = vpack.c.bf16 %v3096_v58, %v3080_v16 }
 0x674   : > { %8832 = vmatpush3.bf16.msra.mxu1 %v9834_v28  ;;  %8872 = vmatpush3.bf16.msra.mxu0 %v9836_v15  ;;  %v2800_v18 = vadd.f32 %v2799_v23, %v11395_v7  ;;  %v2873_v56 = vadd.f32 %v2872_v1, %v11415_v4  ;;  %v2801_v0 = vpop.f32.mrb[65].mxu1  ;;  %v2874_v41 = vpop.f32.mrb[65].mxu0  ;;  %v9841_v28 = vld [vmem:[%s13678_s18 + $0x358] sm:$0xff]  }
 0x675   : > { %8833 = vmatprep.subr.bf16.mxu1 %v9837_v14  ;;  %8873 = vmatprep.subr.bf16.mxu0 %v9839_v32  ;;  %v9843_v15 = vld [vmem:[%s13678_s18 + $0x3d8] sm:$0xff]   ;;  %v2802_v61 = vadd.f32 %v2801_v0, %v11408_v47  ;;  %v2875_v26 = vadd.f32 %v2874_v41, %v11422_v40  ;;  %v2803_v45 = vpop.f32.mrb[66].mxu1  ;;  %v2876_v51 = vpop.f32.mrb[66].mxu0 }
 0x676   : > { %4303 = vmatprep.mubr.bf16.mxu1 %v3190_v52  ;;  %4368 = vmatprep.mubr.bf16.mxu0 %v3192_v48  ;;  %v2804_v30 = vadd.f32 %v2803_v45, %v11395_v7  ;;  %v2877_v14 = vadd.f32 %v2876_v51, %v11415_v4  ;;  %v2805_v32 = vpop.f32.mrb[67].mxu1  ;;  %v2878_v16 = vpop.f32.mrb[67].mxu0  ;;  %v9842_v23 = vld [vmem:[%s13678_s18 + $0x318] sm:$0xff]   ;;  %v3109_v52 = vmax.f32 %v2800_v18, 0.0  ;;  %v3111_v48 = vmax.f32 %v2873_v56, 0.0 }
 0x677   : > { %4304 = vmatmul.mubr.bf16.gmra.mrb[124].mxu1 %v3189_v34  ;;  %4369 = vmatmul.mubr.bf16.gmra.mrb[124].mxu0 %v3191_v57  ;;  %v2806_v55 = vadd.f32 %v2805_v32, %v11408_v47  ;;  %v2879_v58 = vadd.f32 %v2878_v16, %v11422_v40  ;;  %v9844_v1 = vld [vmem:[%s13678_s18 + $0x398] sm:$0xff]   ;;  %v9845_v34 = vld [vmem:[%s13678_s18 + $0x360] sm:$0xff]  }
 0x678   : > { %8834 = vmatpush3.bf16.msra.mxu1 %v9838_v8  ;;  %8874 = vmatpush3.bf16.msra.mxu0 %v9840_v37  ;;  %v3125_v0 = vmax.f32 %v2804_v30, 0.0  ;;  %v3127_v41 = vmax.f32 %v2877_v14, 0.0  ;;  %v9847_v57 = vld [vmem:[%s13678_s18 + $0x3e0] sm:$0xff]   ;;  %v3110_v8 = vmax.f32 %v2802_v61, 0.0  ;;  %v3112_v37 = vmax.f32 %v2875_v26, 0.0 }
 0x679   : > { %8835 = vmatprep.subr.bf16.mxu1 %v9841_v28  ;;  %8875 = vmatprep.subr.bf16.mxu0 %v9843_v15  ;;  %v3126_v45 = vmax.f32 %v2806_v55, 0.0  ;;  %v3128_v51 = vmax.f32 %v2879_v58, 0.0  ;;  %v9846_v30 = vld [vmem:[%s13678_s18 + $0x320] sm:$0xff]   ;;  %v13841_v61 = vsub.s32 4, %v10451_v36 }
 0x67a   : > { %v3205_v32 = vpack.c.bf16 %v3125_v0, %v3109_v52  ;;  %v3207_v16 = vpack.c.bf16 %v3127_v41, %v3111_v48  ;;  %v9848_v14 = vld [vmem:[%s13678_s18 + $0x3a0] sm:$0xff]   ;;  %v9849_v52 = vld [vmem:[%s13678_s18 + $0x368] sm:$0xff]   ;;  %v13843_v0 = vsub.s32 5, %v10451_v36 }
 0x67b   : > { %v2809_v18 = vpop.f32.mrb[68].mxu1  ;;  %v2882_v56 = vpop.f32.mrb[68].mxu0  ;;  %v3206_v28 = vpack.c.bf16 %v3126_v45, %v3110_v8  ;;  %v3208_v15 = vpack.c.bf16 %v3128_v51, %v3112_v37  ;;  %v11543_v26 = vrot.slane %v11385_v63, %v13841_v61  ;;  %v9851_v48 = vld [vmem:[%s13678_s18 + $0x3e8] sm:$0xff]  }
 0x67c   : > { %8836 = vmatpush3.bf16.msra.mxu1 %v9842_v23  ;;  %8876 = vmatpush3.bf16.msra.mxu0 %v9844_v1  ;;  %v2810_v55 = vadd.f32 %v2809_v18, %v11395_v7  ;;  %v2883_v58 = vadd.f32 %v2882_v56, %v11415_v4  ;;  %v2811_v23 = vpop.f32.mrb[69].mxu1  ;;  %v2884_v1 = vpop.f32.mrb[69].mxu0  ;;  %v11556_v41 = vrot.slane %v11385_v63, %v13843_v0 }
 0x67d   : > { %13842 = vst [vmem:[#allocation34_spill] sm:$0xff] %v11543_v26  ;;  %8837 = vmatprep.subr.bf16.mxu1 %v9845_v34  ;;  %8877 = vmatprep.subr.bf16.mxu0 %v9847_v57  ;;  %v2812_v8 = vadd.f32 %v2811_v23, %v11408_v47  ;;  %v2885_v37 = vadd.f32 %v2884_v1, %v11422_v40  ;;  %v2813_v45 = vpop.f32.mrb[70].mxu1  ;;  %v2886_v34 = vpop.f32.mrb[70].mxu0  ;;  %v13845_v57 = vsub.s32 6, %v10451_v36  ;;  %v13847_v23 = vsub.s32 7, %v10451_v36 }
 0x67e   : > { %13844 = vst [vmem:[#allocation35_spill] sm:$0xff] %v11556_v41  ;;  %4311 = vmatprep.mubr.bf16.mxu1 %v3206_v28  ;;  %4376 = vmatprep.mubr.bf16.mxu0 %v3208_v15  ;;  %v2814_v18 = vadd.f32 %v2813_v45, %v11395_v7  ;;  %v2887_v56 = vadd.f32 %v2886_v34, %v11415_v4  ;;  %v2815_v61 = vpop.f32.mrb[71].mxu1  ;;  %v2888_v0 = vpop.f32.mrb[71].mxu0  ;;  %v9850_v45 = vld [vmem:[%s13678_s18 + $0x328] sm:$0xff]   ;;  %v3143_v34 = vmax.f32 %v2883_v58, 0.0 }
 0x67f   : > { %v11563_v51 = vrot.slane %v11385_v63, %v13845_v57  ;;  %4312 = vmatmul.mubr.bf16.gmra.mrb[128].mxu1 %v3205_v32  ;;  %4377 = vmatmul.mubr.bf16.gmra.mrb[128].mxu0 %v3207_v16  ;;  %v11570_v1 = vrot.slane %v11385_v63, %v13847_v23  ;;  %v2816_v28 = vadd.f32 %v2815_v61, %v11408_v47  ;;  %v9852_v32 = vld [vmem:[%s13678_s18 + $0x3a8] sm:$0xff]   ;;  %v3141_v16 = vmax.f32 %v2810_v55, 0.0  ;;  %v9853_v63 = vld [vmem:[%s13678_s18 + $0x370] sm:$0xff]  }
 0x680   : > { %v2889_v15 = vadd.f32 %v2888_v0, %v11422_v40  ;;  %8838 = vmatpush3.bf16.msra.mxu1 %v9846_v30  ;;  %8878 = vmatpush3.bf16.msra.mxu0 %v9848_v14  ;;  %v3157_v36 = vmax.f32 %v2814_v18, 0.0  ;;  %v3159_v57 = vmax.f32 %v2887_v56, 0.0  ;;  %v9855_v30 = vld [vmem:[%s13678_s18 + $0x3f0] sm:$0xff]   ;;  %v3142_v14 = vmax.f32 %v2812_v8, 0.0 }
 0x681   : > { %13846 = vst [vmem:[#allocation36_spill] sm:$0xff] %v11563_v51  ;;  %13848 = vst [vmem:[#allocation37_spill] sm:$0xff] %v11570_v1  ;;  %8839 = vmatprep.subr.bf16.mxu1 %v9849_v52  ;;  %8879 = vmatprep.subr.bf16.mxu0 %v9851_v48  ;;  %v3144_v61 = vmax.f32 %v2885_v37, 0.0  ;;  %v3158_v0 = vmax.f32 %v2816_v28, 0.0  ;;  %v9854_v18 = vld [vmem:[%s13678_s18 + $0x330] sm:$0xff]  }
 0x682   : > { %v3160_v23 = vmax.f32 %v2889_v15, 0.0  ;;  %v3221_v40 = vpack.c.bf16 %v3157_v36, %v3141_v16  ;;  %v3223_v47 = vpack.c.bf16 %v3159_v57, %v3143_v34  ;;  %v9856_v56 = vld [vmem:[%s13678_s18 + $0x3b0] sm:$0xff]  }
 0x683   : > { %v2925_v55 = vpop.f32.mrb[72].mxu1  ;;  %v2998_v58 = vpop.f32.mrb[72].mxu0  ;;  %v3222_v52 = vpack.c.bf16 %v3158_v0, %v3142_v14 }
 0x684   : > { %8840 = vmatpush3.bf16.msra.mxu1 %v9850_v45  ;;  %8880 = vmatpush3.bf16.msra.mxu0 %v9852_v32  ;;  %v3224_v48 = vpack.c.bf16 %v3160_v23, %v3144_v61  ;;  %v2926_v8 = vadd.f32 %v2925_v55, %v11543_v26  ;;  %v2999_v37 = vadd.f32 %v2998_v58, %v11563_v51  ;;  %v2927_v28 = vpop.f32.mrb[73].mxu1  ;;  %v3000_v15 = vpop.f32.mrb[73].mxu0  ;;  %v9857_v45 = vld [vmem:[%s13678_s18 + $0x378] sm:$0xff]  }
 0x685   : > { %8841 = vmatprep.subr.bf16.mxu1 %v9853_v63  ;;  %8881 = vmatprep.subr.bf16.mxu0 %v9855_v30  ;;  %v9859_v32 = vld [vmem:[%s13678_s18 + $0x3f8] sm:$0xff]   ;;  %v2928_v16 = vadd.f32 %v2927_v28, %v11556_v41  ;;  %v3001_v34 = vadd.f32 %v3000_v15, %v11570_v1  ;;  %v2929_v36 = vpop.f32.mrb[74].mxu1  ;;  %v3002_v57 = vpop.f32.mrb[74].mxu0 }
 0x686   : > { %4319 = vmatprep.mubr.bf16.mxu1 %v3222_v52  ;;  %4384 = vmatprep.mubr.bf16.mxu0 %v3224_v48  ;;  %v2930_v14 = vadd.f32 %v2929_v36, %v11543_v26  ;;  %v3003_v63 = vadd.f32 %v3002_v57, %v11563_v51  ;;  %v2931_v30 = vpop.f32.mrb[75].mxu1  ;;  %v3004_v61 = vpop.f32.mrb[75].mxu0  ;;  %v9858_v55 = vld [vmem:[%s13678_s18 + $0x338] sm:$0xff]   ;;  %v3049_v52 = vmax.f32 %v2926_v8, 0.0  ;;  %v3051_v48 = vmax.f32 %v2999_v37, 0.0 }
 0x687   : > { %4320 = vmatmul.mubr.bf16.gmra.mrb[132].mxu1 %v3221_v40  ;;  %4385 = vmatmul.mubr.bf16.gmra.mrb[132].mxu0 %v3223_v47  ;;  %v2932_v0 = vadd.f32 %v2931_v30, %v11556_v41  ;;  %v3005_v23 = vadd.f32 %v3004_v61, %v11570_v1  ;;  %v9860_v58 = vld [vmem:[%s13678_s18 + $0x3b8] sm:$0xff]   ;;  %v3050_v47 = vmax.f32 %v2928_v16, 0.0  ;;  %v3052_v40 = vmax.f32 %v3001_v34, 0.0 }
 0x688   : > { %8842 = vmatpush3.bf16.msra.mxu1 %v9854_v18  ;;  %8882 = vmatpush3.bf16.msra.mxu0 %v9856_v56  ;;  %v3065_v28 = vmax.f32 %v2930_v14, 0.0  ;;  %v3067_v15 = vmax.f32 %v3003_v63, 0.0 }
 0x689   : > { %8843 = vmatprep.subr.bf16.mxu1 %v9857_v45  ;;  %8883 = vmatprep.subr.bf16.mxu0 %v9859_v32  ;;  %v3066_v36 = vmax.f32 %v2932_v0, 0.0  ;;  %v3068_v57 = vmax.f32 %v3005_v23, 0.0  ;;  %v9977_v45 = vld [vmem:[%s13803_s27] sm:$0xff]   ;;  %v13849_v32 = vmov 0.0  }
 0x68a   : > { %v3177_v18 = vpack.c.bf16 %v3065_v28, %v3049_v52  ;;  %v3179_v56 = vpack.c.bf16 %v3067_v15, %v3051_v48  ;;  %v9978_v15 = vld [vmem:[%s13674_s14] sm:$0xff]  }
 0x68b   : > { %v2935_v30 = vpop.f32.mrb[76].mxu1  ;;  %v3008_v61 = vpop.f32.mrb[76].mxu0  ;;  %v3178_v4 = vpack.c.bf16 %v3066_v36, %v3050_v47  ;;  %v3180_v7 = vpack.c.bf16 %v3068_v57, %v3052_v40  ;;  %v9979_v36 = vld [vmem:[%s13803_s27 + $0x8] sm:$0xff]  }
 0x68c   : > { %8844 = vmatpush3.bf16.msra.mxu1 %v9858_v55  ;;  %8884 = vmatpush3.bf16.msra.mxu0 %v9860_v58  ;;  %v2936_v39 = vadd.f32 %v2935_v30, %v11543_v26  ;;  %v3009_v8 = vadd.f32 %v3008_v61, %v11563_v51  ;;  %v2937_v37 = vpop.f32.mrb[77].mxu1  ;;  %v3010_v14 = vpop.f32.mrb[77].mxu0 }
 0x68d   : > { %9657 = vmatprep.subr.bf16.mxu1 %v9977_v45  ;;  %9669 = vmatprep.subr.bf16.mxu0 %v13849_v32  ;;  %v2938_v16 = vadd.f32 %v2937_v37, %v11556_v41  ;;  %v3011_v34 = vadd.f32 %v3010_v14, %v11570_v1  ;;  %v2939_v63 = vpop.f32.mrb[78].mxu1  ;;  %v3012_v0 = vpop.f32.mrb[78].mxu0 }
 0x68e   : > { %4425 = vmatprep.mubr.bf16.mxu1 %v3178_v4  ;;  %4490 = vmatprep.mubr.bf16.mxu0 %v3180_v7  ;;  %v2940_v23 = vadd.f32 %v2939_v63, %v11543_v26  ;;  %v3013_v55 = vadd.f32 %v3012_v0, %v11563_v51  ;;  %v2941_v58 = vpop.f32.mrb[79].mxu1  ;;  %v3014_v52 = vpop.f32.mrb[79].mxu0  ;;  %v3081_v4 = vmax.f32 %v2936_v39, 0.0  ;;  %v3083_v7 = vmax.f32 %v3009_v8, 0.0  ;;  %v9980_v8 = vld [vmem:[%s13674_s14 + $0x8] sm:$0xff]  }
 0x68f   : > { %4426 = vmatmul.mubr.bf16.vlgmr.msra.gmra.mrb[136].mxu1 %v3177_v18  ;;  %4491 = vmatmul.mubr.bf16.vlgmr.msra.gmra.mrb[136].mxu0 %v3179_v56  ;;  %v2942_v48 = vadd.f32 %v2941_v58, %v11556_v41  ;;  %v3015_v28 = vadd.f32 %v3014_v52, %v11570_v1  ;;  %v3082_v57 = vmax.f32 %v2938_v16, 0.0  ;;  %v3084_v18 = vmax.f32 %v3011_v34, 0.0 }
 0x690   : > { %9658 = vmatpush3.bf16.msra.mxu1 %v9977_v45  ;;  %9670 = vmatpush3.bf16.msra.mxu0 %v9978_v15  ;;  %v3097_v47 = vmax.f32 %v2940_v23, 0.0  ;;  %v3099_v40 = vmax.f32 %v3013_v55, 0.0 }
 0x691   : > { %9659 = vmatprep.subr.bf16.mxu1 %v9979_v36  ;;  %9671 = vmatprep.subr.bf16.mxu0 %v13849_v32  ;;  %v3098_v56 = vmax.f32 %v2942_v48, 0.0  ;;  %v3100_v30 = vmax.f32 %v3015_v28, 0.0 }
 0x692   : > { %v3193_v61 = vpack.c.bf16 %v3097_v47, %v3081_v4  ;;  %v3195_v37 = vpack.c.bf16 %v3099_v40, %v3083_v7 }
 0x693   : > { %v2945_v14 = vpop.f32.mrb[80].mxu1  ;;  %v3018_v45 = vpop.f32.mrb[80].mxu0  ;;  %v3194_v63 = vpack.c.bf16 %v3098_v56, %v3082_v57  ;;  %v3196_v39 = vpack.c.bf16 %v3100_v30, %v3084_v18 }
 0x694   : > { %9660 = vmatpush3.bf16.msra.mxu1 %v9979_v36  ;;  %9672 = vmatpush3.bf16.msra.mxu0 %v9980_v8  ;;  %v2946_v0 = vadd.f32 %v2945_v14, %v11543_v26  ;;  %v3019_v23 = vadd.f32 %v3018_v45, %v11563_v51  ;;  %v2947_v16 = vpop.f32.mrb[81].mxu1  ;;  %v3020_v34 = vpop.f32.mrb[81].mxu0 }
 0x695   : > { %5039 = vmatprep.subr.bf16.mxu1 %v10682_v59  ;;  %4966 = vmatprep.subr.bf16.mxu0 %v10691_v17  ;;  %v2948_v55 = vadd.f32 %v2947_v16, %v11556_v41  ;;  %v3021_v58 = vadd.f32 %v3020_v34, %v11570_v1  ;;  %v2949_v52 = vpop.f32.mrb[82].mxu1  ;;  %v3022_v48 = vpop.f32.mrb[82].mxu0 }
 0x696   : > { %4433 = vmatprep.mubr.bf16.mxu1 %v3194_v63  ;;  %4498 = vmatprep.mubr.bf16.mxu0 %v3196_v39  ;;  %v2950_v28 = vadd.f32 %v2949_v52, %v11543_v26  ;;  %v3023_v15 = vadd.f32 %v3022_v48, %v11563_v51  ;;  %v2951_v4 = vpop.f32.mrb[83].mxu1  ;;  %v3024_v7 = vpop.f32.mrb[83].mxu0  ;;  %v3113_v36 = vmax.f32 %v2946_v0, 0.0  ;;  %v3115_v57 = vmax.f32 %v3019_v23, 0.0 }
 0x697   : > { %4434 = vmatmul.mubr.bf16.gmra.mrb[140].mxu1 %v3193_v61  ;;  %4499 = vmatmul.mubr.bf16.gmra.mrb[140].mxu0 %v3195_v37  ;;  %v2952_v47 = vadd.f32 %v2951_v4, %v11556_v41  ;;  %v3025_v40 = vadd.f32 %v3024_v7, %v11570_v1  ;;  %v3114_v30 = vmax.f32 %v2948_v55, 0.0  ;;  %v3116_v14 = vmax.f32 %v3021_v58, 0.0 }
 0x698   : > { %v3129_v18 = vmax.f32 %v2950_v28, 0.0  ;;  %v3131_v56 = vmax.f32 %v3023_v15, 0.0 }
 0x699   : > { %v3130_v45 = vmax.f32 %v2952_v47, 0.0  ;;  %v3132_v63 = vmax.f32 %v3025_v40, 0.0 }
 0x69a   : > { %v3209_v39 = vpack.c.bf16 %v3129_v18, %v3113_v36  ;;  %v3211_v8 = vpack.c.bf16 %v3131_v56, %v3115_v57 }
 0x69b   : > { %v2955_v16 = vpop.f32.mrb[84].mxu1  ;;  %v3028_v34 = vpop.f32.mrb[84].mxu0  ;;  %v3210_v52 = vpack.c.bf16 %v3130_v45, %v3114_v30  ;;  %v3212_v48 = vpack.c.bf16 %v3132_v63, %v3116_v14 }
 0x69c   : > { %v2956_v61 = vadd.f32 %v2955_v16, %v11543_v26  ;;  %v3029_v37 = vadd.f32 %v3028_v34, %v11563_v51  ;;  %v2957_v4 = vpop.f32.mrb[85].mxu1  ;;  %v3030_v7 = vpop.f32.mrb[85].mxu0 }
 0x69d   : > { %v2958_v0 = vadd.f32 %v2957_v4, %v11556_v41  ;;  %v3031_v23 = vadd.f32 %v3030_v7, %v11570_v1  ;;  %v2959_v55 = vpop.f32.mrb[86].mxu1  ;;  %v3032_v58 = vpop.f32.mrb[86].mxu0  ;;  %4441 = vmatprep.mubr.bf16.mxu1 %v3210_v52  ;;  %4506 = vmatprep.mubr.bf16.mxu0 %v3212_v48 }
 0x69e   : > { %v2960_v28 = vadd.f32 %v2959_v55, %v11543_v26  ;;  %v3033_v15 = vadd.f32 %v3032_v58, %v11563_v51  ;;  %v2961_v47 = vpop.f32.mrb[87].mxu1  ;;  %v3034_v40 = vpop.f32.mrb[87].mxu0  ;;  %v3145_v18 = vmax.f32 %v2956_v61, 0.0  ;;  %v3147_v56 = vmax.f32 %v3029_v37, 0.0  ;;  %v8332_v61 = vld [vmem:[%s13679_s19] ss:$0 sm:$0xff] }
 0x69f   : > { %4442 = vmatmul.mubr.bf16.gmra.mrb[144].mxu1 %v3209_v39  ;;  %4507 = vmatmul.mubr.bf16.gmra.mrb[144].mxu0 %v3211_v8  ;;  %v2962_v36 = vadd.f32 %v2961_v47, %v11556_v41  ;;  %v3035_v57 = vadd.f32 %v3034_v40, %v11570_v1  ;;  %v3146_v45 = vmax.f32 %v2958_v0, 0.0  ;;  %v3148_v63 = vmax.f32 %v3031_v23, 0.0 }
 0x6a0   : > { %v3161_v30 = vmax.f32 %v2960_v28, 0.0  ;;  %v3163_v14 = vmax.f32 %v3033_v15, 0.0 }
 0x6a1   : > { %v3162_v16 = vmax.f32 %v2962_v36, 0.0  ;;  %v3164_v34 = vmax.f32 %v3035_v57, 0.0 }
 0x6a2   : > { %v3225_v52 = vpack.c.bf16 %v3161_v30, %v3145_v18  ;;  %v3227_v48 = vpack.c.bf16 %v3163_v14, %v3147_v56 }
 0x6a3   : > { %v3226_v4 = vpack.c.bf16 %v3162_v16, %v3146_v45  ;;  %v3228_v7 = vpack.c.bf16 %v3164_v34, %v3148_v63 }
 0x6a5   : > { %4449 = vmatprep.mubr.bf16.mxu1 %v3226_v4  ;;  %4514 = vmatprep.mubr.bf16.mxu0 %v3228_v7 }
 0x6a7   : > { %4450 = vmatmul.mubr.bf16.gmra.mrb[148].mxu1 %v3225_v52  ;;  %4515 = vmatmul.mubr.bf16.gmra.mrb[148].mxu0 %v3227_v48 }
 0x6a8   : > { %9673 = vmatprep.mubr.msk.bf16.mxu0 %vm10264_vm0, %v13849_v32 }
 0x701   : > { %v8605_v39 = vpop.f32.mrb[88].mxu1  ;;  %v8645_v8 = vpop.f32.mrb[88].mxu0 }
 0x702   : > { %v8606_v37 = vpop.f32.mrb[89].mxu1  ;;  %v8646_v0 = vpop.f32.mrb[89].mxu0 }
 0x703   : > { %v8607_v23 = vadd.f32 %v8606_v37, %v8605_v39  ;;  %v8647_v55 = vadd.f32 %v8646_v0, %v8645_v8  ;;  %v8608_v58 = vpop.f32.mrb[90].mxu1  ;;  %v8648_v28 = vpop.f32.mrb[90].mxu0 }
 0x704   : > { %v8609_v15 = vpop.f32.mrb[91].mxu1  ;;  %v8649_v47 = vpop.f32.mrb[91].mxu0 }
 0x705   : > { %v4038_v40 = vadd.f32 %v8607_v23, %v8332_v61  ;;  %v8610_v36 = vadd.f32 %v8609_v15, %v8608_v58  ;;  %v8650_v57 = vadd.f32 %v8649_v47, %v8648_v28 }
 0x707   : > { %v4103_v18 = vadd.f32 %v8647_v55, %v4038_v40  ;;  %v4041_v56 = vadd.f32 %v8610_v36, %v8332_v61 }
 0x709   : > { %v11657_v30 = vadd.f32 %v8650_v57, %v4041_v56  ;;  %v8611_v14 = vpop.f32.mrb[92].mxu1  ;;  %v8651_v45 = vpop.f32.mrb[92].mxu0 }
 0x70a   : > { %v8612_v63 = vpop.f32.mrb[93].mxu1  ;;  %v8652_v16 = vpop.f32.mrb[93].mxu0 }
 0x70b   : > { %v8613_v34 = vadd.f32 %v8612_v63, %v8611_v14  ;;  %v8653_v52 = vadd.f32 %v8652_v16, %v8651_v45  ;;  %v8614_v48 = vpop.f32.mrb[94].mxu1  ;;  %v8654_v4 = vpop.f32.mrb[94].mxu0 }
 0x70c   : > { %v8615_v7 = vpop.f32.mrb[95].mxu1  ;;  %v8655_v39 = vpop.f32.mrb[95].mxu0 }
 0x70d   : > { %v4046_v8 = vadd.f32 %v8613_v34, %v8332_v61  ;;  %v8616_v37 = vadd.f32 %v8615_v7, %v8614_v48  ;;  %v8656_v0 = vadd.f32 %v8655_v39, %v8654_v4 }
 0x70f   : > { %v4111_v23 = vadd.f32 %v8653_v52, %v4046_v8  ;;  %v4049_v58 = vadd.f32 %v8616_v37, %v8332_v61 }
 0x711   : > { %v11659_v28 = vadd.f32 %v8656_v0, %v4049_v58  ;;  %v8617_v55 = vpop.f32.mrb[96].mxu1  ;;  %v8657_v15 = vpop.f32.mrb[96].mxu0 }
 0x712   : > { %v8618_v47 = vpop.f32.mrb[97].mxu1  ;;  %v8658_v40 = vpop.f32.mrb[97].mxu0 }
 0x713   : > { %v8619_v36 = vadd.f32 %v8618_v47, %v8617_v55  ;;  %v8659_v57 = vadd.f32 %v8658_v40, %v8657_v15  ;;  %v8620_v56 = vpop.f32.mrb[98].mxu1  ;;  %v8660_v14 = vpop.f32.mrb[98].mxu0 }
 0x714   : > { %v8621_v45 = vpop.f32.mrb[99].mxu1  ;;  %v8661_v63 = vpop.f32.mrb[99].mxu0 }
 0x715   : > { %v4054_v16 = vadd.f32 %v8619_v36, %v8332_v61  ;;  %v8622_v17 = vadd.f32 %v8621_v45, %v8620_v56  ;;  %v8662_v59 = vadd.f32 %v8661_v63, %v8660_v14 }
 0x717   : > { %v4119_v34 = vadd.f32 %v8659_v57, %v4054_v16  ;;  %v4057_v48 = vadd.f32 %v8622_v17, %v8332_v61 }
 0x719   : > { %v11661_v4 = vadd.f32 %v8662_v59, %v4057_v48  ;;  %v8623_v52 = vpop.f32.mrb[100].mxu1 }
 0x71a   : > { %v8663_v7 = vpop.f32.mrb[100].mxu0  ;;  %v8624_v39 = vpop.f32.mrb[101].mxu1 }
 0x71b   : > { %v8664_v8 = vpop.f32.mrb[101].mxu0  ;;  %v8625_v37 = vadd.f32 %v8624_v39, %v8623_v52  ;;  %v8626_v58 = vpop.f32.mrb[102].mxu1 }
 0x71c   : > { %v8665_v0 = vadd.f32 %v8664_v8, %v8663_v7  ;;  %v8666_v55 = vpop.f32.mrb[102].mxu0  ;;  %v8627_v15 = vpop.f32.mrb[103].mxu1 }
 0x71d   : > { %v8667_v47 = vpop.f32.mrb[103].mxu0  ;;  %v4062_v40 = vadd.f32 %v8625_v37, %v8332_v61  ;;  %v8628_v32 = vadd.f32 %v8627_v15, %v8626_v58 }
 0x71e   : > { %v8668_v1 = vadd.f32 %v8667_v47, %v8666_v55 }
 0x71f   : > { %v4127_v36 = vadd.f32 %v8665_v0, %v4062_v40  ;;  %v4065_v56 = vadd.f32 %v8628_v32, %v8332_v61 }
 0x721   : > { %v11663_v14 = vadd.f32 %v8668_v1, %v4065_v56  ;;  %v8685_v17 = vpop.f32.mrb[104].mxu1 }
 0x722   : > { %v8725_v59 = vpop.f32.mrb[104].mxu0  ;;  %v8686_v57 = vpop.f32.mrb[105].mxu1 }
 0x723   : > { %v8726_v45 = vpop.f32.mrb[105].mxu0  ;;  %v8687_v63 = vadd.f32 %v8686_v57, %v8685_v17  ;;  %v8688_v48 = vpop.f32.mrb[106].mxu1 }
 0x724   : > { %v8727_v16 = vadd.f32 %v8726_v45, %v8725_v59  ;;  %v8728_v52 = vpop.f32.mrb[106].mxu0  ;;  %v8689_v7 = vpop.f32.mrb[107].mxu1 }
 0x725   : > { %v8729_v39 = vpop.f32.mrb[107].mxu0  ;;  %v4168_v8 = vadd.f32 %v8687_v63, %v4103_v18  ;;  %v8690_v41 = vadd.f32 %v8689_v7, %v8688_v48 }
 0x726   : > { %v8730_v51 = vadd.f32 %v8729_v39, %v8728_v52 }
 0x727   : > { %v4233_v37 = vadd.f32 %v8727_v16, %v4168_v8  ;;  %v4171_v58 = vadd.f32 %v8690_v41, %v11657_v30 }
 0x729   : > { %v11666_v0 = vadd.f32 %v8730_v51, %v4171_v58  ;;  %v8691_v1 = vpop.f32.mrb[108].mxu1 }
 0x72a   : > { %v8731_v32 = vpop.f32.mrb[108].mxu0  ;;  %v8692_v61 = vpop.f32.mrb[109].mxu1 }
 0x72b   : > { %v8732_v55 = vpop.f32.mrb[109].mxu0  ;;  %v8693_v15 = vadd.f32 %v8692_v61, %v8691_v1  ;;  %v8694_v40 = vpop.f32.mrb[110].mxu1 }
 0x72c   : > { %v8733_v47 = vadd.f32 %v8732_v55, %v8731_v32  ;;  %v8734_v56 = vpop.f32.mrb[110].mxu0  ;;  %v8695_v17 = vpop.f32.mrb[111].mxu1 }
 0x72d   : > { %v8735_v59 = vpop.f32.mrb[111].mxu0  ;;  %v4176_v57 = vadd.f32 %v8693_v15, %v4111_v23  ;;  %v8696_v45 = vadd.f32 %v8695_v17, %v8694_v40 }
 0x72e   : > { %v8736_v18 = vadd.f32 %v8735_v59, %v8734_v56 }
 0x72f   : > { %v4241_v63 = vadd.f32 %v8733_v47, %v4176_v57  ;;  %v4179_v16 = vadd.f32 %v8696_v45, %v11659_v28 }
 0x731   : > { %v11669_v48 = vadd.f32 %v8736_v18, %v4179_v16  ;;  %v8697_v41 = vpop.f32.mrb[112].mxu1 }
 0x732   : > { %v8737_v51 = vpop.f32.mrb[112].mxu0  ;;  %v8698_v30 = vpop.f32.mrb[113].mxu1 }
 0x733   : > { %v8738_v52 = vpop.f32.mrb[113].mxu0  ;;  %v8699_v7 = vadd.f32 %v8698_v30, %v8697_v41  ;;  %v8700_v8 = vpop.f32.mrb[114].mxu1 }
 0x734   : > { %v8739_v39 = vadd.f32 %v8738_v52, %v8737_v51  ;;  %v8740_v58 = vpop.f32.mrb[114].mxu0  ;;  %v8701_v1 = vpop.f32.mrb[115].mxu1 }
 0x735   : > { %v8741_v32 = vpop.f32.mrb[115].mxu0  ;;  %v4184_v61 = vadd.f32 %v8699_v7, %v4119_v34  ;;  %v8702_v55 = vadd.f32 %v8701_v1, %v8700_v8 }
 0x736   : > { %v8742_v23 = vadd.f32 %v8741_v32, %v8740_v58 }
 0x737   : > { %v4249_v15 = vadd.f32 %v8739_v39, %v4184_v61  ;;  %v4187_v47 = vadd.f32 %v8702_v55, %v11661_v4 }
 0x739   : > { %v11672_v40 = vadd.f32 %v8742_v23, %v4187_v47 }
 0x73a   : > { %v8703_v28 = vpop.f32.mrb[116].mxu1  ;;  %v8743_v56 = vpop.f32.mrb[116].mxu0 }
 0x73b   : > { %v8704_v17 = vpop.f32.mrb[117].mxu1  ;;  %v8744_v59 = vpop.f32.mrb[117].mxu0 }
 0x73c   : > { %v8705_v57 = vadd.f32 %v8704_v17, %v8703_v28  ;;  %v8745_v45 = vadd.f32 %v8744_v59, %v8743_v56  ;;  %v8706_v18 = vpop.f32.mrb[118].mxu1  ;;  %v8746_v16 = vpop.f32.mrb[118].mxu0 }
 0x73d   : > { %v8707_v41 = vpop.f32.mrb[119].mxu1  ;;  %v8747_v51 = vpop.f32.mrb[119].mxu0 }
 0x73e   : > { %v4192_v30 = vadd.f32 %v8705_v57, %v4127_v36  ;;  %v8708_v52 = vadd.f32 %v8707_v41, %v8706_v18  ;;  %v8748_v34 = vadd.f32 %v8747_v51, %v8746_v16 }
 0x740   : > { %v4257_v7 = vadd.f32 %v8745_v45, %v4192_v30  ;;  %v4195_v39 = vadd.f32 %v8708_v52, %v11663_v14 }
 0x742   : > { %v11675_v8 = vadd.f32 %v8748_v34, %v4195_v39  ;;  %v8765_v4 = vpop.f32.mrb[120].mxu1  ;;  %v8805_v58 = vpop.f32.mrb[120].mxu0 }
 0x743   : > { %v8766_v1 = vpop.f32.mrb[121].mxu1  ;;  %v8806_v32 = vpop.f32.mrb[121].mxu0 }
 0x744   : > { %v8767_v61 = vadd.f32 %v8766_v1, %v8765_v4  ;;  %v8807_v55 = vadd.f32 %v8806_v32, %v8805_v58  ;;  %v8768_v23 = vpop.f32.mrb[122].mxu1  ;;  %v8808_v47 = vpop.f32.mrb[122].mxu0 }
 0x745   : > { %v8769_v28 = vpop.f32.mrb[123].mxu1  ;;  %v8809_v56 = vpop.f32.mrb[123].mxu0 }
 0x746   : > { %v4298_v17 = vadd.f32 %v8767_v61, %v4233_v37  ;;  %v8770_v59 = vadd.f32 %v8769_v28, %v8768_v23  ;;  %v8810_v36 = vadd.f32 %v8809_v56, %v8808_v47 }
 0x748   : > { %v4363_v57 = vadd.f32 %v8807_v55, %v4298_v17  ;;  %v4301_v45 = vadd.f32 %v8770_v59, %v11666_v0 }
 0x74a   : > { %v4366_v18 = vadd.f32 %v8810_v36, %v4301_v45  ;;  %v8771_v14 = vpop.f32.mrb[124].mxu1  ;;  %v8811_v16 = vpop.f32.mrb[124].mxu0 }
 0x74b   : > { %v8772_v41 = vpop.f32.mrb[125].mxu1  ;;  %v8812_v51 = vpop.f32.mrb[125].mxu0 }
 0x74c   : > { %v8773_v30 = vadd.f32 %v8772_v41, %v8771_v14  ;;  %v8813_v52 = vadd.f32 %v8812_v51, %v8811_v16  ;;  %v8774_v34 = vpop.f32.mrb[126].mxu1  ;;  %v8814_v39 = vpop.f32.mrb[126].mxu0 }
 0x74d   : > { %v8775_v4 = vpop.f32.mrb[127].mxu1  ;;  %v8815_v58 = vpop.f32.mrb[127].mxu0 }
 0x74e   : > { %v4306_v1 = vadd.f32 %v8773_v30, %v4241_v63  ;;  %v8776_v32 = vadd.f32 %v8775_v4, %v8774_v34  ;;  %v8816_v26 = vadd.f32 %v8815_v58, %v8814_v39 }
 0x750   : > { %v11678_v37 = vadd.f32 %v8813_v52, %v4306_v1  ;;  %v4309_v61 = vadd.f32 %v8776_v32, %v11669_v48 }
 0x752   : > { %v11681_v55 = vadd.f32 %v8816_v26, %v4309_v61  ;;  %v8777_v0 = vpop.f32.mrb[128].mxu1  ;;  %v8817_v23 = vpop.f32.mrb[128].mxu0 }
 0x753   : > { %v8778_v47 = vpop.f32.mrb[129].mxu1  ;;  %v8818_v28 = vpop.f32.mrb[129].mxu0 }
 0x754   : > { %v8779_v56 = vadd.f32 %v8778_v47, %v8777_v0  ;;  %v8819_v17 = vadd.f32 %v8818_v28, %v8817_v23  ;;  %v8780_v59 = vpop.f32.mrb[130].mxu1  ;;  %v8820_v36 = vpop.f32.mrb[130].mxu0 }
 0x755   : > { %v8781_v45 = vpop.f32.mrb[131].mxu1  ;;  %v8821_v14 = vpop.f32.mrb[131].mxu0 }
 0x756   : > { %v4314_v16 = vadd.f32 %v8779_v56, %v4249_v15  ;;  %v8782_v63 = vadd.f32 %v8781_v45, %v8780_v59  ;;  %v8822_v41 = vadd.f32 %v8821_v14, %v8820_v36 }
 0x758   : > { %v11683_v51 = vadd.f32 %v8819_v17, %v4314_v16  ;;  %v4317_v30 = vadd.f32 %v8782_v63, %v11672_v40 }
 0x75a   : > { %v11686_v48 = vadd.f32 %v8822_v41, %v4317_v30  ;;  %v8783_v26 = vpop.f32.mrb[132].mxu1  ;;  %v8823_v52 = vpop.f32.mrb[132].mxu0 }
 0x75b   : > { %v8784_v34 = vpop.f32.mrb[133].mxu1  ;;  %v8824_v39 = vpop.f32.mrb[133].mxu0 }
 0x75c   : > { %v8785_v4 = vadd.f32 %v8784_v34, %v8783_v26  ;;  %v8825_v58 = vadd.f32 %v8824_v39, %v8823_v52  ;;  %v8786_v1 = vpop.f32.mrb[134].mxu1  ;;  %v8826_v32 = vpop.f32.mrb[134].mxu0 }
 0x75d   : > { %v8787_v61 = vpop.f32.mrb[135].mxu1  ;;  %v8827_v0 = vpop.f32.mrb[135].mxu0 }
 0x75e   : > { %v4322_v23 = vadd.f32 %v8785_v4, %v4257_v7  ;;  %v8788_v15 = vadd.f32 %v8787_v61, %v8786_v1  ;;  %v8828_v47 = vadd.f32 %v8827_v0, %v8826_v32 }
 0x760   : > { %v11688_v28 = vadd.f32 %v8825_v58, %v4322_v23  ;;  %v4325_v56 = vadd.f32 %v8788_v15, %v11675_v8 }
 0x762   : > { %v11691_v40 = vadd.f32 %v8828_v47, %v4325_v56  ;;  %v8845_v17 = vpop.f32.mrb[136].mxu1  ;;  %v8885_v59 = vpop.f32.mrb[136].mxu0 }
 0x763   : > { %v8846_v36 = vpop.f32.mrb[137].mxu1  ;;  %v8886_v45 = vpop.f32.mrb[137].mxu0 }
 0x764   : > { %v8847_v14 = vadd.f32 %v8846_v36, %v8845_v17  ;;  %v8887_v16 = vadd.f32 %v8886_v45, %v8885_v59  ;;  %v8848_v63 = vpop.f32.mrb[138].mxu1  ;;  %v8888_v41 = vpop.f32.mrb[138].mxu0 }
 0x765   : > { %v8849_v30 = vpop.f32.mrb[139].mxu1  ;;  %v8889_v26 = vpop.f32.mrb[139].mxu0 }
 0x766   : > { %v4428_v52 = vadd.f32 %v8847_v14, %v4363_v57  ;;  %v8850_v7 = vadd.f32 %v8849_v30, %v8848_v63  ;;  %v8890_v34 = vadd.f32 %v8889_v26, %v8888_v41 }
 0x768   : > { %v4431_v39 = vadd.f32 %v8850_v7, %v4366_v18  ;;  %v4493_v4 = vadd.f32 %v8887_v16, %v4428_v52 }
 0x76a   : > { %v8851_v58 = vpop.f32.mrb[140].mxu1  ;;  %v8891_v1 = vpop.f32.mrb[140].mxu0  ;;  %v11694_v8 = vadd.f32 %v4493_v4, %v10758_v5  ;;  %v4496_v32 = vadd.f32 %v8890_v34, %v4431_v39 }
 0x76b   : > { %v8852_v61 = vpop.f32.mrb[141].mxu1  ;;  %v8892_v0 = vpop.f32.mrb[141].mxu0 }
 0x76c   : > { %v8853_v23 = vadd.f32 %v8852_v61, %v8851_v58  ;;  %v8893_v15 = vadd.f32 %v8892_v0, %v8891_v1  ;;  %v8854_v47 = vpop.f32.mrb[142].mxu1  ;;  %v8894_v56 = vpop.f32.mrb[142].mxu0  ;;  %v4531_v17 = vsel %vm841_vm1, %v11694_v8, 0.0  ;;  %v11699_v57 = vadd.f32 %v4496_v32, %v10764_v25 }
 0x76d   : > { %v8855_v18 = vpop.f32.mrb[143].mxu1  ;;  %v8895_v59 = vpop.f32.mrb[143].mxu0  ;;  %4532 = vadd.xlane.f32.xlu1 %v4531_v17 }
 0x76e   : > { %v4436_v36 = vadd.f32 %v8853_v23, %v11678_v37  ;;  %v8856_v5 = vadd.f32 %v8855_v18, %v8854_v47  ;;  %v8896_v45 = vadd.f32 %v8895_v59, %v8894_v56  ;;  %v4534_v14 = vsel %vm841_vm1, %v11699_v57, 0.0 }
 0x76f   : > { %4535 = vadd.xlane.f32.xlu0 %v4534_v14 }
 0x770   : > { %v4439_v16 = vadd.f32 %v8856_v5, %v11681_v55  ;;  %v4501_v63 = vadd.f32 %v8893_v15, %v4436_v36 }
 0x772   : > { %v8857_v41 = vpop.f32.mrb[144].mxu1  ;;  %v8897_v30 = vpop.f32.mrb[144].mxu0  ;;  %v11706_v26 = vadd.f32 %v4501_v63, %v10821_v12  ;;  %v4504_v25 = vadd.f32 %v8896_v45, %v4439_v16 }
 0x773   : > { %v8858_v52 = vpop.f32.mrb[145].mxu1  ;;  %v8898_v7 = vpop.f32.mrb[145].mxu0 }
 0x774   : > { %v8859_v34 = vadd.f32 %v8858_v52, %v8857_v41  ;;  %v8899_v39 = vadd.f32 %v8898_v7, %v8897_v30  ;;  %v8860_v37 = vpop.f32.mrb[146].mxu1  ;;  %v8900_v4 = vpop.f32.mrb[146].mxu0  ;;  %v4537_v58 = vsel %vm841_vm1, %v11706_v26, 0.0  ;;  %v4526_v1 = vadd.f32 %v4504_v25, %v10825_v13 }
 0x775   : > { %v8861_v32 = vpop.f32.mrb[147].mxu1  ;;  %v8901_v55 = vpop.f32.mrb[147].mxu0  ;;  %4538 = vadd.xlane.f32.xlu1 %v4537_v58 }
 0x776   : > { %v4444_v61 = vadd.f32 %v8859_v34, %v11683_v51  ;;  %v8862_v0 = vadd.f32 %v8861_v32, %v8860_v37  ;;  %v8902_v12 = vadd.f32 %v8901_v55, %v8900_v4  ;;  %v4540_v23 = vsel %vm841_vm1, %v4526_v1, 0.0 }
 0x777   : > { %4541 = vadd.xlane.f32.xlu0 %v4540_v23 }
 0x778   : > { %v4447_v15 = vadd.f32 %v8862_v0, %v11686_v48  ;;  %v4509_v47 = vadd.f32 %v8899_v39, %v4444_v61 }
 0x77a   : > { %v8863_v56 = vpop.f32.mrb[148].mxu1  ;;  %v8903_v17 = vpop.f32.mrb[148].mxu0  ;;  %v4527_v18 = vadd.f32 %v4509_v47, %v10849_v11  ;;  %v4512_v59 = vadd.f32 %v8902_v12, %v4447_v15 }
 0x77b   : > { %v8864_v36 = vpop.f32.mrb[149].mxu1  ;;  %v8904_v13 = vpop.f32.mrb[149].mxu0 }
 0x77c   : > { %v8865_v5 = vadd.f32 %v8864_v36, %v8863_v56  ;;  %v8905_v45 = vadd.f32 %v8904_v13, %v8903_v17  ;;  %v8866_v14 = vpop.f32.mrb[150].mxu1  ;;  %v8906_v16 = vpop.f32.mrb[150].mxu0  ;;  %v4543_v51 = vsel %vm841_vm1, %v4527_v18, 0.0  ;;  %v4528_v63 = vadd.f32 %v4512_v59, %v10845_v20 }
 0x77d   : > { %v8867_v41 = vpop.f32.mrb[151].mxu1  ;;  %v8907_v30 = vpop.f32.mrb[151].mxu0  ;;  %4544 = vadd.xlane.f32.xlu1 %v4543_v51 }
 0x77e   : > { %v4452_v48 = vadd.f32 %v8865_v5, %v11688_v28  ;;  %v8868_v25 = vadd.f32 %v8867_v41, %v8866_v14  ;;  %v8908_v52 = vadd.f32 %v8907_v30, %v8906_v16  ;;  %v4546_v11 = vsel %vm841_vm1, %v4528_v63, 0.0 }
 0x77f   : > { %4547 = vadd.xlane.f32.xlu0 %v4546_v11 }
 0x780   : > { %v4455_v7 = vadd.f32 %v8868_v25, %v11691_v40  ;;  %v4517_v34 = vadd.f32 %v8905_v45, %v4452_v48 }
 0x782   : > { %v4529_v39 = vadd.f32 %v4517_v34, %v10868_v50  ;;  %v4520_v37 = vadd.f32 %v8908_v52, %v4455_v7 }
 0x784   : > { %v4549_v4 = vsel %vm841_vm1, %v4529_v39, 0.0  ;;  %v4530_v20 = vadd.f32 %v4520_v37, %v10865_v24 }
 0x785   : > { %4550 = vadd.xlane.f32.xlu1 %v4549_v4 }
 0x786   : > { %v4552_v58 = vsel %vm841_vm1, %v4530_v20, 0.0 }
 0x787   : > { %4553 = vadd.xlane.f32.xlu0 %v4552_v58 }
 0x7fa   : > { %v4533_v28 = vpop.xlane.xlu1 %4532 }
 0x7fb   : > { %v4555_v32 = vmul.f32 0.03125, %v4533_v28 }
 0x7fc   : > { %v4536_v55 = vpop.xlane.xlu0 %4535 }
 0x7fd   : > { %v11725_v61 = vsub.f32 %v11694_v8, %v4555_v32  ;;  %v4556_v0 = vmul.f32 0.03125, %v4536_v55 }
 0x7ff   : > { %v11728_v40 = vsub.f32 %v11699_v57, %v4556_v0  ;;  %v4571_v50 = vmul.f32 %v11725_v61, %v11725_v61 }
 0x801   : > { %v4579_v12 = vsel %vm841_vm1, %v4571_v50, 0.0  ;;  %v4572_v24 = vmul.f32 %v11728_v40, %v11728_v40 }
 0x802   : > { %4580 = vadd.xlane.f32.xlu1 %v4579_v12  ;;  %v4539_v23 = vpop.xlane.xlu1 %4538 }
 0x803   : > { %v4557_v15 = vmul.f32 0.03125, %v4539_v23  ;;  %v4582_v47 = vsel %vm841_vm1, %v4572_v24, 0.0 }
 0x804   : > { %4583 = vadd.xlane.f32.xlu0 %v4582_v47  ;;  %v4542_v8 = vpop.xlane.xlu0 %4541 }
 0x805   : > { %v11737_v56 = vsub.f32 %v11706_v26, %v4557_v15  ;;  %v4558_v57 = vmul.f32 0.03125, %v4542_v8 }
 0x807   : > { %v11739_v17 = vsub.f32 %v4526_v1, %v4558_v57  ;;  %v4573_v59 = vmul.f32 %v11737_v56, %v11737_v56 }
 0x809   : > { %v4585_v36 = vsel %vm841_vm1, %v4573_v59, 0.0  ;;  %v4574_v13 = vmul.f32 %v11739_v17, %v11739_v17  ;;  %v8461_v59 = vld [vmem:[%s13682_s22] ss:$0 sm:$0xff] }
 0x80a   : > { %4586 = vadd.xlane.f32.xlu1 %v4585_v36  ;;  %v4545_v5 = vpop.xlane.xlu1 %4544 }
 0x80b   : > { %v4559_v45 = vmul.f32 0.03125, %v4545_v5  ;;  %v4588_v14 = vsel %vm841_vm1, %v4574_v13, 0.0 }
 0x80c   : > { %4589 = vadd.xlane.f32.xlu0 %v4588_v14  ;;  %v4548_v16 = vpop.xlane.xlu0 %4547 }
 0x80d   : > { %v11747_v26 = vsub.f32 %v4527_v18, %v4559_v45  ;;  %v4560_v51 = vmul.f32 0.03125, %v4548_v16 }
 0x80f   : > { %v11749_v1 = vsub.f32 %v4528_v63, %v4560_v51  ;;  %v4575_v41 = vmul.f32 %v11747_v26, %v11747_v26 }
 0x811   : > { %v4591_v30 = vsel %vm841_vm1, %v4575_v41, 0.0  ;;  %v4576_v48 = vmul.f32 %v11749_v1, %v11749_v1  ;;  %v8462_v41 = vld [vmem:[%s13683_s23] ss:$0 sm:$0xff] }
 0x812   : > { %4592 = vadd.xlane.f32.xlu1 %v4591_v30  ;;  %v4551_v25 = vpop.xlane.xlu1 %4550 }
 0x813   : > { %v4561_v52 = vmul.f32 0.03125, %v4551_v25  ;;  %v4594_v11 = vsel %vm841_vm1, %v4576_v48, 0.0 }
 0x814   : > { %4595 = vadd.xlane.f32.xlu0 %v4594_v11  ;;  %v4554_v7 = vpop.xlane.xlu0 %4553 }
 0x815   : > { %v11757_v18 = vsub.f32 %v4529_v39, %v4561_v52  ;;  %v4562_v34 = vmul.f32 0.03125, %v4554_v7 }
 0x817   : > { %v11759_v63 = vsub.f32 %v4530_v20, %v4562_v34  ;;  %v4577_v37 = vmul.f32 %v11757_v18, %v11757_v18 }
 0x819   : > { %v4597_v4 = vsel %vm841_vm1, %v4577_v37, 0.0  ;;  %v4578_v58 = vmul.f32 %v11759_v63, %v11759_v63 }
 0x81a   : > { %4598 = vadd.xlane.f32.xlu1 %v4597_v4 }
 0x81b   : > { %v4600_v28 = vsel %vm841_vm1, %v4578_v58, 0.0 }
 0x81c   : > { %4601 = vadd.xlane.f32.xlu0 %v4600_v28 }
 0x88f   : > { %v4581_v32 = vpop.xlane.xlu1 %4580 }
 0x890   : > { %v4603_v55 = vmul.f32 0.03125, %v4581_v32 }
 0x891   : > { %v4584_v0 = vpop.xlane.xlu0 %4583 }
 0x892   : > { %v4611_v39 = vadd.f32 1e-05, %v4603_v55  ;;  %v4604_v50 = vmul.f32 0.03125, %v4584_v0 }
 0x894   : > { %9897 = vrsqrt.f32 %v4611_v39  ;;  %v4612_v20 = vadd.f32 1e-05, %v4604_v50 }
 0x896   : > { %9899 = vrsqrt.f32 %v4612_v20 }
 0x897   : > { %v4587_v12 = vpop.xlane.xlu1 %4586 }
 0x898   : > { %v4605_v24 = vmul.f32 0.03125, %v4587_v12 }
 0x899   : > { %v4590_v23 = vpop.xlane.xlu0 %4589 }
 0x89a   : > { %v4613_v15 = vadd.f32 1e-05, %v4605_v24  ;;  %v4606_v47 = vmul.f32 0.03125, %v4590_v23 }
 0x89c   : > { %9901 = vrsqrt.f32 %v4613_v15  ;;  %v4614_v8 = vadd.f32 1e-05, %v4606_v47 }
 0x89e   : > { %v9898_v57 = vpop.eup %9897  ;;  %9903 = vrsqrt.f32 %v4614_v8 }
 0x89f   : > { %v4627_v36 = vmul.f32 %v9898_v57, %v11725_v61  ;;  %v4593_v13 = vpop.xlane.xlu1 %4592 }
 0x8a0   : > { %v9900_v5 = vpop.eup %9899  ;;  %v4607_v45 = vmul.f32 0.03125, %v4593_v13 }
 0x8a1   : > { %v4628_v14 = vmul.f32 %v9900_v5, %v11728_v40  ;;  %v4596_v16 = vpop.xlane.xlu0 %4595  ;;  %v4641_v51 = vmul.f32 %v8461_v59, %v4627_v36 }
 0x8a2   : > { %v4615_v30 = vadd.f32 1e-05, %v4607_v45  ;;  %v4608_v48 = vmul.f32 0.03125, %v4596_v16 }
 0x8a3   : > { %v4642_v25 = vmul.f32 %v8461_v59, %v4628_v14  ;;  %v11775_v11 = vadd.f32 %v8462_v41, %v4641_v51 }
 0x8a4   : > { %9905 = vrsqrt.f32 %v4615_v30  ;;  %v4616_v52 = vadd.f32 1e-05, %v4608_v48 }
 0x8a5   : > { %v11777_v7 = vadd.f32 %v8462_v41, %v4642_v25 }
 0x8a6   : > { %v9902_v61 = vpop.eup %9901  ;;  %9907 = vrsqrt.f32 %v4616_v52 }
 0x8a7   : > { %v4629_v34 = vmul.f32 %v9902_v61, %v11737_v56  ;;  %v4599_v40 = vpop.xlane.xlu1 %4598  ;;  %v4663_v37 = vpack.c.bf16 %v11777_v7, %v11775_v11 }
 0x8a8   : > { %v9904_v4 = vpop.eup %9903  ;;  %v4609_v58 = vmul.f32 0.03125, %v4599_v40 }
 0x8a9   : > { %v4643_v28 = vmul.f32 %v8461_v59, %v4629_v34  ;;  %v4630_v32 = vmul.f32 %v9904_v4, %v11739_v17  ;;  %v4602_v55 = vpop.xlane.xlu0 %4601  ;;  %9661 = vmatprep.mubr.msk.bf16.mxu1 %vm841_vm1, %v4663_v37 }
 0x8aa   : > { %v4617_v0 = vadd.f32 1e-05, %v4609_v58  ;;  %v4610_v39 = vmul.f32 0.03125, %v4602_v55 }
 0x8ab   : > { %v4644_v50 = vmul.f32 %v8461_v59, %v4630_v32  ;;  %v11784_v12 = vadd.f32 %v8462_v41, %v4643_v28 }
 0x8ac   : > { %9909 = vrsqrt.f32 %v4617_v0  ;;  %v4618_v20 = vadd.f32 1e-05, %v4610_v39 }
 0x8ad   : > { %v11786_v56 = vadd.f32 %v8462_v41, %v4644_v50 }
 0x8ae   : > { %v9906_v24 = vpop.eup %9905  ;;  %9911 = vrsqrt.f32 %v4618_v20 }
 0x8af   : > { %v4631_v23 = vmul.f32 %v9906_v24, %v11747_v26  ;;  %v4664_v15 = vpack.c.bf16 %v11786_v56, %v11784_v12 }
 0x8b0   : > { %v9908_v17 = vpop.eup %9907 }
 0x8b1   : > { %v4632_v47 = vmul.f32 %v9908_v17, %v11749_v1  ;;  %9662 = vmatmul.mubr.msk.bf16.vlgmr.msra.gmra.mrb[152].mxu1 %vm841_vm1, %v4664_v15  ;;  %v4645_v8 = vmul.f32 %v8461_v59, %v4631_v23 }
 0x8b2   : > { %5040 = vmatpush1.bf16.msra.mxu1 %v10687_v62 }
 0x8b3   : > { %v4646_v57 = vmul.f32 %v8461_v59, %v4632_v47  ;;  %5041 = vmatprep.subr.bf16.mxu1 %v10706_v21  ;;  %v11795_v36 = vadd.f32 %v8462_v41, %v4645_v8 }
 0x8b5   : > { %v11797_v13 = vadd.f32 %v8462_v41, %v4646_v57 }
 0x8b6   : > { %v9910_v5 = vpop.eup %9909  ;;  %5042 = vmatpush1.bf16.msra.mxu1 %v10711_v2 }
 0x8b7   : > { %v4633_v26 = vmul.f32 %v9910_v5, %v11757_v18  ;;  %v4665_v1 = vpack.c.bf16 %v11797_v13, %v11795_v36  ;;  %5185 = vmatprep.subr.bf16.mxu1 %v10739_v10  ;;  %v13850_v18 = vmov 0  }
 0x8b8   : > { %v9912_v45 = vpop.eup %9911 }
 0x8b9   : > { %v4634_v14 = vmul.f32 %v9912_v45, %v11759_v63  ;;  %9665 = vmatprep.mubr.msk.bf16.mxu1 %vm841_vm1, %v4665_v1  ;;  %v4647_v16 = vmul.f32 %v8461_v59, %v4633_v26  ;;  %v9981_v63 = vld [vmem:[%s13671_s11] ss:$0 sm:$0xff] }
 0x8bb   : > { %v4648_v51 = vmul.f32 %v8461_v59, %v4634_v14  ;;  %v11806_v30 = vadd.f32 %v8462_v41, %v4647_v16 }
 0x8bd   : > { %v11808_v48 = vadd.f32 %v8462_v41, %v4648_v51 }
 0x8bf   : > { %v4666_v25 = vpack.c.bf16 %v11808_v48, %v11806_v30 }
 0x8c1   : > { %9666 = vmatmul.mubr.msk.bf16.gmra.mrb[156].mxu1 %vm841_vm1, %v4666_v25 }
 0x8c2   : > { %5071 = vmatprep.mubr.bf16.mxu1 %v13850_v18 }
 0x984   : > { %v9663_v52 = vpop.f32.mrb[152].mxu1 }
 0x985   : > { %v4722_v61 = vadd.f32 %v9981_v63, %v9663_v52  ;;  %v4713_v34 = vpop.f32.mrb[153].mxu1 }
 0x986   : > { %v4714_v40 = vadd.f32 %v9981_v63, %v4713_v34  ;;  %v9664_v59 = vpop.f32.mrb[154].mxu1 }
 0x987   : > { %v4746_v37 = vmul.f32 %v4722_v61, %v10579_v33  ;;  %v4725_v41 = vadd.f32 %v9981_v63, %v9664_v59  ;;  %v4716_v4 = vpop.f32.mrb[155].mxu1 }
 0x988   : > { %v4744_v58 = vmul.f32 %v4714_v40, %v10572_v29  ;;  %v4717_v28 = vadd.f32 %v9981_v63, %v4716_v4 }
 0x989   : > { %v4747_v32 = vmul.f32 %v10577_v31, %v4725_v41  ;;  %v4755_v20 = vsel %vm841_vm1, %v4746_v37, 0.0 }
 0x98a   : > { %v4745_v55 = vmul.f32 %v10570_v27, %v4717_v28  ;;  %v4752_v0 = vsel %vm841_vm1, %v4744_v58, 0.0 }
 0x98b   : > { %v4757_v23 = vsel %vm841_vm1, %v4747_v32, 0.0 }
 0x98c   : > { %v4753_v39 = vsel %vm841_vm1, %v4745_v55, 0.0 }
 0x98d   : > { %v4754_v50 = vadd.f32 %v4753_v39, %v4752_v0 }
 0x98f   : > { %v4756_v24 = vadd.f32 %v4755_v20, %v4754_v50 }
 0x991   : > { %v4758_v15 = vadd.f32 %v4757_v23, %v4756_v24  ;;  %v9982_v24 = vld [vmem:[%s13675_s15] sm:$0x1] }
 0x994   : > { %v9667_v17 = vpop.f32.mrb[156].mxu1 }
 0x995   : > { %v4738_v47 = vadd.f32 %v9981_v63, %v9667_v17  ;;  %v4729_v8 = vpop.f32.mrb[157].mxu1 }
 0x996   : > { %v4730_v57 = vadd.f32 %v9981_v63, %v4729_v8  ;;  %v9668_v5 = vpop.f32.mrb[158].mxu1 }
 0x997   : > { %v4750_v26 = vmul.f32 %v4738_v47, %v10593_v53  ;;  %v4741_v1 = vadd.f32 %v9981_v63, %v9668_v5  ;;  %v4732_v45 = vpop.f32.mrb[159].mxu1 }
 0x998   : > { %v4748_v14 = vmul.f32 %v4730_v57, %v10585_v46  ;;  %v4733_v16 = vadd.f32 %v9981_v63, %v4732_v45 }
 0x999   : > { %v4751_v51 = vmul.f32 %v10589_v49, %v4741_v1  ;;  %v4763_v59 = vsel %vm841_vm1, %v4750_v26, 0.0 }
 0x99a   : > { %v4759_v25 = vsel %vm841_vm1, %v4748_v14, 0.0  ;;  %v4749_v52 = vmul.f32 %v10582_v43, %v4733_v16 }
 0x99b   : > { %v4760_v61 = vadd.f32 %v4759_v25, %v4758_v15  ;;  %v4765_v41 = vsel %vm841_vm1, %v4751_v51, 0.0 }
 0x99c   : > { %v4761_v34 = vsel %vm841_vm1, %v4749_v52, 0.0 }
 0x99d   : > { %v4762_v40 = vadd.f32 %v4761_v34, %v4760_v61 }
 0x99f   : > { %v4764_v37 = vadd.f32 %v4763_v59, %v4762_v40 }
 0x9a1   : > { %v4766_v4 = vadd.f32 %v4765_v41, %v4764_v37 }
 0x9a3   : > { %v4767_v58 = vrot.slane %v4766_v4, 4 }
 0x9a5   : > { %v4768_v28 = vadd.f32 %v4767_v58, %v4766_v4 }
 0x9a7   : > { %v4769_v32 = vrot.slane %v4768_v28, 2 }
 0x9a9   : > { %v4770_v63 = vadd.f32 %v4769_v32, %v4768_v28 }
 0x9ab   : > { %v4771_v55 = vrot.slane %v4770_v63, 1 }
 0x9ad   : > { %v4772_v0 = vadd.f32 %v4771_v55, %v4770_v63 }
 0x9af   : > { %v4773_v39 = vadd.f32 %v4772_v0, %v10608_v35 }
 0x9b1   : > { %v4774_v50 = vpack.c.bf16 %v4773_v39, %v4773_v39 }
 0x9b3   : > { %9674 = vmatmul.mubr.msk.bf16.vlgmr.msra.gmra.mrb[152].mxu0 %vm841_vm1, %v4774_v50 }
 0x9b4   : > { %4967 = vmatpush1.bf16.msra.mxu0 %v10689_v60  ;;  %4998 = vmatprep.mubr.bf16.mxu0 %v13850_v18 }
 0x9b5   : > { %4968 = vmatprep.subr.bf16.mxu0 %v10715_v6 }
 0x9b8   : > { %4969 = vmatpush1.bf16.msra.mxu0 %v10713_v3 }
 0x9b9   : > { %5112 = vmatprep.subr.bf16.mxu0 %v10732_v22 }
 0xa86   : > { %v4812_v20 = vpop.f32.mrb[152].mxu0 }
 0xa87   : > { %v4813_v23 = vadd.f32 %v9982_v24, %v4812_v20  ;;  %v9675_v15 = vpop.f32.mrb[153].mxu0 }
 0xa88   : > { %v4815_v17 = vpop.f32.mrb[154].mxu0 }
 0xa89   : > { %v4821_v47 = vrot.slane %v4813_v23, %v10457_v38  ;;  %v9676_v8 = vpop.f32.mrb[155].mxu0 }
 0xa8b   : > { %v4823_v57 = vadd.f32 %v4821_v47, %v11777_v7  ;;  %v4822_v5 = vadd.f32 %v4821_v47, %v11775_v11  ;;  %v4825_v45 = vadd.f32 %v4821_v47, %v11786_v56  ;;  %v4824_v14 = vadd.f32 %v4821_v47, %v11784_v12 }
 0xa8c   : > { %v4827_v25 = vadd.f32 %v4821_v47, %v11797_v13  ;;  %v4826_v7 = vadd.f32 %v4821_v47, %v11795_v36  ;;  %v4829_v56 = vadd.f32 %v4821_v47, %v11808_v48  ;;  %v4828_v12 = vadd.f32 %v4821_v47, %v11806_v30 }
 0xa8d   : > { %v4833_v26 = vsel %vm841_vm1, %v4823_v57, 0.0  ;;  %v4830_v1 = vsel %vm841_vm1, %v4822_v5, 0.0  ;;  %v4839_v16 = vsel %vm841_vm1, %v4825_v45, 0.0  ;;  %v4836_v51 = vsel %vm841_vm1, %v4824_v14, 0.0 }
 0xa8e   : > { %4834 = vadd.xlane.f32.xlu0 %v4833_v26  ;;  %4831 = vadd.xlane.f32.xlu1 %v4830_v1  ;;  %v4845_v11 = vsel %vm841_vm1, %v4827_v25, 0.0  ;;  %v4842_v52 = vsel %vm841_vm1, %v4826_v7, 0.0  ;;  %v4851_v61 = vsel %vm841_vm1, %v4829_v56, 0.0  ;;  %v4848_v34 = vsel %vm841_vm1, %v4828_v12, 0.0 }
 0xa92   : > { %4840 = vadd.xlane.f32.xlu0 %v4839_v16  ;;  %4837 = vadd.xlane.f32.xlu1 %v4836_v51 }
 0xa96   : > { %4846 = vadd.xlane.f32.xlu0 %v4845_v11  ;;  %4843 = vadd.xlane.f32.xlu1 %v4842_v52 }
 0xa9a   : > { %4852 = vadd.xlane.f32.xlu0 %v4851_v61  ;;  %4849 = vadd.xlane.f32.xlu1 %v4848_v34 }
 0xb1b   : > { %v4835_v13 = vpop.xlane.xlu0 %4834  ;;  %v4832_v36 = vpop.xlane.xlu1 %4831 }
 0xb1c   : > { %v4855_v40 = vmul.f32 0.03125, %v4835_v13  ;;  %v4854_v59 = vmul.f32 0.03125, %v4832_v36 }
 0xb1e   : > { %v11860_v37 = vsub.f32 %v4823_v57, %v4855_v40  ;;  %v11862_v41 = vsub.f32 %v4822_v5, %v4854_v59 }
 0xb1f   : > { %v4841_v4 = vpop.xlane.xlu0 %4840  ;;  %v4838_v48 = vpop.xlane.xlu1 %4837 }
 0xb20   : > { %v4857_v58 = vmul.f32 0.03125, %v4841_v4  ;;  %v4856_v30 = vmul.f32 0.03125, %v4838_v48  ;;  %v4871_v28 = vmul.f32 %v11860_v37, %v11860_v37  ;;  %v4870_v32 = vmul.f32 %v11862_v41, %v11862_v41 }
 0xb22   : > { %v11868_v63 = vsub.f32 %v4825_v45, %v4857_v58  ;;  %v11870_v55 = vsub.f32 %v4824_v14, %v4856_v30  ;;  %v4881_v0 = vsel %vm841_vm1, %v4871_v28, 0.0  ;;  %v4878_v39 = vsel %vm841_vm1, %v4870_v32, 0.0 }
 0xb23   : > { %4882 = vadd.xlane.f32.xlu0 %v4881_v0  ;;  %v4847_v50 = vpop.xlane.xlu0 %4846  ;;  %4879 = vadd.xlane.f32.xlu1 %v4878_v39  ;;  %v4844_v20 = vpop.xlane.xlu1 %4843 }
 0xb24   : > { %v4859_v24 = vmul.f32 0.03125, %v4847_v50  ;;  %v4858_v23 = vmul.f32 0.03125, %v4844_v20  ;;  %v4873_v15 = vmul.f32 %v11868_v63, %v11868_v63  ;;  %v4872_v17 = vmul.f32 %v11870_v55, %v11870_v55 }
 0xb26   : > { %v11878_v47 = vsub.f32 %v4827_v25, %v4859_v24  ;;  %v11880_v8 = vsub.f32 %v4826_v7, %v4858_v23  ;;  %v4887_v57 = vsel %vm841_vm1, %v4873_v15, 0.0  ;;  %v4884_v5 = vsel %vm841_vm1, %v4872_v17, 0.0 }
 0xb27   : > { %4888 = vadd.xlane.f32.xlu0 %v4887_v57  ;;  %v4853_v26 = vpop.xlane.xlu0 %4852  ;;  %4885 = vadd.xlane.f32.xlu1 %v4884_v5  ;;  %v4850_v1 = vpop.xlane.xlu1 %4849 }
 0xb28   : > { %v4861_v45 = vmul.f32 0.03125, %v4853_v26  ;;  %v4860_v14 = vmul.f32 0.03125, %v4850_v1  ;;  %v4875_v16 = vmul.f32 %v11878_v47, %v11878_v47  ;;  %v4874_v51 = vmul.f32 %v11880_v8, %v11880_v8 }
 0xb2a   : > { %v11888_v25 = vsub.f32 %v4829_v56, %v4861_v45  ;;  %v11890_v7 = vsub.f32 %v4828_v12, %v4860_v14  ;;  %v4893_v11 = vsel %vm841_vm1, %v4875_v16, 0.0  ;;  %v4890_v52 = vsel %vm841_vm1, %v4874_v51, 0.0 }
 0xb2b   : > { %4894 = vadd.xlane.f32.xlu0 %v4893_v11  ;;  %4891 = vadd.xlane.f32.xlu1 %v4890_v52  ;;  %v9983_v52 = vld [vmem:[%s13680_s20] ss:$0 sm:$0xff] }
 0xb2c   : > { %v4877_v61 = vmul.f32 %v11888_v25, %v11888_v25  ;;  %v4876_v34 = vmul.f32 %v11890_v7, %v11890_v7 }
 0xb2e   : > { %v4899_v13 = vsel %vm841_vm1, %v4877_v61, 0.0  ;;  %v4896_v36 = vsel %vm841_vm1, %v4876_v34, 0.0 }
 0xb2f   : > { %4900 = vadd.xlane.f32.xlu0 %v4899_v13  ;;  %4897 = vadd.xlane.f32.xlu1 %v4896_v36 }
 0xbb0   : > { %v4883_v56 = vpop.xlane.xlu0 %4882  ;;  %v4880_v12 = vpop.xlane.xlu1 %4879 }
 0xbb1   : > { %v4903_v40 = vmul.f32 0.03125, %v4883_v56  ;;  %v4902_v59 = vmul.f32 0.03125, %v4880_v12  ;;  %v9984_v12 = vld [vmem:[%s13681_s21] ss:$0 sm:$0xff] }
 0xbb3   : > { %v4911_v4 = vadd.f32 1e-05, %v4903_v40  ;;  %v4910_v48 = vadd.f32 1e-05, %v4902_v59 }
 0xbb4   : > { %v4889_v58 = vpop.xlane.xlu0 %4888  ;;  %v4886_v30 = vpop.xlane.xlu1 %4885 }
 0xbb5   : > { %9913 = vrsqrt.f32 %v4911_v4  ;;  %v4905_v28 = vmul.f32 0.03125, %v4889_v58  ;;  %v4904_v32 = vmul.f32 0.03125, %v4886_v30 }
 0xbb6   : > { %9915 = vrsqrt.f32 %v4910_v48 }
 0xbb7   : > { %v4913_v0 = vadd.f32 1e-05, %v4905_v28  ;;  %v4912_v39 = vadd.f32 1e-05, %v4904_v32 }
 0xbb8   : > { %v4895_v50 = vpop.xlane.xlu0 %4894  ;;  %v4892_v20 = vpop.xlane.xlu1 %4891 }
 0xbb9   : > { %9917 = vrsqrt.f32 %v4913_v0  ;;  %v4907_v24 = vmul.f32 0.03125, %v4895_v50  ;;  %v4906_v23 = vmul.f32 0.03125, %v4892_v20 }
 0xbba   : > { %9919 = vrsqrt.f32 %v4912_v39  ;;  %v13851_v39 = vld [vmem:[#allocation5_spill] sm:$0xff] }
 0xbbb   : > { %v4915_v15 = vadd.f32 1e-05, %v4907_v24  ;;  %v4914_v17 = vadd.f32 1e-05, %v4906_v23  ;;  %v13853_v23 = vld [vmem:[#allocation7_spill] sm:$0xff] }
 0xbbc   : > { %v4901_v57 = vpop.xlane.xlu0 %4900  ;;  %v4898_v5 = vpop.xlane.xlu1 %4897 }
 0xbbd   : > { %9921 = vrsqrt.f32 %v4915_v15  ;;  %v4909_v26 = vmul.f32 0.03125, %v4901_v57  ;;  %v4908_v1 = vmul.f32 0.03125, %v4898_v5 }
 0xbbe   : > { %9923 = vrsqrt.f32 %v4914_v17 }
 0xbbf   : > { %v9914_v45 = vpop.eup %9913  ;;  %v4917_v11 = vadd.f32 1e-05, %v4909_v26  ;;  %v4916_v34 = vadd.f32 1e-05, %v4908_v1 }
 0xbc0   : > { %v9916_v14 = vpop.eup %9915  ;;  %v4927_v16 = vmul.f32 %v9914_v45, %v11860_v37 }
 0xbc1   : > { %v4926_v51 = vmul.f32 %v9916_v14, %v11862_v41  ;;  %9925 = vrsqrt.f32 %v4917_v11  ;;  %v13855_v11 = vld [vmem:[#allocation9_spill] sm:$0xff] }
 0xbc2   : > { %v4935_v61 = vmul.f32 %v9983_v52, %v4927_v16  ;;  %9927 = vrsqrt.f32 %v4916_v34  ;;  %v13858_v34 = vld [vmem:[#allocation12_spill] sm:$0xff] }
 0xbc3   : > { %v9918_v13 = vpop.eup %9917  ;;  %v4934_v36 = vmul.f32 %v9983_v52, %v4926_v51  ;;  %v13854_v51 = vld [vmem:[#allocation8_spill] sm:$0xff] }
 0xbc4   : > { %v9920_v56 = vpop.eup %9919  ;;  %v11908_v40 = vadd.f32 %v9984_v12, %v4935_v61  ;;  %v4929_v37 = vmul.f32 %v9918_v13, %v11868_v63  ;;  %v13857_v61 = vld [vmem:[#allocation11_spill] sm:$0xff]  ;;  %v13859_v13 = vld [vmem:[#allocation13_spill] sm:$0xff] }
 0xbc5   : > { %v11911_v59 = vadd.f32 %v9984_v12, %v4934_v36  ;;  %v4928_v41 = vmul.f32 %v9920_v56, %v11870_v55  ;;  %v13860_v36 = vld [vmem:[#allocation14_spill] sm:$0xff]  ;;  %v13861_v56 = vld [vmem:[#allocation15_spill] sm:$0xff] }
 0xbc6   : > { %v4937_v4 = vmul.f32 %v9983_v52, %v4929_v37  ;;  %v13863_v37 = vld [vmem:[#allocation17_spill] sm:$0xff] }
 0xbc7   : > { %v9922_v48 = vpop.eup %9921  ;;  %v11916_v58 = vpack.c.bf16 %v11908_v40, %v11911_v59  ;;  %v4936_v30 = vmul.f32 %v9983_v52, %v4928_v41  ;;  %v13864_v41 = vld [vmem:[#allocation18_spill] sm:$0xff] }
 0xbc8   : > { %v9924_v28 = vpop.eup %9923  ;;  %v11922_v63 = vadd.f32 %v9984_v12, %v4937_v4  ;;  %v4931_v32 = vmul.f32 %v9922_v48, %v11878_v47  ;;  %v13865_v4 = vld [vmem:[#allocation19_spill] sm:$0xff]  ;;  %v13866_v48 = vld [vmem:[#allocation20_spill] sm:$0xff] }
 0xbc9   : > { %8468 = vmatmul.mubr.msk.bf16.vlgmr.msra.gmra.mrb[156].mxu0 %vm841_vm1, %v11916_v58  ;;  %8472 = vmatmul.mubr.msk.bf16.vlgmr.msra.gmra.mrb[160].mxu1 %vm841_vm1, %v11916_v58  ;;  %v11926_v55 = vadd.f32 %v9984_v12, %v4936_v30  ;;  %v4930_v0 = vmul.f32 %v9924_v28, %v11880_v8  ;;  %v13852_v8 = vld [vmem:[#allocation6_spill] sm:$0xff]  ;;  %v13867_v30 = vld [vmem:[#allocation21_spill] sm:$0xff]  ;;  %v9985_v28 = vld [vmem:[%s13678_s18 + $0x40] sm:$0xff]  }
 0xbca   : > { %5113 = vmatpush1.bf16.msra.mxu0 %v10730_v9  ;;  %5186 = vmatpush1.bf16.msra.mxu1 %v10737_v19  ;;  %v4939_v47 = vmul.f32 %v9983_v52, %v4931_v32  ;;  %v9986_v32 = vld [vmem:[%s13678_s18 + $0xc0] sm:$0xff]  }
 0xbcb   : > { %5008 = vmatprep.mubr.bf16.mxu0 %v13850_v18  ;;  %5081 = vmatprep.mubr.bf16.mxu1 %v13850_v18  ;;  %v9926_v50 = vpop.eup %9925  ;;  %v11938_v20 = vpack.c.bf16 %v11922_v63, %v11926_v55  ;;  %v4938_v24 = vmul.f32 %v9983_v52, %v4930_v0  ;;  %v9987_v0 = vld [vmem:[%s13678_s18] sm:$0xff]  }
 0xbcc   : > { %5114 = vmatprep.subr.bf16.mxu0 %v10785_v42  ;;  %5187 = vmatprep.subr.bf16.mxu1 %v10787_v44  ;;  %v9928_v15 = vpop.eup %9927  ;;  %v11948_v17 = vadd.f32 %v9984_v12, %v4939_v47  ;;  %v4933_v5 = vmul.f32 %v9926_v50, %v11888_v25  ;;  %v9988_v50 = vld [vmem:[%s13678_s18 + $0x80] sm:$0xff]   ;;  %v9989_v47 = vld [vmem:[%s13678_s18 + $0x48] sm:$0xff]  }
 0xbcd   : > { %v11950_v57 = vadd.f32 %v9984_v12, %v4938_v24  ;;  %v4932_v26 = vmul.f32 %v9928_v15, %v11890_v7  ;;  %v9991_v24 = vld [vmem:[%s13678_s18 + $0x8] sm:$0xff]  }
 0xbce   : > { %5115 = vmatpush1.bf16.msra.mxu0 %v10806_v54  ;;  %5188 = vmatpush1.bf16.msra.mxu1 %v13851_v39  ;;  %v4941_v45 = vmul.f32 %v9983_v52, %v4933_v5  ;;  %v9992_v15 = vld [vmem:[%s13678_s18 + $0x88] sm:$0xff]   ;;  %v9993_v5 = vld [vmem:[%s13678_s18 + $0x50] sm:$0xff]  }
 0xbcf   : > { %5258 = vmatprep.subr.bf16.mxu0 %v13852_v8  ;;  %5331 = vmatprep.subr.bf16.mxu1 %v13853_v23  ;;  %v11956_v1 = vpack.c.bf16 %v11948_v17, %v11950_v57  ;;  %v4940_v14 = vmul.f32 %v9983_v52, %v4932_v26  ;;  %v13856_v52 = vld [vmem:[#allocation10_spill] sm:$0xff]  ;;  %v9994_v26 = vld [vmem:[%s13678_s18 + $0xd0] sm:$0xff]  }
 0xbd0   : > { %v11964_v16 = vadd.f32 %v9984_v12, %v4941_v45  ;;  %v9995_v45 = vld [vmem:[%s13678_s18 + $0x10] sm:$0xff]  }
 0xbd1   : > { %8469 = vmatmul.mubr.msk.bf16.gmra.mrb[160].mxu0 %vm841_vm1, %v11938_v20  ;;  %8473 = vmatmul.mubr.msk.bf16.gmra.mrb[164].mxu1 %vm841_vm1, %v11938_v20  ;;  %v11966_v25 = vadd.f32 %v9984_v12, %v4940_v14  ;;  %v13862_v12 = vld [vmem:[#allocation16_spill] sm:$0xff]  ;;  %v9996_v14 = vld [vmem:[%s13678_s18 + $0x90] sm:$0xff]  }
 0xbd2   : > { %5018 = vmatprep.mubr.bf16.mxu0 %v13850_v18  ;;  %5091 = vmatprep.mubr.bf16.mxu1 %v13850_v18 }
 0xbd3   : > { %v11970_v7 = vpack.c.bf16 %v11964_v16, %v11966_v25 }
 0xbd9   : > { %8470 = vmatmul.mubr.msk.bf16.gmra.mrb[164].mxu0 %vm841_vm1, %v11956_v1  ;;  %8474 = vmatmul.mubr.msk.bf16.gmra.mrb[168].mxu1 %vm841_vm1, %v11956_v1 }
 0xbda   : > { %5028 = vmatprep.mubr.bf16.mxu0 %v13850_v18  ;;  %5101 = vmatprep.mubr.bf16.mxu1 %v13850_v18 }
 0xbe1   : > { %8471 = vmatmul.mubr.msk.bf16.gmra.mrb[168].mxu0 %vm841_vm1, %v11970_v7  ;;  %8475 = vmatmul.mubr.msk.bf16.gmra.mrb[172].mxu1 %vm841_vm1, %v11970_v7 }
 0xbe2   : > { %5144 = vmatprep.mubr.bf16.mxu0 %v13850_v18  ;;  %5217 = vmatprep.mubr.bf16.mxu1 %v13850_v18 }
 0xbe9   : > { %8476 = vmatmul.mubr.msk.bf16.vlgmr.msra.gmra.mrb[172].mxu0 %vm841_vm1, %v11916_v58  ;;  %8480 = vmatmul.mubr.msk.bf16.vlgmr.msra.gmra.mrb[176].mxu1 %vm841_vm1, %v11916_v58 }
 0xbea   : > { %5259 = vmatpush1.bf16.msra.mxu0 %v13854_v51  ;;  %5332 = vmatpush1.bf16.msra.mxu1 %v13855_v11 }
 0xbeb   : > { %5154 = vmatprep.mubr.bf16.mxu0 %v13850_v18  ;;  %5227 = vmatprep.mubr.bf16.mxu1 %v13850_v18 }
 0xbec   : > { %5260 = vmatprep.subr.bf16.mxu0 %v13856_v52  ;;  %5333 = vmatprep.subr.bf16.mxu1 %v13857_v61 }
 0xbee   : > { %5261 = vmatpush1.bf16.msra.mxu0 %v13858_v34  ;;  %5334 = vmatpush1.bf16.msra.mxu1 %v13859_v13 }
 0xbef   : > { %5404 = vmatprep.subr.bf16.mxu0 %v13860_v36  ;;  %5477 = vmatprep.subr.bf16.mxu1 %v13861_v56 }
 0xbf1   : > { %8477 = vmatmul.mubr.msk.bf16.gmra.mrb[176].mxu0 %vm841_vm1, %v11938_v20  ;;  %8481 = vmatmul.mubr.msk.bf16.gmra.mrb[180].mxu1 %vm841_vm1, %v11938_v20 }
 0xbf2   : > { %5164 = vmatprep.mubr.bf16.mxu0 %v13850_v18  ;;  %5237 = vmatprep.mubr.bf16.mxu1 %v13850_v18 }
 0xbf9   : > { %8478 = vmatmul.mubr.msk.bf16.gmra.mrb[180].mxu0 %vm841_vm1, %v11956_v1  ;;  %8482 = vmatmul.mubr.msk.bf16.gmra.mrb[184].mxu1 %vm841_vm1, %v11956_v1 }
 0xbfa   : > { %5174 = vmatprep.mubr.bf16.mxu0 %v13850_v18  ;;  %5247 = vmatprep.mubr.bf16.mxu1 %v13850_v18 }
 0xc01   : > { %8479 = vmatmul.mubr.msk.bf16.gmra.mrb[184].mxu0 %vm841_vm1, %v11970_v7  ;;  %8483 = vmatmul.mubr.msk.bf16.gmra.mrb[188].mxu1 %vm841_vm1, %v11970_v7 }
 0xc02   : > { %5290 = vmatprep.mubr.bf16.mxu0 %v13850_v18  ;;  %5363 = vmatprep.mubr.bf16.mxu1 %v13850_v18 }
 0xc09   : > { %8484 = vmatmul.mubr.msk.bf16.vlgmr.msra.gmra.mrb[188].mxu0 %vm841_vm1, %v11916_v58  ;;  %8488 = vmatmul.mubr.msk.bf16.vlgmr.msra.gmra.mrb[192].mxu1 %vm841_vm1, %v11916_v58 }
 0xc0a   : > { %5405 = vmatpush1.bf16.msra.mxu0 %v13862_v12  ;;  %5478 = vmatpush1.bf16.msra.mxu1 %v13863_v37 }
 0xc0b   : > { %5300 = vmatprep.mubr.bf16.mxu0 %v13850_v18  ;;  %5373 = vmatprep.mubr.bf16.mxu1 %v13850_v18 }
 0xc0c   : > { %5406 = vmatprep.subr.bf16.mxu0 %v13864_v41  ;;  %5479 = vmatprep.subr.bf16.mxu1 %v13865_v4 }
 0xc0e   : > { %5407 = vmatpush1.bf16.msra.mxu0 %v13866_v48  ;;  %5480 = vmatpush1.bf16.msra.mxu1 %v13867_v30 }
 0xc0f   : > { %8918 = vmatprep.subr.bf16.mxu0 %v9985_v28  ;;  %8958 = vmatprep.subr.bf16.mxu1 %v9986_v32  ;;  %v9997_v28 = vld [vmem:[%s13678_s18 + $0x58] sm:$0xff]  }
 0xc10   : > { %v9999_v32 = vld [vmem:[%s13678_s18 + $0x18] sm:$0xff]  }
 0xc11   : > { %8485 = vmatmul.mubr.msk.bf16.gmra.mrb[192].mxu0 %vm841_vm1, %v11938_v20  ;;  %8489 = vmatmul.mubr.msk.bf16.gmra.mrb[196].mxu1 %vm841_vm1, %v11938_v20 }
 0xc12   : > { %5310 = vmatprep.mubr.bf16.mxu0 %v13850_v18  ;;  %5383 = vmatprep.mubr.bf16.mxu1 %v13850_v18 }
 0xc19   : > { %8486 = vmatmul.mubr.msk.bf16.gmra.mrb[196].mxu0 %vm841_vm1, %v11956_v1  ;;  %8490 = vmatmul.mubr.msk.bf16.gmra.mrb[200].mxu1 %vm841_vm1, %v11956_v1 }
 0xc1a   : > { %5320 = vmatprep.mubr.bf16.mxu0 %v13850_v18  ;;  %5393 = vmatprep.mubr.bf16.mxu1 %v13850_v18 }
 0xc21   : > { %8487 = vmatmul.mubr.msk.bf16.gmra.mrb[200].mxu0 %vm841_vm1, %v11970_v7  ;;  %8491 = vmatmul.mubr.msk.bf16.gmra.mrb[204].mxu1 %vm841_vm1, %v11970_v7 }
 0xc22   : > { %5436 = vmatprep.mubr.bf16.mxu0 %v13850_v18  ;;  %5509 = vmatprep.mubr.bf16.mxu1 %v13850_v18 }
 0xc29   : > { %8492 = vmatmul.mubr.msk.bf16.vlgmr.msra.gmra.mrb[204].mxu0 %vm841_vm1, %v11916_v58  ;;  %8496 = vmatmul.mubr.msk.bf16.vlgmr.msra.gmra.mrb[208].mxu1 %vm841_vm1, %v11916_v58  ;;  %v9990_v58 = vld [vmem:[%s13678_s18 + $0xc8] sm:$0xff]  }
 0xc2a   : > { %5446 = vmatprep.mubr.bf16.mxu0 %v13850_v18  ;;  %5519 = vmatprep.mubr.bf16.mxu1 %v13850_v18 }
 0xc2b   : > { %8919 = vmatpush3.bf16.msra.mxu0 %v9987_v0  ;;  %8959 = vmatpush3.bf16.msra.mxu1 %v9988_v50  ;;  %v10000_v0 = vld [vmem:[%s13678_s18 + $0x98] sm:$0xff]   ;;  %v10001_v50 = vld [vmem:[%s13678_s18 + $0x60] sm:$0xff]  }
 0xc2c   : > { %8920 = vmatprep.subr.bf16.mxu0 %v9989_v47  ;;  %8960 = vmatprep.subr.bf16.mxu1 %v9990_v58  ;;  %v10002_v47 = vld [vmem:[%s13678_s18 + $0xe0] sm:$0xff]  }
 0xc2d   : > { %v10003_v58 = vld [vmem:[%s13678_s18 + $0x20] sm:$0xff]  }
 0xc2f   : > { %8921 = vmatpush3.bf16.msra.mxu0 %v9991_v24  ;;  %8961 = vmatpush3.bf16.msra.mxu1 %v9992_v15  ;;  %v10004_v24 = vld [vmem:[%s13678_s18 + $0xa0] sm:$0xff]   ;;  %v10005_v15 = vld [vmem:[%s13678_s18 + $0x68] sm:$0xff]  }
 0xc30   : > { %8922 = vmatprep.subr.bf16.mxu0 %v9993_v5  ;;  %8962 = vmatprep.subr.bf16.mxu1 %v9994_v26  ;;  %v10007_v5 = vld [vmem:[%s13678_s18 + $0x28] sm:$0xff]  }
 0xc31   : > { %8493 = vmatmul.mubr.msk.bf16.gmra.mrb[208].mxu0 %vm841_vm1, %v11938_v20  ;;  %8497 = vmatmul.mubr.msk.bf16.gmra.mrb[212].mxu1 %vm841_vm1, %v11938_v20  ;;  %v9998_v20 = vld [vmem:[%s13678_s18 + $0xd8] sm:$0xff]   ;;  %v10008_v26 = vld [vmem:[%s13678_s18 + $0xa8] sm:$0xff]  }
 0xc32   : > { %5456 = vmatprep.mubr.bf16.mxu0 %v13850_v18  ;;  %5529 = vmatprep.mubr.bf16.mxu1 %v13850_v18 }
 0xc33   : > { %8923 = vmatpush3.bf16.msra.mxu0 %v9995_v45  ;;  %8963 = vmatpush3.bf16.msra.mxu1 %v9996_v14  ;;  %v10009_v45 = vld [vmem:[%s13678_s18 + $0x70] sm:$0xff]  }
 0xc34   : > { %8924 = vmatprep.subr.bf16.mxu0 %v9997_v28  ;;  %8964 = vmatprep.subr.bf16.mxu1 %v9998_v20  ;;  %v10010_v14 = vld [vmem:[%s13678_s18 + $0xf0] sm:$0xff]  }
 0xc35   : > { %v10011_v28 = vld [vmem:[%s13678_s18 + $0x30] sm:$0xff]  }
 0xc36   : > { %v10012_v20 = vld [vmem:[%s13678_s18 + $0xb0] sm:$0xff]  }
 0xc37   : > { %8925 = vmatpush3.bf16.msra.mxu0 %v9999_v32  ;;  %8965 = vmatpush3.bf16.msra.mxu1 %v10000_v0  ;;  %v10013_v32 = vld [vmem:[%s13678_s18 + $0x78] sm:$0xff]  }
 0xc38   : > { %8926 = vmatprep.subr.bf16.mxu0 %v10001_v50  ;;  %8966 = vmatprep.subr.bf16.mxu1 %v10002_v47  ;;  %v10014_v0 = vld [vmem:[%s13678_s18 + $0xf8] sm:$0xff]   ;;  %v10017_v47 = vld [vmem:[%s13678_s18 + $0x140] sm:$0xff]  }
 0xc39   : > { %8494 = vmatmul.mubr.msk.bf16.gmra.mrb[212].mxu0 %vm841_vm1, %v11956_v1  ;;  %8498 = vmatmul.mubr.msk.bf16.gmra.mrb[216].mxu1 %vm841_vm1, %v11956_v1  ;;  %v10006_v1 = vld [vmem:[%s13678_s18 + $0xe8] sm:$0xff]   ;;  %v10016_v50 = vld [vmem:[%s13678_s18 + $0xb8] sm:$0xff]  }
 0xc3a   : > { %5466 = vmatprep.mubr.bf16.mxu0 %v13850_v18  ;;  %5539 = vmatprep.mubr.bf16.mxu1 %v13850_v18 }
 0xc3b   : > { %8927 = vmatpush3.bf16.msra.mxu0 %v10003_v58  ;;  %8967 = vmatpush3.bf16.msra.mxu1 %v10004_v24  ;;  %v10018_v58 = vld [vmem:[%s13678_s18 + $0x1c0] sm:$0xff]  }
 0xc3c   : > { %8928 = vmatprep.subr.bf16.mxu0 %v10005_v15  ;;  %8968 = vmatprep.subr.bf16.mxu1 %v10006_v1  ;;  %v13868_v1 = vld [vmem:[#allocation22_spill] sm:$0xff] }
 0xc3f   : > { %8929 = vmatpush3.bf16.msra.mxu0 %v10007_v5  ;;  %8969 = vmatpush3.bf16.msra.mxu1 %v10008_v26  ;;  %v13869_v26 = vld [vmem:[#allocation23_spill] sm:$0xff] }
 0xc40   : > { %8930 = vmatprep.subr.bf16.mxu0 %v10009_v45  ;;  %8970 = vmatprep.subr.bf16.mxu1 %v10010_v14 }
 0xc41   : > { %8495 = vmatmul.mubr.msk.bf16.gmra.mrb[216].mxu0 %vm841_vm1, %v11970_v7  ;;  %8499 = vmatmul.mubr.msk.bf16.gmra.mrb[220].mxu1 %vm841_vm1, %v11970_v7  ;;  %v10015_v7 = vld [vmem:[%s13678_s18 + $0x38] sm:$0xff]  }
 0xc43   : > { %8931 = vmatpush3.bf16.msra.mxu0 %v10011_v28  ;;  %8971 = vmatpush3.bf16.msra.mxu1 %v10012_v20  ;;  %v13870_v20 = vld [vmem:[#allocation24_spill] sm:$0xff] }
 0xc44   : > { %8932 = vmatprep.subr.bf16.mxu0 %v10013_v32  ;;  %8972 = vmatprep.subr.bf16.mxu1 %v10014_v0  ;;  %v13871_v0 = vld [vmem:[#allocation25_spill] sm:$0xff] }
 0xc47   : > { %8933 = vmatpush3.bf16.msra.mxu0 %v10015_v7  ;;  %8973 = vmatpush3.bf16.msra.mxu1 %v10016_v50 }
 0xc48   : > { %8998 = vmatprep.subr.bf16.mxu0 %v10017_v47  ;;  %9038 = vmatprep.subr.bf16.mxu1 %v10018_v58 }
 0xc9c   : > { %v5000_v24 = vpop.f32.mrb[156].mxu0  ;;  %v5073_v15 = vpop.f32.mrb[160].mxu1 }
 0xc9d   : > { %v5001_v5 = vadd.f32 %v5000_v24, %v13868_v1  ;;  %v5074_v45 = vadd.f32 %v5073_v15, %v13869_v26  ;;  %v5002_v14 = vpop.f32.mrb[157].mxu0  ;;  %v5075_v28 = vpop.f32.mrb[161].mxu1 }
 0xc9e   : > { %v5003_v32 = vadd.f32 %v5002_v14, %v13870_v20  ;;  %v5076_v7 = vadd.f32 %v5075_v28, %v13871_v0  ;;  %v5004_v50 = vpop.f32.mrb[158].mxu0  ;;  %v5077_v30 = vpop.f32.mrb[162].mxu1 }
 0xc9f   : > { %v5005_v47 = vadd.f32 %v5004_v50, %v13868_v1  ;;  %v5078_v48 = vadd.f32 %v5077_v30, %v13869_v26  ;;  %v5006_v4 = vpop.f32.mrb[159].mxu0  ;;  %v5079_v58 = vpop.f32.mrb[163].mxu1  ;;  %v5550_v37 = vmax.f32 %v5001_v5, 0.0  ;;  %v5552_v15 = vmax.f32 %v5074_v45, 0.0 }
 0xca0   : > { %v5007_v41 = vadd.f32 %v5006_v4, %v13870_v20  ;;  %v5080_v24 = vadd.f32 %v5079_v58, %v13871_v0  ;;  %v5551_v36 = vmax.f32 %v5003_v32, 0.0  ;;  %v5553_v14 = vmax.f32 %v5076_v7, 0.0 }
 0xca1   : > { %v5566_v12 = vmax.f32 %v5005_v47, 0.0  ;;  %v5568_v56 = vmax.f32 %v5078_v48, 0.0 }
 0xca2   : > { %v5567_v13 = vmax.f32 %v5007_v41, 0.0  ;;  %v5569_v28 = vmax.f32 %v5080_v24, 0.0 }
 0xca3   : > { %v5678_v34 = vpack.c.bf16 %v5566_v12, %v5550_v37  ;;  %v5680_v61 = vpack.c.bf16 %v5568_v56, %v5552_v15 }
 0xca4   : > { %v5010_v52 = vpop.f32.mrb[160].mxu0  ;;  %v5083_v50 = vpop.f32.mrb[164].mxu1  ;;  %v5679_v11 = vpack.c.bf16 %v5567_v13, %v5551_v36  ;;  %v5681_v30 = vpack.c.bf16 %v5569_v28, %v5553_v14 }
 0xca5   : > { %v5011_v51 = vadd.f32 %v5010_v52, %v13868_v1  ;;  %v5084_v4 = vadd.f32 %v5083_v50, %v13869_v26  ;;  %v5012_v23 = vpop.f32.mrb[161].mxu0  ;;  %v5085_v58 = vpop.f32.mrb[165].mxu1 }
 0xca6   : > { %v5013_v5 = vadd.f32 %v5012_v23, %v13870_v20  ;;  %v5086_v48 = vadd.f32 %v5085_v58, %v13871_v0  ;;  %v5014_v45 = vpop.f32.mrb[162].mxu0  ;;  %v5087_v32 = vpop.f32.mrb[166].mxu1  ;;  %5774 = vmatprep.mubr.bf16.mxu0 %v5679_v11  ;;  %5839 = vmatprep.mubr.bf16.mxu1 %v5681_v30  ;;  %v10019_v23 = vld [vmem:[%s13678_s18 + $0x100] sm:$0xff]  }
 0xca7   : > { %v5015_v56 = vadd.f32 %v5014_v45, %v13868_v1  ;;  %v5088_v12 = vadd.f32 %v5087_v32, %v13869_v26  ;;  %v5016_v13 = vpop.f32.mrb[163].mxu0  ;;  %v5089_v36 = vpop.f32.mrb[167].mxu1  ;;  %5775 = vmatmul.mubr.bf16.vlgmr.msra.gmra.mrb[220].mxu0 %v5678_v34  ;;  %5840 = vmatmul.mubr.bf16.vlgmr.msra.gmra.mrb[224].mxu1 %v5680_v61  ;;  %v10020_v11 = vld [vmem:[%s13678_s18 + $0x180] sm:$0xff]   ;;  %v5582_v41 = vmax.f32 %v5011_v51, 0.0  ;;  %v5584_v7 = vmax.f32 %v5084_v4, 0.0  ;;  %v10021_v61 = vld [vmem:[%s13678_s18 + $0x148] sm:$0xff]  }
 0xca8   : > { %v5017_v52 = vadd.f32 %v5016_v13, %v13870_v20  ;;  %v5090_v37 = vadd.f32 %v5089_v36, %v13871_v0  ;;  %8999 = vmatpush3.bf16.msra.mxu0 %v10019_v23  ;;  %9039 = vmatpush3.bf16.msra.mxu1 %v10020_v11  ;;  %v10022_v34 = vld [vmem:[%s13678_s18 + $0x1c8] sm:$0xff]   ;;  %v5583_v15 = vmax.f32 %v5013_v5, 0.0  ;;  %v5585_v14 = vmax.f32 %v5086_v48, 0.0 }
 0xca9   : > { %v5598_v47 = vmax.f32 %v5015_v56, 0.0  ;;  %v5600_v24 = vmax.f32 %v5088_v12, 0.0  ;;  %9000 = vmatprep.subr.bf16.mxu0 %v10021_v61  ;;  %9040 = vmatprep.subr.bf16.mxu1 %v10022_v34  ;;  %v10023_v4 = vld [vmem:[%s13678_s18 + $0x108] sm:$0xff]  }
 0xcaa   : > { %v5599_v28 = vmax.f32 %v5017_v52, 0.0  ;;  %v5601_v50 = vmax.f32 %v5090_v37, 0.0  ;;  %v10024_v56 = vld [vmem:[%s13678_s18 + $0x188] sm:$0xff]   ;;  %v10025_v52 = vld [vmem:[%s13678_s18 + $0x150] sm:$0xff]  }
 0xcab   : > { %v5696_v30 = vpack.c.bf16 %v5600_v24, %v5584_v7  ;;  %v5694_v58 = vpack.c.bf16 %v5598_v47, %v5582_v41  ;;  %v10026_v37 = vld [vmem:[%s13678_s18 + $0x1d0] sm:$0xff]  }
 0xcac   : > { %v5697_v51 = vpack.c.bf16 %v5601_v50, %v5585_v14  ;;  %9001 = vmatpush3.bf16.msra.mxu0 %v10023_v4  ;;  %v5020_v45 = vpop.f32.mrb[164].mxu0  ;;  %v5093_v32 = vpop.f32.mrb[168].mxu1  ;;  %9041 = vmatpush3.bf16.msra.mxu1 %v10024_v56  ;;  %v5695_v12 = vpack.c.bf16 %v5599_v28, %v5583_v15  ;;  %v10027_v28 = vld [vmem:[%s13678_s18 + $0x110] sm:$0xff]  }
 0xcad   : > { %v5021_v5 = vadd.f32 %v5020_v45, %v13868_v1  ;;  %v5094_v48 = vadd.f32 %v5093_v32, %v13869_v26  ;;  %v5022_v13 = vpop.f32.mrb[165].mxu0  ;;  %v5095_v36 = vpop.f32.mrb[169].mxu1  ;;  %9002 = vmatprep.subr.bf16.mxu0 %v10025_v52  ;;  %9042 = vmatprep.subr.bf16.mxu1 %v10026_v37  ;;  %v10028_v50 = vld [vmem:[%s13678_s18 + $0x190] sm:$0xff]  }
 0xcae   : > { %v5023_v23 = vadd.f32 %v5022_v13, %v13870_v20  ;;  %v5096_v11 = vadd.f32 %v5095_v36, %v13871_v0  ;;  %v5024_v41 = vpop.f32.mrb[166].mxu0  ;;  %v5097_v7 = vpop.f32.mrb[170].mxu1  ;;  %5782 = vmatprep.mubr.bf16.mxu0 %v5695_v12  ;;  %5847 = vmatprep.mubr.bf16.mxu1 %v5697_v51 }
 0xcaf   : > { %v5025_v47 = vadd.f32 %v5024_v41, %v13868_v1  ;;  %v5098_v24 = vadd.f32 %v5097_v7, %v13869_v26  ;;  %v5026_v61 = vpop.f32.mrb[167].mxu0  ;;  %v5099_v34 = vpop.f32.mrb[171].mxu1  ;;  %5783 = vmatmul.mubr.bf16.gmra.mrb[224].mxu0 %v5694_v58  ;;  %5848 = vmatmul.mubr.bf16.gmra.mrb[228].mxu1 %v5696_v30  ;;  %v5614_v51 = vmax.f32 %v5021_v5, 0.0  ;;  %v5616_v4 = vmax.f32 %v5094_v48, 0.0  ;;  %v10029_v30 = vld [vmem:[%s13678_s18 + $0x158] sm:$0xff]  }
 0xcb0   : > { %v5027_v15 = vadd.f32 %v5026_v61, %v13870_v20  ;;  %v5100_v14 = vadd.f32 %v5099_v34, %v13871_v0  ;;  %9003 = vmatpush3.bf16.msra.mxu0 %v10027_v28  ;;  %9043 = vmatpush3.bf16.msra.mxu1 %v10028_v50  ;;  %v10030_v58 = vld [vmem:[%s13678_s18 + $0x1d8] sm:$0xff]   ;;  %v5615_v56 = vmax.f32 %v5023_v23, 0.0  ;;  %v5617_v12 = vmax.f32 %v5096_v11, 0.0 }
 0xcb1   : > { %v5630_v45 = vmax.f32 %v5025_v47, 0.0  ;;  %v5632_v32 = vmax.f32 %v5098_v24, 0.0  ;;  %9004 = vmatprep.subr.bf16.mxu0 %v10029_v30  ;;  %9044 = vmatprep.subr.bf16.mxu1 %v10030_v58  ;;  %v10031_v41 = vld [vmem:[%s13678_s18 + $0x118] sm:$0xff]  }
 0xcb2   : > { %v5631_v13 = vmax.f32 %v5027_v15, 0.0  ;;  %v5633_v36 = vmax.f32 %v5100_v14, 0.0  ;;  %v10032_v24 = vld [vmem:[%s13678_s18 + $0x198] sm:$0xff]   ;;  %v10033_v15 = vld [vmem:[%s13678_s18 + $0x160] sm:$0xff]  }
 0xcb3   : > { %v5710_v52 = vpack.c.bf16 %v5630_v45, %v5614_v51  ;;  %v5712_v37 = vpack.c.bf16 %v5632_v32, %v5616_v4  ;;  %v10034_v14 = vld [vmem:[%s13678_s18 + $0x1e0] sm:$0xff]  }
 0xcb4   : > { %v5711_v5 = vpack.c.bf16 %v5631_v13, %v5615_v56  ;;  %v5713_v48 = vpack.c.bf16 %v5633_v36, %v5617_v12  ;;  %9005 = vmatpush3.bf16.msra.mxu0 %v10031_v41  ;;  %v5030_v7 = vpop.f32.mrb[168].mxu0  ;;  %v5103_v47 = vpop.f32.mrb[172].mxu1  ;;  %9045 = vmatpush3.bf16.msra.mxu1 %v10032_v24  ;;  %v10035_v13 = vld [vmem:[%s13678_s18 + $0x120] sm:$0xff]  }
 0xcb5   : > { %v5031_v23 = vadd.f32 %v5030_v7, %v13868_v1  ;;  %v5104_v11 = vadd.f32 %v5103_v47, %v13869_v26  ;;  %v5032_v61 = vpop.f32.mrb[169].mxu0  ;;  %v5105_v34 = vpop.f32.mrb[173].mxu1  ;;  %9006 = vmatprep.subr.bf16.mxu0 %v10033_v15  ;;  %9046 = vmatprep.subr.bf16.mxu1 %v10034_v14  ;;  %v10036_v36 = vld [vmem:[%s13678_s18 + $0x1a0] sm:$0xff]  }
 0xcb6   : > { %v5033_v28 = vadd.f32 %v5032_v61, %v13870_v20  ;;  %v5106_v50 = vadd.f32 %v5105_v34, %v13871_v0  ;;  %v5034_v51 = vpop.f32.mrb[170].mxu0  ;;  %v5107_v4 = vpop.f32.mrb[174].mxu1  ;;  %5790 = vmatprep.mubr.bf16.mxu0 %v5711_v5  ;;  %5855 = vmatprep.mubr.bf16.mxu1 %v5713_v48 }
 0xcb7   : > { %v5035_v45 = vadd.f32 %v5034_v51, %v13868_v1  ;;  %v5108_v32 = vadd.f32 %v5107_v4, %v13869_v26  ;;  %v5036_v30 = vpop.f32.mrb[171].mxu0  ;;  %v5109_v58 = vpop.f32.mrb[175].mxu1  ;;  %5791 = vmatmul.mubr.bf16.gmra.mrb[228].mxu0 %v5710_v52  ;;  %5856 = vmatmul.mubr.bf16.gmra.mrb[232].mxu1 %v5712_v37  ;;  %v5646_v5 = vmax.f32 %v5031_v23, 0.0  ;;  %v5648_v48 = vmax.f32 %v5104_v11, 0.0  ;;  %v10037_v52 = vld [vmem:[%s13678_s18 + $0x168] sm:$0xff]  }
 0xcb8   : > { %v5037_v56 = vadd.f32 %v5036_v30, %v13870_v20  ;;  %v5110_v12 = vadd.f32 %v5109_v58, %v13871_v0  ;;  %9007 = vmatpush3.bf16.msra.mxu0 %v10035_v13  ;;  %9047 = vmatpush3.bf16.msra.mxu1 %v10036_v36  ;;  %v10038_v37 = vld [vmem:[%s13678_s18 + $0x1e8] sm:$0xff]   ;;  %v5647_v47 = vmax.f32 %v5033_v28, 0.0  ;;  %v5649_v24 = vmax.f32 %v5106_v50, 0.0  ;;  %v13872_v28 = vld [vmem:[#allocation26_spill] sm:$0xff]  ;;  %v10041_v13 = vld [vmem:[%s13678_s18 + $0x170] sm:$0xff]  }
 0xcb9   : > { %v5662_v41 = vmax.f32 %v5035_v45, 0.0  ;;  %v5664_v7 = vmax.f32 %v5108_v32, 0.0  ;;  %9008 = vmatprep.subr.bf16.mxu0 %v10037_v52  ;;  %9048 = vmatprep.subr.bf16.mxu1 %v10038_v37  ;;  %v10039_v51 = vld [vmem:[%s13678_s18 + $0x128] sm:$0xff]   ;;  %v10042_v36 = vld [vmem:[%s13678_s18 + $0x1f0] sm:$0xff]  }
 0xcba   : > { %v5663_v61 = vmax.f32 %v5037_v56, 0.0  ;;  %v5665_v34 = vmax.f32 %v5110_v12, 0.0  ;;  %v10040_v32 = vld [vmem:[%s13678_s18 + $0x1a8] sm:$0xff]  }
 0xcbb   : > { %v5726_v15 = vpack.c.bf16 %v5662_v41, %v5646_v5  ;;  %v5728_v14 = vpack.c.bf16 %v5664_v7, %v5648_v48  ;;  %v13873_v30 = vld [vmem:[#allocation28_spill] sm:$0xff]  ;;  %v13874_v5 = vld [vmem:[#allocation27_spill] sm:$0xff]  ;;  %v13875_v41 = vld [vmem:[#allocation29_spill] sm:$0xff] }
 0xcbc   : > { %v5727_v23 = vpack.c.bf16 %v5663_v61, %v5647_v47  ;;  %v5729_v11 = vpack.c.bf16 %v5665_v34, %v5649_v24  ;;  %9009 = vmatpush3.bf16.msra.mxu0 %v10039_v51  ;;  %v5146_v4 = vpop.f32.mrb[172].mxu0  ;;  %v5219_v45 = vpop.f32.mrb[176].mxu1  ;;  %9049 = vmatpush3.bf16.msra.mxu1 %v10040_v32 }
 0xcbd   : > { %v5147_v50 = vadd.f32 %v5146_v4, %v13872_v28  ;;  %v5220_v58 = vadd.f32 %v5219_v45, %v13873_v30  ;;  %v5148_v56 = vpop.f32.mrb[173].mxu0  ;;  %v5221_v12 = vpop.f32.mrb[177].mxu1  ;;  %9010 = vmatprep.subr.bf16.mxu0 %v10041_v13  ;;  %9050 = vmatprep.subr.bf16.mxu1 %v10042_v36  ;;  %v10043_v45 = vld [vmem:[%s13678_s18 + $0x130] sm:$0xff]  }
 0xcbe   : > { %v5149_v48 = vadd.f32 %v5148_v56, %v13874_v5  ;;  %v5222_v7 = vadd.f32 %v5221_v12, %v13875_v41  ;;  %v5150_v52 = vpop.f32.mrb[174].mxu0  ;;  %v5223_v37 = vpop.f32.mrb[178].mxu1  ;;  %5798 = vmatprep.mubr.bf16.mxu0 %v5727_v23  ;;  %5863 = vmatprep.mubr.bf16.mxu1 %v5729_v11  ;;  %v10044_v23 = vld [vmem:[%s13678_s18 + $0x1b0] sm:$0xff]  }
 0xcbf   : > { %v5151_v47 = vadd.f32 %v5150_v52, %v13872_v28  ;;  %v5224_v24 = vadd.f32 %v5223_v37, %v13873_v30  ;;  %v5152_v61 = vpop.f32.mrb[175].mxu0  ;;  %v5225_v34 = vpop.f32.mrb[179].mxu1  ;;  %5799 = vmatmul.mubr.bf16.gmra.mrb[232].mxu0 %v5726_v15  ;;  %5864 = vmatmul.mubr.bf16.gmra.mrb[236].mxu1 %v5728_v14  ;;  %v5554_v11 = vmax.f32 %v5147_v50, 0.0  ;;  %v5556_v32 = vmax.f32 %v5220_v58, 0.0  ;;  %v10045_v15 = vld [vmem:[%s13678_s18 + $0x178] sm:$0xff]  }
 0xcc0   : > { %v5153_v51 = vadd.f32 %v5152_v61, %v13874_v5  ;;  %v5226_v4 = vadd.f32 %v5225_v34, %v13875_v41  ;;  %9011 = vmatpush3.bf16.msra.mxu0 %v10043_v45  ;;  %9051 = vmatpush3.bf16.msra.mxu1 %v10044_v23  ;;  %v10046_v14 = vld [vmem:[%s13678_s18 + $0x1f8] sm:$0xff]   ;;  %v5555_v13 = vmax.f32 %v5149_v48, 0.0  ;;  %v5557_v36 = vmax.f32 %v5222_v7, 0.0 }
 0xcc1   : > { %v5570_v56 = vmax.f32 %v5151_v47, 0.0  ;;  %v5572_v12 = vmax.f32 %v5224_v24, 0.0  ;;  %9012 = vmatprep.subr.bf16.mxu0 %v10045_v15  ;;  %9052 = vmatprep.subr.bf16.mxu1 %v10046_v14  ;;  %v10047_v47 = vld [vmem:[%s13678_s18 + $0x138] sm:$0xff]  }
 0xcc2   : > { %v5571_v52 = vmax.f32 %v5153_v51, 0.0  ;;  %v5573_v37 = vmax.f32 %v5226_v4, 0.0  ;;  %v10048_v23 = vld [vmem:[%s13678_s18 + $0x1b8] sm:$0xff]  }
 0xcc3   : > { %v5682_v61 = vpack.c.bf16 %v5570_v56, %v5554_v11  ;;  %v5684_v34 = vpack.c.bf16 %v5572_v12, %v5556_v32  ;;  %v10049_v11 = vld [vmem:[%s13678_s18 + $0x240] sm:$0xff]  }
 0xcc4   : > { %v5683_v50 = vpack.c.bf16 %v5571_v52, %v5555_v13  ;;  %v5685_v58 = vpack.c.bf16 %v5573_v37, %v5557_v36  ;;  %9013 = vmatpush3.bf16.msra.mxu0 %v10047_v47  ;;  %v5156_v24 = vpop.f32.mrb[176].mxu0  ;;  %v5229_v45 = vpop.f32.mrb[180].mxu1  ;;  %9053 = vmatpush3.bf16.msra.mxu1 %v10048_v23  ;;  %v10050_v32 = vld [vmem:[%s13678_s18 + $0x2c0] sm:$0xff]  }
 0xcc5   : > { %v5157_v48 = vadd.f32 %v5156_v24, %v13872_v28  ;;  %v5230_v7 = vadd.f32 %v5229_v45, %v13873_v30  ;;  %v5158_v51 = vpop.f32.mrb[177].mxu0  ;;  %v5231_v4 = vpop.f32.mrb[181].mxu1  ;;  %9078 = vmatprep.subr.bf16.mxu0 %v10049_v11  ;;  %9118 = vmatprep.subr.bf16.mxu1 %v10050_v32  ;;  %v10051_v45 = vld [vmem:[%s13678_s18 + $0x200] sm:$0xff]  }
 0xcc6   : > { %v5159_v56 = vadd.f32 %v5158_v51, %v13874_v5  ;;  %v5232_v12 = vadd.f32 %v5231_v4, %v13875_v41  ;;  %v5160_v15 = vpop.f32.mrb[178].mxu0  ;;  %v5233_v14 = vpop.f32.mrb[182].mxu1  ;;  %5904 = vmatprep.mubr.bf16.mxu0 %v5683_v50  ;;  %5969 = vmatprep.mubr.bf16.mxu1 %v5685_v58  ;;  %v10052_v50 = vld [vmem:[%s13678_s18 + $0x280] sm:$0xff]  }
 0xcc7   : > { %v5161_v13 = vadd.f32 %v5160_v15, %v13872_v28  ;;  %v5234_v36 = vadd.f32 %v5233_v14, %v13873_v30  ;;  %v5162_v52 = vpop.f32.mrb[179].mxu0  ;;  %v5235_v37 = vpop.f32.mrb[183].mxu1  ;;  %5905 = vmatmul.mubr.bf16.vlgmr.msra.gmra.mrb[236].mxu0 %v5682_v61  ;;  %5970 = vmatmul.mubr.bf16.vlgmr.msra.gmra.mrb[240].mxu1 %v5684_v34  ;;  %v5586_v58 = vmax.f32 %v5157_v48, 0.0  ;;  %v5588_v23 = vmax.f32 %v5230_v7, 0.0  ;;  %v10053_v61 = vld [vmem:[%s13678_s18 + $0x248] sm:$0xff]  }
 0xcc8   : > { %v5163_v47 = vadd.f32 %v5162_v52, %v13874_v5  ;;  %v5236_v24 = vadd.f32 %v5235_v37, %v13875_v41  ;;  %9079 = vmatpush3.bf16.msra.mxu0 %v10051_v45  ;;  %9119 = vmatpush3.bf16.msra.mxu1 %v10052_v50  ;;  %v10054_v34 = vld [vmem:[%s13678_s18 + $0x2c8] sm:$0xff]   ;;  %v5587_v11 = vmax.f32 %v5159_v56, 0.0  ;;  %v5589_v32 = vmax.f32 %v5232_v12, 0.0 }
 0xcc9   : > { %v5602_v51 = vmax.f32 %v5161_v13, 0.0  ;;  %v5604_v4 = vmax.f32 %v5234_v36, 0.0  ;;  %9080 = vmatprep.subr.bf16.mxu0 %v10053_v61  ;;  %9120 = vmatprep.subr.bf16.mxu1 %v10054_v34  ;;  %v10055_v13 = vld [vmem:[%s13678_s18 + $0x208] sm:$0xff]  }
 0xcca   : > { %v5603_v15 = vmax.f32 %v5163_v47, 0.0  ;;  %v5605_v14 = vmax.f32 %v5236_v24, 0.0  ;;  %v10056_v50 = vld [vmem:[%s13678_s18 + $0x288] sm:$0xff]  }
 0xccb   : > { %v5698_v52 = vpack.c.bf16 %v5602_v51, %v5586_v58  ;;  %v5700_v37 = vpack.c.bf16 %v5604_v4, %v5588_v23  ;;  %v10057_v58 = vld [vmem:[%s13678_s18 + $0x250] sm:$0xff]  }
 0xccc   : > { %v5699_v48 = vpack.c.bf16 %v5603_v15, %v5587_v11  ;;  %v5701_v7 = vpack.c.bf16 %v5605_v14, %v5589_v32  ;;  %9081 = vmatpush3.bf16.msra.mxu0 %v10055_v13  ;;  %v5166_v36 = vpop.f32.mrb[180].mxu0  ;;  %v5239_v45 = vpop.f32.mrb[184].mxu1  ;;  %9121 = vmatpush3.bf16.msra.mxu1 %v10056_v50  ;;  %v10058_v23 = vld [vmem:[%s13678_s18 + $0x2d0] sm:$0xff]  }
 0xccd   : > { %v5167_v56 = vadd.f32 %v5166_v36, %v13872_v28  ;;  %v5240_v12 = vadd.f32 %v5239_v45, %v13873_v30  ;;  %v5168_v47 = vpop.f32.mrb[181].mxu0  ;;  %v5241_v24 = vpop.f32.mrb[185].mxu1  ;;  %9082 = vmatprep.subr.bf16.mxu0 %v10057_v58  ;;  %9122 = vmatprep.subr.bf16.mxu1 %v10058_v23  ;;  %v10059_v45 = vld [vmem:[%s13678_s18 + $0x210] sm:$0xff]  }
 0xcce   : > { %v5169_v51 = vadd.f32 %v5168_v47, %v13874_v5  ;;  %v5242_v4 = vadd.f32 %v5241_v24, %v13875_v41  ;;  %v5170_v61 = vpop.f32.mrb[182].mxu0  ;;  %v5243_v34 = vpop.f32.mrb[186].mxu1  ;;  %5912 = vmatprep.mubr.bf16.mxu0 %v5699_v48  ;;  %5977 = vmatprep.mubr.bf16.mxu1 %v5701_v7  ;;  %v10060_v48 = vld [vmem:[%s13678_s18 + $0x290] sm:$0xff]  }
 0xccf   : > { %v5171_v11 = vadd.f32 %v5170_v61, %v13872_v28  ;;  %v5244_v32 = vadd.f32 %v5243_v34, %v13873_v30  ;;  %v5172_v15 = vpop.f32.mrb[183].mxu0  ;;  %v5245_v14 = vpop.f32.mrb[187].mxu1  ;;  %5913 = vmatmul.mubr.bf16.gmra.mrb[240].mxu0 %v5698_v52  ;;  %5978 = vmatmul.mubr.bf16.gmra.mrb[244].mxu1 %v5700_v37  ;;  %v5618_v7 = vmax.f32 %v5167_v56, 0.0  ;;  %v5620_v50 = vmax.f32 %v5240_v12, 0.0  ;;  %v10061_v52 = vld [vmem:[%s13678_s18 + $0x258] sm:$0xff]  }
 0xcd0   : > { %v5173_v13 = vadd.f32 %v5172_v15, %v13874_v5  ;;  %v5246_v36 = vadd.f32 %v5245_v14, %v13875_v41  ;;  %9083 = vmatpush3.bf16.msra.mxu0 %v10059_v45  ;;  %9123 = vmatpush3.bf16.msra.mxu1 %v10060_v48  ;;  %v10062_v37 = vld [vmem:[%s13678_s18 + $0x2d8] sm:$0xff]   ;;  %v5619_v58 = vmax.f32 %v5169_v51, 0.0  ;;  %v5621_v23 = vmax.f32 %v5242_v4, 0.0 }
 0xcd1   : > { %v5634_v47 = vmax.f32 %v5171_v11, 0.0  ;;  %v5636_v24 = vmax.f32 %v5244_v32, 0.0  ;;  %9084 = vmatprep.subr.bf16.mxu0 %v10061_v52  ;;  %9124 = vmatprep.subr.bf16.mxu1 %v10062_v37  ;;  %v10063_v11 = vld [vmem:[%s13678_s18 + $0x218] sm:$0xff]  }
 0xcd2   : > { %v5635_v61 = vmax.f32 %v5173_v13, 0.0  ;;  %v5637_v34 = vmax.f32 %v5246_v36, 0.0  ;;  %v10064_v48 = vld [vmem:[%s13678_s18 + $0x298] sm:$0xff]  }
 0xcd3   : > { %v5714_v15 = vpack.c.bf16 %v5634_v47, %v5618_v7  ;;  %v5716_v14 = vpack.c.bf16 %v5636_v24, %v5620_v50  ;;  %v10065_v7 = vld [vmem:[%s13678_s18 + $0x260] sm:$0xff]  }
 0xcd4   : > { %v5715_v56 = vpack.c.bf16 %v5635_v61, %v5619_v58  ;;  %v5717_v12 = vpack.c.bf16 %v5637_v34, %v5621_v23  ;;  %9085 = vmatpush3.bf16.msra.mxu0 %v10063_v11  ;;  %v5176_v32 = vpop.f32.mrb[184].mxu0  ;;  %v5249_v45 = vpop.f32.mrb[188].mxu1  ;;  %9125 = vmatpush3.bf16.msra.mxu1 %v10064_v48  ;;  %v10066_v50 = vld [vmem:[%s13678_s18 + $0x2e0] sm:$0xff]  }
 0xcd5   : > { %v5177_v51 = vadd.f32 %v5176_v32, %v13872_v28  ;;  %v5250_v4 = vadd.f32 %v5249_v45, %v13873_v30  ;;  %v5178_v13 = vpop.f32.mrb[185].mxu0  ;;  %v5251_v36 = vpop.f32.mrb[189].mxu1  ;;  %9086 = vmatprep.subr.bf16.mxu0 %v10065_v7  ;;  %9126 = vmatprep.subr.bf16.mxu1 %v10066_v50  ;;  %v10067_v45 = vld [vmem:[%s13678_s18 + $0x220] sm:$0xff]  }
 0xcd6   : > { %v5179_v47 = vadd.f32 %v5178_v13, %v13874_v5  ;;  %v5252_v24 = vadd.f32 %v5251_v36, %v13875_v41  ;;  %v5180_v52 = vpop.f32.mrb[186].mxu0  ;;  %v5253_v37 = vpop.f32.mrb[190].mxu1  ;;  %5920 = vmatprep.mubr.bf16.mxu0 %v5715_v56  ;;  %5985 = vmatprep.mubr.bf16.mxu1 %v5717_v12  ;;  %v10068_v56 = vld [vmem:[%s13678_s18 + $0x2a0] sm:$0xff]  }
 0xcd7   : > { %v5181_v58 = vadd.f32 %v5180_v52, %v13872_v28  ;;  %v5254_v23 = vadd.f32 %v5253_v37, %v13873_v30  ;;  %v5182_v61 = vpop.f32.mrb[187].mxu0  ;;  %v5255_v34 = vpop.f32.mrb[191].mxu1  ;;  %5921 = vmatmul.mubr.bf16.gmra.mrb[244].mxu0 %v5714_v15  ;;  %5986 = vmatmul.mubr.bf16.gmra.mrb[248].mxu1 %v5716_v14  ;;  %v5650_v12 = vmax.f32 %v5177_v51, 0.0  ;;  %v5652_v48 = vmax.f32 %v5250_v4, 0.0  ;;  %v10069_v15 = vld [vmem:[%s13678_s18 + $0x268] sm:$0xff]   ;;  %v10080_v30 = vld [vmem:[%s13678_s18 + $0x2b8] sm:$0xff]  }
 0xcd8   : > { %v5183_v11 = vadd.f32 %v5182_v61, %v13874_v5  ;;  %v5256_v32 = vadd.f32 %v5255_v34, %v13875_v41  ;;  %9087 = vmatpush3.bf16.msra.mxu0 %v10067_v45  ;;  %9127 = vmatpush3.bf16.msra.mxu1 %v10068_v56  ;;  %v10070_v14 = vld [vmem:[%s13678_s18 + $0x2e8] sm:$0xff]   ;;  %v5651_v7 = vmax.f32 %v5179_v47, 0.0  ;;  %v5653_v50 = vmax.f32 %v5252_v24, 0.0  ;;  %v13876_v47 = vld [vmem:[#allocation30_spill] sm:$0xff] }
 0xcd9   : > { %v5666_v13 = vmax.f32 %v5181_v58, 0.0  ;;  %v5668_v36 = vmax.f32 %v5254_v23, 0.0  ;;  %9088 = vmatprep.subr.bf16.mxu0 %v10069_v15  ;;  %9128 = vmatprep.subr.bf16.mxu1 %v10070_v14  ;;  %v10071_v58 = vld [vmem:[%s13678_s18 + $0x228] sm:$0xff]   ;;  %v13878_v15 = vld [vmem:[#allocation31_spill] sm:$0xff] }
 0xcda   : > { %v5667_v52 = vmax.f32 %v5183_v11, 0.0  ;;  %v5669_v37 = vmax.f32 %v5256_v32, 0.0  ;;  %v10072_v56 = vld [vmem:[%s13678_s18 + $0x2a8] sm:$0xff]  }
 0xcdb   : > { %v5730_v61 = vpack.c.bf16 %v5666_v13, %v5650_v12  ;;  %v5732_v34 = vpack.c.bf16 %v5668_v36, %v5652_v48  ;;  %v13877_v11 = vld [vmem:[#allocation32_spill] sm:$0xff]  ;;  %v10073_v13 = vld [vmem:[%s13678_s18 + $0x270] sm:$0xff]  }
 0xcdc   : > { %v5731_v51 = vpack.c.bf16 %v5667_v52, %v5651_v7  ;;  %v5733_v4 = vpack.c.bf16 %v5669_v37, %v5653_v50  ;;  %9089 = vmatpush3.bf16.msra.mxu0 %v10071_v58  ;;  %v5292_v23 = vpop.f32.mrb[188].mxu0  ;;  %v5365_v45 = vpop.f32.mrb[192].mxu1  ;;  %9129 = vmatpush3.bf16.msra.mxu1 %v10072_v56  ;;  %v10074_v36 = vld [vmem:[%s13678_s18 + $0x2f0] sm:$0xff]  }
 0xcdd   : > { %v5293_v24 = vadd.f32 %v5292_v23, %v13876_v47  ;;  %v5366_v32 = vadd.f32 %v5365_v45, %v13877_v11  ;;  %v5294_v12 = vpop.f32.mrb[189].mxu0  ;;  %v5367_v48 = vpop.f32.mrb[193].mxu1  ;;  %9090 = vmatprep.subr.bf16.mxu0 %v10073_v13  ;;  %9130 = vmatprep.subr.bf16.mxu1 %v10074_v36  ;;  %v13879_v7 = vld [vmem:[#allocation33_spill] sm:$0xff] }
 0xcde   : > { %v5295_v14 = vadd.f32 %v5294_v12, %v13878_v15  ;;  %v5368_v50 = vadd.f32 %v5367_v48, %v13879_v7  ;;  %v5296_v52 = vpop.f32.mrb[190].mxu0  ;;  %v5369_v37 = vpop.f32.mrb[194].mxu1  ;;  %5928 = vmatprep.mubr.bf16.mxu0 %v5731_v51  ;;  %5993 = vmatprep.mubr.bf16.mxu1 %v5733_v4  ;;  %v10075_v12 = vld [vmem:[%s13678_s18 + $0x230] sm:$0xff]  }
 0xcdf   : > { %v5297_v58 = vadd.f32 %v5296_v52, %v13876_v47  ;;  %v5370_v23 = vadd.f32 %v5369_v37, %v13877_v11  ;;  %v5298_v45 = vpop.f32.mrb[191].mxu0  ;;  %v5371_v56 = vpop.f32.mrb[195].mxu1  ;;  %5929 = vmatmul.mubr.bf16.gmra.mrb[248].mxu0 %v5730_v61  ;;  %5994 = vmatmul.mubr.bf16.gmra.mrb[252].mxu1 %v5732_v34  ;;  %v10076_v51 = vld [vmem:[%s13678_s18 + $0x2b0] sm:$0xff]   ;;  %v5558_v4 = vmax.f32 %v5293_v24, 0.0  ;;  %v5560_v48 = vmax.f32 %v5366_v32, 0.0  ;;  %v10077_v61 = vld [vmem:[%s13678_s18 + $0x278] sm:$0xff]  }
 0xce0   : > { %v5299_v13 = vadd.f32 %v5298_v45, %v13878_v15  ;;  %v5372_v36 = vadd.f32 %v5371_v56, %v13879_v7  ;;  %9091 = vmatpush3.bf16.msra.mxu0 %v10075_v12  ;;  %9131 = vmatpush3.bf16.msra.mxu1 %v10076_v51  ;;  %v10078_v34 = vld [vmem:[%s13678_s18 + $0x2f8] sm:$0xff]   ;;  %v5559_v45 = vmax.f32 %v5295_v14, 0.0  ;;  %v5561_v56 = vmax.f32 %v5368_v50, 0.0 }
 0xce1   : > { %v5574_v52 = vmax.f32 %v5297_v58, 0.0  ;;  %v5576_v37 = vmax.f32 %v5370_v23, 0.0  ;;  %9092 = vmatprep.subr.bf16.mxu0 %v10077_v61  ;;  %9132 = vmatprep.subr.bf16.mxu1 %v10078_v34  ;;  %v10079_v58 = vld [vmem:[%s13678_s18 + $0x238] sm:$0xff]  }
 0xce2   : > { %v5575_v12 = vmax.f32 %v5299_v13, 0.0  ;;  %v5577_v41 = vmax.f32 %v5372_v36, 0.0 }
 0xce3   : > { %v5686_v5 = vpack.c.bf16 %v5574_v52, %v5558_v4  ;;  %v5688_v51 = vpack.c.bf16 %v5576_v37, %v5560_v48  ;;  %v10082_v4 = vld [vmem:[%s13678_s18 + $0x3c0] sm:$0xff]  }
 0xce4   : > { %v5687_v24 = vpack.c.bf16 %v5575_v12, %v5559_v45  ;;  %v5689_v32 = vpack.c.bf16 %v5577_v41, %v5561_v56  ;;  %9093 = vmatpush3.bf16.msra.mxu0 %v10079_v58  ;;  %v5302_v23 = vpop.f32.mrb[192].mxu0  ;;  %v5375_v61 = vpop.f32.mrb[196].mxu1  ;;  %9133 = vmatpush3.bf16.msra.mxu1 %v10080_v30  ;;  %v10081_v41 = vld [vmem:[%s13678_s18 + $0x340] sm:$0xff]  }
 0xce5   : > { %v5303_v14 = vadd.f32 %v5302_v23, %v13876_v47  ;;  %v5376_v50 = vadd.f32 %v5375_v61, %v13877_v11  ;;  %v5304_v13 = vpop.f32.mrb[193].mxu0  ;;  %v5377_v36 = vpop.f32.mrb[197].mxu1  ;;  %9158 = vmatprep.subr.bf16.mxu0 %v10081_v41  ;;  %9198 = vmatprep.subr.bf16.mxu1 %v10082_v4  ;;  %v10083_v61 = vld [vmem:[%s13678_s18 + $0x300] sm:$0xff]  }
 0xce6   : > { %v5305_v48 = vadd.f32 %v5304_v13, %v13878_v15  ;;  %v5378_v30 = vadd.f32 %v5377_v36, %v13879_v7  ;;  %v5306_v52 = vpop.f32.mrb[194].mxu0  ;;  %v5379_v37 = vpop.f32.mrb[198].mxu1  ;;  %6034 = vmatprep.mubr.bf16.mxu0 %v5687_v24  ;;  %6099 = vmatprep.mubr.bf16.mxu1 %v5689_v32  ;;  %v10084_v24 = vld [vmem:[%s13678_s18 + $0x380] sm:$0xff]  }
 0xce7   : > { %v5307_v34 = vadd.f32 %v5306_v52, %v13876_v47  ;;  %v5380_v45 = vadd.f32 %v5379_v37, %v13877_v11  ;;  %v5308_v56 = vpop.f32.mrb[195].mxu0  ;;  %v5381_v12 = vpop.f32.mrb[199].mxu1  ;;  %6035 = vmatmul.mubr.bf16.vlgmr.msra.gmra.mrb[252].mxu0 %v5686_v5  ;;  %6100 = vmatmul.mubr.bf16.vlgmr.msra.gmra.mrb[0].mxu1 %v5688_v51  ;;  %v5590_v32 = vmax.f32 %v5303_v14, 0.0  ;;  %v5592_v13 = vmax.f32 %v5376_v50, 0.0  ;;  %v10085_v5 = vld [vmem:[%s13678_s18 + $0x348] sm:$0xff]  }
 0xce8   : > { %v5309_v58 = vadd.f32 %v5308_v56, %v13878_v15  ;;  %v5382_v23 = vadd.f32 %v5381_v12, %v13879_v7  ;;  %9159 = vmatpush3.bf16.msra.mxu0 %v10083_v61  ;;  %9199 = vmatpush3.bf16.msra.mxu1 %v10084_v24  ;;  %v10086_v51 = vld [vmem:[%s13678_s18 + $0x3c8] sm:$0xff]   ;;  %v5591_v4 = vmax.f32 %v5305_v48, 0.0  ;;  %v5593_v52 = vmax.f32 %v5378_v30, 0.0 }
 0xce9   : > { %v5606_v36 = vmax.f32 %v5307_v34, 0.0  ;;  %v5608_v41 = vmax.f32 %v5380_v45, 0.0  ;;  %9160 = vmatprep.subr.bf16.mxu0 %v10085_v5  ;;  %9200 = vmatprep.subr.bf16.mxu1 %v10086_v51  ;;  %v10087_v34 = vld [vmem:[%s13678_s18 + $0x308] sm:$0xff]  }
 0xcea   : > { %v5607_v37 = vmax.f32 %v5309_v58, 0.0  ;;  %v5609_v56 = vmax.f32 %v5382_v23, 0.0  ;;  %v10088_v5 = vld [vmem:[%s13678_s18 + $0x388] sm:$0xff]  }
 0xceb   : > { %v5702_v12 = vpack.c.bf16 %v5606_v36, %v5590_v32  ;;  %v5704_v61 = vpack.c.bf16 %v5608_v41, %v5592_v13  ;;  %v10089_v32 = vld [vmem:[%s13678_s18 + $0x350] sm:$0xff]  }
 0xcec   : > { %v5703_v14 = vpack.c.bf16 %v5607_v37, %v5591_v4  ;;  %v5705_v50 = vpack.c.bf16 %v5609_v56, %v5593_v52  ;;  %9161 = vmatpush3.bf16.msra.mxu0 %v10087_v34  ;;  %v5312_v45 = vpop.f32.mrb[196].mxu0  ;;  %v5385_v24 = vpop.f32.mrb[200].mxu1  ;;  %9201 = vmatpush3.bf16.msra.mxu1 %v10088_v5  ;;  %v10090_v13 = vld [vmem:[%s13678_s18 + $0x3d0] sm:$0xff]  }
 0xced   : > { %v5313_v48 = vadd.f32 %v5312_v45, %v13876_v47  ;;  %v5386_v30 = vadd.f32 %v5385_v24, %v13877_v11  ;;  %v5314_v58 = vpop.f32.mrb[197].mxu0  ;;  %v5387_v23 = vpop.f32.mrb[201].mxu1  ;;  %9162 = vmatprep.subr.bf16.mxu0 %v10089_v32  ;;  %9202 = vmatprep.subr.bf16.mxu1 %v10090_v13  ;;  %v10091_v5 = vld [vmem:[%s13678_s18 + $0x310] sm:$0xff]  }
 0xcee   : > { %v5315_v36 = vadd.f32 %v5314_v58, %v13878_v15  ;;  %v5388_v41 = vadd.f32 %v5387_v23, %v13879_v7  ;;  %v5316_v51 = vpop.f32.mrb[198].mxu0  ;;  %v5389_v4 = vpop.f32.mrb[202].mxu1  ;;  %6042 = vmatprep.mubr.bf16.mxu0 %v5703_v14  ;;  %6107 = vmatprep.mubr.bf16.mxu1 %v5705_v50  ;;  %v10092_v14 = vld [vmem:[%s13678_s18 + $0x390] sm:$0xff]  }
 0xcef   : > { %v5317_v52 = vadd.f32 %v5316_v51, %v13876_v47  ;;  %v5390_v37 = vadd.f32 %v5389_v4, %v13877_v11  ;;  %v5318_v56 = vpop.f32.mrb[199].mxu0  ;;  %v5391_v34 = vpop.f32.mrb[203].mxu1  ;;  %6043 = vmatmul.mubr.bf16.gmra.mrb[0].mxu0 %v5702_v12  ;;  %6108 = vmatmul.mubr.bf16.gmra.mrb[4].mxu1 %v5704_v61  ;;  %v5622_v50 = vmax.f32 %v5313_v48, 0.0  ;;  %v5624_v58 = vmax.f32 %v5386_v30, 0.0  ;;  %v10093_v12 = vld [vmem:[%s13678_s18 + $0x358] sm:$0xff]  }
 0xcf0   : > { %v5319_v45 = vadd.f32 %v5318_v56, %v13878_v15  ;;  %v5392_v24 = vadd.f32 %v5391_v34, %v13879_v7  ;;  %9163 = vmatpush3.bf16.msra.mxu0 %v10091_v5  ;;  %9203 = vmatpush3.bf16.msra.mxu1 %v10092_v14  ;;  %v10094_v61 = vld [vmem:[%s13678_s18 + $0x3d8] sm:$0xff]   ;;  %v5623_v13 = vmax.f32 %v5315_v36, 0.0  ;;  %v5625_v51 = vmax.f32 %v5388_v41, 0.0 }
 0xcf1   : > { %v5638_v23 = vmax.f32 %v5317_v52, 0.0  ;;  %v5640_v32 = vmax.f32 %v5390_v37, 0.0  ;;  %9164 = vmatprep.subr.bf16.mxu0 %v10093_v12  ;;  %9204 = vmatprep.subr.bf16.mxu1 %v10094_v61  ;;  %v10095_v52 = vld [vmem:[%s13678_s18 + $0x318] sm:$0xff]  }
 0xcf2   : > { %v5639_v4 = vmax.f32 %v5319_v45, 0.0  ;;  %v5641_v56 = vmax.f32 %v5392_v24, 0.0  ;;  %v10096_v12 = vld [vmem:[%s13678_s18 + $0x398] sm:$0xff]  }
 0xcf3   : > { %v5718_v34 = vpack.c.bf16 %v5638_v23, %v5622_v50  ;;  %v5720_v5 = vpack.c.bf16 %v5640_v32, %v5624_v58  ;;  %v10097_v50 = vld [vmem:[%s13678_s18 + $0x360] sm:$0xff]  }
 0xcf4   : > { %v5719_v48 = vpack.c.bf16 %v5639_v4, %v5623_v13  ;;  %v5721_v30 = vpack.c.bf16 %v5641_v56, %v5625_v51  ;;  %9165 = vmatpush3.bf16.msra.mxu0 %v10095_v52  ;;  %v5322_v37 = vpop.f32.mrb[200].mxu0  ;;  %v5395_v14 = vpop.f32.mrb[204].mxu1  ;;  %9205 = vmatpush3.bf16.msra.mxu1 %v10096_v12  ;;  %v10098_v58 = vld [vmem:[%s13678_s18 + $0x3e0] sm:$0xff]  }
 0xcf5   : > { %v5323_v36 = vadd.f32 %v5322_v37, %v13876_v47  ;;  %v5396_v41 = vadd.f32 %v5395_v14, %v13877_v11  ;;  %v5324_v45 = vpop.f32.mrb[201].mxu0  ;;  %v5397_v24 = vpop.f32.mrb[205].mxu1  ;;  %9166 = vmatprep.subr.bf16.mxu0 %v10097_v50  ;;  %9206 = vmatprep.subr.bf16.mxu1 %v10098_v58  ;;  %v10099_v12 = vld [vmem:[%s13678_s18 + $0x320] sm:$0xff]  }
 0xcf6   : > { %v5325_v23 = vadd.f32 %v5324_v45, %v13878_v15  ;;  %v5398_v32 = vadd.f32 %v5397_v24, %v13879_v7  ;;  %v5326_v61 = vpop.f32.mrb[202].mxu0  ;;  %v5399_v13 = vpop.f32.mrb[206].mxu1  ;;  %6050 = vmatprep.mubr.bf16.mxu0 %v5719_v48  ;;  %6115 = vmatprep.mubr.bf16.mxu1 %v5721_v30  ;;  %v10100_v48 = vld [vmem:[%s13678_s18 + $0x3a0] sm:$0xff]  }
 0xcf7   : > { %v5327_v51 = vadd.f32 %v5326_v61, %v13876_v47  ;;  %v5400_v4 = vadd.f32 %v5399_v13, %v13877_v11  ;;  %v5328_v56 = vpop.f32.mrb[203].mxu0  ;;  %v5401_v52 = vpop.f32.mrb[207].mxu1  ;;  %6051 = vmatmul.mubr.bf16.gmra.mrb[4].mxu0 %v5718_v34  ;;  %6116 = vmatmul.mubr.bf16.gmra.mrb[8].mxu1 %v5720_v5  ;;  %v5654_v30 = vmax.f32 %v5323_v36, 0.0  ;;  %v5656_v45 = vmax.f32 %v5396_v41, 0.0  ;;  %v10101_v34 = vld [vmem:[%s13678_s18 + $0x368] sm:$0xff]   ;;  %v10112_v47 = vld [vmem:[%s13678_s18 + $0x3b8] sm:$0xff]  }
 0xcf8   : > { %v5329_v37 = vadd.f32 %v5328_v56, %v13878_v15  ;;  %v5402_v14 = vadd.f32 %v5401_v52, %v13879_v7  ;;  %9167 = vmatpush3.bf16.msra.mxu0 %v10099_v12  ;;  %9207 = vmatpush3.bf16.msra.mxu1 %v10100_v48  ;;  %v10102_v5 = vld [vmem:[%s13678_s18 + $0x3e8] sm:$0xff]   ;;  %v5655_v58 = vmax.f32 %v5325_v23, 0.0  ;;  %v5657_v61 = vmax.f32 %v5398_v32, 0.0  ;;  %v13880_v23 = vld [vmem:[#allocation34_spill] sm:$0xff] }
 0xcf9   : > { %v5670_v24 = vmax.f32 %v5327_v51, 0.0  ;;  %v5672_v50 = vmax.f32 %v5400_v4, 0.0  ;;  %9168 = vmatprep.subr.bf16.mxu0 %v10101_v34  ;;  %9208 = vmatprep.subr.bf16.mxu1 %v10102_v5  ;;  %v10103_v51 = vld [vmem:[%s13678_s18 + $0x328] sm:$0xff]   ;;  %v13882_v5 = vld [vmem:[#allocation35_spill] sm:$0xff] }
 0xcfa   : > { %v5671_v13 = vmax.f32 %v5329_v37, 0.0  ;;  %v5673_v56 = vmax.f32 %v5402_v14, 0.0  ;;  %v10104_v34 = vld [vmem:[%s13678_s18 + $0x3a8] sm:$0xff]  }
 0xcfb   : > { %v5734_v52 = vpack.c.bf16 %v5670_v24, %v5654_v30  ;;  %v5736_v12 = vpack.c.bf16 %v5672_v50, %v5656_v45  ;;  %v13881_v37 = vld [vmem:[#allocation36_spill] sm:$0xff]  ;;  %v10105_v24 = vld [vmem:[%s13678_s18 + $0x370] sm:$0xff]  }
 0xcfc   : > { %v5735_v36 = vpack.c.bf16 %v5671_v13, %v5655_v58  ;;  %v5737_v41 = vpack.c.bf16 %v5673_v56, %v5657_v61  ;;  %9169 = vmatpush3.bf16.msra.mxu0 %v10103_v51  ;;  %v5438_v4 = vpop.f32.mrb[204].mxu0  ;;  %v5511_v48 = vpop.f32.mrb[208].mxu1  ;;  %9209 = vmatpush3.bf16.msra.mxu1 %v10104_v34  ;;  %v10106_v50 = vld [vmem:[%s13678_s18 + $0x3f0] sm:$0xff]  }
 0xcfd   : > { %v5439_v32 = vadd.f32 %v5438_v4, %v13880_v23  ;;  %v5512_v14 = vadd.f32 %v5511_v48, %v13881_v37  ;;  %v5440_v30 = vpop.f32.mrb[205].mxu0  ;;  %v5513_v45 = vpop.f32.mrb[209].mxu1  ;;  %9170 = vmatprep.subr.bf16.mxu0 %v10105_v24  ;;  %9210 = vmatprep.subr.bf16.mxu1 %v10106_v50  ;;  %v13883_v61 = vld [vmem:[#allocation37_spill] sm:$0xff] }
 0xcfe   : > { %v5441_v58 = vadd.f32 %v5440_v30, %v13882_v5  ;;  %v5514_v13 = vadd.f32 %v5513_v45, %v13883_v61  ;;  %v5442_v56 = vpop.f32.mrb[206].mxu0  ;;  %v5515_v51 = vpop.f32.mrb[210].mxu1  ;;  %6058 = vmatprep.mubr.bf16.mxu0 %v5735_v36  ;;  %6123 = vmatprep.mubr.bf16.mxu1 %v5737_v41  ;;  %v10107_v30 = vld [vmem:[%s13678_s18 + $0x330] sm:$0xff]  }
 0xcff   : > { %v5443_v4 = vadd.f32 %v5442_v56, %v13880_v23  ;;  %v5516_v48 = vadd.f32 %v5515_v51, %v13881_v37  ;;  %v5444_v34 = vpop.f32.mrb[207].mxu0  ;;  %v5517_v7 = vpop.f32.mrb[211].mxu1  ;;  %6059 = vmatmul.mubr.bf16.gmra.mrb[8].mxu0 %v5734_v52  ;;  %6124 = vmatmul.mubr.bf16.gmra.mrb[12].mxu1 %v5736_v12  ;;  %v10108_v36 = vld [vmem:[%s13678_s18 + $0x3b0] sm:$0xff]   ;;  %v5562_v41 = vmax.f32 %v5439_v32, 0.0  ;;  %v5564_v45 = vmax.f32 %v5512_v14, 0.0  ;;  %v10109_v52 = vld [vmem:[%s13678_s18 + $0x378] sm:$0xff]  }
 0xd00   : > { %v5445_v24 = vadd.f32 %v5444_v34, %v13882_v5  ;;  %v5518_v50 = vadd.f32 %v5517_v7, %v13883_v61  ;;  %9171 = vmatpush3.bf16.msra.mxu0 %v10107_v30  ;;  %9211 = vmatpush3.bf16.msra.mxu1 %v10108_v36  ;;  %v10110_v7 = vld [vmem:[%s13678_s18 + $0x3f8] sm:$0xff]   ;;  %v5563_v12 = vmax.f32 %v5441_v58, 0.0  ;;  %v5565_v34 = vmax.f32 %v5514_v13, 0.0 }
 0xd01   : > { %v5578_v56 = vmax.f32 %v5443_v4, 0.0  ;;  %v5580_v51 = vmax.f32 %v5516_v48, 0.0  ;;  %9172 = vmatprep.subr.bf16.mxu0 %v10109_v52  ;;  %9212 = vmatprep.subr.bf16.mxu1 %v10110_v7  ;;  %v10111_v4 = vld [vmem:[%s13678_s18 + $0x338] sm:$0xff]  }
 0xd02   : > { %v5579_v30 = vmax.f32 %v5445_v24, 0.0  ;;  %v5581_v15 = vmax.f32 %v5518_v50, 0.0 }
 0xd03   : > { %v5690_v11 = vpack.c.bf16 %v5578_v56, %v5562_v41  ;;  %v5692_v36 = vpack.c.bf16 %v5580_v51, %v5564_v45  ;;  %v13884_v41 = vmov 0.0  }
 0xd04   : > { %v5691_v32 = vpack.c.bf16 %v5579_v30, %v5563_v12  ;;  %v5693_v14 = vpack.c.bf16 %v5581_v15, %v5565_v34  ;;  %9173 = vmatpush3.bf16.msra.mxu0 %v10111_v4  ;;  %v5448_v48 = vpop.f32.mrb[208].mxu0  ;;  %v5521_v52 = vpop.f32.mrb[212].mxu1  ;;  %9213 = vmatpush3.bf16.msra.mxu1 %v10112_v47  ;;  %v10113_v15 = vld [vmem:[%s13803_s27] sm:$0xff]  }
 0xd05   : > { %v5449_v58 = vadd.f32 %v5448_v48, %v13880_v23  ;;  %v5522_v13 = vadd.f32 %v5521_v52, %v13881_v37  ;;  %v5450_v24 = vpop.f32.mrb[209].mxu0  ;;  %v5523_v50 = vpop.f32.mrb[213].mxu1  ;;  %9677 = vmatprep.subr.bf16.mxu0 %v10113_v15  ;;  %9689 = vmatprep.subr.bf16.mxu1 %v13884_v41  ;;  %v10114_v52 = vld [vmem:[%s13674_s14] sm:$0xff]  }
 0xd06   : > { %v5451_v45 = vadd.f32 %v5450_v24, %v13882_v5  ;;  %v5524_v56 = vadd.f32 %v5523_v50, %v13883_v61  ;;  %v5452_v51 = vpop.f32.mrb[210].mxu0  ;;  %v5525_v7 = vpop.f32.mrb[214].mxu1  ;;  %6164 = vmatprep.mubr.bf16.mxu0 %v5691_v32  ;;  %6229 = vmatprep.mubr.bf16.mxu1 %v5693_v14 }
 0xd07   : > { %v5453_v47 = vadd.f32 %v5452_v51, %v13880_v23  ;;  %v5526_v12 = vadd.f32 %v5525_v7, %v13881_v37  ;;  %v5454_v34 = vpop.f32.mrb[211].mxu0  ;;  %v5527_v30 = vpop.f32.mrb[215].mxu1  ;;  %6165 = vmatmul.mubr.bf16.vlgmr.msra.gmra.mrb[12].mxu0 %v5690_v11  ;;  %6230 = vmatmul.mubr.bf16.vlgmr.msra.gmra.mrb[16].mxu1 %v5692_v36  ;;  %v5594_v32 = vmax.f32 %v5449_v58, 0.0  ;;  %v5596_v14 = vmax.f32 %v5522_v13, 0.0  ;;  %v10115_v51 = vld [vmem:[%s13803_s27 + $0x8] sm:$0xff]  }
 0xd08   : > { %v5455_v4 = vadd.f32 %v5454_v34, %v13882_v5  ;;  %v5528_v48 = vadd.f32 %v5527_v30, %v13883_v61  ;;  %9678 = vmatpush3.bf16.msra.mxu0 %v10113_v15  ;;  %9690 = vmatpush3.bf16.msra.mxu1 %v10114_v52  ;;  %v5595_v11 = vmax.f32 %v5451_v45, 0.0  ;;  %v5597_v36 = vmax.f32 %v5524_v56, 0.0  ;;  %v10116_v13 = vld [vmem:[%s13674_s14 + $0x8] sm:$0xff]  }
 0xd09   : > { %v5610_v24 = vmax.f32 %v5453_v47, 0.0  ;;  %v5612_v50 = vmax.f32 %v5526_v12, 0.0  ;;  %9679 = vmatprep.subr.bf16.mxu0 %v10115_v51  ;;  %9691 = vmatprep.subr.bf16.mxu1 %v13884_v41 }
 0xd0a   : > { %v5611_v7 = vmax.f32 %v5455_v4, 0.0  ;;  %v5613_v15 = vmax.f32 %v5528_v48, 0.0  ;;  %v13885_v4 = vld [vmem:[#allocation3_spill] sm:$0xff]  ;;  %v13886_v48 = vld [vmem:[#allocation4_spill] sm:$0xff] }
 0xd0b   : > { %v5706_v34 = vpack.c.bf16 %v5610_v24, %v5594_v32  ;;  %v5708_v30 = vpack.c.bf16 %v5612_v50, %v5596_v14 }
 0xd0c   : > { %v5707_v28 = vpack.c.bf16 %v5611_v7, %v5595_v11  ;;  %v5709_v0 = vpack.c.bf16 %v5613_v15, %v5597_v36  ;;  %v5458_v52 = vpop.f32.mrb[212].mxu0  ;;  %v5531_v58 = vpop.f32.mrb[216].mxu1  ;;  %9680 = vmatpush3.bf16.msra.mxu0 %v10115_v51  ;;  %9692 = vmatpush3.bf16.msra.mxu1 %v10116_v13 }
 0xd0d   : > { %v5459_v47 = vadd.f32 %v5458_v52, %v13880_v23  ;;  %v5532_v12 = vadd.f32 %v5531_v58, %v13881_v37  ;;  %v5460_v45 = vpop.f32.mrb[213].mxu0  ;;  %v5533_v56 = vpop.f32.mrb[217].mxu1  ;;  %6766 = vmatprep.subr.bf16.mxu0 %v13885_v4  ;;  %6693 = vmatprep.subr.bf16.mxu1 %v13886_v48 }
 0xd0e   : > { %v5461_v32 = vadd.f32 %v5460_v45, %v13882_v5  ;;  %v5534_v14 = vadd.f32 %v5533_v56, %v13883_v61  ;;  %v5462_v24 = vpop.f32.mrb[214].mxu0  ;;  %v5535_v50 = vpop.f32.mrb[218].mxu1  ;;  %6172 = vmatprep.mubr.bf16.mxu0 %v5707_v28  ;;  %6237 = vmatprep.mubr.bf16.mxu1 %v5709_v0 }
 0xd0f   : > { %v5463_v51 = vadd.f32 %v5462_v24, %v13880_v23  ;;  %v5536_v11 = vadd.f32 %v5535_v50, %v13881_v37  ;;  %v5464_v36 = vpop.f32.mrb[215].mxu0  ;;  %v5537_v7 = vpop.f32.mrb[219].mxu1  ;;  %6173 = vmatmul.mubr.bf16.gmra.mrb[16].mxu0 %v5706_v34  ;;  %6238 = vmatmul.mubr.bf16.gmra.mrb[20].mxu1 %v5708_v30  ;;  %v5626_v58 = vmax.f32 %v5459_v47, 0.0  ;;  %v5628_v13 = vmax.f32 %v5532_v12, 0.0 }
 0xd10   : > { %v5465_v15 = vadd.f32 %v5464_v36, %v13882_v5  ;;  %v5538_v52 = vadd.f32 %v5537_v7, %v13883_v61  ;;  %v5627_v4 = vmax.f32 %v5461_v32, 0.0  ;;  %v5629_v48 = vmax.f32 %v5534_v14, 0.0 }
 0xd11   : > { %v5642_v45 = vmax.f32 %v5463_v51, 0.0  ;;  %v5644_v56 = vmax.f32 %v5536_v11, 0.0 }
 0xd12   : > { %v5643_v28 = vmax.f32 %v5465_v15, 0.0  ;;  %v5645_v0 = vmax.f32 %v5538_v52, 0.0 }
 0xd13   : > { %v5722_v20 = vpack.c.bf16 %v5642_v45, %v5626_v58  ;;  %v5724_v24 = vpack.c.bf16 %v5644_v56, %v5628_v13 }
 0xd14   : > { %v5723_v26 = vpack.c.bf16 %v5643_v28, %v5627_v4  ;;  %v5725_v50 = vpack.c.bf16 %v5645_v0, %v5629_v48  ;;  %v5468_v1 = vpop.f32.mrb[216].mxu0  ;;  %v5541_v8 = vpop.f32.mrb[220].mxu1 }
 0xd15   : > { %v5469_v34 = vadd.f32 %v5468_v1, %v13880_v23  ;;  %v5542_v30 = vadd.f32 %v5541_v8, %v13881_v37  ;;  %v5470_v36 = vpop.f32.mrb[217].mxu0  ;;  %v5543_v7 = vpop.f32.mrb[221].mxu1 }
 0xd16   : > { %v5471_v47 = vadd.f32 %v5470_v36, %v13882_v5  ;;  %v5544_v12 = vadd.f32 %v5543_v7, %v13883_v61  ;;  %v5472_v32 = vpop.f32.mrb[218].mxu0  ;;  %v5545_v14 = vpop.f32.mrb[222].mxu1  ;;  %6180 = vmatprep.mubr.bf16.mxu0 %v5723_v26  ;;  %6245 = vmatprep.mubr.bf16.mxu1 %v5725_v50 }
 0xd17   : > { %v5473_v51 = vadd.f32 %v5472_v32, %v13880_v23  ;;  %v5546_v11 = vadd.f32 %v5545_v14, %v13881_v37  ;;  %v5474_v15 = vpop.f32.mrb[219].mxu0  ;;  %v5547_v52 = vpop.f32.mrb[223].mxu1  ;;  %6181 = vmatmul.mubr.bf16.gmra.mrb[20].mxu0 %v5722_v20  ;;  %6246 = vmatmul.mubr.bf16.gmra.mrb[24].mxu1 %v5724_v24  ;;  %v5658_v58 = vmax.f32 %v5469_v34, 0.0  ;;  %v5660_v13 = vmax.f32 %v5542_v30, 0.0 }
 0xd18   : > { %v5475_v8 = vadd.f32 %v5474_v15, %v13882_v5  ;;  %v5548_v1 = vadd.f32 %v5547_v52, %v13883_v61  ;;  %v5659_v4 = vmax.f32 %v5471_v47, 0.0  ;;  %v5661_v48 = vmax.f32 %v5544_v12, 0.0  ;;  %v10117_v15 = vld [vmem:[%s13679_s19] ss:$0 sm:$0xff] }
 0xd19   : > { %v5674_v45 = vmax.f32 %v5473_v51, 0.0  ;;  %v5676_v56 = vmax.f32 %v5546_v11, 0.0 }
 0xd1a   : > { %v5675_v26 = vmax.f32 %v5475_v8, 0.0  ;;  %v5677_v28 = vmax.f32 %v5548_v1, 0.0 }
 0xd1b   : > { %v5738_v0 = vpack.c.bf16 %v5674_v45, %v5658_v58  ;;  %v5740_v50 = vpack.c.bf16 %v5676_v56, %v5660_v13 }
 0xd1c   : > { %v5739_v36 = vpack.c.bf16 %v5675_v26, %v5659_v4  ;;  %v5741_v7 = vpack.c.bf16 %v5677_v28, %v5661_v48 }
 0xd1e   : > { %6188 = vmatprep.mubr.bf16.mxu0 %v5739_v36  ;;  %6253 = vmatprep.mubr.bf16.mxu1 %v5741_v7 }
 0xd1f   : > { %6189 = vmatmul.mubr.bf16.gmra.mrb[24].mxu0 %v5738_v0  ;;  %6254 = vmatmul.mubr.bf16.gmra.mrb[28].mxu1 %v5740_v50 }
 0xd20   : > { %9693 = vmatprep.mubr.msk.bf16.mxu1 %vm10264_vm0, %v13884_v41 }
 0xd7a   : > { %v8934_v20 = vpop.f32.mrb[220].mxu0  ;;  %v8974_v24 = vpop.f32.mrb[224].mxu1 }
 0xd7b   : > { %v8935_v34 = vpop.f32.mrb[221].mxu0  ;;  %v8975_v30 = vpop.f32.mrb[225].mxu1 }
 0xd7c   : > { %v8936_v32 = vadd.f32 %v8935_v34, %v8934_v20  ;;  %v8976_v47 = vadd.f32 %v8975_v30, %v8974_v24  ;;  %v8937_v12 = vpop.f32.mrb[222].mxu0  ;;  %v8977_v14 = vpop.f32.mrb[226].mxu1 }
 0xd7d   : > { %v8938_v51 = vpop.f32.mrb[223].mxu0  ;;  %v8978_v11 = vpop.f32.mrb[227].mxu1 }
 0xd7e   : > { %v5777_v52 = vadd.f32 %v10117_v15, %v8936_v32  ;;  %v8939_v8 = vadd.f32 %v8938_v51, %v8937_v12  ;;  %v8979_v1 = vadd.f32 %v8978_v11, %v8977_v14 }
 0xd80   : > { %v5842_v58 = vadd.f32 %v8976_v47, %v5777_v52  ;;  %v5780_v13 = vadd.f32 %v10117_v15, %v8939_v8 }
 0xd82   : > { %v12595_v41 = vadd.f32 %v8979_v1, %v5780_v13  ;;  %v8940_v45 = vpop.f32.mrb[224].mxu0  ;;  %v8980_v56 = vpop.f32.mrb[228].mxu1 }
 0xd83   : > { %v8941_v4 = vpop.f32.mrb[225].mxu0  ;;  %v8981_v48 = vpop.f32.mrb[229].mxu1 }
 0xd84   : > { %v8942_v26 = vadd.f32 %v8941_v4, %v8940_v45  ;;  %v8982_v28 = vadd.f32 %v8981_v48, %v8980_v56  ;;  %v8943_v0 = vpop.f32.mrb[226].mxu0  ;;  %v8983_v50 = vpop.f32.mrb[230].mxu1 }
 0xd85   : > { %v8944_v36 = vpop.f32.mrb[227].mxu0  ;;  %v8984_v7 = vpop.f32.mrb[231].mxu1 }
 0xd86   : > { %v5785_v20 = vadd.f32 %v10117_v15, %v8942_v26  ;;  %v8945_v24 = vadd.f32 %v8944_v36, %v8943_v0  ;;  %v8985_v34 = vadd.f32 %v8984_v7, %v8983_v50 }
 0xd88   : > { %v5850_v30 = vadd.f32 %v8982_v28, %v5785_v20  ;;  %v5788_v32 = vadd.f32 %v10117_v15, %v8945_v24 }
 0xd8a   : > { %v12597_v12 = vadd.f32 %v8985_v34, %v5788_v32  ;;  %v8946_v47 = vpop.f32.mrb[228].mxu0  ;;  %v8986_v14 = vpop.f32.mrb[232].mxu1 }
 0xd8b   : > { %v8947_v51 = vpop.f32.mrb[229].mxu0  ;;  %v8987_v11 = vpop.f32.mrb[233].mxu1 }
 0xd8c   : > { %v8948_v52 = vadd.f32 %v8947_v51, %v8946_v47  ;;  %v8988_v8 = vadd.f32 %v8987_v11, %v8986_v14  ;;  %v8949_v1 = vpop.f32.mrb[230].mxu0  ;;  %v8989_v13 = vpop.f32.mrb[234].mxu1 }
 0xd8d   : > { %v8950_v45 = vpop.f32.mrb[231].mxu0  ;;  %v8990_v56 = vpop.f32.mrb[235].mxu1 }
 0xd8e   : > { %v5793_v4 = vadd.f32 %v10117_v15, %v8948_v52  ;;  %v8951_v48 = vadd.f32 %v8950_v45, %v8949_v1  ;;  %v8991_v61 = vadd.f32 %v8990_v56, %v8989_v13 }
 0xd90   : > { %v5858_v26 = vadd.f32 %v8988_v8, %v5793_v4  ;;  %v5796_v0 = vadd.f32 %v10117_v15, %v8951_v48 }
 0xd92   : > { %v12599_v50 = vadd.f32 %v8991_v61, %v5796_v0  ;;  %v8952_v28 = vpop.f32.mrb[232].mxu0  ;;  %v8992_v36 = vpop.f32.mrb[236].mxu1 }
 0xd93   : > { %v8953_v7 = vpop.f32.mrb[233].mxu0  ;;  %v8993_v20 = vpop.f32.mrb[237].mxu1 }
 0xd94   : > { %v8954_v24 = vadd.f32 %v8953_v7, %v8952_v28  ;;  %v8994_v34 = vadd.f32 %v8993_v20, %v8992_v36  ;;  %v8955_v32 = vpop.f32.mrb[234].mxu0  ;;  %v8995_v47 = vpop.f32.mrb[238].mxu1 }
 0xd95   : > { %v8956_v14 = vpop.f32.mrb[235].mxu0  ;;  %v8996_v51 = vpop.f32.mrb[239].mxu1 }
 0xd96   : > { %v5801_v11 = vadd.f32 %v10117_v15, %v8954_v24  ;;  %v8957_v5 = vadd.f32 %v8956_v14, %v8955_v32  ;;  %v8997_v37 = vadd.f32 %v8996_v51, %v8995_v47 }
 0xd98   : > { %v5866_v52 = vadd.f32 %v8994_v34, %v5801_v11  ;;  %v5804_v1 = vadd.f32 %v10117_v15, %v8957_v5 }
 0xd9a   : > { %v12601_v13 = vadd.f32 %v8997_v37, %v5804_v1  ;;  %v9014_v8 = vpop.f32.mrb[236].mxu0  ;;  %v9054_v61 = vpop.f32.mrb[240].mxu1 }
 0xd9b   : > { %v9015_v45 = vpop.f32.mrb[237].mxu0  ;;  %v9055_v56 = vpop.f32.mrb[241].mxu1 }
 0xd9c   : > { %v9016_v4 = vadd.f32 %v9015_v45, %v9014_v8  ;;  %v9056_v48 = vadd.f32 %v9055_v56, %v9054_v61  ;;  %v9017_v0 = vpop.f32.mrb[238].mxu0  ;;  %v9057_v28 = vpop.f32.mrb[242].mxu1 }
 0xd9d   : > { %v9018_v36 = vpop.f32.mrb[239].mxu0  ;;  %v9058_v7 = vpop.f32.mrb[243].mxu1 }
 0xd9e   : > { %v5907_v20 = vadd.f32 %v9016_v4, %v5842_v58  ;;  %v9019_v23 = vadd.f32 %v9018_v36, %v9017_v0  ;;  %v9059_v39 = vadd.f32 %v9058_v7, %v9057_v28 }
 0xda0   : > { %v5972_v24 = vadd.f32 %v9056_v48, %v5907_v20  ;;  %v5910_v32 = vadd.f32 %v9019_v23, %v12595_v41 }
 0xda2   : > { %v12604_v34 = vadd.f32 %v9059_v39, %v5910_v32  ;;  %v9020_v37 = vpop.f32.mrb[240].mxu0  ;;  %v9060_v5 = vpop.f32.mrb[244].mxu1 }
 0xda3   : > { %v9021_v15 = vpop.f32.mrb[241].mxu0  ;;  %v9061_v47 = vpop.f32.mrb[245].mxu1 }
 0xda4   : > { %v9022_v14 = vadd.f32 %v9021_v15, %v9020_v37  ;;  %v9062_v51 = vadd.f32 %v9061_v47, %v9060_v5  ;;  %v9023_v11 = vpop.f32.mrb[242].mxu0  ;;  %v9063_v1 = vpop.f32.mrb[246].mxu1 }
 0xda5   : > { %v9024_v8 = vpop.f32.mrb[243].mxu0  ;;  %v9064_v61 = vpop.f32.mrb[247].mxu1 }
 0xda6   : > { %v5915_v45 = vadd.f32 %v9022_v14, %v5850_v30  ;;  %v9025_v56 = vadd.f32 %v9024_v8, %v9023_v11  ;;  %v9065_v58 = vadd.f32 %v9064_v61, %v9063_v1 }
 0xda8   : > { %v5980_v4 = vadd.f32 %v9062_v51, %v5915_v45  ;;  %v5918_v48 = vadd.f32 %v9025_v56, %v12597_v12 }
 0xdaa   : > { %v12607_v0 = vadd.f32 %v9065_v58, %v5918_v48  ;;  %v9026_v39 = vpop.f32.mrb[244].mxu0  ;;  %v9066_v23 = vpop.f32.mrb[248].mxu1 }
 0xdab   : > { %v9027_v41 = vpop.f32.mrb[245].mxu0  ;;  %v9067_v28 = vpop.f32.mrb[249].mxu1 }
 0xdac   : > { %v9028_v36 = vadd.f32 %v9027_v41, %v9026_v39  ;;  %v9068_v7 = vadd.f32 %v9067_v28, %v9066_v23  ;;  %v9029_v20 = vpop.f32.mrb[246].mxu0  ;;  %v9069_v32 = vpop.f32.mrb[250].mxu1 }
 0xdad   : > { %v9030_v37 = vpop.f32.mrb[247].mxu0  ;;  %v9070_v5 = vpop.f32.mrb[251].mxu1 }
 0xdae   : > { %v5923_v15 = vadd.f32 %v9028_v36, %v5858_v26  ;;  %v9031_v47 = vadd.f32 %v9030_v37, %v9029_v20  ;;  %v9071_v30 = vadd.f32 %v9070_v5, %v9069_v32 }
 0xdb0   : > { %v5988_v14 = vadd.f32 %v9068_v7, %v5923_v15  ;;  %v5926_v51 = vadd.f32 %v9031_v47, %v12599_v50 }
 0xdb2   : > { %v12610_v11 = vadd.f32 %v9071_v30, %v5926_v51  ;;  %v9032_v12 = vpop.f32.mrb[248].mxu0  ;;  %v9072_v1 = vpop.f32.mrb[252].mxu1 }
 0xdb3   : > { %v9033_v8 = vpop.f32.mrb[249].mxu0  ;;  %v9073_v61 = vpop.f32.mrb[253].mxu1 }
 0xdb4   : > { %v9034_v45 = vadd.f32 %v9033_v8, %v9032_v12  ;;  %v9074_v56 = vadd.f32 %v9073_v61, %v9072_v1  ;;  %v9035_v58 = vpop.f32.mrb[250].mxu0  ;;  %v9075_v48 = vpop.f32.mrb[254].mxu1 }
 0xdb5   : > { %v9036_v39 = vpop.f32.mrb[251].mxu0  ;;  %v9076_v23 = vpop.f32.mrb[255].mxu1 }
 0xdb6   : > { %v5931_v41 = vadd.f32 %v9034_v45, %v5866_v52  ;;  %v9037_v28 = vadd.f32 %v9036_v39, %v9035_v58  ;;  %v9077_v26 = vadd.f32 %v9076_v23, %v9075_v48 }
 0xdb8   : > { %v5996_v36 = vadd.f32 %v9074_v56, %v5931_v41  ;;  %v5934_v7 = vadd.f32 %v9037_v28, %v12601_v13 }
 0xdba   : > { %v12613_v20 = vadd.f32 %v9077_v26, %v5934_v7  ;;  %v9094_v50 = vpop.f32.mrb[252].mxu0  ;;  %v9134_v32 = vpop.f32.mrb[0].mxu1 }
 0xdbb   : > { %v9095_v37 = vpop.f32.mrb[253].mxu0  ;;  %v9135_v5 = vpop.f32.mrb[1].mxu1 }
 0xdbc   : > { %v9096_v15 = vadd.f32 %v9095_v37, %v9094_v50  ;;  %v9136_v47 = vadd.f32 %v9135_v5, %v9134_v32  ;;  %v9097_v30 = vpop.f32.mrb[254].mxu0  ;;  %v9137_v51 = vpop.f32.mrb[2].mxu1 }
 0xdbd   : > { %v9098_v12 = vpop.f32.mrb[255].mxu0  ;;  %v9138_v1 = vpop.f32.mrb[3].mxu1 }
 0xdbe   : > { %v6037_v8 = vadd.f32 %v9096_v15, %v5972_v24  ;;  %v9099_v61 = vadd.f32 %v9098_v12, %v9097_v30  ;;  %v9139_v52 = vadd.f32 %v9138_v1, %v9137_v51 }
 0xdc0   : > { %v6102_v45 = vadd.f32 %v9136_v47, %v6037_v8  ;;  %v6040_v56 = vadd.f32 %v9099_v61, %v12604_v34 }
 0xdc2   : > { %v12616_v58 = vadd.f32 %v9139_v52, %v6040_v56  ;;  %v9100_v13 = vpop.f32.mrb[0].mxu0  ;;  %v9140_v48 = vpop.f32.mrb[4].mxu1 }
 0xdc3   : > { %v9101_v39 = vpop.f32.mrb[1].mxu0  ;;  %v9141_v23 = vpop.f32.mrb[5].mxu1 }
 0xdc4   : > { %v9102_v41 = vadd.f32 %v9101_v39, %v9100_v13  ;;  %v9142_v28 = vadd.f32 %v9141_v23, %v9140_v48  ;;  %v9103_v26 = vpop.f32.mrb[2].mxu0  ;;  %v9143_v7 = vpop.f32.mrb[6].mxu1 }
 0xdc5   : > { %v9104_v50 = vpop.f32.mrb[3].mxu0  ;;  %v9144_v32 = vpop.f32.mrb[7].mxu1 }
 0xdc6   : > { %v6045_v37 = vadd.f32 %v9102_v41, %v5980_v4  ;;  %v9105_v5 = vadd.f32 %v9104_v50, %v9103_v26  ;;  %v9145_v24 = vadd.f32 %v9144_v32, %v9143_v7 }
 0xdc8   : > { %v12618_v15 = vadd.f32 %v9142_v28, %v6045_v37  ;;  %v6048_v47 = vadd.f32 %v9105_v5, %v12607_v0 }
 0xdca   : > { %v12621_v34 = vadd.f32 %v9145_v24, %v6048_v47  ;;  %v9106_v30 = vpop.f32.mrb[4].mxu0  ;;  %v9146_v51 = vpop.f32.mrb[8].mxu1 }
 0xdcb   : > { %v9107_v12 = vpop.f32.mrb[5].mxu0  ;;  %v9147_v1 = vpop.f32.mrb[9].mxu1 }
 0xdcc   : > { %v9108_v8 = vadd.f32 %v9107_v12, %v9106_v30  ;;  %v9148_v61 = vadd.f32 %v9147_v1, %v9146_v51  ;;  %v9109_v52 = vpop.f32.mrb[6].mxu0  ;;  %v9149_v56 = vpop.f32.mrb[10].mxu1 }
 0xdcd   : > { %v9110_v13 = vpop.f32.mrb[7].mxu0  ;;  %v9150_v48 = vpop.f32.mrb[11].mxu1 }
 0xdce   : > { %v6053_v39 = vadd.f32 %v9108_v8, %v5988_v14  ;;  %v9111_v4 = vadd.f32 %v9110_v13, %v9109_v52  ;;  %v9151_v23 = vadd.f32 %v9150_v48, %v9149_v56 }
 0xdd0   : > { %v12623_v41 = vadd.f32 %v9148_v61, %v6053_v39  ;;  %v6056_v28 = vadd.f32 %v9111_v4, %v12610_v11 }
 0xdd2   : > { %v12626_v0 = vadd.f32 %v9151_v23, %v6056_v28  ;;  %v9112_v26 = vpop.f32.mrb[8].mxu0  ;;  %v9152_v7 = vpop.f32.mrb[12].mxu1 }
 0xdd3   : > { %v9113_v50 = vpop.f32.mrb[9].mxu0  ;;  %v9153_v32 = vpop.f32.mrb[13].mxu1 }
 0xdd4   : > { %v9114_v37 = vadd.f32 %v9113_v50, %v9112_v26  ;;  %v9154_v5 = vadd.f32 %v9153_v32, %v9152_v7  ;;  %v9115_v24 = vpop.f32.mrb[10].mxu0  ;;  %v9155_v47 = vpop.f32.mrb[14].mxu1 }
 0xdd5   : > { %v9116_v30 = vpop.f32.mrb[11].mxu0  ;;  %v9156_v51 = vpop.f32.mrb[15].mxu1 }
 0xdd6   : > { %v6061_v12 = vadd.f32 %v9114_v37, %v5996_v36  ;;  %v9117_v14 = vadd.f32 %v9116_v30, %v9115_v24  ;;  %v9157_v1 = vadd.f32 %v9156_v51, %v9155_v47 }
 0xdd8   : > { %v12628_v8 = vadd.f32 %v9154_v5, %v6061_v12  ;;  %v6064_v61 = vadd.f32 %v9117_v14, %v12613_v20 }
 0xdda   : > { %v12631_v11 = vadd.f32 %v9157_v1, %v6064_v61  ;;  %v9174_v52 = vpop.f32.mrb[12].mxu0  ;;  %v9214_v56 = vpop.f32.mrb[16].mxu1 }
 0xddb   : > { %v9175_v13 = vpop.f32.mrb[13].mxu0  ;;  %v9215_v48 = vpop.f32.mrb[17].mxu1 }
 0xddc   : > { %v9176_v39 = vadd.f32 %v9175_v13, %v9174_v52  ;;  %v9216_v4 = vadd.f32 %v9215_v48, %v9214_v56  ;;  %v9177_v23 = vpop.f32.mrb[14].mxu0  ;;  %v9217_v28 = vpop.f32.mrb[18].mxu1 }
 0xddd   : > { %v9178_v26 = vpop.f32.mrb[15].mxu0  ;;  %v9218_v7 = vpop.f32.mrb[19].mxu1 }
 0xdde   : > { %v6167_v50 = vadd.f32 %v9176_v39, %v6102_v45  ;;  %v9179_v36 = vadd.f32 %v9178_v26, %v9177_v23  ;;  %v9219_v32 = vadd.f32 %v9218_v7, %v9217_v28 }
 0xde0   : > { %v6232_v37 = vadd.f32 %v9216_v4, %v6167_v50  ;;  %v6170_v5 = vadd.f32 %v9179_v36, %v12616_v58 }
 0xde2   : > { %v6235_v24 = vadd.f32 %v9219_v32, %v6170_v5  ;;  %v9180_v20 = vpop.f32.mrb[16].mxu0  ;;  %v9220_v47 = vpop.f32.mrb[20].mxu1  ;;  %v12635_v30 = vadd.f32 %v6232_v37, %v11911_v59 }
 0xde3   : > { %v9181_v51 = vpop.f32.mrb[17].mxu0  ;;  %v9221_v12 = vpop.f32.mrb[21].mxu1 }
 0xde4   : > { %v9182_v14 = vadd.f32 %v9181_v51, %v9180_v20  ;;  %v9222_v1 = vadd.f32 %v9221_v12, %v9220_v47  ;;  %v9183_v61 = vpop.f32.mrb[18].mxu0  ;;  %v9223_v52 = vpop.f32.mrb[22].mxu1  ;;  %v6270_v45 = vsel %vm841_vm1, %v12635_v30, 0.0  ;;  %v12640_v56 = vadd.f32 %v6235_v24, %v11908_v40 }
 0xde5   : > { %v9184_v13 = vpop.f32.mrb[19].mxu0  ;;  %v9224_v58 = vpop.f32.mrb[23].mxu1  ;;  %6271 = vadd.xlane.f32.xlu1 %v6270_v45 }
 0xde6   : > { %v6175_v48 = vadd.f32 %v9182_v14, %v12618_v15  ;;  %v9185_v39 = vadd.f32 %v9184_v13, %v9183_v61  ;;  %v9225_v59 = vadd.f32 %v9224_v58, %v9223_v52  ;;  %v6273_v4 = vsel %vm841_vm1, %v12640_v56, 0.0 }
 0xde7   : > { %6274 = vadd.xlane.f32.xlu0 %v6273_v4 }
 0xde8   : > { %v6240_v23 = vadd.f32 %v9222_v1, %v6175_v48  ;;  %v6178_v28 = vadd.f32 %v9185_v39, %v12621_v34 }
 0xdea   : > { %v6243_v26 = vadd.f32 %v9225_v59, %v6178_v28  ;;  %v9186_v7 = vpop.f32.mrb[20].mxu0  ;;  %v9226_v50 = vpop.f32.mrb[24].mxu1  ;;  %v12647_v40 = vadd.f32 %v6240_v23, %v11926_v55 }
 0xdeb   : > { %v9187_v36 = vpop.f32.mrb[21].mxu0  ;;  %v9227_v32 = vpop.f32.mrb[25].mxu1 }
 0xdec   : > { %v9188_v37 = vadd.f32 %v9187_v36, %v9186_v7  ;;  %v9228_v5 = vadd.f32 %v9227_v32, %v9226_v50  ;;  %v9189_v15 = vpop.f32.mrb[22].mxu0  ;;  %v9229_v24 = vpop.f32.mrb[26].mxu1  ;;  %v6276_v20 = vsel %vm841_vm1, %v12647_v40, 0.0  ;;  %v6265_v47 = vadd.f32 %v6243_v26, %v11922_v63 }
 0xded   : > { %v9190_v51 = vpop.f32.mrb[23].mxu0  ;;  %v9230_v12 = vpop.f32.mrb[27].mxu1  ;;  %6277 = vadd.xlane.f32.xlu1 %v6276_v20 }
 0xdee   : > { %v6183_v34 = vadd.f32 %v9188_v37, %v12623_v41  ;;  %v9191_v14 = vadd.f32 %v9190_v51, %v9189_v15  ;;  %v9231_v1 = vadd.f32 %v9230_v12, %v9229_v24  ;;  %v6279_v55 = vsel %vm841_vm1, %v6265_v47, 0.0 }
 0xdef   : > { %6280 = vadd.xlane.f32.xlu0 %v6279_v55 }
 0xdf0   : > { %v6248_v61 = vadd.f32 %v9228_v5, %v6183_v34  ;;  %v6186_v52 = vadd.f32 %v9191_v14, %v12626_v0 }
 0xdf2   : > { %v6251_v45 = vadd.f32 %v9231_v1, %v6186_v52  ;;  %v9192_v13 = vpop.f32.mrb[24].mxu0  ;;  %v9232_v58 = vpop.f32.mrb[28].mxu1  ;;  %v6266_v48 = vadd.f32 %v6248_v61, %v11950_v57 }
 0xdf3   : > { %v9193_v39 = vpop.f32.mrb[25].mxu0  ;;  %v9233_v63 = vpop.f32.mrb[29].mxu1 }
 0xdf4   : > { %v9194_v59 = vadd.f32 %v9193_v39, %v9192_v13  ;;  %v9234_v4 = vadd.f32 %v9233_v63, %v9232_v58  ;;  %v9195_v23 = vpop.f32.mrb[26].mxu0  ;;  %v9235_v28 = vpop.f32.mrb[30].mxu1  ;;  %v6282_v41 = vsel %vm841_vm1, %v6266_v48, 0.0  ;;  %v6267_v26 = vadd.f32 %v6251_v45, %v11948_v17 }
 0xdf5   : > { %v9196_v7 = vpop.f32.mrb[27].mxu0  ;;  %v9236_v50 = vpop.f32.mrb[31].mxu1  ;;  %6283 = vadd.xlane.f32.xlu1 %v6282_v41 }
 0xdf6   : > { %v6191_v0 = vadd.f32 %v9194_v59, %v12628_v8  ;;  %v9197_v36 = vadd.f32 %v9196_v7, %v9195_v23  ;;  %v9237_v32 = vadd.f32 %v9236_v50, %v9235_v28  ;;  %v6285_v37 = vsel %vm841_vm1, %v6267_v26, 0.0 }
 0xdf7   : > { %6286 = vadd.xlane.f32.xlu0 %v6285_v37 }
 0xdf8   : > { %v6256_v57 = vadd.f32 %v9234_v4, %v6191_v0  ;;  %v6194_v5 = vadd.f32 %v9197_v36, %v12631_v11 }
 0xdfa   : > { %v6259_v15 = vadd.f32 %v9237_v32, %v6194_v5  ;;  %v6268_v24 = vadd.f32 %v6256_v57, %v11966_v25 }
 0xdfc   : > { %v6288_v20 = vsel %vm841_vm1, %v6268_v24, 0.0  ;;  %v6269_v17 = vadd.f32 %v6259_v15, %v11964_v16 }
 0xdfd   : > { %6289 = vadd.xlane.f32.xlu1 %v6288_v20 }
 0xdfe   : > { %v6291_v51 = vsel %vm841_vm1, %v6269_v17, 0.0 }
 0xdff   : > { %6292 = vadd.xlane.f32.xlu0 %v6291_v51 }
 0xe72   : > { %v6272_v8 = vpop.xlane.xlu1 %6271 }
 0xe73   : > { %v6294_v12 = vmul.f32 0.03125, %v6272_v8 }
 0xe74   : > { %v6275_v34 = vpop.xlane.xlu0 %6274 }
 0xe75   : > { %v6302_v14 = vsub.f32 %v12635_v30, %v6294_v12  ;;  %v6295_v1 = vmul.f32 0.03125, %v6275_v34 }
 0xe77   : > { %v12667_v55 = vsub.f32 %v12640_v56, %v6295_v1  ;;  %v6310_v11 = vmul.f32 %v6302_v14, %v6302_v14 }
 0xe79   : > { %v6318_v25 = vsel %vm841_vm1, %v6310_v11, 0.0  ;;  %v6311_v61 = vmul.f32 %v12667_v55, %v12667_v55 }
 0xe7a   : > { %6319 = vadd.xlane.f32.xlu1 %v6318_v25  ;;  %v6278_v16 = vpop.xlane.xlu1 %6277 }
 0xe7b   : > { %v6296_v52 = vmul.f32 0.03125, %v6278_v16  ;;  %v6321_v45 = vsel %vm841_vm1, %v6311_v61, 0.0 }
 0xe7c   : > { %6322 = vadd.xlane.f32.xlu0 %v6321_v45  ;;  %v6281_v13 = vpop.xlane.xlu0 %6280 }
 0xe7d   : > { %v12674_v58 = vsub.f32 %v12647_v40, %v6296_v52  ;;  %v6297_v30 = vmul.f32 0.03125, %v6281_v13 }
 0xe7f   : > { %v12676_v39 = vsub.f32 %v6265_v47, %v6297_v30  ;;  %v6312_v56 = vmul.f32 %v12674_v58, %v12674_v58 }
 0xe81   : > { %v6324_v63 = vsel %vm841_vm1, %v6312_v56, 0.0  ;;  %v6313_v59 = vmul.f32 %v12676_v39, %v12676_v39 }
 0xe82   : > { %6325 = vadd.xlane.f32.xlu1 %v6324_v63  ;;  %v6284_v4 = vpop.xlane.xlu1 %6283 }
 0xe83   : > { %v6298_v23 = vmul.f32 0.03125, %v6284_v4  ;;  %v6327_v28 = vsel %vm841_vm1, %v6313_v59, 0.0 }
 0xe84   : > { %6328 = vadd.xlane.f32.xlu0 %v6327_v28  ;;  %v6287_v41 = vpop.xlane.xlu0 %6286 }
 0xe85   : > { %v12684_v40 = vsub.f32 %v6266_v48, %v6298_v23  ;;  %v6299_v7 = vmul.f32 0.03125, %v6287_v41 }
 0xe87   : > { %v12686_v47 = vsub.f32 %v6267_v26, %v6299_v7  ;;  %v6314_v50 = vmul.f32 %v12684_v40, %v12684_v40  ;;  %v10118_v7 = vld [vmem:[%s13682_s22] ss:$0 sm:$0xff] }
 0xe89   : > { %v6330_v0 = vsel %vm841_vm1, %v6314_v50, 0.0  ;;  %v6315_v36 = vmul.f32 %v12686_v47, %v12686_v47 }
 0xe8a   : > { %6331 = vadd.xlane.f32.xlu1 %v6330_v0  ;;  %v6290_v32 = vpop.xlane.xlu1 %6289 }
 0xe8b   : > { %v6300_v37 = vmul.f32 0.03125, %v6290_v32  ;;  %v6333_v57 = vsel %vm841_vm1, %v6315_v36, 0.0 }
 0xe8c   : > { %6334 = vadd.xlane.f32.xlu0 %v6333_v57  ;;  %v6293_v5 = vpop.xlane.xlu0 %6292 }
 0xe8d   : > { %v12694_v48 = vsub.f32 %v6268_v24, %v6300_v37  ;;  %v6301_v15 = vmul.f32 0.03125, %v6293_v5 }
 0xe8f   : > { %v12696_v26 = vsub.f32 %v6269_v17, %v6301_v15  ;;  %v6316_v20 = vmul.f32 %v12694_v48, %v12694_v48 }
 0xe91   : > { %v6336_v51 = vsel %vm841_vm1, %v6316_v20, 0.0  ;;  %v6317_v8 = vmul.f32 %v12696_v26, %v12696_v26 }
 0xe92   : > { %6337 = vadd.xlane.f32.xlu1 %v6336_v51 }
 0xe93   : > { %v6339_v12 = vsel %vm841_vm1, %v6317_v8, 0.0 }
 0xe94   : > { %6340 = vadd.xlane.f32.xlu0 %v6339_v12 }
 0xf07   : > { %v6320_v34 = vpop.xlane.xlu1 %6319 }
 0xf08   : > { %v6342_v1 = vmul.f32 0.03125, %v6320_v34 }
 0xf09   : > { %v6323_v11 = vpop.xlane.xlu0 %6322 }
 0xf0a   : > { %v6350_v24 = vadd.f32 1e-05, %v6342_v1  ;;  %v6343_v25 = vmul.f32 0.03125, %v6323_v11 }
 0xf0c   : > { %9929 = vrsqrt.f32 %v6350_v24  ;;  %v6351_v17 = vadd.f32 1e-05, %v6343_v25 }
 0xf0e   : > { %9931 = vrsqrt.f32 %v6351_v17 }
 0xf0f   : > { %v6326_v61 = vpop.xlane.xlu1 %6325 }
 0xf10   : > { %v6344_v16 = vmul.f32 0.03125, %v6326_v61 }
 0xf11   : > { %v6329_v52 = vpop.xlane.xlu0 %6328 }
 0xf12   : > { %v6352_v45 = vadd.f32 1e-05, %v6344_v16  ;;  %v6345_v13 = vmul.f32 0.03125, %v6329_v52 }
 0xf14   : > { %9933 = vrsqrt.f32 %v6352_v45  ;;  %v6353_v30 = vadd.f32 1e-05, %v6345_v13 }
 0xf16   : > { %v9930_v56 = vpop.eup %9929  ;;  %9935 = vrsqrt.f32 %v6353_v30 }
 0xf17   : > { %v6366_v63 = vmul.f32 %v9930_v56, %v6302_v14  ;;  %v6332_v59 = vpop.xlane.xlu1 %6331  ;;  %v10119_v14 = vld [vmem:[%s13683_s23] ss:$0 sm:$0xff] }
 0xf18   : > { %v9932_v4 = vpop.eup %9931  ;;  %v6346_v23 = vmul.f32 0.03125, %v6332_v59 }
 0xf19   : > { %v6367_v28 = vmul.f32 %v9932_v4, %v12667_v55  ;;  %v6335_v41 = vpop.xlane.xlu0 %6334  ;;  %v6374_v50 = vmul.f32 %v10118_v7, %v6366_v63 }
 0xf1a   : > { %v6354_v0 = vadd.f32 1e-05, %v6346_v23  ;;  %v6347_v36 = vmul.f32 0.03125, %v6335_v41 }
 0xf1b   : > { %v6375_v32 = vmul.f32 %v10118_v7, %v6367_v28  ;;  %v12711_v57 = vadd.f32 %v10119_v14, %v6374_v50 }
 0xf1c   : > { %9937 = vrsqrt.f32 %v6354_v0  ;;  %v6355_v37 = vadd.f32 1e-05, %v6347_v36 }
 0xf1d   : > { %v12713_v5 = vadd.f32 %v10119_v14, %v6375_v32 }
 0xf1e   : > { %v9934_v55 = vpop.eup %9933  ;;  %9939 = vrsqrt.f32 %v6355_v37 }
 0xf1f   : > { %v6368_v15 = vmul.f32 %v9934_v55, %v12674_v58  ;;  %v6338_v20 = vpop.xlane.xlu1 %6337  ;;  %v6390_v51 = vpack.c.bf16 %v12713_v5, %v12711_v57 }
 0xf20   : > { %v9936_v8 = vpop.eup %9935  ;;  %v6348_v12 = vmul.f32 0.03125, %v6338_v20 }
 0xf21   : > { %v6376_v34 = vmul.f32 %v10118_v7, %v6368_v15  ;;  %v6369_v1 = vmul.f32 %v9936_v8, %v12676_v39  ;;  %v6341_v11 = vpop.xlane.xlu0 %6340  ;;  %9681 = vmatprep.mubr.msk.bf16.mxu0 %vm841_vm1, %v6390_v51 }
 0xf22   : > { %v6356_v24 = vadd.f32 1e-05, %v6348_v12  ;;  %v6349_v25 = vmul.f32 0.03125, %v6341_v11 }
 0xf23   : > { %v6377_v17 = vmul.f32 %v10118_v7, %v6369_v1  ;;  %v12720_v16 = vadd.f32 %v10119_v14, %v6376_v34 }
 0xf24   : > { %9941 = vrsqrt.f32 %v6356_v24  ;;  %v6357_v61 = vadd.f32 1e-05, %v6349_v25 }
 0xf25   : > { %v12722_v58 = vadd.f32 %v10119_v14, %v6377_v17 }
 0xf26   : > { %v9938_v52 = vpop.eup %9937  ;;  %9943 = vrsqrt.f32 %v6357_v61 }
 0xf27   : > { %v6391_v45 = vpack.c.bf16 %v12722_v58, %v12720_v16  ;;  %v6370_v13 = vmul.f32 %v9938_v52, %v12684_v40 }
 0xf28   : > { %v9940_v39 = vpop.eup %9939 }
 0xf29   : > { %v6371_v30 = vmul.f32 %v9940_v39, %v12686_v47  ;;  %9682 = vmatmul.mubr.msk.bf16.vlgmr.msra.gmra.mrb[28].mxu0 %vm841_vm1, %v6391_v45  ;;  %v6378_v56 = vmul.f32 %v10118_v7, %v6370_v13 }
 0xf2a   : > { %6767 = vmatpush1.bf16.msra.mxu0 %v10687_v62 }
 0xf2b   : > { %v6379_v63 = vmul.f32 %v10118_v7, %v6371_v30  ;;  %6768 = vmatprep.subr.bf16.mxu0 %v10706_v21  ;;  %v12731_v59 = vadd.f32 %v10119_v14, %v6378_v56 }
 0xf2d   : > { %v12733_v4 = vadd.f32 %v10119_v14, %v6379_v63 }
 0xf2e   : > { %v9942_v23 = vpop.eup %9941  ;;  %6769 = vmatpush1.bf16.msra.mxu0 %v10711_v2 }
 0xf2f   : > { %v6372_v40 = vmul.f32 %v9942_v23, %v12694_v48  ;;  %v6392_v47 = vpack.c.bf16 %v12733_v4, %v12731_v59  ;;  %6912 = vmatprep.subr.bf16.mxu0 %v10739_v10  ;;  %v10120_v10 = vld [vmem:[%s13671_s11] ss:$0 sm:$0xff] }
 0xf30   : > { %v9944_v28 = vpop.eup %9943 }
 0xf31   : > { %v6380_v41 = vmul.f32 %v10118_v7, %v6372_v40  ;;  %v6373_v62 = vmul.f32 %v9944_v28, %v12696_v26  ;;  %9685 = vmatprep.mubr.msk.bf16.mxu0 %vm841_vm1, %v6392_v47 }
 0xf33   : > { %v6381_v21 = vmul.f32 %v10118_v7, %v6373_v62  ;;  %v12742_v50 = vadd.f32 %v10119_v14, %v6380_v41 }
 0xf35   : > { %v12744_v0 = vadd.f32 %v10119_v14, %v6381_v21 }
 0xf37   : > { %v6393_v2 = vpack.c.bf16 %v12744_v0, %v12742_v50 }
 0xf39   : > { %9686 = vmatmul.mubr.msk.bf16.gmra.mrb[32].mxu0 %vm841_vm1, %v6393_v2 }
 0xf3a   : > { %6798 = vmatprep.mubr.bf16.mxu0 %v13850_v18 }
 0xffc   : > { %v9683_v48 = vpop.f32.mrb[28].mxu0 }
 0xffd   : > { %v6449_v26 = vadd.f32 %v10120_v10, %v9683_v48  ;;  %v6440_v36 = vpop.f32.mrb[29].mxu0 }
 0xffe   : > { %v6441_v32 = vadd.f32 %v10120_v10, %v6440_v36  ;;  %v9684_v7 = vpop.f32.mrb[30].mxu0 }
 0xfff   : > { %v6473_v37 = vmul.f32 %v6449_v26, %v10579_v33  ;;  %v6452_v14 = vadd.f32 %v10120_v10, %v9684_v7  ;;  %v6443_v55 = vpop.f32.mrb[31].mxu0  ;;  %v10121_v7 = vld [vmem:[%s13675_s15] sm:$0x1] }
0x1000   : > { %v6471_v15 = vmul.f32 %v6441_v32, %v10572_v29  ;;  %v6444_v20 = vadd.f32 %v10120_v10, %v6443_v55 }
0x1001   : > { %v6474_v51 = vmul.f32 %v10577_v31, %v6452_v14  ;;  %v6482_v11 = vsel %vm841_vm1, %v6473_v37, 0.0 }
0x1002   : > { %v6472_v8 = vmul.f32 %v10570_v27, %v6444_v20  ;;  %v6479_v12 = vsel %vm841_vm1, %v6471_v15, 0.0 }
0x1003   : > { %v6484_v25 = vsel %vm841_vm1, %v6474_v51, 0.0 }
0x1004   : > { %v6480_v34 = vsel %vm841_vm1, %v6472_v8, 0.0 }
0x1005   : > { %v6481_v1 = vadd.f32 %v6480_v34, %v6479_v12 }
0x1007   : > { %v6483_v24 = vadd.f32 %v6482_v11, %v6481_v1 }
0x1009   : > { %v6485_v33 = vadd.f32 %v6484_v25, %v6483_v24 }
0x100c   : > { %v9687_v17 = vpop.f32.mrb[32].mxu0 }
0x100d   : > { %v6465_v61 = vadd.f32 %v10120_v10, %v9687_v17  ;;  %v6456_v52 = vpop.f32.mrb[33].mxu0 }
0x100e   : > { %v6457_v29 = vadd.f32 %v10120_v10, %v6456_v52  ;;  %v9688_v45 = vpop.f32.mrb[34].mxu0 }
0x100f   : > { %v6477_v31 = vmul.f32 %v6465_v61, %v10593_v53  ;;  %v6468_v13 = vadd.f32 %v10120_v10, %v9688_v45  ;;  %v6459_v27 = vpop.f32.mrb[35].mxu0 }
0x1010   : > { %v6475_v39 = vmul.f32 %v6457_v29, %v10585_v46  ;;  %v6460_v30 = vadd.f32 %v10120_v10, %v6459_v27 }
0x1011   : > { %v6478_v56 = vmul.f32 %v10589_v49, %v6468_v13  ;;  %v6490_v41 = vsel %vm841_vm1, %v6477_v31, 0.0 }
0x1012   : > { %v6486_v63 = vsel %vm841_vm1, %v6475_v39, 0.0  ;;  %v6476_v23 = vmul.f32 %v10582_v43, %v6460_v30 }
0x1013   : > { %v6487_v40 = vadd.f32 %v6486_v63, %v6485_v33  ;;  %v6492_v53 = vsel %vm841_vm1, %v6478_v56, 0.0 }
0x1014   : > { %v6488_v47 = vsel %vm841_vm1, %v6476_v23, 0.0 }
0x1015   : > { %v6489_v28 = vadd.f32 %v6488_v47, %v6487_v40 }
0x1017   : > { %v6491_v62 = vadd.f32 %v6490_v41, %v6489_v28 }
0x1019   : > { %v6493_v21 = vadd.f32 %v6492_v53, %v6491_v62 }
0x101b   : > { %v6494_v2 = vrot.slane %v6493_v21, 4 }
0x101d   : > { %v6495_v48 = vadd.f32 %v6494_v2, %v6493_v21 }
0x101f   : > { %v6496_v46 = vrot.slane %v6495_v48, 2 }
0x1021   : > { %v6497_v10 = vadd.f32 %v6496_v46, %v6495_v48 }
0x1023   : > { %v6498_v26 = vrot.slane %v6497_v10, 1 }
0x1025   : > { %v6499_v49 = vadd.f32 %v6498_v26, %v6497_v10 }
0x1027   : > { %v6500_v36 = vadd.f32 %v6499_v49, %v10608_v35 }
0x1029   : > { %v6501_v32 = vpack.c.bf16 %v6500_v36, %v6500_v36 }
0x102b   : > { %9694 = vmatmul.mubr.msk.bf16.vlgmr.msra.gmra.mrb[32].mxu1 %vm841_vm1, %v6501_v32 }
0x102c   : > { %6694 = vmatpush1.bf16.msra.mxu1 %v10689_v60  ;;  %6725 = vmatprep.mubr.bf16.mxu1 %v13850_v18 }
0x102d   : > { %6695 = vmatprep.subr.bf16.mxu1 %v10715_v6 }
0x1030   : > { %6696 = vmatpush1.bf16.msra.mxu1 %v10713_v3 }
0x1031   : > { %6839 = vmatprep.subr.bf16.mxu1 %v10732_v22 }
0x10fe   : > { %v6539_v43 = vpop.f32.mrb[32].mxu1 }
0x10ff   : > { %v6540_v37 = vadd.f32 %v10121_v7, %v6539_v43  ;;  %v9695_v35 = vpop.f32.mrb[33].mxu1 }
0x1100   : > { %v6542_v14 = vpop.f32.mrb[34].mxu1 }
0x1101   : > { %v6548_v55 = vrot.slane %v6540_v37, %v10457_v38  ;;  %v9696_v15 = vpop.f32.mrb[35].mxu1 }
0x1103   : > { %v6550_v60 = vadd.f32 %v6548_v55, %v12713_v5  ;;  %v6549_v20 = vadd.f32 %v6548_v55, %v12711_v57  ;;  %v6552_v22 = vadd.f32 %v6548_v55, %v12722_v58  ;;  %v6551_v51 = vadd.f32 %v6548_v55, %v12720_v16 }
0x1104   : > { %v6554_v38 = vadd.f32 %v6548_v55, %v12733_v4  ;;  %v6553_v5 = vadd.f32 %v6548_v55, %v12731_v59  ;;  %v6556_v58 = vadd.f32 %v6548_v55, %v12744_v0  ;;  %v6555_v16 = vadd.f32 %v6548_v55, %v12742_v50 }
0x1105   : > { %v6560_v6 = vsel %vm841_vm1, %v6550_v60, 0.0  ;;  %v6557_v3 = vsel %vm841_vm1, %v6549_v20, 0.0  ;;  %v6566_v8 = vsel %vm841_vm1, %v6552_v22, 0.0  ;;  %v6563_v12 = vsel %vm841_vm1, %v6551_v51, 0.0 }
0x1106   : > { %6561 = vadd.xlane.f32.xlu0 %v6560_v6  ;;  %6558 = vadd.xlane.f32.xlu1 %v6557_v3  ;;  %v6572_v57 = vsel %vm841_vm1, %v6554_v38, 0.0  ;;  %v6569_v34 = vsel %vm841_vm1, %v6553_v5, 0.0  ;;  %v6578_v1 = vsel %vm841_vm1, %v6556_v58, 0.0  ;;  %v6575_v11 = vsel %vm841_vm1, %v6555_v16, 0.0 }
0x110a   : > { %6567 = vadd.xlane.f32.xlu0 %v6566_v8  ;;  %6564 = vadd.xlane.f32.xlu1 %v6563_v12 }
0x110e   : > { %6573 = vadd.xlane.f32.xlu0 %v6572_v57  ;;  %6570 = vadd.xlane.f32.xlu1 %v6569_v34 }
0x1112   : > { %6579 = vadd.xlane.f32.xlu0 %v6578_v1  ;;  %6576 = vadd.xlane.f32.xlu1 %v6575_v11 }
0x1193   : > { %v6562_v4 = vpop.xlane.xlu0 %6561  ;;  %v6559_v59 = vpop.xlane.xlu1 %6558 }
0x1194   : > { %v6582_v24 = vmul.f32 0.03125, %v6562_v4  ;;  %v6581_v25 = vmul.f32 0.03125, %v6559_v59 }
0x1196   : > { %v12796_v33 = vsub.f32 %v6550_v60, %v6582_v24  ;;  %v12798_v17 = vsub.f32 %v6549_v20, %v6581_v25 }
0x1197   : > { %v6568_v61 = vpop.xlane.xlu0 %6567  ;;  %v6565_v0 = vpop.xlane.xlu1 %6564 }
0x1198   : > { %v6584_v52 = vmul.f32 0.03125, %v6568_v61  ;;  %v6583_v50 = vmul.f32 0.03125, %v6565_v0  ;;  %v6598_v29 = vmul.f32 %v12796_v33, %v12796_v33  ;;  %v6597_v45 = vmul.f32 %v12798_v17, %v12798_v17 }
0x119a   : > { %v12804_v31 = vsub.f32 %v6552_v22, %v6584_v52  ;;  %v12806_v13 = vsub.f32 %v6551_v51, %v6583_v50  ;;  %v6608_v27 = vsel %vm841_vm1, %v6598_v29, 0.0  ;;  %v6605_v39 = vsel %vm841_vm1, %v6597_v45, 0.0  ;;  %v10122_v45 = vld [vmem:[%s13680_s20] ss:$0 sm:$0xff] }
0x119b   : > { %6609 = vadd.xlane.f32.xlu0 %v6608_v27  ;;  %v6574_v30 = vpop.xlane.xlu0 %6573  ;;  %6606 = vadd.xlane.f32.xlu1 %v6605_v39  ;;  %v6571_v56 = vpop.xlane.xlu1 %6570 }
0x119c   : > { %v6586_v63 = vmul.f32 0.03125, %v6574_v30  ;;  %v6585_v23 = vmul.f32 0.03125, %v6571_v56  ;;  %v6600_v40 = vmul.f32 %v12804_v31, %v12804_v31  ;;  %v6599_v47 = vmul.f32 %v12806_v13, %v12806_v13 }
0x119e   : > { %v12814_v28 = vsub.f32 %v6554_v38, %v6586_v63  ;;  %v12816_v41 = vsub.f32 %v6553_v5, %v6585_v23  ;;  %v6614_v62 = vsel %vm841_vm1, %v6600_v40, 0.0  ;;  %v6611_v53 = vsel %vm841_vm1, %v6599_v47, 0.0  ;;  %v10123_v23 = vld [vmem:[%s13681_s21] ss:$0 sm:$0xff] }
0x119f   : > { %6615 = vadd.xlane.f32.xlu0 %v6614_v62  ;;  %v6580_v21 = vpop.xlane.xlu0 %6579  ;;  %6612 = vadd.xlane.f32.xlu1 %v6611_v53  ;;  %v6577_v2 = vpop.xlane.xlu1 %6576 }
0x11a0   : > { %v6588_v48 = vmul.f32 0.03125, %v6580_v21  ;;  %v6587_v46 = vmul.f32 0.03125, %v6577_v2  ;;  %v6602_v10 = vmul.f32 %v12814_v28, %v12814_v28  ;;  %v6601_v26 = vmul.f32 %v12816_v41, %v12816_v41 }
0x11a2   : > { %v12824_v49 = vsub.f32 %v6556_v58, %v6588_v48  ;;  %v12826_v36 = vsub.f32 %v6555_v16, %v6587_v46  ;;  %v6620_v32 = vsel %vm841_vm1, %v6602_v10, 0.0  ;;  %v6617_v43 = vsel %vm841_vm1, %v6601_v26, 0.0  ;;  %v13887_v26 = vld [vmem:[#allocation5_spill] sm:$0xff] }
0x11a3   : > { %6621 = vadd.xlane.f32.xlu0 %v6620_v32  ;;  %6618 = vadd.xlane.f32.xlu1 %v6617_v43  ;;  %v13889_v43 = vld [vmem:[#allocation7_spill] sm:$0xff] }
0x11a4   : > { %v6604_v7 = vmul.f32 %v12824_v49, %v12824_v49  ;;  %v6603_v37 = vmul.f32 %v12826_v36, %v12826_v36 }
0x11a6   : > { %v6626_v35 = vsel %vm841_vm1, %v6604_v7, 0.0  ;;  %v6623_v14 = vsel %vm841_vm1, %v6603_v37, 0.0 }
0x11a7   : > { %6627 = vadd.xlane.f32.xlu0 %v6626_v35  ;;  %6624 = vadd.xlane.f32.xlu1 %v6623_v14 }
0x1228   : > { %v6610_v55 = vpop.xlane.xlu0 %6609  ;;  %v6607_v15 = vpop.xlane.xlu1 %6606 }
0x1229   : > { %v6630_v60 = vmul.f32 0.03125, %v6610_v55  ;;  %v6629_v20 = vmul.f32 0.03125, %v6607_v15 }
0x122b   : > { %v6638_v6 = vadd.f32 1e-05, %v6630_v60  ;;  %v6637_v3 = vadd.f32 1e-05, %v6629_v20  ;;  %v13890_v60 = vld [vmem:[#allocation8_spill] sm:$0xff]  ;;  %v13891_v20 = vld [vmem:[#allocation9_spill] sm:$0xff] }
0x122c   : > { %v6616_v22 = vpop.xlane.xlu0 %6615  ;;  %v6613_v51 = vpop.xlane.xlu1 %6612 }
0x122d   : > { %9945 = vrsqrt.f32 %v6638_v6  ;;  %v6632_v8 = vmul.f32 0.03125, %v6616_v22  ;;  %v6631_v12 = vmul.f32 0.03125, %v6613_v51  ;;  %v13892_v6 = vld [vmem:[#allocation10_spill] sm:$0xff]  ;;  %v13894_v22 = vld [vmem:[#allocation12_spill] sm:$0xff]  ;;  %v13895_v51 = vld [vmem:[#allocation13_spill] sm:$0xff] }
0x122e   : > { %9947 = vrsqrt.f32 %v6637_v3  ;;  %v13893_v3 = vld [vmem:[#allocation11_spill] sm:$0xff] }
0x122f   : > { %v6640_v38 = vadd.f32 1e-05, %v6632_v8  ;;  %v6639_v5 = vadd.f32 1e-05, %v6631_v12  ;;  %v13896_v8 = vld [vmem:[#allocation14_spill] sm:$0xff]  ;;  %v13897_v12 = vld [vmem:[#allocation15_spill] sm:$0xff] }
0x1230   : > { %v6622_v57 = vpop.xlane.xlu0 %6621  ;;  %v6619_v34 = vpop.xlane.xlu1 %6618 }
0x1231   : > { %9949 = vrsqrt.f32 %v6640_v38  ;;  %v6634_v58 = vmul.f32 0.03125, %v6622_v57  ;;  %v6633_v16 = vmul.f32 0.03125, %v6619_v34  ;;  %v13898_v38 = vld [vmem:[#allocation16_spill] sm:$0xff]  ;;  %v13900_v57 = vld [vmem:[#allocation18_spill] sm:$0xff]  ;;  %v13901_v34 = vld [vmem:[#allocation19_spill] sm:$0xff] }
0x1232   : > { %9951 = vrsqrt.f32 %v6639_v5  ;;  %v13899_v5 = vld [vmem:[#allocation17_spill] sm:$0xff] }
0x1233   : > { %v6642_v1 = vadd.f32 1e-05, %v6634_v58  ;;  %v6641_v11 = vadd.f32 1e-05, %v6633_v16  ;;  %v13902_v58 = vld [vmem:[#allocation20_spill] sm:$0xff]  ;;  %v13903_v16 = vld [vmem:[#allocation21_spill] sm:$0xff] }
0x1234   : > { %v6628_v4 = vpop.xlane.xlu0 %6627  ;;  %v6625_v59 = vpop.xlane.xlu1 %6624 }
0x1235   : > { %9953 = vrsqrt.f32 %v6642_v1  ;;  %v6636_v24 = vmul.f32 0.03125, %v6628_v4  ;;  %v6635_v25 = vmul.f32 0.03125, %v6625_v59  ;;  %v10124_v1 = vld [vmem:[%s13678_s18 + $0x40] sm:$0xff]  }
0x1236   : > { %9955 = vrsqrt.f32 %v6641_v11  ;;  %v10125_v11 = vld [vmem:[%s13678_s18 + $0xc0] sm:$0xff]  }
0x1237   : > { %v9946_v61 = vpop.eup %9945  ;;  %v6644_v29 = vadd.f32 1e-05, %v6636_v24  ;;  %v6643_v39 = vadd.f32 1e-05, %v6635_v25  ;;  %v10126_v4 = vld [vmem:[%s13678_s18] sm:$0xff]   ;;  %v10128_v24 = vld [vmem:[%s13678_s18 + $0x48] sm:$0xff]  }
0x1238   : > { %v9948_v0 = vpop.eup %9947  ;;  %v6654_v52 = vmul.f32 %v9946_v61, %v12796_v33  ;;  %v10127_v59 = vld [vmem:[%s13678_s18 + $0x80] sm:$0xff]   ;;  %v10129_v25 = vld [vmem:[%s13678_s18 + $0xc8] sm:$0xff]  }
0x1239   : > { %v6653_v50 = vmul.f32 %v9948_v0, %v12798_v17  ;;  %9957 = vrsqrt.f32 %v6644_v29  ;;  %v10130_v61 = vld [vmem:[%s13678_s18 + $0x8] sm:$0xff]   ;;  %v10134_v29 = vld [vmem:[%s13678_s18 + $0x10] sm:$0xff]  }
0x123a   : > { %v6662_v27 = vmul.f32 %v10122_v45, %v6654_v52  ;;  %9959 = vrsqrt.f32 %v6643_v39  ;;  %v10131_v0 = vld [vmem:[%s13678_s18 + $0x88] sm:$0xff]   ;;  %v10132_v52 = vld [vmem:[%s13678_s18 + $0x50] sm:$0xff]   ;;  %v10137_v39 = vld [vmem:[%s13678_s18 + $0xd8] sm:$0xff]  }
0x123b   : > { %v9950_v30 = vpop.eup %9949  ;;  %v6661_v56 = vmul.f32 %v10122_v45, %v6653_v50  ;;  %v10133_v50 = vld [vmem:[%s13678_s18 + $0xd0] sm:$0xff]  }
0x123c   : > { %v9952_v63 = vpop.eup %9951  ;;  %v12844_v40 = vadd.f32 %v10123_v23, %v6662_v27  ;;  %v6656_v33 = vmul.f32 %v9950_v30, %v12804_v31  ;;  %v10136_v27 = vld [vmem:[%s13678_s18 + $0x58] sm:$0xff]  }
0x123d   : > { %v12847_v47 = vadd.f32 %v10123_v23, %v6661_v56  ;;  %v6655_v17 = vmul.f32 %v9952_v63, %v12806_v13  ;;  %v10138_v30 = vld [vmem:[%s13678_s18 + $0x18] sm:$0xff]   ;;  %v10140_v63 = vld [vmem:[%s13678_s18 + $0x60] sm:$0xff]  }
0x123e   : > { %v6664_v62 = vmul.f32 %v10122_v45, %v6656_v33  ;;  %v10139_v56 = vld [vmem:[%s13678_s18 + $0x98] sm:$0xff]   ;;  %v10142_v33 = vld [vmem:[%s13678_s18 + $0x20] sm:$0xff]  }
0x123f   : > { %v9954_v53 = vpop.eup %9953  ;;  %v12852_v21 = vpack.c.bf16 %v12844_v40, %v12847_v47  ;;  %v6663_v2 = vmul.f32 %v10122_v45, %v6655_v17  ;;  %v10143_v17 = vld [vmem:[%s13678_s18 + $0xa0] sm:$0xff]  }
0x1240   : > { %v9956_v48 = vpop.eup %9955  ;;  %v12858_v31 = vadd.f32 %v10123_v23, %v6664_v62  ;;  %v6658_v46 = vmul.f32 %v9954_v53, %v12814_v28  ;;  %v10144_v62 = vld [vmem:[%s13678_s18 + $0x68] sm:$0xff]  }
0x1241   : > { %8505 = vmatmul.mubr.msk.bf16.vlgmr.msra.gmra.mrb[36].mxu1 %vm841_vm1, %v12852_v21  ;;  %8509 = vmatmul.mubr.msk.bf16.vlgmr.msra.gmra.mrb[36].mxu0 %vm841_vm1, %v12852_v21  ;;  %v12862_v13 = vadd.f32 %v10123_v23, %v6663_v2  ;;  %v6657_v10 = vmul.f32 %v9956_v48, %v12816_v41  ;;  %v13888_v41 = vld [vmem:[#allocation6_spill] sm:$0xff]  ;;  %v10145_v53 = vld [vmem:[%s13678_s18 + $0xe8] sm:$0xff]   ;;  %v10148_v2 = vld [vmem:[%s13678_s18 + $0x70] sm:$0xff]  }
0x1242   : > { %6840 = vmatpush1.bf16.msra.mxu1 %v10730_v9  ;;  %6913 = vmatpush1.bf16.msra.mxu0 %v10737_v19  ;;  %v6666_v28 = vmul.f32 %v10122_v45, %v6658_v46  ;;  %v10149_v48 = vld [vmem:[%s13678_s18 + $0xf0] sm:$0xff]  }
0x1243   : > { %6735 = vmatprep.mubr.bf16.mxu1 %v13850_v18  ;;  %6808 = vmatprep.mubr.bf16.mxu0 %v13850_v18  ;;  %v9958_v9 = vpop.eup %9957  ;;  %v12874_v19 = vpack.c.bf16 %v12858_v31, %v12862_v13  ;;  %v6665_v32 = vmul.f32 %v10122_v45, %v6657_v10  ;;  %v10150_v46 = vld [vmem:[%s13678_s18 + $0x30] sm:$0xff]  }
0x1244   : > { %6841 = vmatprep.subr.bf16.mxu1 %v10785_v42  ;;  %6914 = vmatprep.subr.bf16.mxu0 %v10787_v44  ;;  %v9960_v7 = vpop.eup %9959  ;;  %v12884_v42 = vadd.f32 %v10123_v23, %v6666_v28  ;;  %v10151_v10 = vld [vmem:[%s13678_s18 + $0xb0] sm:$0xff]   ;;  %v10155_v28 = vld [vmem:[%s13678_s18 + $0xb8] sm:$0xff]  }
0x1245   : > { %v12886_v44 = vadd.f32 %v10123_v23, %v6665_v32  ;;  %v6659_v37 = vmul.f32 %v9960_v7, %v12826_v36  ;;  %v10156_v32 = vld [vmem:[%s13678_s18 + $0x140] sm:$0xff]  }
0x1246   : > { %6842 = vmatpush1.bf16.msra.mxu1 %v10806_v54  ;;  %6915 = vmatpush1.bf16.msra.mxu0 %v13887_v26  ;;  %v6660_v54 = vmul.f32 %v9958_v9, %v12824_v49  ;;  %v10152_v26 = vld [vmem:[%s13678_s18 + $0x78] sm:$0xff]  }
0x1247   : > { %6985 = vmatprep.subr.bf16.mxu1 %v13888_v41  ;;  %7058 = vmatprep.subr.bf16.mxu0 %v13889_v43  ;;  %v12892_v35 = vpack.c.bf16 %v12884_v42, %v12886_v44  ;;  %v6667_v55 = vmul.f32 %v10122_v45, %v6659_v37  ;;  %v10153_v9 = vld [vmem:[%s13678_s18 + $0xf8] sm:$0xff]   ;;  %v10157_v41 = vld [vmem:[%s13678_s18 + $0x1c0] sm:$0xff]  }
0x1248   : > { %v6668_v14 = vmul.f32 %v10122_v45, %v6660_v54  ;;  %v10135_v45 = vld [vmem:[%s13678_s18 + $0x90] sm:$0xff]   ;;  %v13904_v54 = vld [vmem:[#allocation22_spill] sm:$0xff] }
0x1249   : > { %8506 = vmatmul.mubr.msk.bf16.gmra.mrb[40].mxu1 %vm841_vm1, %v12874_v19  ;;  %8510 = vmatmul.mubr.msk.bf16.gmra.mrb[40].mxu0 %vm841_vm1, %v12874_v19  ;;  %v12902_v49 = vadd.f32 %v10123_v23, %v6667_v55 }
0x124a   : > { %6745 = vmatprep.mubr.bf16.mxu1 %v13850_v18  ;;  %6818 = vmatprep.mubr.bf16.mxu0 %v13850_v18  ;;  %v12900_v15 = vadd.f32 %v10123_v23, %v6668_v14  ;;  %v10141_v23 = vld [vmem:[%s13678_s18 + $0xe0] sm:$0xff]  }
0x124c   : > { %v12906_v36 = vpack.c.bf16 %v12900_v15, %v12902_v49 }
0x1251   : > { %8507 = vmatmul.mubr.msk.bf16.gmra.mrb[44].mxu1 %vm841_vm1, %v12892_v35  ;;  %8511 = vmatmul.mubr.msk.bf16.gmra.mrb[44].mxu0 %vm841_vm1, %v12892_v35 }
0x1252   : > { %6755 = vmatprep.mubr.bf16.mxu1 %v13850_v18  ;;  %6828 = vmatprep.mubr.bf16.mxu0 %v13850_v18 }
0x1259   : > { %8508 = vmatmul.mubr.msk.bf16.gmra.mrb[48].mxu1 %vm841_vm1, %v12906_v36  ;;  %8512 = vmatmul.mubr.msk.bf16.gmra.mrb[48].mxu0 %vm841_vm1, %v12906_v36 }
0x125a   : > { %6871 = vmatprep.mubr.bf16.mxu1 %v13850_v18  ;;  %6944 = vmatprep.mubr.bf16.mxu0 %v13850_v18 }
0x1261   : > { %8513 = vmatmul.mubr.msk.bf16.vlgmr.msra.gmra.mrb[52].mxu1 %vm841_vm1, %v12852_v21  ;;  %8517 = vmatmul.mubr.msk.bf16.vlgmr.msra.gmra.mrb[52].mxu0 %vm841_vm1, %v12852_v21 }
0x1262   : > { %6986 = vmatpush1.bf16.msra.mxu1 %v13890_v60  ;;  %7059 = vmatpush1.bf16.msra.mxu0 %v13891_v20  ;;  %v13906_v60 = vld [vmem:[#allocation24_spill] sm:$0xff] }
0x1263   : > { %6881 = vmatprep.mubr.bf16.mxu1 %v13850_v18  ;;  %6954 = vmatprep.mubr.bf16.mxu0 %v13850_v18 }
0x1264   : > { %6987 = vmatprep.subr.bf16.mxu1 %v13892_v6  ;;  %7060 = vmatprep.subr.bf16.mxu0 %v13893_v3  ;;  %v13907_v6 = vld [vmem:[#allocation25_spill] sm:$0xff] }
0x1266   : > { %6988 = vmatpush1.bf16.msra.mxu1 %v13894_v22  ;;  %7061 = vmatpush1.bf16.msra.mxu0 %v13895_v51 }
0x1267   : > { %7131 = vmatprep.subr.bf16.mxu1 %v13896_v8  ;;  %7204 = vmatprep.subr.bf16.mxu0 %v13897_v12 }
0x1269   : > { %8514 = vmatmul.mubr.msk.bf16.gmra.mrb[56].mxu1 %vm841_vm1, %v12874_v19  ;;  %8518 = vmatmul.mubr.msk.bf16.gmra.mrb[56].mxu0 %vm841_vm1, %v12874_v19 }
0x126a   : > { %6891 = vmatprep.mubr.bf16.mxu1 %v13850_v18  ;;  %6964 = vmatprep.mubr.bf16.mxu0 %v13850_v18 }
0x1271   : > { %8515 = vmatmul.mubr.msk.bf16.gmra.mrb[60].mxu1 %vm841_vm1, %v12892_v35  ;;  %8519 = vmatmul.mubr.msk.bf16.gmra.mrb[60].mxu0 %vm841_vm1, %v12892_v35 }
0x1272   : > { %6901 = vmatprep.mubr.bf16.mxu1 %v13850_v18  ;;  %6974 = vmatprep.mubr.bf16.mxu0 %v13850_v18 }
0x1279   : > { %8516 = vmatmul.mubr.msk.bf16.gmra.mrb[64].mxu1 %vm841_vm1, %v12906_v36  ;;  %8520 = vmatmul.mubr.msk.bf16.gmra.mrb[64].mxu0 %vm841_vm1, %v12906_v36 }
0x127a   : > { %7017 = vmatprep.mubr.bf16.mxu1 %v13850_v18  ;;  %7090 = vmatprep.mubr.bf16.mxu0 %v13850_v18 }
0x1281   : > { %8521 = vmatmul.mubr.msk.bf16.vlgmr.msra.gmra.mrb[68].mxu1 %vm841_vm1, %v12852_v21  ;;  %8525 = vmatmul.mubr.msk.bf16.vlgmr.msra.gmra.mrb[68].mxu0 %vm841_vm1, %v12852_v21 }
0x1282   : > { %7132 = vmatpush1.bf16.msra.mxu1 %v13898_v38  ;;  %7205 = vmatpush1.bf16.msra.mxu0 %v13899_v5 }
0x1283   : > { %7027 = vmatprep.mubr.bf16.mxu1 %v13850_v18  ;;  %7100 = vmatprep.mubr.bf16.mxu0 %v13850_v18 }
0x1284   : > { %7133 = vmatprep.subr.bf16.mxu1 %v13900_v57  ;;  %7206 = vmatprep.subr.bf16.mxu0 %v13901_v34 }
0x1286   : > { %7134 = vmatpush1.bf16.msra.mxu1 %v13902_v58  ;;  %7207 = vmatpush1.bf16.msra.mxu0 %v13903_v16 }
0x1287   : > { %9247 = vmatprep.subr.bf16.mxu1 %v10124_v1  ;;  %9287 = vmatprep.subr.bf16.mxu0 %v10125_v11 }
0x1289   : > { %8522 = vmatmul.mubr.msk.bf16.gmra.mrb[72].mxu1 %vm841_vm1, %v12874_v19  ;;  %8526 = vmatmul.mubr.msk.bf16.gmra.mrb[72].mxu0 %vm841_vm1, %v12874_v19 }
0x128a   : > { %7037 = vmatprep.mubr.bf16.mxu1 %v13850_v18  ;;  %7110 = vmatprep.mubr.bf16.mxu0 %v13850_v18 }
0x1291   : > { %8523 = vmatmul.mubr.msk.bf16.gmra.mrb[76].mxu1 %vm841_vm1, %v12892_v35  ;;  %8527 = vmatmul.mubr.msk.bf16.gmra.mrb[76].mxu0 %vm841_vm1, %v12892_v35 }
0x1292   : > { %7047 = vmatprep.mubr.bf16.mxu1 %v13850_v18  ;;  %7120 = vmatprep.mubr.bf16.mxu0 %v13850_v18 }
0x1299   : > { %8524 = vmatmul.mubr.msk.bf16.gmra.mrb[80].mxu1 %vm841_vm1, %v12906_v36  ;;  %8528 = vmatmul.mubr.msk.bf16.gmra.mrb[80].mxu0 %vm841_vm1, %v12906_v36 }
0x129a   : > { %7163 = vmatprep.mubr.bf16.mxu1 %v13850_v18  ;;  %7236 = vmatprep.mubr.bf16.mxu0 %v13850_v18 }
0x12a1   : > { %8529 = vmatmul.mubr.msk.bf16.vlgmr.msra.gmra.mrb[84].mxu1 %vm841_vm1, %v12852_v21  ;;  %8533 = vmatmul.mubr.msk.bf16.vlgmr.msra.gmra.mrb[84].mxu0 %vm841_vm1, %v12852_v21  ;;  %v10147_v21 = vld [vmem:[%s13678_s18 + $0xa8] sm:$0xff]  }
0x12a2   : > { %7173 = vmatprep.mubr.bf16.mxu1 %v13850_v18  ;;  %7246 = vmatprep.mubr.bf16.mxu0 %v13850_v18 }
0x12a3   : > { %9248 = vmatpush3.bf16.msra.mxu1 %v10126_v4  ;;  %9288 = vmatpush3.bf16.msra.mxu0 %v10127_v59 }
0x12a4   : > { %9249 = vmatprep.subr.bf16.mxu1 %v10128_v24  ;;  %9289 = vmatprep.subr.bf16.mxu0 %v10129_v25 }
0x12a7   : > { %9250 = vmatpush3.bf16.msra.mxu1 %v10130_v61  ;;  %9290 = vmatpush3.bf16.msra.mxu0 %v10131_v0 }
0x12a8   : > { %9251 = vmatprep.subr.bf16.mxu1 %v10132_v52  ;;  %9291 = vmatprep.subr.bf16.mxu0 %v10133_v50 }
0x12a9   : > { %8530 = vmatmul.mubr.msk.bf16.gmra.mrb[88].mxu1 %vm841_vm1, %v12874_v19  ;;  %8534 = vmatmul.mubr.msk.bf16.gmra.mrb[88].mxu0 %vm841_vm1, %v12874_v19  ;;  %v10154_v19 = vld [vmem:[%s13678_s18 + $0x38] sm:$0xff]  }
0x12aa   : > { %7183 = vmatprep.mubr.bf16.mxu1 %v13850_v18  ;;  %7256 = vmatprep.mubr.bf16.mxu0 %v13850_v18 }
0x12ab   : > { %9252 = vmatpush3.bf16.msra.mxu1 %v10134_v29  ;;  %9292 = vmatpush3.bf16.msra.mxu0 %v10135_v45 }
0x12ac   : > { %9253 = vmatprep.subr.bf16.mxu1 %v10136_v27  ;;  %9293 = vmatprep.subr.bf16.mxu0 %v10137_v39 }
0x12af   : > { %9254 = vmatpush3.bf16.msra.mxu1 %v10138_v30  ;;  %9294 = vmatpush3.bf16.msra.mxu0 %v10139_v56 }
0x12b0   : > { %9255 = vmatprep.subr.bf16.mxu1 %v10140_v63  ;;  %9295 = vmatprep.subr.bf16.mxu0 %v10141_v23 }
0x12b1   : > { %8531 = vmatmul.mubr.msk.bf16.gmra.mrb[92].mxu1 %vm841_vm1, %v12892_v35  ;;  %8535 = vmatmul.mubr.msk.bf16.gmra.mrb[92].mxu0 %vm841_vm1, %v12892_v35  ;;  %v13905_v35 = vld [vmem:[#allocation23_spill] sm:$0xff] }
0x12b2   : > { %7193 = vmatprep.mubr.bf16.mxu1 %v13850_v18  ;;  %7266 = vmatprep.mubr.bf16.mxu0 %v13850_v18  ;;  %v10146_v18 = vld [vmem:[%s13678_s18 + $0x28] sm:$0xff]  }
0x12b3   : > { %9256 = vmatpush3.bf16.msra.mxu1 %v10142_v33  ;;  %9296 = vmatpush3.bf16.msra.mxu0 %v10143_v17 }
0x12b4   : > { %9257 = vmatprep.subr.bf16.mxu1 %v10144_v62  ;;  %9297 = vmatprep.subr.bf16.mxu0 %v10145_v53 }
0x12b7   : > { %9258 = vmatpush3.bf16.msra.mxu1 %v10146_v18  ;;  %9298 = vmatpush3.bf16.msra.mxu0 %v10147_v21 }
0x12b8   : > { %9259 = vmatprep.subr.bf16.mxu1 %v10148_v2  ;;  %9299 = vmatprep.subr.bf16.mxu0 %v10149_v48 }
0x12b9   : > { %8532 = vmatmul.mubr.msk.bf16.gmra.mrb[96].mxu1 %vm841_vm1, %v12906_v36  ;;  %8536 = vmatmul.mubr.msk.bf16.gmra.mrb[96].mxu0 %vm841_vm1, %v12906_v36 }
0x12bb   : > { %9260 = vmatpush3.bf16.msra.mxu1 %v10150_v46  ;;  %9300 = vmatpush3.bf16.msra.mxu0 %v10151_v10  ;;  %v10158_v46 = vld [vmem:[%s13678_s18 + $0x100] sm:$0xff]  }
0x12bc   : > { %9261 = vmatprep.subr.bf16.mxu1 %v10152_v26  ;;  %9301 = vmatprep.subr.bf16.mxu0 %v10153_v9  ;;  %v10159_v10 = vld [vmem:[%s13678_s18 + $0x180] sm:$0xff]  }
0x12bf   : > { %9262 = vmatpush3.bf16.msra.mxu1 %v10154_v19  ;;  %9302 = vmatpush3.bf16.msra.mxu0 %v10155_v28 }
0x12c0   : > { %9327 = vmatprep.subr.bf16.mxu1 %v10156_v32  ;;  %9367 = vmatprep.subr.bf16.mxu0 %v10157_v41  ;;  %v10160_v32 = vld [vmem:[%s13678_s18 + $0x148] sm:$0xff]  }
0x12c1   : > { %v10161_v41 = vld [vmem:[%s13678_s18 + $0x1c8] sm:$0xff]  }
0x1314   : > { %v6727_v43 = vpop.f32.mrb[36].mxu1  ;;  %v6800_v7 = vpop.f32.mrb[36].mxu0 }
0x1315   : > { %v6728_v37 = vadd.f32 %v6727_v43, %v13904_v54  ;;  %v6801_v14 = vadd.f32 %v6800_v7, %v13905_v35  ;;  %v6729_v55 = vpop.f32.mrb[37].mxu1  ;;  %v6802_v36 = vpop.f32.mrb[37].mxu0 }
0x1316   : > { %v6730_v20 = vadd.f32 %v6729_v55, %v13906_v60  ;;  %v6803_v3 = vadd.f32 %v6802_v36, %v13907_v6  ;;  %v6731_v22 = vpop.f32.mrb[38].mxu1  ;;  %v6804_v51 = vpop.f32.mrb[38].mxu0 }
0x1317   : > { %v6732_v8 = vadd.f32 %v6731_v22, %v13904_v54  ;;  %v6805_v12 = vadd.f32 %v6804_v51, %v13905_v35  ;;  %v6733_v38 = vpop.f32.mrb[39].mxu1  ;;  %v6806_v5 = vpop.f32.mrb[39].mxu0  ;;  %v7277_v58 = vmax.f32 %v6728_v37, 0.0  ;;  %v7279_v16 = vmax.f32 %v6801_v14, 0.0  ;;  %v10162_v22 = vld [vmem:[%s13678_s18 + $0x108] sm:$0xff]  }
0x1318   : > { %v6734_v57 = vadd.f32 %v6733_v38, %v13906_v60  ;;  %v6807_v34 = vadd.f32 %v6806_v5, %v13907_v6  ;;  %v7278_v4 = vmax.f32 %v6730_v20, 0.0  ;;  %v7280_v59 = vmax.f32 %v6803_v3, 0.0 }
0x1319   : > { %v7293_v1 = vmax.f32 %v6732_v8, 0.0  ;;  %v7295_v11 = vmax.f32 %v6805_v12, 0.0  ;;  %v10163_v12 = vld [vmem:[%s13678_s18 + $0x188] sm:$0xff]  }
0x131a   : > { %v7294_v24 = vmax.f32 %v6734_v57, 0.0  ;;  %v7296_v25 = vmax.f32 %v6807_v34, 0.0 }
0x131b   : > { %v7405_v61 = vpack.c.bf16 %v7293_v1, %v7277_v58  ;;  %v7407_v0 = vpack.c.bf16 %v7295_v11, %v7279_v16  ;;  %v10164_v58 = vld [vmem:[%s13678_s18 + $0x150] sm:$0xff]  }
0x131c   : > { %v7406_v52 = vpack.c.bf16 %v7294_v24, %v7278_v4  ;;  %v7408_v50 = vpack.c.bf16 %v7296_v25, %v7280_v59  ;;  %v6737_v29 = vpop.f32.mrb[40].mxu1  ;;  %v6810_v45 = vpop.f32.mrb[40].mxu0  ;;  %v10165_v16 = vld [vmem:[%s13678_s18 + $0x1d0] sm:$0xff]  }
0x131d   : > { %v6738_v27 = vadd.f32 %v6737_v29, %v13904_v54  ;;  %v6811_v39 = vadd.f32 %v6810_v45, %v13905_v35  ;;  %v6739_v30 = vpop.f32.mrb[41].mxu1  ;;  %v6812_v56 = vpop.f32.mrb[41].mxu0  ;;  %v10166_v29 = vld [vmem:[%s13678_s18 + $0x110] sm:$0xff]  }
0x131e   : > { %v6740_v63 = vadd.f32 %v6739_v30, %v13906_v60  ;;  %v6813_v23 = vadd.f32 %v6812_v56, %v13907_v6  ;;  %v6741_v33 = vpop.f32.mrb[42].mxu1  ;;  %v6814_v17 = vpop.f32.mrb[42].mxu0  ;;  %7501 = vmatprep.mubr.bf16.mxu1 %v7406_v52  ;;  %7566 = vmatprep.mubr.bf16.mxu0 %v7408_v50  ;;  %v10167_v45 = vld [vmem:[%s13678_s18 + $0x190] sm:$0xff]  }
0x131f   : > { %v6742_v62 = vadd.f32 %v6741_v33, %v13904_v54  ;;  %v6815_v53 = vadd.f32 %v6814_v17, %v13905_v35  ;;  %v6743_v18 = vpop.f32.mrb[43].mxu1  ;;  %v6816_v21 = vpop.f32.mrb[43].mxu0  ;;  %7502 = vmatmul.mubr.bf16.vlgmr.msra.gmra.mrb[100].mxu1 %v7405_v61  ;;  %7567 = vmatmul.mubr.bf16.vlgmr.msra.gmra.mrb[100].mxu0 %v7407_v0  ;;  %v7309_v26 = vmax.f32 %v6738_v27, 0.0  ;;  %v7311_v9 = vmax.f32 %v6811_v39, 0.0 }
0x1320   : > { %v6744_v2 = vadd.f32 %v6743_v18, %v13906_v60  ;;  %v6817_v48 = vadd.f32 %v6816_v21, %v13907_v6  ;;  %9328 = vmatpush3.bf16.msra.mxu1 %v10158_v46  ;;  %9368 = vmatpush3.bf16.msra.mxu0 %v10159_v10  ;;  %v7310_v43 = vmax.f32 %v6740_v63, 0.0  ;;  %v7312_v7 = vmax.f32 %v6813_v23, 0.0  ;;  %v10168_v63 = vld [vmem:[%s13678_s18 + $0x158] sm:$0xff]  }
0x1321   : > { %v7325_v19 = vmax.f32 %v6742_v62, 0.0  ;;  %v7327_v28 = vmax.f32 %v6815_v53, 0.0  ;;  %9329 = vmatprep.subr.bf16.mxu1 %v10160_v32  ;;  %9369 = vmatprep.subr.bf16.mxu0 %v10161_v41  ;;  %v10169_v23 = vld [vmem:[%s13678_s18 + $0x1d8] sm:$0xff]  }
0x1322   : > { %v7326_v37 = vmax.f32 %v6744_v2, 0.0  ;;  %v7328_v14 = vmax.f32 %v6817_v48, 0.0  ;;  %v10170_v46 = vld [vmem:[%s13678_s18 + $0x118] sm:$0xff]  }
0x1323   : > { %v7421_v55 = vpack.c.bf16 %v7325_v19, %v7309_v26  ;;  %v7423_v36 = vpack.c.bf16 %v7327_v28, %v7311_v9  ;;  %v10171_v9 = vld [vmem:[%s13678_s18 + $0x198] sm:$0xff]  }
0x1324   : > { %v7422_v20 = vpack.c.bf16 %v7326_v37, %v7310_v43  ;;  %v7424_v3 = vpack.c.bf16 %v7328_v14, %v7312_v7  ;;  %9330 = vmatpush3.bf16.msra.mxu1 %v10162_v22  ;;  %v6747_v51 = vpop.f32.mrb[44].mxu1  ;;  %v6820_v8 = vpop.f32.mrb[44].mxu0  ;;  %9370 = vmatpush3.bf16.msra.mxu0 %v10163_v12  ;;  %v10172_v43 = vld [vmem:[%s13678_s18 + $0x160] sm:$0xff]  }
0x1325   : > { %v6748_v38 = vadd.f32 %v6747_v51, %v13904_v54  ;;  %v6821_v5 = vadd.f32 %v6820_v8, %v13905_v35  ;;  %v6749_v57 = vpop.f32.mrb[45].mxu1  ;;  %v6822_v34 = vpop.f32.mrb[45].mxu0  ;;  %9331 = vmatprep.subr.bf16.mxu1 %v10164_v58  ;;  %9371 = vmatprep.subr.bf16.mxu0 %v10165_v16  ;;  %v10173_v7 = vld [vmem:[%s13678_s18 + $0x1e0] sm:$0xff]  }
0x1326   : > { %v6750_v1 = vadd.f32 %v6749_v57, %v13906_v60  ;;  %v6823_v11 = vadd.f32 %v6822_v34, %v13907_v6  ;;  %v6751_v4 = vpop.f32.mrb[46].mxu1  ;;  %v6824_v59 = vpop.f32.mrb[46].mxu0  ;;  %7509 = vmatprep.mubr.bf16.mxu1 %v7422_v20  ;;  %7574 = vmatprep.mubr.bf16.mxu0 %v7424_v3 }
0x1327   : > { %v6752_v24 = vadd.f32 %v6751_v4, %v13904_v54  ;;  %v6825_v25 = vadd.f32 %v6824_v59, %v13905_v35  ;;  %v6753_v61 = vpop.f32.mrb[47].mxu1  ;;  %v6826_v0 = vpop.f32.mrb[47].mxu0  ;;  %7510 = vmatmul.mubr.bf16.gmra.mrb[104].mxu1 %v7421_v55  ;;  %7575 = vmatmul.mubr.bf16.gmra.mrb[104].mxu0 %v7423_v36  ;;  %v7341_v27 = vmax.f32 %v6748_v38, 0.0  ;;  %v7343_v39 = vmax.f32 %v6821_v5, 0.0  ;;  %v10174_v38 = vld [vmem:[%s13678_s18 + $0x120] sm:$0xff]  }
0x1328   : > { %v6754_v52 = vadd.f32 %v6753_v61, %v13906_v60  ;;  %v6827_v50 = vadd.f32 %v6826_v0, %v13907_v6  ;;  %9332 = vmatpush3.bf16.msra.mxu1 %v10166_v29  ;;  %9372 = vmatpush3.bf16.msra.mxu0 %v10167_v45  ;;  %v7342_v33 = vmax.f32 %v6750_v1, 0.0  ;;  %v7344_v17 = vmax.f32 %v6823_v11, 0.0  ;;  %v10175_v5 = vld [vmem:[%s13678_s18 + $0x1a0] sm:$0xff]   ;;  %v10178_v61 = vld [vmem:[%s13678_s18 + $0x128] sm:$0xff]   ;;  %v13908_v29 = vld [vmem:[#allocation26_spill] sm:$0xff] }
0x1329   : > { %v7357_v30 = vmax.f32 %v6752_v24, 0.0  ;;  %v7359_v56 = vmax.f32 %v6825_v25, 0.0  ;;  %9333 = vmatprep.subr.bf16.mxu1 %v10168_v63  ;;  %9373 = vmatprep.subr.bf16.mxu0 %v10169_v23  ;;  %v10180_v63 = vld [vmem:[%s13678_s18 + $0x170] sm:$0xff]  }
0x132a   : > { %v7358_v62 = vmax.f32 %v6754_v52, 0.0  ;;  %v7360_v53 = vmax.f32 %v6827_v50, 0.0  ;;  %v10179_v50 = vld [vmem:[%s13678_s18 + $0x1a8] sm:$0xff]   ;;  %v10181_v23 = vld [vmem:[%s13678_s18 + $0x1f0] sm:$0xff]  }
0x132b   : > { %v7437_v18 = vpack.c.bf16 %v7357_v30, %v7341_v27  ;;  %v7439_v21 = vpack.c.bf16 %v7359_v56, %v7343_v39  ;;  %v13909_v27 = vld [vmem:[#allocation28_spill] sm:$0xff] }
0x132c   : > { %v7438_v2 = vpack.c.bf16 %v7358_v62, %v7342_v33  ;;  %v7440_v48 = vpack.c.bf16 %v7360_v53, %v7344_v17  ;;  %9334 = vmatpush3.bf16.msra.mxu1 %v10170_v46  ;;  %v6757_v10 = vpop.f32.mrb[48].mxu1  ;;  %v6830_v26 = vpop.f32.mrb[48].mxu0  ;;  %9374 = vmatpush3.bf16.msra.mxu0 %v10171_v9  ;;  %v13910_v33 = vld [vmem:[#allocation27_spill] sm:$0xff]  ;;  %v13911_v62 = vld [vmem:[#allocation29_spill] sm:$0xff] }
0x132d   : > { %v6758_v19 = vadd.f32 %v6757_v10, %v13904_v54  ;;  %v6831_v28 = vadd.f32 %v6830_v26, %v13905_v35  ;;  %v6759_v32 = vpop.f32.mrb[49].mxu1  ;;  %v6832_v41 = vpop.f32.mrb[49].mxu0  ;;  %9335 = vmatprep.subr.bf16.mxu1 %v10172_v43  ;;  %9375 = vmatprep.subr.bf16.mxu0 %v10173_v7 }
0x132e   : > { %v6760_v37 = vadd.f32 %v6759_v32, %v13906_v60  ;;  %v6833_v14 = vadd.f32 %v6832_v41, %v13907_v6  ;;  %v6761_v55 = vpop.f32.mrb[50].mxu1  ;;  %v6834_v36 = vpop.f32.mrb[50].mxu0  ;;  %7517 = vmatprep.mubr.bf16.mxu1 %v7438_v2  ;;  %7582 = vmatprep.mubr.bf16.mxu0 %v7440_v48 }
0x132f   : > { %v6762_v20 = vadd.f32 %v6761_v55, %v13904_v54  ;;  %v6835_v3 = vadd.f32 %v6834_v36, %v13905_v35  ;;  %v6763_v22 = vpop.f32.mrb[51].mxu1  ;;  %v6836_v51 = vpop.f32.mrb[51].mxu0  ;;  %7518 = vmatmul.mubr.bf16.gmra.mrb[108].mxu1 %v7437_v18  ;;  %7583 = vmatmul.mubr.bf16.gmra.mrb[108].mxu0 %v7439_v21  ;;  %v7373_v54 = vmax.f32 %v6758_v19, 0.0  ;;  %v7375_v35 = vmax.f32 %v6831_v28, 0.0  ;;  %v10182_v19 = vld [vmem:[%s13678_s18 + $0x130] sm:$0xff]  }
0x1330   : > { %v6764_v8 = vadd.f32 %v6763_v22, %v13906_v60  ;;  %v6837_v12 = vadd.f32 %v6836_v51, %v13907_v6  ;;  %9336 = vmatpush3.bf16.msra.mxu1 %v10174_v38  ;;  %9376 = vmatpush3.bf16.msra.mxu0 %v10175_v5  ;;  %v10176_v60 = vld [vmem:[%s13678_s18 + $0x168] sm:$0xff]   ;;  %v7374_v58 = vmax.f32 %v6760_v37, 0.0  ;;  %v7376_v16 = vmax.f32 %v6833_v14, 0.0  ;;  %v10183_v28 = vld [vmem:[%s13678_s18 + $0x1b0] sm:$0xff]   ;;  %v10184_v37 = vld [vmem:[%s13678_s18 + $0x178] sm:$0xff]  }
0x1331   : > { %v7389_v57 = vmax.f32 %v6762_v20, 0.0  ;;  %v7391_v34 = vmax.f32 %v6835_v3, 0.0  ;;  %9337 = vmatprep.subr.bf16.mxu1 %v10176_v60  ;;  %v10177_v6 = vld [vmem:[%s13678_s18 + $0x1e8] sm:$0xff]   ;;  %v10185_v14 = vld [vmem:[%s13678_s18 + $0x1f8] sm:$0xff]  }
0x1332   : > { %9377 = vmatprep.subr.bf16.mxu0 %v10177_v6  ;;  %v7390_v1 = vmax.f32 %v6764_v8, 0.0  ;;  %v7392_v11 = vmax.f32 %v6837_v12, 0.0  ;;  %v10186_v38 = vld [vmem:[%s13678_s18 + $0x138] sm:$0xff]  }
0x1333   : > { %v7453_v4 = vpack.c.bf16 %v7389_v57, %v7373_v54  ;;  %v7455_v59 = vpack.c.bf16 %v7391_v34, %v7375_v35  ;;  %v10187_v35 = vld [vmem:[%s13678_s18 + $0x1b8] sm:$0xff]  }
0x1334   : > { %v7454_v24 = vpack.c.bf16 %v7390_v1, %v7374_v58  ;;  %v7456_v25 = vpack.c.bf16 %v7392_v11, %v7376_v16  ;;  %9338 = vmatpush3.bf16.msra.mxu1 %v10178_v61  ;;  %v6873_v0 = vpop.f32.mrb[52].mxu1  ;;  %v6946_v52 = vpop.f32.mrb[52].mxu0  ;;  %9378 = vmatpush3.bf16.msra.mxu0 %v10179_v50  ;;  %v10188_v58 = vld [vmem:[%s13678_s18 + $0x240] sm:$0xff]  }
0x1335   : > { %v6874_v45 = vadd.f32 %v6873_v0, %v13908_v29  ;;  %v6947_v39 = vadd.f32 %v6946_v52, %v13909_v27  ;;  %v6875_v30 = vpop.f32.mrb[53].mxu1  ;;  %v6948_v56 = vpop.f32.mrb[53].mxu0  ;;  %9339 = vmatprep.subr.bf16.mxu1 %v10180_v63  ;;  %9379 = vmatprep.subr.bf16.mxu0 %v10181_v23  ;;  %v10189_v16 = vld [vmem:[%s13678_s18 + $0x2c0] sm:$0xff]  }
0x1336   : > { %v6876_v17 = vadd.f32 %v6875_v30, %v13910_v33  ;;  %v6949_v53 = vadd.f32 %v6948_v56, %v13911_v62  ;;  %v6877_v18 = vpop.f32.mrb[54].mxu1  ;;  %v6950_v21 = vpop.f32.mrb[54].mxu0  ;;  %7525 = vmatprep.mubr.bf16.mxu1 %v7454_v24  ;;  %7590 = vmatprep.mubr.bf16.mxu0 %v7456_v25 }
0x1337   : > { %v6878_v2 = vadd.f32 %v6877_v18, %v13908_v29  ;;  %v6951_v48 = vadd.f32 %v6950_v21, %v13909_v27  ;;  %v6879_v46 = vpop.f32.mrb[55].mxu1  ;;  %v6952_v10 = vpop.f32.mrb[55].mxu0  ;;  %7526 = vmatmul.mubr.bf16.gmra.mrb[112].mxu1 %v7453_v4  ;;  %7591 = vmatmul.mubr.bf16.gmra.mrb[112].mxu0 %v7455_v59  ;;  %v7281_v32 = vmax.f32 %v6874_v45, 0.0  ;;  %v7283_v41 = vmax.f32 %v6947_v39, 0.0  ;;  %v10190_v45 = vld [vmem:[%s13678_s18 + $0x200] sm:$0xff]  }
0x1338   : > { %v6880_v26 = vadd.f32 %v6879_v46, %v13910_v33  ;;  %v6953_v9 = vadd.f32 %v6952_v10, %v13911_v62  ;;  %9340 = vmatpush3.bf16.msra.mxu1 %v10182_v19  ;;  %9380 = vmatpush3.bf16.msra.mxu0 %v10183_v28  ;;  %v7282_v55 = vmax.f32 %v6876_v17, 0.0  ;;  %v7284_v36 = vmax.f32 %v6949_v53, 0.0  ;;  %v10191_v39 = vld [vmem:[%s13678_s18 + $0x280] sm:$0xff]   ;;  %v10192_v17 = vld [vmem:[%s13678_s18 + $0x248] sm:$0xff]  }
0x1339   : > { %v7297_v43 = vmax.f32 %v6878_v2, 0.0  ;;  %v7299_v7 = vmax.f32 %v6951_v48, 0.0  ;;  %9341 = vmatprep.subr.bf16.mxu1 %v10184_v37  ;;  %9381 = vmatprep.subr.bf16.mxu0 %v10185_v14  ;;  %v10193_v53 = vld [vmem:[%s13678_s18 + $0x2c8] sm:$0xff]  }
0x133a   : > { %v7298_v20 = vmax.f32 %v6880_v26, 0.0  ;;  %v7300_v3 = vmax.f32 %v6953_v9, 0.0  ;;  %v10194_v19 = vld [vmem:[%s13678_s18 + $0x208] sm:$0xff]  }
0x133b   : > { %v7409_v22 = vpack.c.bf16 %v7297_v43, %v7281_v32  ;;  %v7411_v51 = vpack.c.bf16 %v7299_v7, %v7283_v41  ;;  %v10195_v41 = vld [vmem:[%s13678_s18 + $0x288] sm:$0xff]  }
0x133c   : > { %v7410_v8 = vpack.c.bf16 %v7298_v20, %v7282_v55  ;;  %v7412_v12 = vpack.c.bf16 %v7300_v3, %v7284_v36  ;;  %9342 = vmatpush3.bf16.msra.mxu1 %v10186_v38  ;;  %v6883_v5 = vpop.f32.mrb[56].mxu1  ;;  %v6956_v54 = vpop.f32.mrb[56].mxu0  ;;  %9382 = vmatpush3.bf16.msra.mxu0 %v10187_v35  ;;  %v10196_v55 = vld [vmem:[%s13678_s18 + $0x250] sm:$0xff]  }
0x133d   : > { %v6884_v57 = vadd.f32 %v6883_v5, %v13908_v29  ;;  %v6957_v34 = vadd.f32 %v6956_v54, %v13909_v27  ;;  %v6885_v60 = vpop.f32.mrb[57].mxu1  ;;  %v6958_v6 = vpop.f32.mrb[57].mxu0  ;;  %9407 = vmatprep.subr.bf16.mxu1 %v10188_v58  ;;  %9447 = vmatprep.subr.bf16.mxu0 %v10189_v16  ;;  %v10197_v36 = vld [vmem:[%s13678_s18 + $0x2d0] sm:$0xff]  }
0x133e   : > { %v6886_v1 = vadd.f32 %v6885_v60, %v13910_v33  ;;  %v6959_v11 = vadd.f32 %v6958_v6, %v13911_v62  ;;  %v6887_v4 = vpop.f32.mrb[58].mxu1  ;;  %v6960_v59 = vpop.f32.mrb[58].mxu0  ;;  %7631 = vmatprep.mubr.bf16.mxu1 %v7410_v8  ;;  %7696 = vmatprep.mubr.bf16.mxu0 %v7412_v12 }
0x133f   : > { %v6888_v24 = vadd.f32 %v6887_v4, %v13908_v29  ;;  %v6961_v25 = vadd.f32 %v6960_v59, %v13909_v27  ;;  %v6889_v61 = vpop.f32.mrb[59].mxu1  ;;  %v6962_v0 = vpop.f32.mrb[59].mxu0  ;;  %7632 = vmatmul.mubr.bf16.vlgmr.msra.gmra.mrb[116].mxu1 %v7409_v22  ;;  %7697 = vmatmul.mubr.bf16.vlgmr.msra.gmra.mrb[116].mxu0 %v7411_v51  ;;  %v7313_v30 = vmax.f32 %v6884_v57, 0.0  ;;  %v7315_v56 = vmax.f32 %v6957_v34, 0.0  ;;  %v10198_v57 = vld [vmem:[%s13678_s18 + $0x210] sm:$0xff]  }
0x1340   : > { %v6890_v52 = vadd.f32 %v6889_v61, %v13910_v33  ;;  %v6963_v50 = vadd.f32 %v6962_v0, %v13911_v62  ;;  %9408 = vmatpush3.bf16.msra.mxu1 %v10190_v45  ;;  %9448 = vmatpush3.bf16.msra.mxu0 %v10191_v39  ;;  %v7314_v18 = vmax.f32 %v6886_v1, 0.0  ;;  %v7316_v21 = vmax.f32 %v6959_v11, 0.0  ;;  %v10199_v34 = vld [vmem:[%s13678_s18 + $0x290] sm:$0xff]   ;;  %v10200_v1 = vld [vmem:[%s13678_s18 + $0x258] sm:$0xff]  }
0x1341   : > { %v7329_v63 = vmax.f32 %v6888_v24, 0.0  ;;  %v7331_v23 = vmax.f32 %v6961_v25, 0.0  ;;  %9409 = vmatprep.subr.bf16.mxu1 %v10192_v17  ;;  %9449 = vmatprep.subr.bf16.mxu0 %v10193_v53  ;;  %v10201_v11 = vld [vmem:[%s13678_s18 + $0x2d8] sm:$0xff]  }
0x1342   : > { %v7330_v2 = vmax.f32 %v6890_v52, 0.0  ;;  %v7332_v48 = vmax.f32 %v6963_v50, 0.0  ;;  %v10202_v45 = vld [vmem:[%s13678_s18 + $0x218] sm:$0xff]  }
0x1343   : > { %v7425_v46 = vpack.c.bf16 %v7329_v63, %v7313_v30  ;;  %v7427_v10 = vpack.c.bf16 %v7331_v23, %v7315_v56  ;;  %v10203_v56 = vld [vmem:[%s13678_s18 + $0x298] sm:$0xff]  }
0x1344   : > { %v7426_v26 = vpack.c.bf16 %v7330_v2, %v7314_v18  ;;  %v7428_v9 = vpack.c.bf16 %v7332_v48, %v7316_v21  ;;  %9410 = vmatpush3.bf16.msra.mxu1 %v10194_v19  ;;  %v6893_v28 = vpop.f32.mrb[60].mxu1  ;;  %v6966_v32 = vpop.f32.mrb[60].mxu0  ;;  %9450 = vmatpush3.bf16.msra.mxu0 %v10195_v41  ;;  %v10204_v18 = vld [vmem:[%s13678_s18 + $0x260] sm:$0xff]  }
0x1345   : > { %v6894_v43 = vadd.f32 %v6893_v28, %v13908_v29  ;;  %v6967_v7 = vadd.f32 %v6966_v32, %v13909_v27  ;;  %v6895_v37 = vpop.f32.mrb[61].mxu1  ;;  %v6968_v14 = vpop.f32.mrb[61].mxu0  ;;  %9411 = vmatprep.subr.bf16.mxu1 %v10196_v55  ;;  %9451 = vmatprep.subr.bf16.mxu0 %v10197_v36  ;;  %v10205_v21 = vld [vmem:[%s13678_s18 + $0x2e0] sm:$0xff]  }
0x1346   : > { %v6896_v20 = vadd.f32 %v6895_v37, %v13910_v33  ;;  %v6969_v3 = vadd.f32 %v6968_v14, %v13911_v62  ;;  %v6897_v22 = vpop.f32.mrb[62].mxu1  ;;  %v6970_v51 = vpop.f32.mrb[62].mxu0  ;;  %7639 = vmatprep.mubr.bf16.mxu1 %v7426_v26  ;;  %7704 = vmatprep.mubr.bf16.mxu0 %v7428_v9 }
0x1347   : > { %v6898_v8 = vadd.f32 %v6897_v22, %v13908_v29  ;;  %v6971_v12 = vadd.f32 %v6970_v51, %v13909_v27  ;;  %v6899_v38 = vpop.f32.mrb[63].mxu1  ;;  %v6972_v5 = vpop.f32.mrb[63].mxu0  ;;  %7640 = vmatmul.mubr.bf16.gmra.mrb[120].mxu1 %v7425_v46  ;;  %7705 = vmatmul.mubr.bf16.gmra.mrb[120].mxu0 %v7427_v10  ;;  %v7345_v60 = vmax.f32 %v6894_v43, 0.0  ;;  %v7347_v6 = vmax.f32 %v6967_v7, 0.0  ;;  %v10206_v43 = vld [vmem:[%s13678_s18 + $0x220] sm:$0xff]  }
0x1348   : > { %v6900_v54 = vadd.f32 %v6899_v38, %v13910_v33  ;;  %v6973_v35 = vadd.f32 %v6972_v5, %v13911_v62  ;;  %9412 = vmatpush3.bf16.msra.mxu1 %v10198_v57  ;;  %9452 = vmatpush3.bf16.msra.mxu0 %v10199_v34  ;;  %v7346_v4 = vmax.f32 %v6896_v20, 0.0  ;;  %v7348_v59 = vmax.f32 %v6969_v3, 0.0  ;;  %v10207_v7 = vld [vmem:[%s13678_s18 + $0x2a0] sm:$0xff]   ;;  %v10210_v38 = vld [vmem:[%s13678_s18 + $0x228] sm:$0xff]   ;;  %v13912_v57 = vld [vmem:[#allocation30_spill] sm:$0xff] }
0x1349   : > { %v7361_v58 = vmax.f32 %v6898_v8, 0.0  ;;  %v7363_v16 = vmax.f32 %v6971_v12, 0.0  ;;  %9413 = vmatprep.subr.bf16.mxu1 %v10200_v1  ;;  %9453 = vmatprep.subr.bf16.mxu0 %v10201_v11  ;;  %v10212_v1 = vld [vmem:[%s13678_s18 + $0x270] sm:$0xff]  }
0x134a   : > { %v7362_v24 = vmax.f32 %v6900_v54, 0.0  ;;  %v7364_v25 = vmax.f32 %v6973_v35, 0.0  ;;  %v10211_v35 = vld [vmem:[%s13678_s18 + $0x2a8] sm:$0xff]   ;;  %v10213_v11 = vld [vmem:[%s13678_s18 + $0x2f0] sm:$0xff]  }
0x134b   : > { %v7441_v61 = vpack.c.bf16 %v7361_v58, %v7345_v60  ;;  %v7443_v0 = vpack.c.bf16 %v7363_v16, %v7347_v6  ;;  %v13913_v60 = vld [vmem:[#allocation32_spill] sm:$0xff] }
0x134c   : > { %v7442_v52 = vpack.c.bf16 %v7362_v24, %v7346_v4  ;;  %v7444_v50 = vpack.c.bf16 %v7364_v25, %v7348_v59  ;;  %9414 = vmatpush3.bf16.msra.mxu1 %v10202_v45  ;;  %v6903_v39 = vpop.f32.mrb[64].mxu1  ;;  %v6976_v30 = vpop.f32.mrb[64].mxu0  ;;  %9454 = vmatpush3.bf16.msra.mxu0 %v10203_v56  ;;  %v13914_v4 = vld [vmem:[#allocation31_spill] sm:$0xff]  ;;  %v13915_v24 = vld [vmem:[#allocation33_spill] sm:$0xff] }
0x134d   : > { %v6904_v63 = vadd.f32 %v6903_v39, %v13908_v29  ;;  %v6977_v23 = vadd.f32 %v6976_v30, %v13909_v27  ;;  %v6905_v17 = vpop.f32.mrb[65].mxu1  ;;  %v6978_v53 = vpop.f32.mrb[65].mxu0  ;;  %9415 = vmatprep.subr.bf16.mxu1 %v10204_v18  ;;  %9455 = vmatprep.subr.bf16.mxu0 %v10205_v21 }
0x134e   : > { %v6906_v2 = vadd.f32 %v6905_v17, %v13910_v33  ;;  %v6979_v48 = vadd.f32 %v6978_v53, %v13911_v62  ;;  %v6907_v46 = vpop.f32.mrb[66].mxu1  ;;  %v6980_v10 = vpop.f32.mrb[66].mxu0  ;;  %7647 = vmatprep.mubr.bf16.mxu1 %v7442_v52  ;;  %7712 = vmatprep.mubr.bf16.mxu0 %v7444_v50 }
0x134f   : > { %v6908_v26 = vadd.f32 %v6907_v46, %v13908_v29  ;;  %v6981_v9 = vadd.f32 %v6980_v10, %v13909_v27  ;;  %v6909_v19 = vpop.f32.mrb[67].mxu1  ;;  %v6982_v28 = vpop.f32.mrb[67].mxu0  ;;  %7648 = vmatmul.mubr.bf16.gmra.mrb[124].mxu1 %v7441_v61  ;;  %7713 = vmatmul.mubr.bf16.gmra.mrb[124].mxu0 %v7443_v0  ;;  %v7377_v29 = vmax.f32 %v6904_v63, 0.0  ;;  %v7379_v27 = vmax.f32 %v6977_v23, 0.0  ;;  %v10214_v63 = vld [vmem:[%s13678_s18 + $0x230] sm:$0xff]  }
0x1350   : > { %v6910_v32 = vadd.f32 %v6909_v19, %v13910_v33  ;;  %v6983_v41 = vadd.f32 %v6982_v28, %v13911_v62  ;;  %9416 = vmatpush3.bf16.msra.mxu1 %v10206_v43  ;;  %9456 = vmatpush3.bf16.msra.mxu0 %v10207_v7  ;;  %v10208_v33 = vld [vmem:[%s13678_s18 + $0x268] sm:$0xff]   ;;  %v7378_v55 = vmax.f32 %v6906_v2, 0.0  ;;  %v7380_v36 = vmax.f32 %v6979_v48, 0.0  ;;  %v10215_v23 = vld [vmem:[%s13678_s18 + $0x2b0] sm:$0xff]   ;;  %v10216_v2 = vld [vmem:[%s13678_s18 + $0x278] sm:$0xff]  }
0x1351   : > { %v7393_v37 = vmax.f32 %v6908_v26, 0.0  ;;  %v7395_v14 = vmax.f32 %v6981_v9, 0.0  ;;  %9417 = vmatprep.subr.bf16.mxu1 %v10208_v33  ;;  %v10209_v62 = vld [vmem:[%s13678_s18 + $0x2e8] sm:$0xff]   ;;  %v10217_v48 = vld [vmem:[%s13678_s18 + $0x2f8] sm:$0xff]  }
0x1352   : > { %9457 = vmatprep.subr.bf16.mxu0 %v10209_v62  ;;  %v7394_v20 = vmax.f32 %v6910_v32, 0.0  ;;  %v7396_v3 = vmax.f32 %v6983_v41, 0.0  ;;  %v10218_v43 = vld [vmem:[%s13678_s18 + $0x238] sm:$0xff]  }
0x1353   : > { %v7457_v22 = vpack.c.bf16 %v7393_v37, %v7377_v29  ;;  %v7459_v51 = vpack.c.bf16 %v7395_v14, %v7379_v27  ;;  %v10219_v27 = vld [vmem:[%s13678_s18 + $0x2b8] sm:$0xff]  }
0x1354   : > { %v7458_v8 = vpack.c.bf16 %v7394_v20, %v7378_v55  ;;  %v7460_v12 = vpack.c.bf16 %v7396_v3, %v7380_v36  ;;  %9418 = vmatpush3.bf16.msra.mxu1 %v10210_v38  ;;  %v7019_v5 = vpop.f32.mrb[68].mxu1  ;;  %v7092_v54 = vpop.f32.mrb[68].mxu0  ;;  %9458 = vmatpush3.bf16.msra.mxu0 %v10211_v35  ;;  %v10220_v55 = vld [vmem:[%s13678_s18 + $0x340] sm:$0xff]  }
0x1355   : > { %v7020_v34 = vadd.f32 %v7019_v5, %v13912_v57  ;;  %v7093_v6 = vadd.f32 %v7092_v54, %v13913_v60  ;;  %v7021_v58 = vpop.f32.mrb[69].mxu1  ;;  %v7094_v16 = vpop.f32.mrb[69].mxu0  ;;  %9419 = vmatprep.subr.bf16.mxu1 %v10212_v1  ;;  %9459 = vmatprep.subr.bf16.mxu0 %v10213_v11  ;;  %v10221_v36 = vld [vmem:[%s13678_s18 + $0x3c0] sm:$0xff]  }
0x1356   : > { %v7022_v59 = vadd.f32 %v7021_v58, %v13914_v4  ;;  %v7095_v25 = vadd.f32 %v7094_v16, %v13915_v24  ;;  %v7023_v61 = vpop.f32.mrb[70].mxu1  ;;  %v7096_v0 = vpop.f32.mrb[70].mxu0  ;;  %7655 = vmatprep.mubr.bf16.mxu1 %v7458_v8  ;;  %7720 = vmatprep.mubr.bf16.mxu0 %v7460_v12 }
0x1357   : > { %v7024_v52 = vadd.f32 %v7023_v61, %v13912_v57  ;;  %v7097_v50 = vadd.f32 %v7096_v0, %v13913_v60  ;;  %v7025_v45 = vpop.f32.mrb[71].mxu1  ;;  %v7098_v39 = vpop.f32.mrb[71].mxu0  ;;  %7656 = vmatmul.mubr.bf16.gmra.mrb[128].mxu1 %v7457_v22  ;;  %7721 = vmatmul.mubr.bf16.gmra.mrb[128].mxu0 %v7459_v51  ;;  %v7285_v17 = vmax.f32 %v7020_v34, 0.0  ;;  %v7287_v53 = vmax.f32 %v7093_v6, 0.0  ;;  %v10222_v34 = vld [vmem:[%s13678_s18 + $0x300] sm:$0xff]  }
0x1358   : > { %v7026_v30 = vadd.f32 %v7025_v45, %v13914_v4  ;;  %v7099_v56 = vadd.f32 %v7098_v39, %v13915_v24  ;;  %9420 = vmatpush3.bf16.msra.mxu1 %v10214_v63  ;;  %9460 = vmatpush3.bf16.msra.mxu0 %v10215_v23  ;;  %v7286_v46 = vmax.f32 %v7022_v59, 0.0  ;;  %v7288_v10 = vmax.f32 %v7095_v25, 0.0  ;;  %v10223_v6 = vld [vmem:[%s13678_s18 + $0x380] sm:$0xff]   ;;  %v10224_v59 = vld [vmem:[%s13678_s18 + $0x348] sm:$0xff]  }
0x1359   : > { %v7301_v18 = vmax.f32 %v7024_v52, 0.0  ;;  %v7303_v21 = vmax.f32 %v7097_v50, 0.0  ;;  %9421 = vmatprep.subr.bf16.mxu1 %v10216_v2  ;;  %9461 = vmatprep.subr.bf16.mxu0 %v10217_v48  ;;  %v10225_v25 = vld [vmem:[%s13678_s18 + $0x3c8] sm:$0xff]  }
0x135a   : > { %v7302_v26 = vmax.f32 %v7026_v30, 0.0  ;;  %v7304_v9 = vmax.f32 %v7099_v56, 0.0  ;;  %v10226_v63 = vld [vmem:[%s13678_s18 + $0x308] sm:$0xff]  }
0x135b   : > { %v7413_v19 = vpack.c.bf16 %v7301_v18, %v7285_v17  ;;  %v7415_v28 = vpack.c.bf16 %v7303_v21, %v7287_v53  ;;  %v10227_v53 = vld [vmem:[%s13678_s18 + $0x388] sm:$0xff]  }
0x135c   : > { %v7414_v32 = vpack.c.bf16 %v7302_v26, %v7286_v46  ;;  %v7416_v41 = vpack.c.bf16 %v7304_v9, %v7288_v10  ;;  %9422 = vmatpush3.bf16.msra.mxu1 %v10218_v43  ;;  %v7029_v7 = vpop.f32.mrb[72].mxu1  ;;  %v7102_v29 = vpop.f32.mrb[72].mxu0  ;;  %9462 = vmatpush3.bf16.msra.mxu0 %v10219_v27  ;;  %v10228_v46 = vld [vmem:[%s13678_s18 + $0x350] sm:$0xff]  }
0x135d   : > { %v7030_v37 = vadd.f32 %v7029_v7, %v13912_v57  ;;  %v7103_v14 = vadd.f32 %v7102_v29, %v13913_v60  ;;  %v7031_v33 = vpop.f32.mrb[73].mxu1  ;;  %v7104_v62 = vpop.f32.mrb[73].mxu0  ;;  %9487 = vmatprep.subr.bf16.mxu1 %v10220_v55  ;;  %9527 = vmatprep.subr.bf16.mxu0 %v10221_v36  ;;  %v10229_v10 = vld [vmem:[%s13678_s18 + $0x3d0] sm:$0xff]  }
0x135e   : > { %v7032_v20 = vadd.f32 %v7031_v33, %v13914_v4  ;;  %v7105_v3 = vadd.f32 %v7104_v62, %v13915_v24  ;;  %v7033_v22 = vpop.f32.mrb[74].mxu1  ;;  %v7106_v51 = vpop.f32.mrb[74].mxu0  ;;  %7761 = vmatprep.mubr.bf16.mxu1 %v7414_v32  ;;  %7826 = vmatprep.mubr.bf16.mxu0 %v7416_v41 }
0x135f   : > { %v7034_v8 = vadd.f32 %v7033_v22, %v13912_v57  ;;  %v7107_v12 = vadd.f32 %v7106_v51, %v13913_v60  ;;  %v7035_v38 = vpop.f32.mrb[75].mxu1  ;;  %v7108_v5 = vpop.f32.mrb[75].mxu0  ;;  %7762 = vmatmul.mubr.bf16.vlgmr.msra.gmra.mrb[132].mxu1 %v7413_v19  ;;  %7827 = vmatmul.mubr.bf16.vlgmr.msra.gmra.mrb[132].mxu0 %v7415_v28  ;;  %v7317_v58 = vmax.f32 %v7030_v37, 0.0  ;;  %v7319_v16 = vmax.f32 %v7103_v14, 0.0  ;;  %v10230_v37 = vld [vmem:[%s13678_s18 + $0x310] sm:$0xff]  }
0x1360   : > { %v7036_v54 = vadd.f32 %v7035_v38, %v13914_v4  ;;  %v7109_v35 = vadd.f32 %v7108_v5, %v13915_v24  ;;  %9488 = vmatpush3.bf16.msra.mxu1 %v10222_v34  ;;  %9528 = vmatpush3.bf16.msra.mxu0 %v10223_v6  ;;  %v7318_v61 = vmax.f32 %v7032_v20, 0.0  ;;  %v7320_v0 = vmax.f32 %v7105_v3, 0.0  ;;  %v10231_v14 = vld [vmem:[%s13678_s18 + $0x390] sm:$0xff]   ;;  %v10232_v20 = vld [vmem:[%s13678_s18 + $0x358] sm:$0xff]  }
0x1361   : > { %v7333_v1 = vmax.f32 %v7034_v8, 0.0  ;;  %v7335_v11 = vmax.f32 %v7107_v12, 0.0  ;;  %9489 = vmatprep.subr.bf16.mxu1 %v10224_v59  ;;  %9529 = vmatprep.subr.bf16.mxu0 %v10225_v25  ;;  %v10233_v3 = vld [vmem:[%s13678_s18 + $0x3d8] sm:$0xff]  }
0x1362   : > { %v7334_v52 = vmax.f32 %v7036_v54, 0.0  ;;  %v7336_v50 = vmax.f32 %v7109_v35, 0.0  ;;  %v10234_v34 = vld [vmem:[%s13678_s18 + $0x318] sm:$0xff]  }
0x1363   : > { %v7429_v45 = vpack.c.bf16 %v7333_v1, %v7317_v58  ;;  %v7431_v39 = vpack.c.bf16 %v7335_v11, %v7319_v16  ;;  %v10235_v16 = vld [vmem:[%s13678_s18 + $0x398] sm:$0xff]  }
0x1364   : > { %v7430_v30 = vpack.c.bf16 %v7334_v52, %v7318_v61  ;;  %v7432_v56 = vpack.c.bf16 %v7336_v50, %v7320_v0  ;;  %9490 = vmatpush3.bf16.msra.mxu1 %v10226_v63  ;;  %v7039_v23 = vpop.f32.mrb[76].mxu1  ;;  %v7112_v17 = vpop.f32.mrb[76].mxu0  ;;  %9530 = vmatpush3.bf16.msra.mxu0 %v10227_v53  ;;  %v10236_v61 = vld [vmem:[%s13678_s18 + $0x360] sm:$0xff]  }
0x1365   : > { %v7040_v18 = vadd.f32 %v7039_v23, %v13912_v57  ;;  %v7113_v21 = vadd.f32 %v7112_v17, %v13913_v60  ;;  %v7041_v2 = vpop.f32.mrb[77].mxu1  ;;  %v7114_v48 = vpop.f32.mrb[77].mxu0  ;;  %9491 = vmatprep.subr.bf16.mxu1 %v10228_v46  ;;  %9531 = vmatprep.subr.bf16.mxu0 %v10229_v10  ;;  %v10237_v0 = vld [vmem:[%s13678_s18 + $0x3e0] sm:$0xff]  }
0x1366   : > { %v7042_v26 = vadd.f32 %v7041_v2, %v13914_v4  ;;  %v7115_v9 = vadd.f32 %v7114_v48, %v13915_v24  ;;  %v7043_v19 = vpop.f32.mrb[78].mxu1  ;;  %v7116_v28 = vpop.f32.mrb[78].mxu0  ;;  %7769 = vmatprep.mubr.bf16.mxu1 %v7430_v30  ;;  %7834 = vmatprep.mubr.bf16.mxu0 %v7432_v56 }
0x1367   : > { %v7044_v32 = vadd.f32 %v7043_v19, %v13912_v57  ;;  %v7117_v41 = vadd.f32 %v7116_v28, %v13913_v60  ;;  %v7045_v43 = vpop.f32.mrb[79].mxu1  ;;  %v7118_v7 = vpop.f32.mrb[79].mxu0  ;;  %7770 = vmatmul.mubr.bf16.gmra.mrb[136].mxu1 %v7429_v45  ;;  %7835 = vmatmul.mubr.bf16.gmra.mrb[136].mxu0 %v7431_v39  ;;  %v7349_v33 = vmax.f32 %v7040_v18, 0.0  ;;  %v7351_v62 = vmax.f32 %v7113_v21, 0.0  ;;  %v10238_v18 = vld [vmem:[%s13678_s18 + $0x320] sm:$0xff]  }
0x1368   : > { %v7046_v29 = vadd.f32 %v7045_v43, %v13914_v4  ;;  %v7119_v27 = vadd.f32 %v7118_v7, %v13915_v24  ;;  %9492 = vmatpush3.bf16.msra.mxu1 %v10230_v37  ;;  %9532 = vmatpush3.bf16.msra.mxu0 %v10231_v14  ;;  %v7350_v22 = vmax.f32 %v7042_v26, 0.0  ;;  %v7352_v51 = vmax.f32 %v7115_v9, 0.0  ;;  %v10239_v21 = vld [vmem:[%s13678_s18 + $0x3a0] sm:$0xff]   ;;  %v10242_v43 = vld [vmem:[%s13678_s18 + $0x328] sm:$0xff]   ;;  %v13916_v37 = vld [vmem:[#allocation34_spill] sm:$0xff] }
0x1369   : > { %v7365_v55 = vmax.f32 %v7044_v32, 0.0  ;;  %v7367_v36 = vmax.f32 %v7117_v41, 0.0  ;;  %9493 = vmatprep.subr.bf16.mxu1 %v10232_v20  ;;  %9533 = vmatprep.subr.bf16.mxu0 %v10233_v3  ;;  %v10244_v20 = vld [vmem:[%s13678_s18 + $0x370] sm:$0xff]  }
0x136a   : > { %v7366_v8 = vmax.f32 %v7046_v29, 0.0  ;;  %v7368_v12 = vmax.f32 %v7119_v27, 0.0  ;;  %v10243_v27 = vld [vmem:[%s13678_s18 + $0x3a8] sm:$0xff]   ;;  %v10245_v3 = vld [vmem:[%s13678_s18 + $0x3f0] sm:$0xff]  }
0x136b   : > { %v7445_v38 = vpack.c.bf16 %v7365_v55, %v7349_v33  ;;  %v7447_v5 = vpack.c.bf16 %v7367_v36, %v7351_v62  ;;  %v13917_v33 = vld [vmem:[#allocation36_spill] sm:$0xff] }
0x136c   : > { %v7446_v54 = vpack.c.bf16 %v7366_v8, %v7350_v22  ;;  %v7448_v35 = vpack.c.bf16 %v7368_v12, %v7352_v51  ;;  %9494 = vmatpush3.bf16.msra.mxu1 %v10234_v34  ;;  %v7049_v6 = vpop.f32.mrb[80].mxu1  ;;  %v7122_v58 = vpop.f32.mrb[80].mxu0  ;;  %9534 = vmatpush3.bf16.msra.mxu0 %v10235_v16  ;;  %v13918_v22 = vld [vmem:[#allocation35_spill] sm:$0xff]  ;;  %v13919_v8 = vld [vmem:[#allocation37_spill] sm:$0xff] }
0x136d   : > { %v7050_v1 = vadd.f32 %v7049_v6, %v13912_v57  ;;  %v7123_v11 = vadd.f32 %v7122_v58, %v13913_v60  ;;  %v7051_v59 = vpop.f32.mrb[81].mxu1  ;;  %v7124_v25 = vpop.f32.mrb[81].mxu0  ;;  %9495 = vmatprep.subr.bf16.mxu1 %v10236_v61  ;;  %9535 = vmatprep.subr.bf16.mxu0 %v10237_v0 }
0x136e   : > { %v7052_v52 = vadd.f32 %v7051_v59, %v13914_v4  ;;  %v7125_v50 = vadd.f32 %v7124_v25, %v13915_v24  ;;  %v7053_v45 = vpop.f32.mrb[82].mxu1  ;;  %v7126_v39 = vpop.f32.mrb[82].mxu0  ;;  %7777 = vmatprep.mubr.bf16.mxu1 %v7446_v54  ;;  %7842 = vmatprep.mubr.bf16.mxu0 %v7448_v35 }
0x136f   : > { %v7054_v30 = vadd.f32 %v7053_v45, %v13912_v57  ;;  %v7127_v56 = vadd.f32 %v7126_v39, %v13913_v60  ;;  %v7055_v63 = vpop.f32.mrb[83].mxu1  ;;  %v7128_v23 = vpop.f32.mrb[83].mxu0  ;;  %7778 = vmatmul.mubr.bf16.gmra.mrb[140].mxu1 %v7445_v38  ;;  %7843 = vmatmul.mubr.bf16.gmra.mrb[140].mxu0 %v7447_v5  ;;  %v7381_v57 = vmax.f32 %v7050_v1, 0.0  ;;  %v7383_v60 = vmax.f32 %v7123_v11, 0.0  ;;  %v10246_v1 = vld [vmem:[%s13678_s18 + $0x330] sm:$0xff]  }
0x1370   : > { %v7056_v17 = vadd.f32 %v7055_v63, %v13914_v4  ;;  %v7129_v53 = vadd.f32 %v7128_v23, %v13915_v24  ;;  %9496 = vmatpush3.bf16.msra.mxu1 %v10238_v18  ;;  %9536 = vmatpush3.bf16.msra.mxu0 %v10239_v21  ;;  %v10240_v4 = vld [vmem:[%s13678_s18 + $0x368] sm:$0xff]   ;;  %v7382_v46 = vmax.f32 %v7052_v52, 0.0  ;;  %v7384_v10 = vmax.f32 %v7125_v50, 0.0  ;;  %v10247_v11 = vld [vmem:[%s13678_s18 + $0x3b0] sm:$0xff]   ;;  %v10248_v52 = vld [vmem:[%s13678_s18 + $0x378] sm:$0xff]  }
0x1371   : > { %v7397_v2 = vmax.f32 %v7054_v30, 0.0  ;;  %v7399_v48 = vmax.f32 %v7127_v56, 0.0  ;;  %9497 = vmatprep.subr.bf16.mxu1 %v10240_v4  ;;  %v10241_v24 = vld [vmem:[%s13678_s18 + $0x3e8] sm:$0xff]   ;;  %v10249_v50 = vld [vmem:[%s13678_s18 + $0x3f8] sm:$0xff]  }
0x1372   : > { %9537 = vmatprep.subr.bf16.mxu0 %v10241_v24  ;;  %v7398_v26 = vmax.f32 %v7056_v17, 0.0  ;;  %v7400_v9 = vmax.f32 %v7129_v53, 0.0  ;;  %v10250_v18 = vld [vmem:[%s13678_s18 + $0x338] sm:$0xff]  }
0x1373   : > { %v7461_v19 = vpack.c.bf16 %v7397_v2, %v7381_v57  ;;  %v7463_v28 = vpack.c.bf16 %v7399_v48, %v7383_v60  ;;  %v10251_v60 = vld [vmem:[%s13678_s18 + $0x3b8] sm:$0xff]  }
0x1374   : > { %v7462_v32 = vpack.c.bf16 %v7398_v26, %v7382_v46  ;;  %v7464_v41 = vpack.c.bf16 %v7400_v9, %v7384_v10  ;;  %9498 = vmatpush3.bf16.msra.mxu1 %v10242_v43  ;;  %v7165_v7 = vpop.f32.mrb[84].mxu1  ;;  %v7238_v29 = vpop.f32.mrb[84].mxu0  ;;  %9538 = vmatpush3.bf16.msra.mxu0 %v10243_v27 }
0x1375   : > { %v7166_v14 = vadd.f32 %v7165_v7, %v13916_v37  ;;  %v7239_v62 = vadd.f32 %v7238_v29, %v13917_v33  ;;  %v7167_v55 = vpop.f32.mrb[85].mxu1  ;;  %v7240_v36 = vpop.f32.mrb[85].mxu0  ;;  %9499 = vmatprep.subr.bf16.mxu1 %v10244_v20  ;;  %9539 = vmatprep.subr.bf16.mxu0 %v10245_v3 }
0x1376   : > { %v7168_v51 = vadd.f32 %v7167_v55, %v13918_v22  ;;  %v7241_v12 = vadd.f32 %v7240_v36, %v13919_v8  ;;  %v7169_v38 = vpop.f32.mrb[86].mxu1  ;;  %v7242_v5 = vpop.f32.mrb[86].mxu0  ;;  %7785 = vmatprep.mubr.bf16.mxu1 %v7462_v32  ;;  %7850 = vmatprep.mubr.bf16.mxu0 %v7464_v41 }
0x1377   : > { %v7170_v54 = vadd.f32 %v7169_v38, %v13916_v37  ;;  %v7243_v35 = vadd.f32 %v7242_v5, %v13917_v33  ;;  %v7171_v34 = vpop.f32.mrb[87].mxu1  ;;  %v7244_v6 = vpop.f32.mrb[87].mxu0  ;;  %7786 = vmatmul.mubr.bf16.gmra.mrb[144].mxu1 %v7461_v19  ;;  %7851 = vmatmul.mubr.bf16.gmra.mrb[144].mxu0 %v7463_v28  ;;  %v7289_v59 = vmax.f32 %v7166_v14, 0.0  ;;  %v7291_v25 = vmax.f32 %v7239_v62, 0.0 }
0x1378   : > { %v7172_v58 = vadd.f32 %v7171_v34, %v13918_v22  ;;  %v7245_v16 = vadd.f32 %v7244_v6, %v13919_v8  ;;  %9500 = vmatpush3.bf16.msra.mxu1 %v10246_v1  ;;  %9540 = vmatpush3.bf16.msra.mxu0 %v10247_v11  ;;  %v7290_v45 = vmax.f32 %v7168_v51, 0.0  ;;  %v7292_v39 = vmax.f32 %v7241_v12, 0.0 }
0x1379   : > { %v7305_v61 = vmax.f32 %v7170_v54, 0.0  ;;  %v7307_v0 = vmax.f32 %v7243_v35, 0.0  ;;  %9501 = vmatprep.subr.bf16.mxu1 %v10248_v52  ;;  %9541 = vmatprep.subr.bf16.mxu0 %v10249_v50 }
0x137a   : > { %v7306_v30 = vmax.f32 %v7172_v58, 0.0  ;;  %v7308_v56 = vmax.f32 %v7245_v16, 0.0 }
0x137b   : > { %v7417_v63 = vpack.c.bf16 %v7305_v61, %v7289_v59  ;;  %v7419_v23 = vpack.c.bf16 %v7307_v0, %v7291_v25 }
0x137c   : > { %v7418_v17 = vpack.c.bf16 %v7306_v30, %v7290_v45  ;;  %v7420_v53 = vpack.c.bf16 %v7308_v56, %v7292_v39  ;;  %9502 = vmatpush3.bf16.msra.mxu1 %v10250_v18  ;;  %v7175_v21 = vpop.f32.mrb[88].mxu1  ;;  %v7248_v57 = vpop.f32.mrb[88].mxu0  ;;  %9542 = vmatpush3.bf16.msra.mxu0 %v10251_v60 }
0x137d   : > { %v7176_v2 = vadd.f32 %v7175_v21, %v13916_v37  ;;  %v7249_v48 = vadd.f32 %v7248_v57, %v13917_v33  ;;  %v7177_v4 = vpop.f32.mrb[89].mxu1  ;;  %v7250_v24 = vpop.f32.mrb[89].mxu0 }
0x137e   : > { %v7178_v46 = vadd.f32 %v7177_v4, %v13918_v22  ;;  %v7251_v10 = vadd.f32 %v7250_v24, %v13919_v8  ;;  %v7179_v26 = vpop.f32.mrb[90].mxu1  ;;  %v7252_v9 = vpop.f32.mrb[90].mxu0  ;;  %7891 = vmatprep.mubr.bf16.mxu1 %v7418_v17  ;;  %7956 = vmatprep.mubr.bf16.mxu0 %v7420_v53 }
0x137f   : > { %v7180_v19 = vadd.f32 %v7179_v26, %v13916_v37  ;;  %v7253_v28 = vadd.f32 %v7252_v9, %v13917_v33  ;;  %v7181_v32 = vpop.f32.mrb[91].mxu1  ;;  %v7254_v41 = vpop.f32.mrb[91].mxu0  ;;  %7892 = vmatmul.mubr.bf16.vlgmr.msra.gmra.mrb[148].mxu1 %v7417_v63  ;;  %7957 = vmatmul.mubr.bf16.vlgmr.msra.gmra.mrb[148].mxu0 %v7419_v23  ;;  %v7321_v29 = vmax.f32 %v7176_v2, 0.0  ;;  %v7323_v27 = vmax.f32 %v7249_v48, 0.0 }
0x1380   : > { %v7182_v43 = vadd.f32 %v7181_v32, %v13918_v22  ;;  %v7255_v7 = vadd.f32 %v7254_v41, %v13919_v8  ;;  %v7322_v55 = vmax.f32 %v7178_v46, 0.0  ;;  %v7324_v36 = vmax.f32 %v7251_v10, 0.0 }
0x1381   : > { %v7337_v14 = vmax.f32 %v7180_v19, 0.0  ;;  %v7339_v62 = vmax.f32 %v7253_v28, 0.0 }
0x1382   : > { %v7338_v20 = vmax.f32 %v7182_v43, 0.0  ;;  %v7340_v3 = vmax.f32 %v7255_v7, 0.0 }
0x1383   : > { %v7433_v51 = vpack.c.bf16 %v7337_v14, %v7321_v29  ;;  %v7435_v12 = vpack.c.bf16 %v7339_v62, %v7323_v27 }
0x1384   : > { %v7434_v38 = vpack.c.bf16 %v7338_v20, %v7322_v55  ;;  %v7436_v5 = vpack.c.bf16 %v7340_v3, %v7324_v36  ;;  %v7185_v54 = vpop.f32.mrb[92].mxu1  ;;  %v7258_v35 = vpop.f32.mrb[92].mxu0 }
0x1385   : > { %v7186_v34 = vadd.f32 %v7185_v54, %v13916_v37  ;;  %v7259_v6 = vadd.f32 %v7258_v35, %v13917_v33  ;;  %v7187_v58 = vpop.f32.mrb[93].mxu1  ;;  %v7260_v16 = vpop.f32.mrb[93].mxu0 }
0x1386   : > { %v7188_v1 = vadd.f32 %v7187_v58, %v13918_v22  ;;  %v7261_v11 = vadd.f32 %v7260_v16, %v13919_v8  ;;  %v7189_v59 = vpop.f32.mrb[94].mxu1  ;;  %v7262_v25 = vpop.f32.mrb[94].mxu0  ;;  %7899 = vmatprep.mubr.bf16.mxu1 %v7434_v38  ;;  %7964 = vmatprep.mubr.bf16.mxu0 %v7436_v5 }
0x1387   : > { %v7190_v61 = vadd.f32 %v7189_v59, %v13916_v37  ;;  %v7263_v0 = vadd.f32 %v7262_v25, %v13917_v33  ;;  %v7191_v52 = vpop.f32.mrb[95].mxu1  ;;  %v7264_v50 = vpop.f32.mrb[95].mxu0  ;;  %7900 = vmatmul.mubr.bf16.gmra.mrb[152].mxu1 %v7433_v51  ;;  %7965 = vmatmul.mubr.bf16.gmra.mrb[152].mxu0 %v7435_v12  ;;  %v7353_v30 = vmax.f32 %v7186_v34, 0.0  ;;  %v7355_v56 = vmax.f32 %v7259_v6, 0.0 }
0x1388   : > { %v7192_v45 = vadd.f32 %v7191_v52, %v13918_v22  ;;  %v7265_v39 = vadd.f32 %v7264_v50, %v13919_v8  ;;  %v7354_v17 = vmax.f32 %v7188_v1, 0.0  ;;  %v7356_v53 = vmax.f32 %v7261_v11, 0.0 }
0x1389   : > { %v7369_v63 = vmax.f32 %v7190_v61, 0.0  ;;  %v7371_v23 = vmax.f32 %v7263_v0, 0.0  ;;  %v10252_v61 = vld [vmem:[%s13679_s19] ss:$0 sm:$0xff] }
0x138a   : > { %v7370_v18 = vmax.f32 %v7192_v45, 0.0  ;;  %v7372_v21 = vmax.f32 %v7265_v39, 0.0 }
0x138b   : > { %v7449_v57 = vpack.c.bf16 %v7369_v63, %v7353_v30  ;;  %v7451_v60 = vpack.c.bf16 %v7371_v23, %v7355_v56 }
0x138c   : > { %v7450_v2 = vpack.c.bf16 %v7370_v18, %v7354_v17  ;;  %v7452_v48 = vpack.c.bf16 %v7372_v21, %v7356_v53  ;;  %v7195_v4 = vpop.f32.mrb[96].mxu1  ;;  %v7268_v24 = vpop.f32.mrb[96].mxu0 }
0x138d   : > { %v7196_v46 = vadd.f32 %v7195_v4, %v13916_v37  ;;  %v7269_v10 = vadd.f32 %v7268_v24, %v13917_v33  ;;  %v7197_v26 = vpop.f32.mrb[97].mxu1  ;;  %v7270_v9 = vpop.f32.mrb[97].mxu0 }
0x138e   : > { %v7198_v19 = vadd.f32 %v7197_v26, %v13918_v22  ;;  %v7271_v28 = vadd.f32 %v7270_v9, %v13919_v8  ;;  %v7199_v32 = vpop.f32.mrb[98].mxu1  ;;  %v7272_v41 = vpop.f32.mrb[98].mxu0  ;;  %7907 = vmatprep.mubr.bf16.mxu1 %v7450_v2  ;;  %7972 = vmatprep.mubr.bf16.mxu0 %v7452_v48 }
0x138f   : > { %v7200_v43 = vadd.f32 %v7199_v32, %v13916_v37  ;;  %v7273_v7 = vadd.f32 %v7272_v41, %v13917_v33  ;;  %v7201_v29 = vpop.f32.mrb[99].mxu1  ;;  %v7274_v27 = vpop.f32.mrb[99].mxu0  ;;  %7908 = vmatmul.mubr.bf16.gmra.mrb[156].mxu1 %v7449_v57  ;;  %7973 = vmatmul.mubr.bf16.gmra.mrb[156].mxu0 %v7451_v60  ;;  %v7385_v55 = vmax.f32 %v7196_v46, 0.0  ;;  %v7387_v36 = vmax.f32 %v7269_v10, 0.0 }
0x1390   : > { %v7202_v14 = vadd.f32 %v7201_v29, %v13918_v22  ;;  %v7275_v62 = vadd.f32 %v7274_v27, %v13919_v8  ;;  %v7386_v51 = vmax.f32 %v7198_v19, 0.0  ;;  %v7388_v12 = vmax.f32 %v7271_v28, 0.0 }
0x1391   : > { %v7401_v20 = vmax.f32 %v7200_v43, 0.0  ;;  %v7403_v3 = vmax.f32 %v7273_v7, 0.0 }
0x1392   : > { %v7402_v38 = vmax.f32 %v7202_v14, 0.0  ;;  %v7404_v5 = vmax.f32 %v7275_v62, 0.0 }
0x1393   : > { %v7465_v54 = vpack.c.bf16 %v7401_v20, %v7385_v55  ;;  %v7467_v37 = vpack.c.bf16 %v7403_v3, %v7387_v36 }
0x1394   : > { %v7466_v35 = vpack.c.bf16 %v7402_v38, %v7386_v51  ;;  %v7468_v33 = vpack.c.bf16 %v7404_v5, %v7388_v12 }
0x1396   : > { %7915 = vmatprep.mubr.bf16.mxu1 %v7466_v35  ;;  %7980 = vmatprep.mubr.bf16.mxu0 %v7468_v33 }
0x1397   : > { %7916 = vmatmul.mubr.bf16.gmra.mrb[160].mxu1 %v7465_v54  ;;  %7981 = vmatmul.mubr.bf16.gmra.mrb[160].mxu0 %v7467_v37 }
0x13f2   : > { %v9263_v34 = vpop.f32.mrb[100].mxu1  ;;  %v9303_v22 = vpop.f32.mrb[100].mxu0 }
0x13f3   : > { %v9264_v6 = vpop.f32.mrb[101].mxu1  ;;  %v9304_v8 = vpop.f32.mrb[101].mxu0 }
0x13f4   : > { %v9265_v58 = vadd.f32 %v9264_v6, %v9263_v34  ;;  %v9305_v16 = vadd.f32 %v9304_v8, %v9303_v22  ;;  %v9266_v1 = vpop.f32.mrb[102].mxu1  ;;  %v9306_v11 = vpop.f32.mrb[102].mxu0 }
0x13f5   : > { %v9267_v59 = vpop.f32.mrb[103].mxu1  ;;  %v9307_v25 = vpop.f32.mrb[103].mxu0 }
0x13f6   : > { %v7504_v0 = vadd.f32 %v10252_v61, %v9265_v58  ;;  %v9268_v52 = vadd.f32 %v9267_v59, %v9266_v1  ;;  %v9308_v50 = vadd.f32 %v9307_v25, %v9306_v11 }
0x13f8   : > { %v7569_v45 = vadd.f32 %v9305_v16, %v7504_v0  ;;  %v7507_v39 = vadd.f32 %v10252_v61, %v9268_v52 }
0x13fa   : > { %v13513_v30 = vadd.f32 %v9308_v50, %v7507_v39  ;;  %v9269_v56 = vpop.f32.mrb[104].mxu1  ;;  %v9309_v63 = vpop.f32.mrb[104].mxu0 }
0x13fb   : > { %v9270_v23 = vpop.f32.mrb[105].mxu1  ;;  %v9310_v17 = vpop.f32.mrb[105].mxu0 }
0x13fc   : > { %v9271_v53 = vadd.f32 %v9270_v23, %v9269_v56  ;;  %v9311_v18 = vadd.f32 %v9310_v17, %v9309_v63  ;;  %v9272_v21 = vpop.f32.mrb[106].mxu1  ;;  %v9312_v57 = vpop.f32.mrb[106].mxu0 }
0x13fd   : > { %v9273_v60 = vpop.f32.mrb[107].mxu1  ;;  %v9313_v2 = vpop.f32.mrb[107].mxu0 }
0x13fe   : > { %v7512_v48 = vadd.f32 %v10252_v61, %v9271_v53  ;;  %v9274_v4 = vadd.f32 %v9273_v60, %v9272_v21  ;;  %v9314_v24 = vadd.f32 %v9313_v2, %v9312_v57 }
0x1400   : > { %v7577_v46 = vadd.f32 %v9311_v18, %v7512_v48  ;;  %v7515_v10 = vadd.f32 %v10252_v61, %v9274_v4 }
0x1402   : > { %v13515_v26 = vadd.f32 %v9314_v24, %v7515_v10  ;;  %v9275_v9 = vpop.f32.mrb[108].mxu1  ;;  %v9315_v19 = vpop.f32.mrb[108].mxu0 }
0x1403   : > { %v9276_v28 = vpop.f32.mrb[109].mxu1  ;;  %v9316_v32 = vpop.f32.mrb[109].mxu0 }
0x1404   : > { %v9277_v41 = vadd.f32 %v9276_v28, %v9275_v9  ;;  %v9317_v43 = vadd.f32 %v9316_v32, %v9315_v19  ;;  %v9278_v7 = vpop.f32.mrb[110].mxu1  ;;  %v9318_v29 = vpop.f32.mrb[110].mxu0 }
0x1405   : > { %v9279_v27 = vpop.f32.mrb[111].mxu1  ;;  %v9319_v14 = vpop.f32.mrb[111].mxu0 }
0x1406   : > { %v7520_v62 = vadd.f32 %v10252_v61, %v9277_v41  ;;  %v9280_v55 = vadd.f32 %v9279_v27, %v9278_v7  ;;  %v9320_v36 = vadd.f32 %v9319_v14, %v9318_v29 }
0x1408   : > { %v7585_v20 = vadd.f32 %v9317_v43, %v7520_v62  ;;  %v7523_v3 = vadd.f32 %v10252_v61, %v9280_v55 }
0x140a   : > { %v13517_v51 = vadd.f32 %v9320_v36, %v7523_v3  ;;  %v9281_v12 = vpop.f32.mrb[112].mxu1  ;;  %v9321_v38 = vpop.f32.mrb[112].mxu0 }
0x140b   : > { %v9282_v5 = vpop.f32.mrb[113].mxu1  ;;  %v9322_v54 = vpop.f32.mrb[113].mxu0 }
0x140c   : > { %v9283_v37 = vadd.f32 %v9282_v5, %v9281_v12  ;;  %v9323_v35 = vadd.f32 %v9322_v54, %v9321_v38  ;;  %v9284_v33 = vpop.f32.mrb[114].mxu1  ;;  %v9324_v34 = vpop.f32.mrb[114].mxu0 }
0x140d   : > { %v9285_v22 = vpop.f32.mrb[115].mxu1  ;;  %v9325_v6 = vpop.f32.mrb[115].mxu0 }
0x140e   : > { %v7528_v8 = vadd.f32 %v10252_v61, %v9283_v37  ;;  %v9286_v58 = vadd.f32 %v9285_v22, %v9284_v33  ;;  %v9326_v16 = vadd.f32 %v9325_v6, %v9324_v34 }
0x1410   : > { %v7593_v1 = vadd.f32 %v9323_v35, %v7528_v8  ;;  %v7531_v11 = vadd.f32 %v10252_v61, %v9286_v58 }
0x1412   : > { %v13519_v59 = vadd.f32 %v9326_v16, %v7531_v11  ;;  %v9343_v25 = vpop.f32.mrb[116].mxu1  ;;  %v9383_v0 = vpop.f32.mrb[116].mxu0 }
0x1413   : > { %v9344_v52 = vpop.f32.mrb[117].mxu1  ;;  %v9384_v50 = vpop.f32.mrb[117].mxu0 }
0x1414   : > { %v9345_v39 = vadd.f32 %v9344_v52, %v9343_v25  ;;  %v9385_v56 = vadd.f32 %v9384_v50, %v9383_v0  ;;  %v9346_v63 = vpop.f32.mrb[118].mxu1  ;;  %v9386_v23 = vpop.f32.mrb[118].mxu0 }
0x1415   : > { %v9347_v17 = vpop.f32.mrb[119].mxu1  ;;  %v9387_v53 = vpop.f32.mrb[119].mxu0 }
0x1416   : > { %v7634_v18 = vadd.f32 %v9345_v39, %v7569_v45  ;;  %v9348_v21 = vadd.f32 %v9347_v17, %v9346_v63  ;;  %v9388_v57 = vadd.f32 %v9387_v53, %v9386_v23 }
0x1418   : > { %v7699_v60 = vadd.f32 %v9385_v56, %v7634_v18  ;;  %v7637_v2 = vadd.f32 %v9348_v21, %v13513_v30 }
0x141a   : > { %v13522_v48 = vadd.f32 %v9388_v57, %v7637_v2  ;;  %v9349_v61 = vpop.f32.mrb[120].mxu1  ;;  %v9389_v4 = vpop.f32.mrb[120].mxu0 }
0x141b   : > { %v9350_v24 = vpop.f32.mrb[121].mxu1  ;;  %v9390_v10 = vpop.f32.mrb[121].mxu0 }
0x141c   : > { %v9351_v9 = vadd.f32 %v9350_v24, %v9349_v61  ;;  %v9391_v19 = vadd.f32 %v9390_v10, %v9389_v4  ;;  %v9352_v28 = vpop.f32.mrb[122].mxu1  ;;  %v9392_v32 = vpop.f32.mrb[122].mxu0 }
0x141d   : > { %v9353_v41 = vpop.f32.mrb[123].mxu1  ;;  %v9393_v43 = vpop.f32.mrb[123].mxu0 }
0x141e   : > { %v7642_v7 = vadd.f32 %v9351_v9, %v7577_v46  ;;  %v9354_v29 = vadd.f32 %v9353_v41, %v9352_v28  ;;  %v9394_v45 = vadd.f32 %v9393_v43, %v9392_v32 }
0x1420   : > { %v7707_v27 = vadd.f32 %v9391_v19, %v7642_v7  ;;  %v7645_v14 = vadd.f32 %v9354_v29, %v13515_v26 }
0x1422   : > { %v13525_v62 = vadd.f32 %v9394_v45, %v7645_v14  ;;  %v9355_v30 = vpop.f32.mrb[124].mxu1  ;;  %v9395_v55 = vpop.f32.mrb[124].mxu0 }
0x1423   : > { %v9356_v36 = vpop.f32.mrb[125].mxu1  ;;  %v9396_v3 = vpop.f32.mrb[125].mxu0 }
0x1424   : > { %v9357_v12 = vadd.f32 %v9356_v36, %v9355_v30  ;;  %v9397_v38 = vadd.f32 %v9396_v3, %v9395_v55  ;;  %v9358_v5 = vpop.f32.mrb[126].mxu1  ;;  %v9398_v54 = vpop.f32.mrb[126].mxu0 }
0x1425   : > { %v9359_v37 = vpop.f32.mrb[127].mxu1  ;;  %v9399_v35 = vpop.f32.mrb[127].mxu0 }
0x1426   : > { %v7650_v33 = vadd.f32 %v9357_v12, %v7585_v20  ;;  %v9360_v34 = vadd.f32 %v9359_v37, %v9358_v5  ;;  %v9400_v46 = vadd.f32 %v9399_v35, %v9398_v54 }
0x1428   : > { %v7715_v22 = vadd.f32 %v9397_v38, %v7650_v33  ;;  %v7653_v6 = vadd.f32 %v9360_v34, %v13517_v51 }
0x142a   : > { %v13528_v8 = vadd.f32 %v9400_v46, %v7653_v6  ;;  %v9361_v26 = vpop.f32.mrb[128].mxu1  ;;  %v9401_v58 = vpop.f32.mrb[128].mxu0 }
0x142b   : > { %v9362_v16 = vpop.f32.mrb[129].mxu1  ;;  %v9402_v11 = vpop.f32.mrb[129].mxu0 }
0x142c   : > { %v9363_v25 = vadd.f32 %v9362_v16, %v9361_v26  ;;  %v9403_v0 = vadd.f32 %v9402_v11, %v9401_v58  ;;  %v9364_v52 = vpop.f32.mrb[130].mxu1  ;;  %v9404_v50 = vpop.f32.mrb[130].mxu0 }
0x142d   : > { %v9365_v39 = vpop.f32.mrb[131].mxu1  ;;  %v9405_v56 = vpop.f32.mrb[131].mxu0 }
0x142e   : > { %v7658_v63 = vadd.f32 %v9363_v25, %v7593_v1  ;;  %v9366_v23 = vadd.f32 %v9365_v39, %v9364_v52  ;;  %v9406_v20 = vadd.f32 %v9405_v56, %v9404_v50 }
0x1430   : > { %v7723_v17 = vadd.f32 %v9403_v0, %v7658_v63  ;;  %v7661_v53 = vadd.f32 %v9366_v23, %v13519_v59 }
0x1432   : > { %v13531_v18 = vadd.f32 %v9406_v20, %v7661_v53  ;;  %v9423_v51 = vpop.f32.mrb[132].mxu1  ;;  %v9463_v21 = vpop.f32.mrb[132].mxu0 }
0x1433   : > { %v9424_v57 = vpop.f32.mrb[133].mxu1  ;;  %v9464_v2 = vpop.f32.mrb[133].mxu0 }
0x1434   : > { %v9425_v61 = vadd.f32 %v9424_v57, %v9423_v51  ;;  %v9465_v4 = vadd.f32 %v9464_v2, %v9463_v21  ;;  %v9426_v24 = vpop.f32.mrb[134].mxu1  ;;  %v9466_v10 = vpop.f32.mrb[134].mxu0 }
0x1435   : > { %v9427_v9 = vpop.f32.mrb[135].mxu1  ;;  %v9467_v19 = vpop.f32.mrb[135].mxu0 }
0x1436   : > { %v7764_v28 = vadd.f32 %v9425_v61, %v7699_v60  ;;  %v9428_v32 = vadd.f32 %v9427_v9, %v9426_v24  ;;  %v9468_v1 = vadd.f32 %v9467_v19, %v9466_v10 }
0x1438   : > { %v7829_v41 = vadd.f32 %v9465_v4, %v7764_v28  ;;  %v7767_v43 = vadd.f32 %v9428_v32, %v13522_v48 }
0x143a   : > { %v13534_v7 = vadd.f32 %v9468_v1, %v7767_v43  ;;  %v9429_v59 = vpop.f32.mrb[136].mxu1  ;;  %v9469_v29 = vpop.f32.mrb[136].mxu0 }
0x143b   : > { %v9430_v45 = vpop.f32.mrb[137].mxu1  ;;  %v9470_v14 = vpop.f32.mrb[137].mxu0 }
0x143c   : > { %v9431_v30 = vadd.f32 %v9430_v45, %v9429_v59  ;;  %v9471_v55 = vadd.f32 %v9470_v14, %v9469_v29  ;;  %v9432_v36 = vpop.f32.mrb[138].mxu1  ;;  %v9472_v3 = vpop.f32.mrb[138].mxu0 }
0x143d   : > { %v9433_v12 = vpop.f32.mrb[139].mxu1  ;;  %v9473_v38 = vpop.f32.mrb[139].mxu0 }
0x143e   : > { %v7772_v5 = vadd.f32 %v9431_v30, %v7707_v27  ;;  %v9434_v54 = vadd.f32 %v9433_v12, %v9432_v36  ;;  %v9474_v60 = vadd.f32 %v9473_v38, %v9472_v3 }
0x1440   : > { %v13536_v37 = vadd.f32 %v9471_v55, %v7772_v5  ;;  %v7775_v35 = vadd.f32 %v9434_v54, %v13525_v62 }
0x1442   : > { %v13539_v48 = vadd.f32 %v9474_v60, %v7775_v35  ;;  %v9435_v33 = vpop.f32.mrb[140].mxu1  ;;  %v9475_v34 = vpop.f32.mrb[140].mxu0 }
0x1443   : > { %v9436_v46 = vpop.f32.mrb[141].mxu1  ;;  %v9476_v6 = vpop.f32.mrb[141].mxu0 }
0x1444   : > { %v9437_v26 = vadd.f32 %v9436_v46, %v9435_v33  ;;  %v9477_v58 = vadd.f32 %v9476_v6, %v9475_v34  ;;  %v9438_v16 = vpop.f32.mrb[142].mxu1  ;;  %v9478_v11 = vpop.f32.mrb[142].mxu0 }
0x1445   : > { %v9439_v25 = vpop.f32.mrb[143].mxu1  ;;  %v9479_v0 = vpop.f32.mrb[143].mxu0 }
0x1446   : > { %v7780_v52 = vadd.f32 %v9437_v26, %v7715_v22  ;;  %v9440_v27 = vadd.f32 %v9439_v25, %v9438_v16  ;;  %v9480_v50 = vadd.f32 %v9479_v0, %v9478_v11 }
0x1448   : > { %v13541_v39 = vadd.f32 %v9477_v58, %v7780_v52  ;;  %v7783_v56 = vadd.f32 %v9440_v27, %v13528_v8 }
0x144a   : > { %v13544_v62 = vadd.f32 %v9480_v50, %v7783_v56  ;;  %v9441_v63 = vpop.f32.mrb[144].mxu1  ;;  %v9481_v23 = vpop.f32.mrb[144].mxu0 }
0x144b   : > { %v9442_v20 = vpop.f32.mrb[145].mxu1  ;;  %v9482_v53 = vpop.f32.mrb[145].mxu0 }
0x144c   : > { %v9443_v51 = vadd.f32 %v9442_v20, %v9441_v63  ;;  %v9483_v21 = vadd.f32 %v9482_v53, %v9481_v23  ;;  %v9444_v57 = vpop.f32.mrb[146].mxu1  ;;  %v9484_v2 = vpop.f32.mrb[146].mxu0 }
0x144d   : > { %v9445_v61 = vpop.f32.mrb[147].mxu1  ;;  %v9485_v4 = vpop.f32.mrb[147].mxu0 }
0x144e   : > { %v7788_v24 = vadd.f32 %v9443_v51, %v7723_v17  ;;  %v9446_v22 = vadd.f32 %v9445_v61, %v9444_v57  ;;  %v9486_v10 = vadd.f32 %v9485_v4, %v9484_v2 }
0x1450   : > { %v13546_v9 = vadd.f32 %v9483_v21, %v7788_v24  ;;  %v7791_v19 = vadd.f32 %v9446_v22, %v13531_v18 }
0x1452   : > { %v13549_v8 = vadd.f32 %v9486_v10, %v7791_v19  ;;  %v9503_v28 = vpop.f32.mrb[148].mxu1  ;;  %v9543_v32 = vpop.f32.mrb[148].mxu0 }
0x1453   : > { %v9504_v1 = vpop.f32.mrb[149].mxu1  ;;  %v9544_v43 = vpop.f32.mrb[149].mxu0 }
0x1454   : > { %v9505_v59 = vadd.f32 %v9504_v1, %v9503_v28  ;;  %v9545_v29 = vadd.f32 %v9544_v43, %v9543_v32  ;;  %v9506_v45 = vpop.f32.mrb[150].mxu1  ;;  %v9546_v14 = vpop.f32.mrb[150].mxu0 }
0x1455   : > { %v9507_v30 = vpop.f32.mrb[151].mxu1  ;;  %v9547_v55 = vpop.f32.mrb[151].mxu0 }
0x1456   : > { %v7894_v36 = vadd.f32 %v9505_v59, %v7829_v41  ;;  %v9508_v17 = vadd.f32 %v9507_v30, %v9506_v45  ;;  %v9548_v3 = vadd.f32 %v9547_v55, %v9546_v14 }
0x1458   : > { %v7959_v12 = vadd.f32 %v9545_v29, %v7894_v36  ;;  %v7897_v38 = vadd.f32 %v9508_v17, %v13534_v7 }
0x145a   : > { %v7962_v5 = vadd.f32 %v9548_v3, %v7897_v38  ;;  %v9509_v18 = vpop.f32.mrb[152].mxu1  ;;  %v9549_v54 = vpop.f32.mrb[152].mxu0  ;;  %v13553_v60 = vadd.f32 %v7959_v12, %v12847_v47 }
0x145b   : > { %v9510_v35 = vpop.f32.mrb[153].mxu1  ;;  %v9550_v33 = vpop.f32.mrb[153].mxu0 }
0x145c   : > { %v9511_v34 = vadd.f32 %v9510_v35, %v9509_v18  ;;  %v9551_v46 = vadd.f32 %v9550_v33, %v9549_v54  ;;  %v9512_v6 = vpop.f32.mrb[154].mxu1  ;;  %v9552_v26 = vpop.f32.mrb[154].mxu0  ;;  %v7997_v41 = vsel %vm841_vm1, %v13553_v60, 0.0  ;;  %v13558_v58 = vadd.f32 %v7962_v5, %v12844_v40 }
0x145d   : > { %v9513_v16 = vpop.f32.mrb[155].mxu1  ;;  %v9553_v7 = vpop.f32.mrb[155].mxu0  ;;  %7998 = vadd.xlane.f32.xlu1 %v7997_v41 }
0x145e   : > { %v7902_v11 = vadd.f32 %v9511_v34, %v13536_v37  ;;  %v9514_v25 = vadd.f32 %v9513_v16, %v9512_v6  ;;  %v9554_v47 = vadd.f32 %v9553_v7, %v9552_v26  ;;  %v8000_v0 = vsel %vm841_vm1, %v13558_v58, 0.0 }
0x145f   : > { %8001 = vadd.xlane.f32.xlu0 %v8000_v0 }
0x1460   : > { %v7967_v52 = vadd.f32 %v9551_v46, %v7902_v11  ;;  %v7905_v27 = vadd.f32 %v9514_v25, %v13539_v48 }
0x1462   : > { %v7970_v50 = vadd.f32 %v9554_v47, %v7905_v27  ;;  %v9515_v56 = vpop.f32.mrb[156].mxu1  ;;  %v9555_v63 = vpop.f32.mrb[156].mxu0  ;;  %v13565_v40 = vadd.f32 %v7967_v52, %v12862_v13 }
0x1463   : > { %v9516_v23 = vpop.f32.mrb[157].mxu1  ;;  %v9556_v20 = vpop.f32.mrb[157].mxu0 }
0x1464   : > { %v9517_v53 = vadd.f32 %v9516_v23, %v9515_v56  ;;  %v9557_v51 = vadd.f32 %v9556_v20, %v9555_v63  ;;  %v9518_v37 = vpop.f32.mrb[158].mxu1  ;;  %v9558_v21 = vpop.f32.mrb[158].mxu0  ;;  %v8003_v57 = vsel %vm841_vm1, %v13565_v40, 0.0  ;;  %v7992_v2 = vadd.f32 %v7970_v50, %v12858_v31 }
0x1465   : > { %v9519_v61 = vpop.f32.mrb[159].mxu1  ;;  %v9559_v4 = vpop.f32.mrb[159].mxu0  ;;  %8004 = vadd.xlane.f32.xlu1 %v8003_v57 }
0x1466   : > { %v7910_v48 = vadd.f32 %v9517_v53, %v13541_v39  ;;  %v9520_v24 = vadd.f32 %v9519_v61, %v9518_v37  ;;  %v9560_v22 = vadd.f32 %v9559_v4, %v9558_v21  ;;  %v8006_v13 = vsel %vm841_vm1, %v7992_v2, 0.0 }
0x1467   : > { %8007 = vadd.xlane.f32.xlu0 %v8006_v13 }
0x1468   : > { %v7975_v10 = vadd.f32 %v9557_v51, %v7910_v48  ;;  %v7913_v19 = vadd.f32 %v9520_v24, %v13544_v62 }
0x146a   : > { %v7978_v28 = vadd.f32 %v9560_v22, %v7913_v19  ;;  %v9521_v32 = vpop.f32.mrb[160].mxu1  ;;  %v9561_v1 = vpop.f32.mrb[160].mxu0  ;;  %v7993_v43 = vadd.f32 %v7975_v10, %v12886_v44 }
0x146b   : > { %v9522_v59 = vpop.f32.mrb[161].mxu1  ;;  %v9562_v31 = vpop.f32.mrb[161].mxu0 }
0x146c   : > { %v9523_v29 = vadd.f32 %v9522_v59, %v9521_v32  ;;  %v9563_v45 = vadd.f32 %v9562_v31, %v9561_v1  ;;  %v9524_v14 = vpop.f32.mrb[162].mxu1  ;;  %v9564_v30 = vpop.f32.mrb[162].mxu0  ;;  %v8009_v39 = vsel %vm841_vm1, %v7993_v43, 0.0  ;;  %v7994_v55 = vadd.f32 %v7978_v28, %v12884_v42 }
0x146d   : > { %v9525_v36 = vpop.f32.mrb[163].mxu1  ;;  %v9565_v17 = vpop.f32.mrb[163].mxu0  ;;  %8010 = vadd.xlane.f32.xlu1 %v8009_v39 }
0x146e   : > { %v7918_v62 = vadd.f32 %v9523_v29, %v13546_v9  ;;  %v9526_v3 = vadd.f32 %v9525_v36, %v9524_v14  ;;  %v9566_v12 = vadd.f32 %v9565_v17, %v9564_v30  ;;  %v8012_v38 = vsel %vm841_vm1, %v7994_v55, 0.0 }
0x146f   : > { %8013 = vadd.xlane.f32.xlu0 %v8012_v38 }
0x1470   : > { %v7983_v44 = vadd.f32 %v9563_v45, %v7918_v62  ;;  %v7921_v5 = vadd.f32 %v9526_v3, %v13549_v8 }
0x1472   : > { %v7986_v18 = vadd.f32 %v9566_v12, %v7921_v5  ;;  %v7995_v54 = vadd.f32 %v7983_v44, %v12902_v49  ;;  %v10253_v44 = vld [vmem:[%s13682_s22] ss:$0 sm:$0xff] }
0x1474   : > { %v8015_v35 = vsel %vm841_vm1, %v7995_v54, 0.0  ;;  %v7996_v42 = vadd.f32 %v7986_v18, %v12900_v15 }
0x1475   : > { %8016 = vadd.xlane.f32.xlu1 %v8015_v35 }
0x1476   : > { %v8018_v33 = vsel %vm841_vm1, %v7996_v42, 0.0 }
0x1477   : > { %8019 = vadd.xlane.f32.xlu0 %v8018_v33  ;;  %v10254_v33 = vld [vmem:[%s13683_s23] ss:$0 sm:$0xff] }
0x14ea   : > { %v7999_v9 = vpop.xlane.xlu1 %7998 }
0x14eb   : > { %v8021_v34 = vmul.f32 0.03125, %v7999_v9 }
0x14ec   : > { %v8002_v46 = vpop.xlane.xlu0 %8001 }
0x14ed   : > { %v8029_v6 = vsub.f32 %v13553_v60, %v8021_v34  ;;  %v8022_v26 = vmul.f32 0.03125, %v8002_v46 }
0x14ef   : > { %v13585_v41 = vsub.f32 %v13558_v58, %v8022_v26  ;;  %v8037_v8 = vmul.f32 %v8029_v6, %v8029_v6 }
0x14f1   : > { %v8045_v49 = vsel %vm841_vm1, %v8037_v8, 0.0  ;;  %v8038_v16 = vmul.f32 %v13585_v41, %v13585_v41 }
0x14f2   : > { %8046 = vadd.xlane.f32.xlu1 %v8045_v49  ;;  %v8005_v15 = vpop.xlane.xlu1 %8004 }
0x14f3   : > { %v8023_v7 = vmul.f32 0.03125, %v8005_v15  ;;  %v8048_v11 = vsel %vm841_vm1, %v8038_v16, 0.0 }
0x14f4   : > { %8049 = vadd.xlane.f32.xlu0 %v8048_v11  ;;  %v8008_v25 = vpop.xlane.xlu0 %8007 }
0x14f5   : > { %v13592_v47 = vsub.f32 %v13565_v40, %v8023_v7  ;;  %v8024_v60 = vmul.f32 0.03125, %v8008_v25 }
0x14f7   : > { %v13594_v0 = vsub.f32 %v7992_v2, %v8024_v60  ;;  %v8039_v58 = vmul.f32 %v13592_v47, %v13592_v47 }
0x14f9   : > { %v8051_v52 = vsel %vm841_vm1, %v8039_v58, 0.0  ;;  %v8040_v27 = vmul.f32 %v13594_v0, %v13594_v0 }
0x14fa   : > { %8052 = vadd.xlane.f32.xlu1 %v8051_v52  ;;  %v8011_v50 = vpop.xlane.xlu1 %8010 }
0x14fb   : > { %v8025_v56 = vmul.f32 0.03125, %v8011_v50  ;;  %v8054_v63 = vsel %vm841_vm1, %v8040_v27, 0.0 }
0x14fc   : > { %8055 = vadd.xlane.f32.xlu0 %v8054_v63  ;;  %v8014_v23 = vpop.xlane.xlu0 %8013 }
0x14fd   : > { %v13602_v40 = vsub.f32 %v7993_v43, %v8025_v56  ;;  %v8026_v20 = vmul.f32 0.03125, %v8014_v23 }
0x14ff   : > { %v13604_v53 = vsub.f32 %v7994_v55, %v8026_v20  ;;  %v8041_v51 = vmul.f32 %v13602_v40, %v13602_v40 }
0x1501   : > { %v8057_v37 = vsel %vm841_vm1, %v8041_v51, 0.0  ;;  %v8042_v21 = vmul.f32 %v13604_v53, %v13604_v53 }
0x1502   : > { %8058 = vadd.xlane.f32.xlu1 %v8057_v37  ;;  %v8017_v57 = vpop.xlane.xlu1 %8016 }
0x1503   : > { %v8027_v2 = vmul.f32 0.03125, %v8017_v57  ;;  %v8060_v61 = vsel %vm841_vm1, %v8042_v21, 0.0 }
0x1504   : > { %8061 = vadd.xlane.f32.xlu0 %v8060_v61  ;;  %v8020_v4 = vpop.xlane.xlu0 %8019 }
0x1505   : > { %v13612_v48 = vsub.f32 %v7995_v54, %v8027_v2  ;;  %v8028_v24 = vmul.f32 0.03125, %v8020_v4 }
0x1507   : > { %v13614_v22 = vsub.f32 %v7996_v42, %v8028_v24  ;;  %v8043_v13 = vmul.f32 %v13612_v48, %v13612_v48 }
0x1509   : > { %v8063_v10 = vsel %vm841_vm1, %v8043_v13, 0.0  ;;  %v8044_v19 = vmul.f32 %v13614_v22, %v13614_v22 }
0x150a   : > { %8064 = vadd.xlane.f32.xlu1 %v8063_v10 }
0x150b   : > { %v8066_v28 = vsel %vm841_vm1, %v8044_v19, 0.0 }
0x150c   : > { %8067 = vadd.xlane.f32.xlu0 %v8066_v28 }
0x157f   : > { %v8047_v32 = vpop.xlane.xlu1 %8046 }
0x1580   : > { %v8069_v1 = vmul.f32 0.03125, %v8047_v32 }
0x1581   : > { %v8050_v43 = vpop.xlane.xlu0 %8049 }
0x1582   : > { %v8077_v59 = vadd.f32 1e-05, %v8069_v1  ;;  %v8070_v31 = vmul.f32 0.03125, %v8050_v43 }
0x1584   : > { %9961 = vrsqrt.f32 %v8077_v59  ;;  %v8078_v29 = vadd.f32 1e-05, %v8070_v31 }
0x1586   : > { %9963 = vrsqrt.f32 %v8078_v29 }
0x1587   : > { %v8053_v45 = vpop.xlane.xlu1 %8052 }
0x1588   : > { %v8071_v14 = vmul.f32 0.03125, %v8053_v45 }
0x1589   : > { %v8056_v30 = vpop.xlane.xlu0 %8055 }
0x158a   : > { %v8079_v39 = vadd.f32 1e-05, %v8071_v14  ;;  %v8072_v55 = vmul.f32 0.03125, %v8056_v30 }
0x158c   : > { %9965 = vrsqrt.f32 %v8079_v39  ;;  %v8080_v36 = vadd.f32 1e-05, %v8072_v55 }
0x158e   : > { %v9962_v17 = vpop.eup %9961  ;;  %9967 = vrsqrt.f32 %v8080_v36 }
0x158f   : > { %v8093_v62 = vmul.f32 %v9962_v17, %v8029_v6  ;;  %v8059_v3 = vpop.xlane.xlu1 %8058 }
0x1590   : > { %v9964_v12 = vpop.eup %9963  ;;  %v8073_v38 = vmul.f32 0.03125, %v8059_v3 }
0x1591   : > { %v8101_v5 = vmul.f32 %v10253_v44, %v8093_v62  ;;  %v8094_v18 = vmul.f32 %v9964_v12, %v13585_v41  ;;  %v8062_v54 = vpop.xlane.xlu0 %8061 }
0x1592   : > { %v8081_v35 = vadd.f32 1e-05, %v8073_v38  ;;  %v8074_v42 = vmul.f32 0.03125, %v8062_v54 }
0x1593   : > { %v8109_v9 = vadd.f32 %v10254_v33, %v8101_v5  ;;  %v8102_v34 = vmul.f32 %v10253_v44, %v8094_v18 }
0x1594   : > { %9969 = vrsqrt.f32 %v8081_v35  ;;  %v8082_v46 = vadd.f32 1e-05, %v8074_v42 }
0x1595   : > { %8117 = vst.msk [vmem:[%s13630_s26] sm:$0xff] %vm841_vm1, %v8109_v9  ;;  %v8110_v6 = vadd.f32 %v10254_v33, %v8102_v34 }
0x1596   : > { %v9966_v26 = vpop.eup %9965  ;;  %9971 = vrsqrt.f32 %v8082_v46 }
0x1597   : > { %8118 = vst.msk [vmem:[%s13630_s26 + $0x8] sm:$0xff] %vm841_vm1, %v8110_v6  ;;  %v8095_v41 = vmul.f32 %v9966_v26, %v13592_v47  ;;  %v8065_v8 = vpop.xlane.xlu1 %8064 }
0x1598   : > { %v9968_v49 = vpop.eup %9967  ;;  %v8075_v16 = vmul.f32 0.03125, %v8065_v8 }
0x1599   : > { %v8103_v15 = vmul.f32 %v10253_v44, %v8095_v41  ;;  %v8096_v7 = vmul.f32 %v9968_v49, %v13594_v0  ;;  %v8068_v11 = vpop.xlane.xlu0 %8067 }
0x159a   : > { %v8083_v25 = vadd.f32 1e-05, %v8075_v16  ;;  %v8076_v60 = vmul.f32 0.03125, %v8068_v11 }
0x159b   : > { %v8111_v58 = vadd.f32 %v10254_v33, %v8103_v15  ;;  %v8104_v52 = vmul.f32 %v10253_v44, %v8096_v7 }
0x159c   : > { %9973 = vrsqrt.f32 %v8083_v25  ;;  %v8084_v27 = vadd.f32 1e-05, %v8076_v60 }
0x159d   : > { %8119 = vst.msk [vmem:[%s13630_s26 + $0x10] sm:$0xff] %vm841_vm1, %v8111_v58  ;;  %v8112_v50 = vadd.f32 %v10254_v33, %v8104_v52 }
0x159e   : > { %v9970_v47 = vpop.eup %9969  ;;  %9975 = vrsqrt.f32 %v8084_v27 }
0x159f   : > { %8120 = vst.msk [vmem:[%s13630_s26 + $0x18] sm:$0xff] %vm841_vm1, %v8112_v50  ;;  %v8097_v56 = vmul.f32 %v9970_v47, %v13602_v40 }
0x15a0   : > { %v9972_v0 = vpop.eup %9971 }
0x15a1   : > { %v8105_v63 = vmul.f32 %v10253_v44, %v8097_v56  ;;  %v8098_v23 = vmul.f32 %v9972_v0, %v13604_v53 }
0x15a3   : > { %v8113_v20 = vadd.f32 %v10254_v33, %v8105_v63  ;;  %v8106_v51 = vmul.f32 %v10253_v44, %v8098_v23 }
0x15a5   : > { %8121 = vst.msk [vmem:[%s13630_s26 + $0x20] sm:$0xff] %vm841_vm1, %v8113_v20  ;;  %v8114_v37 = vadd.f32 %v10254_v33, %v8106_v51 }
0x15a6   : > { %v9974_v21 = vpop.eup %9973 }
0x15a7   : > { %8122 = vst.msk [vmem:[%s13630_s26 + $0x28] sm:$0xff] %vm841_vm1, %v8114_v37  ;;  %v8099_v57 = vmul.f32 %v9974_v21, %v13612_v48 }
0x15a8   : > { %v9976_v2 = vpop.eup %9975 }
0x15a9   : > { %v8107_v61 = vmul.f32 %v10253_v44, %v8099_v57  ;;  %v8100_v40 = vmul.f32 %v9976_v2, %v13614_v22 }
0x15ab   : > { %v8115_v4 = vadd.f32 %v10254_v33, %v8107_v61  ;;  %v8108_v24 = vmul.f32 %v10253_v44, %v8100_v40 }
0x15ad   : > { %8123 = vst.msk [vmem:[%s13630_s26 + $0x30] sm:$0xff] %vm841_vm1, %v8115_v4  ;;  %v8116_v13 = vadd.f32 %v10254_v33, %v8108_v24 }
0x15af   : > { %8124 = vst.msk [vmem:[%s13630_s26 + $0x38] sm:$0xff] %vm841_vm1, %v8116_v13 }
0x15b0 PF: > { %s13920_s3 = sld [smem:[#allocation2_spill]] }
0x15b6   : > { %s34_s5 = sadd.s32 1, %s13920_s3  }
0x15b7   : > { %p31_p4 = scmp.ge.s32.totalorder %s34_s5, 4  }
0x15b9   :  { %33 = sbr.rel (!%p31_p4) target bundleno = 10 (0xa), region = 155 }

</bundles_post_ra>
